<compile_context>
chip_gen: v7x
topology: tpu7x:2x2x1
jax: 0.10.0
libtpu: 0.0.40
codegen_flags: <defaults>
</compile_context>

<pallas_src>
import math
import functools

import jax
import jax.numpy as jnp
from jax.experimental import pallas as pl
from jax.experimental.pallas import tpu as pltpu


# -------------------------- per-generation VMEM cap -------------------------

def _default_vmem_limit():
    try:
        cap = pltpu.get_tpu_info().vmem_capacity_bytes
        mib = max(32, min(cap * 3 // 4 // (1024 * 1024), 96))
        return int(mib) * 1024 * 1024
    except Exception:
        return 48 * 1024 * 1024      # safe fallback (fits v7x's 64 MiB per TC)


_VMEM_LIMIT = _default_vmem_limit()


def _compiler_params(n_parallel_axes=1):
    return pltpu.CompilerParams(
        dimension_semantics=("parallel",) * n_parallel_axes,
        vmem_limit_bytes=_VMEM_LIMIT)


# ------------------------------ in-kernel math ------------------------------

def _ln_val(x, g, b, eps=1e-5):
    """LayerNorm of a value over its last axis (f32 math)."""
    mu = jnp.mean(x, axis=-1, keepdims=True)
    var = jnp.mean(jnp.square(x - mu), axis=-1, keepdims=True)
    return (x - mu) * jax.lax.rsqrt(var + eps) * g + b


# ------------------------------ Pallas kernels ------------------------------

def _input_kernel(src_ref, g_ref, b_ref, w_ref, bias_ref, pe_ref, o_ref, *,
                  eps=1e-5):
    """Fused: LayerNorm(input) -> Linear -> ReLU (dropout = id) -> + pos-enc."""
    s = src_ref[...]                                             # (S, Din) f32
    xn = _ln_val(s, g_ref[...], b_ref[...], eps)
    y = jnp.dot(xn.astype(jnp.bfloat16), w_ref[...],
                preferred_element_type=jnp.float32) + bias_ref[...]
    o_ref[...] = jnp.maximum(y, 0.0) + pe_ref[...]


def _encoder_layer_kernel(x_ref, bias_ref,
                          q_w, q_b, k_w, k_b, v_w, v_b,
                          ow, ob, n1g, n1b,
                          f1w, f1b, f2w, f2b, n2g, n2b,
                          o_ref, *, nhead, eps=1e-5):
    """One fused post-norm nn.TransformerEncoderLayer (ReLU FFN, dropout off).

    Heads are handled with per-head weight slabs (ref[h] indexing), so no
    reshape / transpose / concat is needed inside the kernel.
    """
    x = x_ref[...]                                               # (S, D) f32
    S, D = x.shape
    dh = D // nhead
    scale = 1.0 / math.sqrt(dh)
    bias = bias_ref[...]                                         # (1, S)
    xb = x.astype(jnp.bfloat16)

    # --- multi-head self-attention (out_proj folded into the head loop) ---
    attn = jnp.zeros_like(x)                                     # (S, D) f32
    for h in range(nhead):
        qh = jnp.dot(xb, q_w[h], preferred_element_type=jnp.float32) + q_b[h]
        kh = jnp.dot(xb, k_w[h], preferred_element_type=jnp.float32) + k_b[h]
        vh = jnp.dot(xb, v_w[h], preferred_element_type=jnp.float32) + v_b[h]
        # scores = Q @ K^T (NT matmul via dot_general, no explicit transpose)
        s = jax.lax.dot_general(
            qh.astype(jnp.bfloat16), kh.astype(jnp.bfloat16),
            (((1,), (1,)), ((), ())),
            preferred_element_type=jnp.float32) * scale + bias    # (S, S)
        m = jnp.max(s, axis=-1, keepdims=True)
        p = jnp.exp(s - m)
        p = p * pl.reciprocal(jnp.sum(p, axis=-1, keepdims=True), approx=True)
        oh = jnp.dot(p.astype(jnp.bfloat16), vh.astype(jnp.bfloat16),
                     preferred_element_type=jnp.float32)          # (S, dh)
        attn = attn + jnp.dot(oh.astype(jnp.bfloat16), ow[h],
                              preferred_element_type=jnp.float32)  # (S, D)

    attn = attn + ob[...] + x                                    # + bias + residual
    h1 = _ln_val(attn, n1g[...], n1b[...], eps)                  # norm1

    # --- feed-forward (Linear -> ReLU -> Linear) + residual + norm2 ---
    f = jnp.dot(h1.astype(jnp.bfloat16), f1w[...],
                preferred_element_type=jnp.float32) + f1b[...]
    f = jnp.maximum(f, 0.0)
    y = jnp.dot(f.astype(jnp.bfloat16), f2w[...],
                preferred_element_type=jnp.float32) + f2b[...] + h1
    o_ref[...] = _ln_val(y, n2g[...], n2b[...], eps)


def _head_kernel(*refs, n_proj, eps=1e-5):
    """Fused: final encoder LayerNorm -> [Linear -> LN -> ReLU]* -> Linear."""
    x_ref, fin_g, fin_b = refs[0], refs[1], refs[2]
    idx = 3
    proj = []
    for _ in range(n_proj):
        proj.append(refs[idx:idx + 4])
        idx += 4
    p2_w, p2_b = refs[idx], refs[idx + 1]
    o_ref = refs[idx + 2]

    x = _ln_val(x_ref[...], fin_g[...], fin_b[...], eps)
    for (w, b, g, bn) in proj:
        y = jnp.dot(x.astype(jnp.bfloat16), w[...],
                    preferred_element_type=jnp.float32) + b[...]
        x = jnp.maximum(_ln_val(y, g[...], bn[...], eps), 0.0)
    o_ref[...] = jnp.dot(x.astype(jnp.bfloat16), p2_w[...],
                         preferred_element_type=jnp.float32) + p2_b[...]


# ------------------------------ pallas_call glue -----------------------------

def input_stage(src, p, pe):
    B, S, Din = src.shape
    D = p['in_w'].shape[1]
    c2 = lambda b: (0, 0)
    return pl.pallas_call(
        _input_kernel,
        out_shape=jax.ShapeDtypeStruct((B, S, D), jnp.float32),
        grid=(B,),
        in_specs=[pl.BlockSpec((None, S, Din), lambda b: (b, 0, 0)),
                  pl.BlockSpec((1, Din), c2),
                  pl.BlockSpec((1, Din), c2),
                  pl.BlockSpec((Din, D), c2),
                  pl.BlockSpec((1, D), c2),
                  pl.BlockSpec((S, D), c2)],
        out_specs=pl.BlockSpec((None, S, D), lambda b: (b, 0, 0)),
        compiler_params=_compiler_params(),
    )(src, p['in_ln_g'], p['in_ln_b'], p['in_w'], p['in_b'], pe)


def encoder_layer(x, bias, p, nhead):
    B, S, D = x.shape
    dh = D // nhead
    ff = p['ff1_w'].shape[1]
    c2 = lambda b: (0, 0)
    c3 = lambda b: (0, 0, 0)
    in_specs = [
        pl.BlockSpec((None, S, D), lambda b: (b, 0, 0)),    # x
        pl.BlockSpec((None, 1, S), lambda b: (b, 0, 0)),    # key-padding bias
        pl.BlockSpec((nhead, D, dh), c3),                   # q_w
        pl.BlockSpec((nhead, 1, dh), c3),                   # q_b
        pl.BlockSpec((nhead, D, dh), c3),                   # k_w
        pl.BlockSpec((nhead, 1, dh), c3),                   # k_b
        pl.BlockSpec((nhead, D, dh), c3),                   # v_w
        pl.BlockSpec((nhead, 1, dh), c3),                   # v_b
        pl.BlockSpec((nhead, dh, D), c3),                   # out_w (per head)
        pl.BlockSpec((1, D), c2),                           # out_b
        pl.BlockSpec((1, D), c2),                           # n1_g
        pl.BlockSpec((1, D), c2),                           # n1_b
        pl.BlockSpec((D, ff), c2),                          # ff1_w
        pl.BlockSpec((1, ff), c2),                          # ff1_b
        pl.BlockSpec((ff, D), c2),                          # ff2_w
        pl.BlockSpec((1, D), c2),                           # ff2_b
        pl.BlockSpec((1, D), c2),                           # n2_g
        pl.BlockSpec((1, D), c2),                           # n2_b
    ]
    return pl.pallas_call(
        functools.partial(_encoder_layer_kernel, nhead=nhead),
        out_shape=jax.ShapeDtypeStruct((B, S, D), jnp.float32),
        grid=(B,),
        in_specs=in_specs,
        out_specs=pl.BlockSpec((None, S, D), lambda b: (b, 0, 0)),
        compiler_params=_compiler_params(),
    )(x, bias, p['q_w'], p['q_b'], p['k_w'], p['k_b'], p['v_w'], p['v_b'],
      p['out_w'], p['out_b'], p['n1_g'], p['n1_b'],
      p['ff1_w'], p['ff1_b'], p['ff2_w'], p['ff2_b'], p['n2_g'], p['n2_b'])


def output_stage(x, p):
    B, S, D = x.shape
    n_proj = len(p['proj'])
    out_dim = p['p2_w'].shape[1]
    c2 = lambda b: (0, 0)
    in_specs = [pl.BlockSpec((None, S, D), lambda b: (b, 0, 0)),
                pl.BlockSpec((1, D), c2),
                pl.BlockSpec((1, D), c2)]
    args = [x, p['fin_g'], p['fin_b']]
    for pr in p['proj']:
        Kp, Np = pr['w'].shape
        in_specs += [pl.BlockSpec((Kp, Np), c2),
                     pl.BlockSpec((1, Np), c2),
                     pl.BlockSpec((1, Np), c2),
                     pl.BlockSpec((1, Np), c2)]
        args += [pr['w'], pr['b'], pr['g'], pr['bn']]
    Kl, Nl = p['p2_w'].shape
    in_specs += [pl.BlockSpec((Kl, Nl), c2), pl.BlockSpec((1, Nl), c2)]
    args += [p['p2_w'], p['p2_b']]

    return pl.pallas_call(
        functools.partial(_head_kernel, n_proj=n_proj),
        out_shape=jax.ShapeDtypeStruct((B, S, out_dim), jnp.float32),
        grid=(B,),
        in_specs=in_specs,
        out_specs=pl.BlockSpec((None, S, out_dim), lambda b: (b, 0, 0)),
        compiler_params=_compiler_params(),
    )(*args)


# ------------------------------- model forward ------------------------------

def positional_encoding(seq_len, d_model):
    pos = jnp.arange(seq_len, dtype=jnp.float32)[:, None]
    div = jnp.exp(jnp.arange(0, d_model, 2, dtype=jnp.float32)
                  * (-math.log(10000.0) / d_model))
    ang = pos * div
    pe = jnp.zeros((seq_len, d_model), jnp.float32)
    pe = pe.at[:, 0::2].set(jnp.sin(ang))
    pe = pe.at[:, 1::2].set(jnp.cos(ang))
    return pe                                                    # (S, D)


def transformer_forward(src, params, nhead=8):
    B, S, _ = src.shape
    D = params['in_w'].shape[1]
    pe = positional_encoding(S, D)

    # key padding mask: all-zero src rows -> large negative additive bias.
    # (PyTorch uses -inf; -1e9 avoids NaN on fully-masked rows — documented divergence.)
    pad = jnp.all(src == 0.0, axis=-1)                           # (B, S)
    bias = jnp.where(pad, -1e9, 0.0).astype(jnp.float32)[:, None, :]  # (B,1,S)

    x = input_stage(src, params, pe)                             # (B, S, D)
    for lp in params['layers']:
        x = encoder_layer(x, bias, lp, nhead)
    return output_stage(x, params)                               # (B, S, out)


# ------------------------------ parameter init ------------------------------

def _xavier(key, shape, gain=0.1):
    fan_in, fan_out = shape
    a = gain * math.sqrt(6.0 / (fan_in + fan_out))
    return jax.random.uniform(key, shape, jnp.float32, -a, a)


def _row(n, val=0.0):
    return jnp.full((1, n), val, jnp.float32)


def init_params(key, input_size, hidden_sizes, output_size, nhead, num_layers):
    D = hidden_sizes[-1]
    ff = 2 * D
    dh = D // nhead
    keys = iter(jax.random.split(key, 64))

    p = {
        'in_ln_g': _row(input_size, 1.0), 'in_ln_b': _row(input_size),
        'in_w': _xavier(next(keys), (input_size, D)).astype(jnp.bfloat16),
        'in_b': _row(D),
    }

    def to_heads_in(w):      # (D, D) -> (nhead, D, dh)
        return w.reshape(D, nhead, dh).transpose(1, 0, 2)

    layers = []
    for _ in range(num_layers):
        qkv = _xavier(next(keys), (D, 3 * D))
        out_w = _xavier(next(keys), (D, D))
        layers.append({
            'q_w': to_heads_in(qkv[:, :D]).astype(jnp.bfloat16),
            'k_w': to_heads_in(qkv[:, D:2 * D]).astype(jnp.bfloat16),
            'v_w': to_heads_in(qkv[:, 2 * D:]).astype(jnp.bfloat16),
            'q_b': jnp.zeros((nhead, 1, dh), jnp.float32),
            'k_b': jnp.zeros((nhead, 1, dh), jnp.float32),
            'v_b': jnp.zeros((nhead, 1, dh), jnp.float32),
            'out_w': out_w.reshape(nhead, dh, D).astype(jnp.bfloat16),
            'out_b': _row(D),
            'n1_g': _row(D, 1.0), 'n1_b': _row(D),
            'ff1_w': _xavier(next(keys), (D, ff)).astype(jnp.bfloat16),
            'ff1_b': _row(ff),
            'ff2_w': _xavier(next(keys), (ff, D)).astype(jnp.bfloat16),
            'ff2_b': _row(D),
            'n2_g': _row(D, 1.0), 'n2_b': _row(D),
        })
    p['layers'] = layers
    p['fin_g'] = _row(D, 1.0)
    p['fin_b'] = _row(D)

    prev = D
    proj = []
    for h in reversed(hidden_sizes[:-1]):
        proj.append({'w': _xavier(next(keys), (prev, h)).astype(jnp.bfloat16),
                     'b': _row(h), 'g': _row(h, 1.0), 'bn': _row(h)})
        prev = h
    p['proj'] = proj
    p['p2_w'] = _xavier(next(keys), (prev, output_size)).astype(jnp.bfloat16)
    p['p2_b'] = _row(output_size)
    return p


# ----------------------------------- main ------------------------------------

if __name__ == "__main__":
    B, S = 2, 8
    input_size = 16
    hidden_sizes = (24, 32)      # hidden_size = 32, divisible by nhead = 8
    output_size = 10
    nhead, num_layers = 8, 4

    k_params, k_src = jax.random.split(jax.random.PRNGKey(0))
    params = init_params(k_params, input_size, hidden_sizes, output_size,
                         nhead, num_layers)
    src = jax.random.normal(k_src, (B, S, input_size), jnp.float32)

    fwd = jax.jit(lambda s: transformer_forward(s, params, nhead=nhead))
    out = fwd(src)
    jax.block_until_ready(out)
    assert out.shape == (B, S, output_size)
    assert bool(jnp.all(jnp.isfinite(out)))
    print("KERNEL_OK")
</pallas_src>

<mosaic_0001>
module attributes {stable_mosaic.version = 11 : i64} {
  func.func @_input_kernel(%arg0: i32, %arg1: memref<1x8x16xf32, #tpu.memory_space<vmem>>, %arg2: memref<1x16xf32, #tpu.memory_space<vmem>>, %arg3: memref<1x16xf32, #tpu.memory_space<vmem>>, %arg4: memref<16x32xbf16, #tpu.memory_space<vmem>>, %arg5: memref<1x32xf32, #tpu.memory_space<vmem>>, %arg6: memref<8x32xf32, #tpu.memory_space<vmem>>, %arg7: memref<1x8x32xf32, #tpu.memory_space<vmem>>) attributes {dimension_semantics = [#tpu.dimension_semantics<parallel>], iteration_bounds = array<i64: 2>, scalar_prefetch = 0 : i64, scratch_operands = 0 : i64, tpu.core_type = #tpu.core_type<tc>, window_params = [{transform_indices = @transform_0, window_bounds = array<i64: 1, 8, 16>}, {pipeline_mode = #tpu.pipeline_mode<synchronous>, transform_indices = @transform_1, window_bounds = array<i64: 1, 16>}, {pipeline_mode = #tpu.pipeline_mode<synchronous>, transform_indices = @transform_2, window_bounds = array<i64: 1, 16>}, {pipeline_mode = #tpu.pipeline_mode<synchronous>, transform_indices = @transform_3, window_bounds = array<i64: 16, 32>}, {pipeline_mode = #tpu.pipeline_mode<synchronous>, transform_indices = @transform_4, window_bounds = array<i64: 1, 32>}, {pipeline_mode = #tpu.pipeline_mode<synchronous>, transform_indices = @transform_5, window_bounds = array<i64: 8, 32>}, {transform_indices = @transform_6, window_bounds = array<i64: 1, 8, 32>}]} {
    %c0 = arith.constant 0 : index
    %c0_0 = arith.constant 0 : index
    %c0_1 = arith.constant 0 : index
    %0 = vector.load %arg1[%c0, %c0_0, %c0_1] : memref<1x8x16xf32, #tpu.memory_space<vmem>>, vector<1x8x16xf32>
    %1 = vector.shape_cast %0 : vector<1x8x16xf32> to vector<8x16xf32>
    %c0_2 = arith.constant 0 : index
    %c0_3 = arith.constant 0 : index
    %2 = vector.load %arg2[%c0_2, %c0_3] : memref<1x16xf32, #tpu.memory_space<vmem>>, vector<1x16xf32>
    %c0_4 = arith.constant 0 : index
    %c0_5 = arith.constant 0 : index
    %3 = vector.load %arg3[%c0_4, %c0_5] : memref<1x16xf32, #tpu.memory_space<vmem>>, vector<1x16xf32>
    %cst = arith.constant dense<0.000000e+00> : vector<8xf32>
    %4 = vector.multi_reduction <add>, %1, %cst [1] : vector<8x16xf32> to vector<8xf32>
    %5 = vector.shape_cast %4 : vector<8xf32> to vector<8x1xf32>
    %cst_6 = arith.constant 1.600000e+01 : f32
    %6 = vector.broadcast %cst_6 : f32 to vector<8x1xf32>
    %7 = arith.divf %5, %6 : vector<8x1xf32>
    %8 = vector.broadcast %7 : vector<8x1xf32> to vector<8x16xf32>
    %9 = arith.subf %1, %8 : vector<8x16xf32>
    %10 = arith.mulf %9, %9 : vector<8x16xf32>
    %cst_7 = arith.constant dense<0.000000e+00> : vector<8xf32>
    %11 = vector.multi_reduction <add>, %10, %cst_7 [1] : vector<8x16xf32> to vector<8xf32>
    %12 = vector.shape_cast %11 : vector<8xf32> to vector<8x1xf32>
    %cst_8 = arith.constant 1.600000e+01 : f32
    %13 = vector.broadcast %cst_8 : f32 to vector<8x1xf32>
    %14 = arith.divf %12, %13 : vector<8x1xf32>
    %15 = vector.broadcast %7 : vector<8x1xf32> to vector<8x16xf32>
    %16 = arith.subf %1, %15 : vector<8x16xf32>
    %cst_9 = arith.constant 9.99999974E-6 : f32
    %17 = vector.broadcast %cst_9 : f32 to vector<8x1xf32>
    %18 = arith.addf %14, %17 : vector<8x1xf32>
    %19 = math.rsqrt %18 : vector<8x1xf32>
    %20 = vector.broadcast %19 : vector<8x1xf32> to vector<8x16xf32>
    %21 = arith.mulf %16, %20 : vector<8x16xf32>
    %22 = vector.broadcast %2 : vector<1x16xf32> to vector<8x16xf32>
    %23 = arith.mulf %21, %22 : vector<8x16xf32>
    %24 = vector.broadcast %3 : vector<1x16xf32> to vector<8x16xf32>
    %25 = arith.addf %23, %24 : vector<8x16xf32>
    %26 = arith.truncf %25 : vector<8x16xf32> to vector<8x16xbf16>
    %c0_10 = arith.constant 0 : index
    %c0_11 = arith.constant 0 : index
    %27 = vector.load %arg4[%c0_10, %c0_11] : memref<16x32xbf16, #tpu.memory_space<vmem>>, vector<16x32xbf16>
    %cst_12 = arith.constant dense<0.000000e+00> : vector<8x32xf32>
    %28 = tpu.matmul %26, %27, %cst_12 {dimension_numbers = #tpu.dot_dimension_numbers<[1], [0], [0], [1], [0, 0, 1, 1], [], []>} : vector<8x16xbf16>, vector<16x32xbf16>, vector<8x32xf32> -> vector<8x32xf32>
    %c0_13 = arith.constant 0 : index
    %c0_14 = arith.constant 0 : index
    %29 = vector.load %arg5[%c0_13, %c0_14] : memref<1x32xf32, #tpu.memory_space<vmem>>, vector<1x32xf32>
    %30 = vector.broadcast %29 : vector<1x32xf32> to vector<8x32xf32>
    %31 = arith.addf %28, %30 : vector<8x32xf32>
    %cst_15 = arith.constant 0.000000e+00 : f32
    %32 = vector.broadcast %cst_15 : f32 to vector<8x32xf32>
    %33 = arith.maximumf %31, %32 : vector<8x32xf32>
    %c0_16 = arith.constant 0 : index
    %c0_17 = arith.constant 0 : index
    %34 = vector.load %arg6[%c0_16, %c0_17] : memref<8x32xf32, #tpu.memory_space<vmem>>, vector<8x32xf32>
    %35 = arith.addf %33, %34 : vector<8x32xf32>
    %c0_18 = arith.constant 0 : index
    %c0_19 = arith.constant 0 : index
    %c0_20 = arith.constant 0 : index
    %36 = vector.load %arg7[%c0_18, %c0_19, %c0_20] : memref<1x8x32xf32, #tpu.memory_space<vmem>>, vector<1x8x32xf32>
    %37 = vector.shape_cast %36 : vector<1x8x32xf32> to vector<8x32xf32>
    %38 = vector.shape_cast %35 : vector<8x32xf32> to vector<1x8x32xf32>
    tpu.vector_store %arg7[%c0_18, %c0_19, %c0_20], %38 {strides = array<i32>} : memref<1x8x32xf32, #tpu.memory_space<vmem>>, vector<1x8x32xf32>,
    return
  }
  func.func @transform_0(%arg0: i32) -> (i32, i32, i32) {
    %c0_i32 = arith.constant 0 : i32
    %c0_i32_0 = arith.constant 0 : i32
    %c0_i32_1 = arith.constant 0 : i32
    return %arg0, %c0_i32, %c0_i32_0 : i32, i32, i32
  }
  func.func @transform_1(%arg0: i32) -> (i32, i32) {
    %c0_i32 = arith.constant 0 : i32
    %c0_i32_0 = arith.constant 0 : i32
    %c0_i32_1 = arith.constant 0 : i32
    return %c0_i32, %c0_i32_0 : i32, i32
  }
  func.func @transform_2(%arg0: i32) -> (i32, i32) {
    %c0_i32 = arith.constant 0 : i32
    %c0_i32_0 = arith.constant 0 : i32
    %c0_i32_1 = arith.constant 0 : i32
    return %c0_i32, %c0_i32_0 : i32, i32
  }
  func.func @transform_3(%arg0: i32) -> (i32, i32) {
    %c0_i32 = arith.constant 0 : i32
    %c0_i32_0 = arith.constant 0 : i32
    %c0_i32_1 = arith.constant 0 : i32
    return %c0_i32, %c0_i32_0 : i32, i32
  }
  func.func @transform_4(%arg0: i32) -> (i32, i32) {
    %c0_i32 = arith.constant 0 : i32
    %c0_i32_0 = arith.constant 0 : i32
    %c0_i32_1 = arith.constant 0 : i32
    return %c0_i32, %c0_i32_0 : i32, i32
  }
  func.func @transform_5(%arg0: i32) -> (i32, i32) {
    %c0_i32 = arith.constant 0 : i32
    %c0_i32_0 = arith.constant 0 : i32
    %c0_i32_1 = arith.constant 0 : i32
    return %c0_i32, %c0_i32_0 : i32, i32
  }
  func.func @transform_6(%arg0: i32) -> (i32, i32, i32) {
    %c0_i32 = arith.constant 0 : i32
    %c0_i32_0 = arith.constant 0 : i32
    %c0_i32_1 = arith.constant 0 : i32
    return %arg0, %c0_i32, %c0_i32_0 : i32, i32, i32
  }
}

module attributes {stable_mosaic.version = 11 : i64} {
  func.func @_encoder_layer_kernel(%arg0: i32, %arg1: memref<1x8x32xf32, #tpu.memory_space<vmem>>, %arg2: memref<1x1x8xf32, #tpu.memory_space<vmem>>, %arg3: memref<8x32x4xbf16, #tpu.memory_space<vmem>>, %arg4: memref<8x1x4xf32, #tpu.memory_space<vmem>>, %arg5: memref<8x32x4xbf16, #tpu.memory_space<vmem>>, %arg6: memref<8x1x4xf32, #tpu.memory_space<vmem>>, %arg7: memref<8x32x4xbf16, #tpu.memory_space<vmem>>, %arg8: memref<8x1x4xf32, #tpu.memory_space<vmem>>, %arg9: memref<8x4x32xbf16, #tpu.memory_space<vmem>>, %arg10: memref<1x32xf32, #tpu.memory_space<vmem>>, %arg11: memref<1x32xf32, #tpu.memory_space<vmem>>, %arg12: memref<1x32xf32, #tpu.memory_space<vmem>>, %arg13: memref<32x64xbf16, #tpu.memory_space<vmem>>, %arg14: memref<1x64xf32, #tpu.memory_space<vmem>>, %arg15: memref<64x32xbf16, #tpu.memory_space<vmem>>, %arg16: memref<1x32xf32, #tpu.memory_space<vmem>>, %arg17: memref<1x32xf32, #tpu.memory_space<vmem>>, %arg18: memref<1x32xf32, #tpu.memory_space<vmem>>, %arg19: memref<1x8x32xf32, #tpu.memory_space<vmem>>) attributes {dimension_semantics = [#tpu.dimension_semantics<parallel>], iteration_bounds = array<i64: 2>, scalar_prefetch = 0 : i64, scratch_operands = 0 : i64, tpu.core_type = #tpu.core_type<tc>, window_params = [{transform_indices = @transform_0, window_bounds = array<i64: 1, 8, 32>}, {transform_indices = @transform_1, window_bounds = array<i64: 1, 1, 8>}, {pipeline_mode = #tpu.pipeline_mode<synchronous>, transform_indices = @transform_2, window_bounds = array<i64: 8, 32, 4>}, {pipeline_mode = #tpu.pipeline_mode<synchronous>, transform_indices = @transform_3, window_bounds = array<i64: 8, 1, 4>}, {pipeline_mode = #tpu.pipeline_mode<synchronous>, transform_indices = @transform_4, window_bounds = array<i64: 8, 32, 4>}, {pipeline_mode = #tpu.pipeline_mode<synchronous>, transform_indices = @transform_5, window_bounds = array<i64: 8, 1, 4>}, {pipeline_mode = #tpu.pipeline_mode<synchronous>, transform_indices = @transform_6, window_bounds = array<i64: 8, 32, 4>}, {pipeline_mode = #tpu.pipeline_mode<synchronous>, transform_indices = @transform_7, window_bounds = array<i64: 8, 1, 4>}, {pipeline_mode = #tpu.pipeline_mode<synchronous>, transform_indices = @transform_8, window_bounds = array<i64: 8, 4, 32>}, {pipeline_mode = #tpu.pipeline_mode<synchronous>, transform_indices = @transform_9, window_bounds = array<i64: 1, 32>}, {pipeline_mode = #tpu.pipeline_mode<synchronous>, transform_indices = @transform_10, window_bounds = array<i64: 1, 32>}, {pipeline_mode = #tpu.pipeline_mode<synchronous>, transform_indices = @transform_11, window_bounds = array<i64: 1, 32>}, {pipeline_mode = #tpu.pipeline_mode<synchronous>, transform_indices = @transform_12, window_bounds = array<i64: 32, 64>}, {pipeline_mode = #tpu.pipeline_mode<synchronous>, transform_indices = @transform_13, window_bounds = array<i64: 1, 64>}, {pipeline_mode = #tpu.pipeline_mode<synchronous>, transform_indices = @transform_14, window_bounds = array<i64: 64, 32>}, {pipeline_mode = #tpu.pipeline_mode<synchronous>, transform_indices = @transform_15, window_bounds = array<i64: 1, 32>}, {pipeline_mode = #tpu.pipeline_mode<synchronous>, transform_indices = @transform_16, window_bounds = array<i64: 1, 32>}, {pipeline_mode = #tpu.pipeline_mode<synchronous>, transform_indices = @transform_17, window_bounds = array<i64: 1, 32>}, {transform_indices = @transform_18, window_bounds = array<i64: 1, 8, 32>}]} {
    %c0 = arith.constant 0 : index
    %c0_0 = arith.constant 0 : index
    %c0_1 = arith.constant 0 : index
    %0 = vector.load %arg1[%c0, %c0_0, %c0_1] : memref<1x8x32xf32, #tpu.memory_space<vmem>>, vector<1x8x32xf32>
    %1 = vector.shape_cast %0 : vector<1x8x32xf32> to vector<8x32xf32>
    %c0_2 = arith.constant 0 : index
    %c0_3 = arith.constant 0 : index
    %c0_4 = arith.constant 0 : index
    %2 = vector.load %arg2[%c0_2, %c0_3, %c0_4] : memref<1x1x8xf32, #tpu.memory_space<vmem>>, vector<1x1x8xf32>
    %3 = vector.shape_cast %2 : vector<1x1x8xf32> to vector<1x8xf32>
    %4 = arith.truncf %1 : vector<8x32xf32> to vector<8x32xbf16>
    %cst = arith.constant 0.000000e+00 : f32
    %5 = vector.broadcast %cst : f32 to vector<8x32xf32>
    %c0_5 = arith.constant 0 : index
    %c0_6 = arith.constant 0 : index
    %c0_7 = arith.constant 0 : index
    %6 = vector.load %arg3[%c0_5, %c0_6, %c0_7] : memref<8x32x4xbf16, #tpu.memory_space<vmem>>, vector<1x32x4xbf16>
    %7 = vector.shape_cast %6 : vector<1x32x4xbf16> to vector<32x4xbf16>
    %cst_8 = arith.constant dense<0.000000e+00> : vector<8x4xf32>
    %8 = tpu.matmul %4, %7, %cst_8 {dimension_numbers = #tpu.dot_dimension_numbers<[1], [0], [0], [1], [0, 0, 1, 1], [], []>} : vector<8x32xbf16>, vector<32x4xbf16>, vector<8x4xf32> -> vector<8x4xf32>
    %c0_9 = arith.constant 0 : index
    %c0_10 = arith.constant 0 : index
    %c0_11 = arith.constant 0 : index
    %9 = vector.load %arg4[%c0_9, %c0_10, %c0_11] : memref<8x1x4xf32, #tpu.memory_space<vmem>>, vector<1x1x4xf32>
    %10 = vector.shape_cast %9 : vector<1x1x4xf32> to vector<1x4xf32>
    %11 = vector.broadcast %10 : vector<1x4xf32> to vector<8x4xf32>
    %12 = arith.addf %8, %11 : vector<8x4xf32>
    %c0_12 = arith.constant 0 : index
    %c0_13 = arith.constant 0 : index
    %c0_14 = arith.constant 0 : index
    %13 = vector.load %arg5[%c0_12, %c0_13, %c0_14] : memref<8x32x4xbf16, #tpu.memory_space<vmem>>, vector<1x32x4xbf16>
    %14 = vector.shape_cast %13 : vector<1x32x4xbf16> to vector<32x4xbf16>
    %cst_15 = arith.constant dense<0.000000e+00> : vector<8x4xf32>
    %15 = tpu.matmul %4, %14, %cst_15 {dimension_numbers = #tpu.dot_dimension_numbers<[1], [0], [0], [1], [0, 0, 1, 1], [], []>} : vector<8x32xbf16>, vector<32x4xbf16>, vector<8x4xf32> -> vector<8x4xf32>
    %c0_16 = arith.constant 0 : index
    %c0_17 = arith.constant 0 : index
    %c0_18 = arith.constant 0 : index
    %16 = vector.load %arg6[%c0_16, %c0_17, %c0_18] : memref<8x1x4xf32, #tpu.memory_space<vmem>>, vector<1x1x4xf32>
    %17 = vector.shape_cast %16 : vector<1x1x4xf32> to vector<1x4xf32>
    %18 = vector.broadcast %17 : vector<1x4xf32> to vector<8x4xf32>
    %19 = arith.addf %15, %18 : vector<8x4xf32>
    %c0_19 = arith.constant 0 : index
    %c0_20 = arith.constant 0 : index
    %c0_21 = arith.constant 0 : index
    %20 = vector.load %arg7[%c0_19, %c0_20, %c0_21] : memref<8x32x4xbf16, #tpu.memory_space<vmem>>, vector<1x32x4xbf16>
    %21 = vector.shape_cast %20 : vector<1x32x4xbf16> to vector<32x4xbf16>
    %cst_22 = arith.constant dense<0.000000e+00> : vector<8x4xf32>
    %22 = tpu.matmul %4, %21, %cst_22 {dimension_numbers = #tpu.dot_dimension_numbers<[1], [0], [0], [1], [0, 0, 1, 1], [], []>} : vector<8x32xbf16>, vector<32x4xbf16>, vector<8x4xf32> -> vector<8x4xf32>
    %c0_23 = arith.constant 0 : index
    %c0_24 = arith.constant 0 : index
    %c0_25 = arith.constant 0 : index
    %23 = vector.load %arg8[%c0_23, %c0_24, %c0_25] : memref<8x1x4xf32, #tpu.memory_space<vmem>>, vector<1x1x4xf32>
    %24 = vector.shape_cast %23 : vector<1x1x4xf32> to vector<1x4xf32>
    %25 = vector.broadcast %24 : vector<1x4xf32> to vector<8x4xf32>
    %26 = arith.addf %22, %25 : vector<8x4xf32>
    %27 = arith.truncf %12 : vector<8x4xf32> to vector<8x4xbf16>
    %28 = arith.truncf %19 : vector<8x4xf32> to vector<8x4xbf16>
    %cst_26 = arith.constant dense<0.000000e+00> : vector<8x8xf32>
    %29 = tpu.matmul %27, %28, %cst_26 {dimension_numbers = #tpu.dot_dimension_numbers<[1], [1], [0], [0], [0, 0, 1, 0], [], []>} : vector<8x4xbf16>, vector<8x4xbf16>, vector<8x8xf32> -> vector<8x8xf32>
    %cst_27 = arith.constant 5.000000e-01 : f32
    %30 = vector.broadcast %cst_27 : f32 to vector<8x8xf32>
    %31 = arith.mulf %29, %30 : vector<8x8xf32>
    %32 = vector.broadcast %3 : vector<1x8xf32> to vector<8x8xf32>
    %33 = arith.addf %31, %32 : vector<8x8xf32>
    %cst_28 = arith.constant dense<0xFF800000> : vector<8xf32>
    %34 = vector.multi_reduction <maximumf>, %33, %cst_28 [1] : vector<8x8xf32> to vector<8xf32>
    %35 = vector.shape_cast %34 : vector<8xf32> to vector<8x1xf32>
    %36 = vector.broadcast %35 : vector<8x1xf32> to vector<8x8xf32>
    %37 = arith.subf %33, %36 : vector<8x8xf32>
    %38 = math.exp %37 : vector<8x8xf32>
    %cst_29 = arith.constant dense<0.000000e+00> : vector<8xf32>
    %39 = vector.multi_reduction <add>, %38, %cst_29 [1] : vector<8x8xf32> to vector<8xf32>
    %40 = vector.shape_cast %39 : vector<8xf32> to vector<8x1xf32>
    %41 = tpu.reciprocal %40 {approx = true} : vector<8x1xf32> -> vector<8x1xf32>
    %42 = vector.broadcast %41 : vector<8x1xf32> to vector<8x8xf32>
    %43 = arith.mulf %38, %42 : vector<8x8xf32>
    %44 = arith.truncf %43 : vector<8x8xf32> to vector<8x8xbf16>
    %45 = arith.truncf %26 : vector<8x4xf32> to vector<8x4xbf16>
    %cst_30 = arith.constant dense<0.000000e+00> : vector<8x4xf32>
    %46 = tpu.matmul %44, %45, %cst_30 {dimension_numbers = #tpu.dot_dimension_numbers<[1], [0], [0], [1], [0, 0, 1, 1], [], []>} : vector<8x8xbf16>, vector<8x4xbf16>, vector<8x4xf32> -> vector<8x4xf32>
    %47 = arith.truncf %46 : vector<8x4xf32> to vector<8x4xbf16>
    %c0_31 = arith.constant 0 : index
    %c0_32 = arith.constant 0 : index
    %c0_33 = arith.constant 0 : index
    %48 = vector.load %arg9[%c0_31, %c0_32, %c0_33] : memref<8x4x32xbf16, #tpu.memory_space<vmem>>, vector<1x4x32xbf16>
    %49 = vector.shape_cast %48 : vector<1x4x32xbf16> to vector<4x32xbf16>
    %cst_34 = arith.constant dense<0.000000e+00> : vector<8x32xf32>
    %50 = tpu.matmul %47, %49, %cst_34 {dimension_numbers = #tpu.dot_dimension_numbers<[1], [0], [0], [1], [0, 0, 1, 1], [], []>} : vector<8x4xbf16>, vector<4x32xbf16>, vector<8x32xf32> -> vector<8x32xf32>
    %51 = arith.addf %5, %50 : vector<8x32xf32>
    %c1 = arith.constant 1 : index
    %c0_35 = arith.constant 0 : index
    %c0_36 = arith.constant 0 : index
    %52 = vector.load %arg3[%c1, %c0_35, %c0_36] : memref<8x32x4xbf16, #tpu.memory_space<vmem>>, vector<1x32x4xbf16>
    %53 = vector.shape_cast %52 : vector<1x32x4xbf16> to vector<32x4xbf16>
    %cst_37 = arith.constant dense<0.000000e+00> : vector<8x4xf32>
    %54 = tpu.matmul %4, %53, %cst_37 {dimension_numbers = #tpu.dot_dimension_numbers<[1], [0], [0], [1], [0, 0, 1, 1], [], []>} : vector<8x32xbf16>, vector<32x4xbf16>, vector<8x4xf32> -> vector<8x4xf32>
    %c1_38 = arith.constant 1 : index
    %c0_39 = arith.constant 0 : index
    %c0_40 = arith.constant 0 : index
    %55 = vector.load %arg4[%c1_38, %c0_39, %c0_40] : memref<8x1x4xf32, #tpu.memory_space<vmem>>, vector<1x1x4xf32>
    %56 = vector.shape_cast %55 : vector<1x1x4xf32> to vector<1x4xf32>
    %57 = vector.broadcast %56 : vector<1x4xf32> to vector<8x4xf32>
    %58 = arith.addf %54, %57 : vector<8x4xf32>
    %c1_41 = arith.constant 1 : index
    %c0_42 = arith.constant 0 : index
    %c0_43 = arith.constant 0 : index
    %59 = vector.load %arg5[%c1_41, %c0_42, %c0_43] : memref<8x32x4xbf16, #tpu.memory_space<vmem>>, vector<1x32x4xbf16>
    %60 = vector.shape_cast %59 : vector<1x32x4xbf16> to vector<32x4xbf16>
    %cst_44 = arith.constant dense<0.000000e+00> : vector<8x4xf32>
    %61 = tpu.matmul %4, %60, %cst_44 {dimension_numbers = #tpu.dot_dimension_numbers<[1], [0], [0], [1], [0, 0, 1, 1], [], []>} : vector<8x32xbf16>, vector<32x4xbf16>, vector<8x4xf32> -> vector<8x4xf32>
    %c1_45 = arith.constant 1 : index
    %c0_46 = arith.constant 0 : index
    %c0_47 = arith.constant 0 : index
    %62 = vector.load %arg6[%c1_45, %c0_46, %c0_47] : memref<8x1x4xf32, #tpu.memory_space<vmem>>, vector<1x1x4xf32>
    %63 = vector.shape_cast %62 : vector<1x1x4xf32> to vector<1x4xf32>
    %64 = vector.broadcast %63 : vector<1x4xf32> to vector<8x4xf32>
    %65 = arith.addf %61, %64 : vector<8x4xf32>
    %c1_48 = arith.constant 1 : index
    %c0_49 = arith.constant 0 : index
    %c0_50 = arith.constant 0 : index
    %66 = vector.load %arg7[%c1_48, %c0_49, %c0_50] : memref<8x32x4xbf16, #tpu.memory_space<vmem>>, vector<1x32x4xbf16>
    %67 = vector.shape_cast %66 : vector<1x32x4xbf16> to vector<32x4xbf16>
    %cst_51 = arith.constant dense<0.000000e+00> : vector<8x4xf32>
    %68 = tpu.matmul %4, %67, %cst_51 {dimension_numbers = #tpu.dot_dimension_numbers<[1], [0], [0], [1], [0, 0, 1, 1], [], []>} : vector<8x32xbf16>, vector<32x4xbf16>, vector<8x4xf32> -> vector<8x4xf32>
    %c1_52 = arith.constant 1 : index
    %c0_53 = arith.constant 0 : index
    %c0_54 = arith.constant 0 : index
    %69 = vector.load %arg8[%c1_52, %c0_53, %c0_54] : memref<8x1x4xf32, #tpu.memory_space<vmem>>, vector<1x1x4xf32>
    %70 = vector.shape_cast %69 : vector<1x1x4xf32> to vector<1x4xf32>
    %71 = vector.broadcast %70 : vector<1x4xf32> to vector<8x4xf32>
    %72 = arith.addf %68, %71 : vector<8x4xf32>
    %73 = arith.truncf %58 : vector<8x4xf32> to vector<8x4xbf16>
    %74 = arith.truncf %65 : vector<8x4xf32> to vector<8x4xbf16>
    %cst_55 = arith.constant dense<0.000000e+00> : vector<8x8xf32>
    %75 = tpu.matmul %73, %74, %cst_55 {dimension_numbers = #tpu.dot_dimension_numbers<[1], [1], [0], [0], [0, 0, 1, 0], [], []>} : vector<8x4xbf16>, vector<8x4xbf16>, vector<8x8xf32> -> vector<8x8xf32>
    %cst_56 = arith.constant 5.000000e-01 : f32
    %76 = vector.broadcast %cst_56 : f32 to vector<8x8xf32>
    %77 = arith.mulf %75, %76 : vector<8x8xf32>
    %78 = vector.broadcast %3 : vector<1x8xf32> to vector<8x8xf32>
    %79 = arith.addf %77, %78 : vector<8x8xf32>
    %cst_57 = arith.constant dense<0xFF800000> : vector<8xf32>
    %80 = vector.multi_reduction <maximumf>, %79, %cst_57 [1] : vector<8x8xf32> to vector<8xf32>
    %81 = vector.shape_cast %80 : vector<8xf32> to vector<8x1xf32>
    %82 = vector.broadcast %81 : vector<8x1xf32> to vector<8x8xf32>
    %83 = arith.subf %79, %82 : vector<8x8xf32>
    %84 = math.exp %83 : vector<8x8xf32>
    %cst_58 = arith.constant dense<0.000000e+00> : vector<8xf32>
    %85 = vector.multi_reduction <add>, %84, %cst_58 [1] : vector<8x8xf32> to vector<8xf32>
    %86 = vector.shape_cast %85 : vector<8xf32> to vector<8x1xf32>
    %87 = tpu.reciprocal %86 {approx = true} : vector<8x1xf32> -> vector<8x1xf32>
    %88 = vector.broadcast %87 : vector<8x1xf32> to vector<8x8xf32>
    %89 = arith.mulf %84, %88 : vector<8x8xf32>
    %90 = arith.truncf %89 : vector<8x8xf32> to vector<8x8xbf16>
    %91 = arith.truncf %72 : vector<8x4xf32> to vector<8x4xbf16>
    %cst_59 = arith.constant dense<0.000000e+00> : vector<8x4xf32>
    %92 = tpu.matmul %90, %91, %cst_59 {dimension_numbers = #tpu.dot_dimension_numbers<[1], [0], [0], [1], [0, 0, 1, 1], [], []>} : vector<8x8xbf16>, vector<8x4xbf16>, vector<8x4xf32> -> vector<8x4xf32>
    %93 = arith.truncf %92 : vector<8x4xf32> to vector<8x4xbf16>
    %c1_60 = arith.constant 1 : index
    %c0_61 = arith.constant 0 : index
    %c0_62 = arith.constant 0 : index
    %94 = vector.load %arg9[%c1_60, %c0_61, %c0_62] : memref<8x4x32xbf16, #tpu.memory_space<vmem>>, vector<1x4x32xbf16>
    %95 = vector.shape_cast %94 : vector<1x4x32xbf16> to vector<4x32xbf16>
    %cst_63 = arith.constant dense<0.000000e+00> : vector<8x32xf32>
    %96 = tpu.matmul %93, %95, %cst_63 {dimension_numbers = #tpu.dot_dimension_numbers<[1], [0], [0], [1], [0, 0, 1, 1], [], []>} : vector<8x4xbf16>, vector<4x32xbf16>, vector<8x32xf32> -> vector<8x32xf32>
    %97 = arith.addf %51, %96 : vector<8x32xf32>
    %c2 = arith.constant 2 : index
    %c0_64 = arith.constant 0 : index
    %c0_65 = arith.constant 0 : index
    %98 = vector.load %arg3[%c2, %c0_64, %c0_65] : memref<8x32x4xbf16, #tpu.memory_space<vmem>>, vector<1x32x4xbf16>
    %99 = vector.shape_cast %98 : vector<1x32x4xbf16> to vector<32x4xbf16>
    %cst_66 = arith.constant dense<0.000000e+00> : vector<8x4xf32>
    %100 = tpu.matmul %4, %99, %cst_66 {dimension_numbers = #tpu.dot_dimension_numbers<[1], [0], [0], [1], [0, 0, 1, 1], [], []>} : vector<8x32xbf16>, vector<32x4xbf16>, vector<8x4xf32> -> vector<8x4xf32>
    %c2_67 = arith.constant 2 : index
    %c0_68 = arith.constant 0 : index
    %c0_69 = arith.constant 0 : index
    %101 = vector.load %arg4[%c2_67, %c0_68, %c0_69] : memref<8x1x4xf32, #tpu.memory_space<vmem>>, vector<1x1x4xf32>
    %102 = vector.shape_cast %101 : vector<1x1x4xf32> to vector<1x4xf32>
    %103 = vector.broadcast %102 : vector<1x4xf32> to vector<8x4xf32>
    %104 = arith.addf %100, %103 : vector<8x4xf32>
    %c2_70 = arith.constant 2 : index
    %c0_71 = arith.constant 0 : index
    %c0_72 = arith.constant 0 : index
    %105 = vector.load %arg5[%c2_70, %c0_71, %c0_72] : memref<8x32x4xbf16, #tpu.memory_space<vmem>>, vector<1x32x4xbf16>
    %106 = vector.shape_cast %105 : vector<1x32x4xbf16> to vector<32x4xbf16>
    %cst_73 = arith.constant dense<0.000000e+00> : vector<8x4xf32>
    %107 = tpu.matmul %4, %106, %cst_73 {dimension_numbers = #tpu.dot_dimension_numbers<[1], [0], [0], [1], [0, 0, 1, 1], [], []>} : vector<8x32xbf16>, vector<32x4xbf16>, vector<8x4xf32> -> vector<8x4xf32>
    %c2_74 = arith.constant 2 : index
    %c0_75 = arith.constant 0 : index
    %c0_76 = arith.constant 0 : index
    %108 = vector.load %arg6[%c2_74, %c0_75, %c0_76] : memref<8x1x4xf32, #tpu.memory_space<vmem>>, vector<1x1x4xf32>
    %109 = vector.shape_cast %108 : vector<1x1x4xf32> to vector<1x4xf32>
    %110 = vector.broadcast %109 : vector<1x4xf32> to vector<8x4xf32>
    %111 = arith.addf %107, %110 : vector<8x4xf32>
    %c2_77 = arith.constant 2 : index
    %c0_78 = arith.constant 0 : index
    %c0_79 = arith.constant 0 : index
    %112 = vector.load %arg7[%c2_77, %c0_78, %c0_79] : memref<8x32x4xbf16, #tpu.memory_space<vmem>>, vector<1x32x4xbf16>
    %113 = vector.shape_cast %112 : vector<1x32x4xbf16> to vector<32x4xbf16>
    %cst_80 = arith.constant dense<0.000000e+00> : vector<8x4xf32>
    %114 = tpu.matmul %4, %113, %cst_80 {dimension_numbers = #tpu.dot_dimension_numbers<[1], [0], [0], [1], [0, 0, 1, 1], [], []>} : vector<8x32xbf16>, vector<32x4xbf16>, vector<8x4xf32> -> vector<8x4xf32>
    %c2_81 = arith.constant 2 : index
    %c0_82 = arith.constant 0 : index
    %c0_83 = arith.constant 0 : index
    %115 = vector.load %arg8[%c2_81, %c0_82, %c0_83] : memref<8x1x4xf32, #tpu.memory_space<vmem>>, vector<1x1x4xf32>
    %116 = vector.shape_cast %115 : vector<1x1x4xf32> to vector<1x4xf32>
    %117 = vector.broadcast %116 : vector<1x4xf32> to vector<8x4xf32>
    %118 = arith.addf %114, %117 : vector<8x4xf32>
    %119 = arith.truncf %104 : vector<8x4xf32> to vector<8x4xbf16>
    %120 = arith.truncf %111 : vector<8x4xf32> to vector<8x4xbf16>
    %cst_84 = arith.constant dense<0.000000e+00> : vector<8x8xf32>
    %121 = tpu.matmul %119, %120, %cst_84 {dimension_numbers = #tpu.dot_dimension_numbers<[1], [1], [0], [0], [0, 0, 1, 0], [], []>} : vector<8x4xbf16>, vector<8x4xbf16>, vector<8x8xf32> -> vector<8x8xf32>
    %cst_85 = arith.constant 5.000000e-01 : f32
    %122 = vector.broadcast %cst_85 : f32 to vector<8x8xf32>
    %123 = arith.mulf %121, %122 : vector<8x8xf32>
    %124 = vector.broadcast %3 : vector<1x8xf32> to vector<8x8xf32>
    %125 = arith.addf %123, %124 : vector<8x8xf32>
    %cst_86 = arith.constant dense<0xFF800000> : vector<8xf32>
    %126 = vector.multi_reduction <maximumf>, %125, %cst_86 [1] : vector<8x8xf32> to vector<8xf32>
    %127 = vector.shape_cast %126 : vector<8xf32> to vector<8x1xf32>
    %128 = vector.broadcast %127 : vector<8x1xf32> to vector<8x8xf32>
    %129 = arith.subf %125, %128 : vector<8x8xf32>
    %130 = math.exp %129 : vector<8x8xf32>
    %cst_87 = arith.constant dense<0.000000e+00> : vector<8xf32>
    %131 = vector.multi_reduction <add>, %130, %cst_87 [1] : vector<8x8xf32> to vector<8xf32>
    %132 = vector.shape_cast %131 : vector<8xf32> to vector<8x1xf32>
    %133 = tpu.reciprocal %132 {approx = true} : vector<8x1xf32> -> vector<8x1xf32>
    %134 = vector.broadcast %133 : vector<8x1xf32> to vector<8x8xf32>
    %135 = arith.mulf %130, %134 : vector<8x8xf32>
    %136 = arith.truncf %135 : vector<8x8xf32> to vector<8x8xbf16>
    %137 = arith.truncf %118 : vector<8x4xf32> to vector<8x4xbf16>
    %cst_88 = arith.constant dense<0.000000e+00> : vector<8x4xf32>
    %138 = tpu.matmul %136, %137, %cst_88 {dimension_numbers = #tpu.dot_dimension_numbers<[1], [0], [0], [1], [0, 0, 1, 1], [], []>} : vector<8x8xbf16>, vector<8x4xbf16>, vector<8x4xf32> -> vector<8x4xf32>
    %139 = arith.truncf %138 : vector<8x4xf32> to vector<8x4xbf16>
    %c2_89 = arith.constant 2 : index
    %c0_90 = arith.constant 0 : index
    %c0_91 = arith.constant 0 : index
    %140 = vector.load %arg9[%c2_89, %c0_90, %c0_91] : memref<8x4x32xbf16, #tpu.memory_space<vmem>>, vector<1x4x32xbf16>
    %141 = vector.shape_cast %140 : vector<1x4x32xbf16> to vector<4x32xbf16>
    %cst_92 = arith.constant dense<0.000000e+00> : vector<8x32xf32>
    %142 = tpu.matmul %139, %141, %cst_92 {dimension_numbers = #tpu.dot_dimension_numbers<[1], [0], [0], [1], [0, 0, 1, 1], [], []>} : vector<8x4xbf16>, vector<4x32xbf16>, vector<8x32xf32> -> vector<8x32xf32>
    %143 = arith.addf %97, %142 : vector<8x32xf32>
    %c3 = arith.constant 3 : index
    %c0_93 = arith.constant 0 : index
    %c0_94 = arith.constant 0 : index
    %144 = vector.load %arg3[%c3, %c0_93, %c0_94] : memref<8x32x4xbf16, #tpu.memory_space<vmem>>, vector<1x32x4xbf16>
    %145 = vector.shape_cast %144 : vector<1x32x4xbf16> to vector<32x4xbf16>
    %cst_95 = arith.constant dense<0.000000e+00> : vector<8x4xf32>
    %146 = tpu.matmul %4, %145, %cst_95 {dimension_numbers = #tpu.dot_dimension_numbers<[1], [0], [0], [1], [0, 0, 1, 1], [], []>} : vector<8x32xbf16>, vector<32x4xbf16>, vector<8x4xf32> -> vector<8x4xf32>
    %c3_96 = arith.constant 3 : index
    %c0_97 = arith.constant 0 : index
    %c0_98 = arith.constant 0 : index
    %147 = vector.load %arg4[%c3_96, %c0_97, %c0_98] : memref<8x1x4xf32, #tpu.memory_space<vmem>>, vector<1x1x4xf32>
    %148 = vector.shape_cast %147 : vector<1x1x4xf32> to vector<1x4xf32>
    %149 = vector.broadcast %148 : vector<1x4xf32> to vector<8x4xf32>
    %150 = arith.addf %146, %149 : vector<8x4xf32>
    %c3_99 = arith.constant 3 : index
    %c0_100 = arith.constant 0 : index
    %c0_101 = arith.constant 0 : index
    %151 = vector.load %arg5[%c3_99, %c0_100, %c0_101] : memref<8x32x4xbf16, #tpu.memory_space<vmem>>, vector<1x32x4xbf16>
    %152 = vector.shape_cast %151 : vector<1x32x4xbf16> to vector<32x4xbf16>
    %cst_102 = arith.constant dense<0.000000e+00> : vector<8x4xf32>
    %153 = tpu.matmul %4, %152, %cst_102 {dimension_numbers = #tpu.dot_dimension_numbers<[1], [0], [0], [1], [0, 0, 1, 1], [], []>} : vector<8x32xbf16>, vector<32x4xbf16>, vector<8x4xf32> -> vector<8x4xf32>
    %c3_103 = arith.constant 3 : index
    %c0_104 = arith.constant 0 : index
    %c0_105 = arith.constant 0 : index
    %154 = vector.load %arg6[%c3_103, %c0_104, %c0_105] : memref<8x1x4xf32, #tpu.memory_space<vmem>>, vector<1x1x4xf32>
    %155 = vector.shape_cast %154 : vector<1x1x4xf32> to vector<1x4xf32>
    %156 = vector.broadcast %155 : vector<1x4xf32> to vector<8x4xf32>
    %157 = arith.addf %153, %156 : vector<8x4xf32>
    %c3_106 = arith.constant 3 : index
    %c0_107 = arith.constant 0 : index
    %c0_108 = arith.constant 0 : index
    %158 = vector.load %arg7[%c3_106, %c0_107, %c0_108] : memref<8x32x4xbf16, #tpu.memory_space<vmem>>, vector<1x32x4xbf16>
    %159 = vector.shape_cast %158 : vector<1x32x4xbf16> to vector<32x4xbf16>
    %cst_109 = arith.constant dense<0.000000e+00> : vector<8x4xf32>
    %160 = tpu.matmul %4, %159, %cst_109 {dimension_numbers = #tpu.dot_dimension_numbers<[1], [0], [0], [1], [0, 0, 1, 1], [], []>} : vector<8x32xbf16>, vector<32x4xbf16>, vector<8x4xf32> -> vector<8x4xf32>
    %c3_110 = arith.constant 3 : index
    %c0_111 = arith.constant 0 : index
    %c0_112 = arith.constant 0 : index
    %161 = vector.load %arg8[%c3_110, %c0_111, %c0_112] : memref<8x1x4xf32, #tpu.memory_space<vmem>>, vector<1x1x4xf32>
    %162 = vector.shape_cast %161 : vector<1x1x4xf32> to vector<1x4xf32>
    %163 = vector.broadcast %162 : vector<1x4xf32> to vector<8x4xf32>
    %164 = arith.addf %160, %163 : vector<8x4xf32>
    %165 = arith.truncf %150 : vector<8x4xf32> to vector<8x4xbf16>
    %166 = arith.truncf %157 : vector<8x4xf32> to vector<8x4xbf16>
    %cst_113 = arith.constant dense<0.000000e+00> : vector<8x8xf32>
    %167 = tpu.matmul %165, %166, %cst_113 {dimension_numbers = #tpu.dot_dimension_numbers<[1], [1], [0], [0], [0, 0, 1, 0], [], []>} : vector<8x4xbf16>, vector<8x4xbf16>, vector<8x8xf32> -> vector<8x8xf32>
    %cst_114 = arith.constant 5.000000e-01 : f32
    %168 = vector.broadcast %cst_114 : f32 to vector<8x8xf32>
    %169 = arith.mulf %167, %168 : vector<8x8xf32>
    %170 = vector.broadcast %3 : vector<1x8xf32> to vector<8x8xf32>
    %171 = arith.addf %169, %170 : vector<8x8xf32>
    %cst_115 = arith.constant dense<0xFF800000> : vector<8xf32>
    %172 = vector.multi_reduction <maximumf>, %171, %cst_115 [1] : vector<8x8xf32> to vector<8xf32>
    %173 = vector.shape_cast %172 : vector<8xf32> to vector<8x1xf32>
    %174 = vector.broadcast %173 : vector<8x1xf32> to vector<8x8xf32>
    %175 = arith.subf %171, %174 : vector<8x8xf32>
    %176 = math.exp %175 : vector<8x8xf32>
    %cst_116 = arith.constant dense<0.000000e+00> : vector<8xf32>
    %177 = vector.multi_reduction <add>, %176, %cst_116 [1] : vector<8x8xf32> to vector<8xf32>
    %178 = vector.shape_cast %177 : vector<8xf32> to vector<8x1xf32>
    %179 = tpu.reciprocal %178 {approx = true} : vector<8x1xf32> -> vector<8x1xf32>
    %180 = vector.broadcast %179 : vector<8x1xf32> to vector<8x8xf32>
    %181 = arith.mulf %176, %180 : vector<8x8xf32>
    %182 = arith.truncf %181 : vector<8x8xf32> to vector<8x8xbf16>
    %183 = arith.truncf %164 : vector<8x4xf32> to vector<8x4xbf16>
    %cst_117 = arith.constant dense<0.000000e+00> : vector<8x4xf32>
    %184 = tpu.matmul %182, %183, %cst_117 {dimension_numbers = #tpu.dot_dimension_numbers<[1], [0], [0], [1], [0, 0, 1, 1], [], []>} : vector<8x8xbf16>, vector<8x4xbf16>, vector<8x4xf32> -> vector<8x4xf32>
    %185 = arith.truncf %184 : vector<8x4xf32> to vector<8x4xbf16>
    %c3_118 = arith.constant 3 : index
    %c0_119 = arith.constant 0 : index
    %c0_120 = arith.constant 0 : index
    %186 = vector.load %arg9[%c3_118, %c0_119, %c0_120] : memref<8x4x32xbf16, #tpu.memory_space<vmem>>, vector<1x4x32xbf16>
    %187 = vector.shape_cast %186 : vector<1x4x32xbf16> to vector<4x32xbf16>
    %cst_121 = arith.constant dense<0.000000e+00> : vector<8x32xf32>
    %188 = tpu.matmul %185, %187, %cst_121 {dimension_numbers = #tpu.dot_dimension_numbers<[1], [0], [0], [1], [0, 0, 1, 1], [], []>} : vector<8x4xbf16>, vector<4x32xbf16>, vector<8x32xf32> -> vector<8x32xf32>
    %189 = arith.addf %143, %188 : vector<8x32xf32>
    %c4 = arith.constant 4 : index
    %c0_122 = arith.constant 0 : index
    %c0_123 = arith.constant 0 : index
    %190 = vector.load %arg3[%c4, %c0_122, %c0_123] : memref<8x32x4xbf16, #tpu.memory_space<vmem>>, vector<1x32x4xbf16>
    %191 = vector.shape_cast %190 : vector<1x32x4xbf16> to vector<32x4xbf16>
    %cst_124 = arith.constant dense<0.000000e+00> : vector<8x4xf32>
    %192 = tpu.matmul %4, %191, %cst_124 {dimension_numbers = #tpu.dot_dimension_numbers<[1], [0], [0], [1], [0, 0, 1, 1], [], []>} : vector<8x32xbf16>, vector<32x4xbf16>, vector<8x4xf32> -> vector<8x4xf32>
    %c4_125 = arith.constant 4 : index
    %c0_126 = arith.constant 0 : index
    %c0_127 = arith.constant 0 : index
    %193 = vector.load %arg4[%c4_125, %c0_126, %c0_127] : memref<8x1x4xf32, #tpu.memory_space<vmem>>, vector<1x1x4xf32>
    %194 = vector.shape_cast %193 : vector<1x1x4xf32> to vector<1x4xf32>
    %195 = vector.broadcast %194 : vector<1x4xf32> to vector<8x4xf32>
    %196 = arith.addf %192, %195 : vector<8x4xf32>
    %c4_128 = arith.constant 4 : index
    %c0_129 = arith.constant 0 : index
    %c0_130 = arith.constant 0 : index
    %197 = vector.load %arg5[%c4_128, %c0_129, %c0_130] : memref<8x32x4xbf16, #tpu.memory_space<vmem>>, vector<1x32x4xbf16>
    %198 = vector.shape_cast %197 : vector<1x32x4xbf16> to vector<32x4xbf16>
    %cst_131 = arith.constant dense<0.000000e+00> : vector<8x4xf32>
    %199 = tpu.matmul %4, %198, %cst_131 {dimension_numbers = #tpu.dot_dimension_numbers<[1], [0], [0], [1], [0, 0, 1, 1], [], []>} : vector<8x32xbf16>, vector<32x4xbf16>, vector<8x4xf32> -> vector<8x4xf32>
    %c4_132 = arith.constant 4 : index
    %c0_133 = arith.constant 0 : index
    %c0_134 = arith.constant 0 : index
    %200 = vector.load %arg6[%c4_132, %c0_133, %c0_134] : memref<8x1x4xf32, #tpu.memory_space<vmem>>, vector<1x1x4xf32>
    %201 = vector.shape_cast %200 : vector<1x1x4xf32> to vector<1x4xf32>
    %202 = vector.broadcast %201 : vector<1x4xf32> to vector<8x4xf32>
    %203 = arith.addf %199, %202 : vector<8x4xf32>
    %c4_135 = arith.constant 4 : index
    %c0_136 = arith.constant 0 : index
    %c0_137 = arith.constant 0 : index
    %204 = vector.load %arg7[%c4_135, %c0_136, %c0_137] : memref<8x32x4xbf16, #tpu.memory_space<vmem>>, vector<1x32x4xbf16>
    %205 = vector.shape_cast %204 : vector<1x32x4xbf16> to vector<32x4xbf16>
    %cst_138 = arith.constant dense<0.000000e+00> : vector<8x4xf32>
    %206 = tpu.matmul %4, %205, %cst_138 {dimension_numbers = #tpu.dot_dimension_numbers<[1], [0], [0], [1], [0, 0, 1, 1], [], []>} : vector<8x32xbf16>, vector<32x4xbf16>, vector<8x4xf32> -> vector<8x4xf32>
    %c4_139 = arith.constant 4 : index
    %c0_140 = arith.constant 0 : index
    %c0_141 = arith.constant 0 : index
    %207 = vector.load %arg8[%c4_139, %c0_140, %c0_141] : memref<8x1x4xf32, #tpu.memory_space<vmem>>, vector<1x1x4xf32>
    %208 = vector.shape_cast %207 : vector<1x1x4xf32> to vector<1x4xf32>
    %209 = vector.broadcast %208 : vector<1x4xf32> to vector<8x4xf32>
    %210 = arith.addf %206, %209 : vector<8x4xf32>
    %211 = arith.truncf %196 : vector<8x4xf32> to vector<8x4xbf16>
    %212 = arith.truncf %203 : vector<8x4xf32> to vector<8x4xbf16>
    %cst_142 = arith.constant dense<0.000000e+00> : vector<8x8xf32>
    %213 = tpu.matmul %211, %212, %cst_142 {dimension_numbers = #tpu.dot_dimension_numbers<[1], [1], [0], [0], [0, 0, 1, 0], [], []>} : vector<8x4xbf16>, vector<8x4xbf16>, vector<8x8xf32> -> vector<8x8xf32>
    %cst_143 = arith.constant 5.000000e-01 : f32
    %214 = vector.broadcast %cst_143 : f32 to vector<8x8xf32>
    %215 = arith.mulf %213, %214 : vector<8x8xf32>
    %216 = vector.broadcast %3 : vector<1x8xf32> to vector<8x8xf32>
    %217 = arith.addf %215, %216 : vector<8x8xf32>
    %cst_144 = arith.constant dense<0xFF800000> : vector<8xf32>
    %218 = vector.multi_reduction <maximumf>, %217, %cst_144 [1] : vector<8x8xf32> to vector<8xf32>
    %219 = vector.shape_cast %218 : vector<8xf32> to vector<8x1xf32>
    %220 = vector.broadcast %219 : vector<8x1xf32> to vector<8x8xf32>
    %221 = arith.subf %217, %220 : vector<8x8xf32>
    %222 = math.exp %221 : vector<8x8xf32>
    %cst_145 = arith.constant dense<0.000000e+00> : vector<8xf32>
    %223 = vector.multi_reduction <add>, %222, %cst_145 [1] : vector<8x8xf32> to vector<8xf32>
    %224 = vector.shape_cast %223 : vector<8xf32> to vector<8x1xf32>
    %225 = tpu.reciprocal %224 {approx = true} : vector<8x1xf32> -> vector<8x1xf32>
    %226 = vector.broadcast %225 : vector<8x1xf32> to vector<8x8xf32>
    %227 = arith.mulf %222, %226 : vector<8x8xf32>
    %228 = arith.truncf %227 : vector<8x8xf32> to vector<8x8xbf16>
    %229 = arith.truncf %210 : vector<8x4xf32> to vector<8x4xbf16>
    %cst_146 = arith.constant dense<0.000000e+00> : vector<8x4xf32>
    %230 = tpu.matmul %228, %229, %cst_146 {dimension_numbers = #tpu.dot_dimension_numbers<[1], [0], [0], [1], [0, 0, 1, 1], [], []>} : vector<8x8xbf16>, vector<8x4xbf16>, vector<8x4xf32> -> vector<8x4xf32>
    %231 = arith.truncf %230 : vector<8x4xf32> to vector<8x4xbf16>
    %c4_147 = arith.constant 4 : index
    %c0_148 = arith.constant 0 : index
    %c0_149 = arith.constant 0 : index
    %232 = vector.load %arg9[%c4_147, %c0_148, %c0_149] : memref<8x4x32xbf16, #tpu.memory_space<vmem>>, vector<1x4x32xbf16>
    %233 = vector.shape_cast %232 : vector<1x4x32xbf16> to vector<4x32xbf16>
    %cst_150 = arith.constant dense<0.000000e+00> : vector<8x32xf32>
    %234 = tpu.matmul %231, %233, %cst_150 {dimension_numbers = #tpu.dot_dimension_numbers<[1], [0], [0], [1], [0, 0, 1, 1], [], []>} : vector<8x4xbf16>, vector<4x32xbf16>, vector<8x32xf32> -> vector<8x32xf32>
    %235 = arith.addf %189, %234 : vector<8x32xf32>
    %c5 = arith.constant 5 : index
    %c0_151 = arith.constant 0 : index
    %c0_152 = arith.constant 0 : index
    %236 = vector.load %arg3[%c5, %c0_151, %c0_152] : memref<8x32x4xbf16, #tpu.memory_space<vmem>>, vector<1x32x4xbf16>
    %237 = vector.shape_cast %236 : vector<1x32x4xbf16> to vector<32x4xbf16>
    %cst_153 = arith.constant dense<0.000000e+00> : vector<8x4xf32>
    %238 = tpu.matmul %4, %237, %cst_153 {dimension_numbers = #tpu.dot_dimension_numbers<[1], [0], [0], [1], [0, 0, 1, 1], [], []>} : vector<8x32xbf16>, vector<32x4xbf16>, vector<8x4xf32> -> vector<8x4xf32>
    %c5_154 = arith.constant 5 : index
    %c0_155 = arith.constant 0 : index
    %c0_156 = arith.constant 0 : index
    %239 = vector.load %arg4[%c5_154, %c0_155, %c0_156] : memref<8x1x4xf32, #tpu.memory_space<vmem>>, vector<1x1x4xf32>
    %240 = vector.shape_cast %239 : vector<1x1x4xf32> to vector<1x4xf32>
    %241 = vector.broadcast %240 : vector<1x4xf32> to vector<8x4xf32>
    %242 = arith.addf %238, %241 : vector<8x4xf32>
    %c5_157 = arith.constant 5 : index
    %c0_158 = arith.constant 0 : index
    %c0_159 = arith.constant 0 : index
    %243 = vector.load %arg5[%c5_157, %c0_158, %c0_159] : memref<8x32x4xbf16, #tpu.memory_space<vmem>>, vector<1x32x4xbf16>
    %244 = vector.shape_cast %243 : vector<1x32x4xbf16> to vector<32x4xbf16>
    %cst_160 = arith.constant dense<0.000000e+00> : vector<8x4xf32>
    %245 = tpu.matmul %4, %244, %cst_160 {dimension_numbers = #tpu.dot_dimension_numbers<[1], [0], [0], [1], [0, 0, 1, 1], [], []>} : vector<8x32xbf16>, vector<32x4xbf16>, vector<8x4xf32> -> vector<8x4xf32>
    %c5_161 = arith.constant 5 : index
    %c0_162 = arith.constant 0 : index
    %c0_163 = arith.constant 0 : index
    %246 = vector.load %arg6[%c5_161, %c0_162, %c0_163] : memref<8x1x4xf32, #tpu.memory_space<vmem>>, vector<1x1x4xf32>
    %247 = vector.shape_cast %246 : vector<1x1x4xf32> to vector<1x4xf32>
    %248 = vector.broadcast %247 : vector<1x4xf32> to vector<8x4xf32>
    %249 = arith.addf %245, %248 : vector<8x4xf32>
    %c5_164 = arith.constant 5 : index
    %c0_165 = arith.constant 0 : index
    %c0_166 = arith.constant 0 : index
    %250 = vector.load %arg7[%c5_164, %c0_165, %c0_166] : memref<8x32x4xbf16, #tpu.memory_space<vmem>>, vector<1x32x4xbf16>
    %251 = vector.shape_cast %250 : vector<1x32x4xbf16> to vector<32x4xbf16>
    %cst_167 = arith.constant dense<0.000000e+00> : vector<8x4xf32>
    %252 = tpu.matmul %4, %251, %cst_167 {dimension_numbers = #tpu.dot_dimension_numbers<[1], [0], [0], [1], [0, 0, 1, 1], [], []>} : vector<8x32xbf16>, vector<32x4xbf16>, vector<8x4xf32> -> vector<8x4xf32>
    %c5_168 = arith.constant 5 : index
    %c0_169 = arith.constant 0 : index
    %c0_170 = arith.constant 0 : index
    %253 = vector.load %arg8[%c5_168, %c0_169, %c0_170] : memref<8x1x4xf32, #tpu.memory_space<vmem>>, vector<1x1x4xf32>
    %254 = vector.shape_cast %253 : vector<1x1x4xf32> to vector<1x4xf32>
    %255 = vector.broadcast %254 : vector<1x4xf32> to vector<8x4xf32>
    %256 = arith.addf %252, %255 : vector<8x4xf32>
    %257 = arith.truncf %242 : vector<8x4xf32> to vector<8x4xbf16>
    %258 = arith.truncf %249 : vector<8x4xf32> to vector<8x4xbf16>
    %cst_171 = arith.constant dense<0.000000e+00> : vector<8x8xf32>
    %259 = tpu.matmul %257, %258, %cst_171 {dimension_numbers = #tpu.dot_dimension_numbers<[1], [1], [0], [0], [0, 0, 1, 0], [], []>} : vector<8x4xbf16>, vector<8x4xbf16>, vector<8x8xf32> -> vector<8x8xf32>
    %cst_172 = arith.constant 5.000000e-01 : f32
    %260 = vector.broadcast %cst_172 : f32 to vector<8x8xf32>
    %261 = arith.mulf %259, %260 : vector<8x8xf32>
    %262 = vector.broadcast %3 : vector<1x8xf32> to vector<8x8xf32>
    %263 = arith.addf %261, %262 : vector<8x8xf32>
    %cst_173 = arith.constant dense<0xFF800000> : vector<8xf32>
    %264 = vector.multi_reduction <maximumf>, %263, %cst_173 [1] : vector<8x8xf32> to vector<8xf32>
    %265 = vector.shape_cast %264 : vector<8xf32> to vector<8x1xf32>
    %266 = vector.broadcast %265 : vector<8x1xf32> to vector<8x8xf32>
    %267 = arith.subf %263, %266 : vector<8x8xf32>
    %268 = math.exp %267 : vector<8x8xf32>
    %cst_174 = arith.constant dense<0.000000e+00> : vector<8xf32>
    %269 = vector.multi_reduction <add>, %268, %cst_174 [1] : vector<8x8xf32> to vector<8xf32>
    %270 = vector.shape_cast %269 : vector<8xf32> to vector<8x1xf32>
    %271 = tpu.reciprocal %270 {approx = true} : vector<8x1xf32> -> vector<8x1xf32>
    %272 = vector.broadcast %271 : vector<8x1xf32> to vector<8x8xf32>
    %273 = arith.mulf %268, %272 : vector<8x8xf32>
    %274 = arith.truncf %273 : vector<8x8xf32> to vector<8x8xbf16>
    %275 = arith.truncf %256 : vector<8x4xf32> to vector<8x4xbf16>
    %cst_175 = arith.constant dense<0.000000e+00> : vector<8x4xf32>
    %276 = tpu.matmul %274, %275, %cst_175 {dimension_numbers = #tpu.dot_dimension_numbers<[1], [0], [0], [1], [0, 0, 1, 1], [], []>} : vector<8x8xbf16>, vector<8x4xbf16>, vector<8x4xf32> -> vector<8x4xf32>
    %277 = arith.truncf %276 : vector<8x4xf32> to vector<8x4xbf16>
    %c5_176 = arith.constant 5 : index
    %c0_177 = arith.constant 0 : index
    %c0_178 = arith.constant 0 : index
    %278 = vector.load %arg9[%c5_176, %c0_177, %c0_178] : memref<8x4x32xbf16, #tpu.memory_space<vmem>>, vector<1x4x32xbf16>
    %279 = vector.shape_cast %278 : vector<1x4x32xbf16> to vector<4x32xbf16>
    %cst_179 = arith.constant dense<0.000000e+00> : vector<8x32xf32>
    %280 = tpu.matmul %277, %279, %cst_179 {dimension_numbers = #tpu.dot_dimension_numbers<[1], [0], [0], [1], [0, 0, 1, 1], [], []>} : vector<8x4xbf16>, vector<4x32xbf16>, vector<8x32xf32> -> vector<8x32xf32>
    %281 = arith.addf %235, %280 : vector<8x32xf32>
    %c6 = arith.constant 6 : index
    %c0_180 = arith.constant 0 : index
    %c0_181 = arith.constant 0 : index
    %282 = vector.load %arg3[%c6, %c0_180, %c0_181] : memref<8x32x4xbf16, #tpu.memory_space<vmem>>, vector<1x32x4xbf16>
    %283 = vector.shape_cast %282 : vector<1x32x4xbf16> to vector<32x4xbf16>
    %cst_182 = arith.constant dense<0.000000e+00> : vector<8x4xf32>
    %284 = tpu.matmul %4, %283, %cst_182 {dimension_numbers = #tpu.dot_dimension_numbers<[1], [0], [0], [1], [0, 0, 1, 1], [], []>} : vector<8x32xbf16>, vector<32x4xbf16>, vector<8x4xf32> -> vector<8x4xf32>
    %c6_183 = arith.constant 6 : index
    %c0_184 = arith.constant 0 : index
    %c0_185 = arith.constant 0 : index
    %285 = vector.load %arg4[%c6_183, %c0_184, %c0_185] : memref<8x1x4xf32, #tpu.memory_space<vmem>>, vector<1x1x4xf32>
    %286 = vector.shape_cast %285 : vector<1x1x4xf32> to vector<1x4xf32>
    %287 = vector.broadcast %286 : vector<1x4xf32> to vector<8x4xf32>
    %288 = arith.addf %284, %287 : vector<8x4xf32>
    %c6_186 = arith.constant 6 : index
    %c0_187 = arith.constant 0 : index
    %c0_188 = arith.constant 0 : index
    %289 = vector.load %arg5[%c6_186, %c0_187, %c0_188] : memref<8x32x4xbf16, #tpu.memory_space<vmem>>, vector<1x32x4xbf16>
    %290 = vector.shape_cast %289 : vector<1x32x4xbf16> to vector<32x4xbf16>
    %cst_189 = arith.constant dense<0.000000e+00> : vector<8x4xf32>
    %291 = tpu.matmul %4, %290, %cst_189 {dimension_numbers = #tpu.dot_dimension_numbers<[1], [0], [0], [1], [0, 0, 1, 1], [], []>} : vector<8x32xbf16>, vector<32x4xbf16>, vector<8x4xf32> -> vector<8x4xf32>
    %c6_190 = arith.constant 6 : index
    %c0_191 = arith.constant 0 : index
    %c0_192 = arith.constant 0 : index
    %292 = vector.load %arg6[%c6_190, %c0_191, %c0_192] : memref<8x1x4xf32, #tpu.memory_space<vmem>>, vector<1x1x4xf32>
    %293 = vector.shape_cast %292 : vector<1x1x4xf32> to vector<1x4xf32>
    %294 = vector.broadcast %293 : vector<1x4xf32> to vector<8x4xf32>
    %295 = arith.addf %291, %294 : vector<8x4xf32>
    %c6_193 = arith.constant 6 : index
    %c0_194 = arith.constant 0 : index
    %c0_195 = arith.constant 0 : index
    %296 = vector.load %arg7[%c6_193, %c0_194, %c0_195] : memref<8x32x4xbf16, #tpu.memory_space<vmem>>, vector<1x32x4xbf16>
    %297 = vector.shape_cast %296 : vector<1x32x4xbf16> to vector<32x4xbf16>
    %cst_196 = arith.constant dense<0.000000e+00> : vector<8x4xf32>
    %298 = tpu.matmul %4, %297, %cst_196 {dimension_numbers = #tpu.dot_dimension_numbers<[1], [0], [0], [1], [0, 0, 1, 1], [], []>} : vector<8x32xbf16>, vector<32x4xbf16>, vector<8x4xf32> -> vector<8x4xf32>
    %c6_197 = arith.constant 6 : index
    %c0_198 = arith.constant 0 : index
    %c0_199 = arith.constant 0 : index
    %299 = vector.load %arg8[%c6_197, %c0_198, %c0_199] : memref<8x1x4xf32, #tpu.memory_space<vmem>>, vector<1x1x4xf32>
    %300 = vector.shape_cast %299 : vector<1x1x4xf32> to vector<1x4xf32>
    %301 = vector.broadcast %300 : vector<1x4xf32> to vector<8x4xf32>
    %302 = arith.addf %298, %301 : vector<8x4xf32>
    %303 = arith.truncf %288 : vector<8x4xf32> to vector<8x4xbf16>
    %304 = arith.truncf %295 : vector<8x4xf32> to vector<8x4xbf16>
    %cst_200 = arith.constant dense<0.000000e+00> : vector<8x8xf32>
    %305 = tpu.matmul %303, %304, %cst_200 {dimension_numbers = #tpu.dot_dimension_numbers<[1], [1], [0], [0], [0, 0, 1, 0], [], []>} : vector<8x4xbf16>, vector<8x4xbf16>, vector<8x8xf32> -> vector<8x8xf32>
    %cst_201 = arith.constant 5.000000e-01 : f32
    %306 = vector.broadcast %cst_201 : f32 to vector<8x8xf32>
    %307 = arith.mulf %305, %306 : vector<8x8xf32>
    %308 = vector.broadcast %3 : vector<1x8xf32> to vector<8x8xf32>
    %309 = arith.addf %307, %308 : vector<8x8xf32>
    %cst_202 = arith.constant dense<0xFF800000> : vector<8xf32>
    %310 = vector.multi_reduction <maximumf>, %309, %cst_202 [1] : vector<8x8xf32> to vector<8xf32>
    %311 = vector.shape_cast %310 : vector<8xf32> to vector<8x1xf32>
    %312 = vector.broadcast %311 : vector<8x1xf32> to vector<8x8xf32>
    %313 = arith.subf %309, %312 : vector<8x8xf32>
    %314 = math.exp %313 : vector<8x8xf32>
    %cst_203 = arith.constant dense<0.000000e+00> : vector<8xf32>
    %315 = vector.multi_reduction <add>, %314, %cst_203 [1] : vector<8x8xf32> to vector<8xf32>
    %316 = vector.shape_cast %315 : vector<8xf32> to vector<8x1xf32>
    %317 = tpu.reciprocal %316 {approx = true} : vector<8x1xf32> -> vector<8x1xf32>
    %318 = vector.broadcast %317 : vector<8x1xf32> to vector<8x8xf32>
    %319 = arith.mulf %314, %318 : vector<8x8xf32>
    %320 = arith.truncf %319 : vector<8x8xf32> to vector<8x8xbf16>
    %321 = arith.truncf %302 : vector<8x4xf32> to vector<8x4xbf16>
    %cst_204 = arith.constant dense<0.000000e+00> : vector<8x4xf32>
    %322 = tpu.matmul %320, %321, %cst_204 {dimension_numbers = #tpu.dot_dimension_numbers<[1], [0], [0], [1], [0, 0, 1, 1], [], []>} : vector<8x8xbf16>, vector<8x4xbf16>, vector<8x4xf32> -> vector<8x4xf32>
    %323 = arith.truncf %322 : vector<8x4xf32> to vector<8x4xbf16>
    %c6_205 = arith.constant 6 : index
    %c0_206 = arith.constant 0 : index
    %c0_207 = arith.constant 0 : index
    %324 = vector.load %arg9[%c6_205, %c0_206, %c0_207] : memref<8x4x32xbf16, #tpu.memory_space<vmem>>, vector<1x4x32xbf16>
    %325 = vector.shape_cast %324 : vector<1x4x32xbf16> to vector<4x32xbf16>
    %cst_208 = arith.constant dense<0.000000e+00> : vector<8x32xf32>
    %326 = tpu.matmul %323, %325, %cst_208 {dimension_numbers = #tpu.dot_dimension_numbers<[1], [0], [0], [1], [0, 0, 1, 1], [], []>} : vector<8x4xbf16>, vector<4x32xbf16>, vector<8x32xf32> -> vector<8x32xf32>
    %327 = arith.addf %281, %326 : vector<8x32xf32>
    %c7 = arith.constant 7 : index
    %c0_209 = arith.constant 0 : index
    %c0_210 = arith.constant 0 : index
    %328 = vector.load %arg3[%c7, %c0_209, %c0_210] : memref<8x32x4xbf16, #tpu.memory_space<vmem>>, vector<1x32x4xbf16>
    %329 = vector.shape_cast %328 : vector<1x32x4xbf16> to vector<32x4xbf16>
    %cst_211 = arith.constant dense<0.000000e+00> : vector<8x4xf32>
    %330 = tpu.matmul %4, %329, %cst_211 {dimension_numbers = #tpu.dot_dimension_numbers<[1], [0], [0], [1], [0, 0, 1, 1], [], []>} : vector<8x32xbf16>, vector<32x4xbf16>, vector<8x4xf32> -> vector<8x4xf32>
    %c7_212 = arith.constant 7 : index
    %c0_213 = arith.constant 0 : index
    %c0_214 = arith.constant 0 : index
    %331 = vector.load %arg4[%c7_212, %c0_213, %c0_214] : memref<8x1x4xf32, #tpu.memory_space<vmem>>, vector<1x1x4xf32>
    %332 = vector.shape_cast %331 : vector<1x1x4xf32> to vector<1x4xf32>
    %333 = vector.broadcast %332 : vector<1x4xf32> to vector<8x4xf32>
    %334 = arith.addf %330, %333 : vector<8x4xf32>
    %c7_215 = arith.constant 7 : index
    %c0_216 = arith.constant 0 : index
    %c0_217 = arith.constant 0 : index
    %335 = vector.load %arg5[%c7_215, %c0_216, %c0_217] : memref<8x32x4xbf16, #tpu.memory_space<vmem>>, vector<1x32x4xbf16>
    %336 = vector.shape_cast %335 : vector<1x32x4xbf16> to vector<32x4xbf16>
    %cst_218 = arith.constant dense<0.000000e+00> : vector<8x4xf32>
    %337 = tpu.matmul %4, %336, %cst_218 {dimension_numbers = #tpu.dot_dimension_numbers<[1], [0], [0], [1], [0, 0, 1, 1], [], []>} : vector<8x32xbf16>, vector<32x4xbf16>, vector<8x4xf32> -> vector<8x4xf32>
    %c7_219 = arith.constant 7 : index
    %c0_220 = arith.constant 0 : index
    %c0_221 = arith.constant 0 : index
    %338 = vector.load %arg6[%c7_219, %c0_220, %c0_221] : memref<8x1x4xf32, #tpu.memory_space<vmem>>, vector<1x1x4xf32>
    %339 = vector.shape_cast %338 : vector<1x1x4xf32> to vector<1x4xf32>
    %340 = vector.broadcast %339 : vector<1x4xf32> to vector<8x4xf32>
    %341 = arith.addf %337, %340 : vector<8x4xf32>
    %c7_222 = arith.constant 7 : index
    %c0_223 = arith.constant 0 : index
    %c0_224 = arith.constant 0 : index
    %342 = vector.load %arg7[%c7_222, %c0_223, %c0_224] : memref<8x32x4xbf16, #tpu.memory_space<vmem>>, vector<1x32x4xbf16>
    %343 = vector.shape_cast %342 : vector<1x32x4xbf16> to vector<32x4xbf16>
    %cst_225 = arith.constant dense<0.000000e+00> : vector<8x4xf32>
    %344 = tpu.matmul %4, %343, %cst_225 {dimension_numbers = #tpu.dot_dimension_numbers<[1], [0], [0], [1], [0, 0, 1, 1], [], []>} : vector<8x32xbf16>, vector<32x4xbf16>, vector<8x4xf32> -> vector<8x4xf32>
    %c7_226 = arith.constant 7 : index
    %c0_227 = arith.constant 0 : index
    %c0_228 = arith.constant 0 : index
    %345 = vector.load %arg8[%c7_226, %c0_227, %c0_228] : memref<8x1x4xf32, #tpu.memory_space<vmem>>, vector<1x1x4xf32>
    %346 = vector.shape_cast %345 : vector<1x1x4xf32> to vector<1x4xf32>
    %347 = vector.broadcast %346 : vector<1x4xf32> to vector<8x4xf32>
    %348 = arith.addf %344, %347 : vector<8x4xf32>
    %349 = arith.truncf %334 : vector<8x4xf32> to vector<8x4xbf16>
    %350 = arith.truncf %341 : vector<8x4xf32> to vector<8x4xbf16>
    %cst_229 = arith.constant dense<0.000000e+00> : vector<8x8xf32>
    %351 = tpu.matmul %349, %350, %cst_229 {dimension_numbers = #tpu.dot_dimension_numbers<[1], [1], [0], [0], [0, 0, 1, 0], [], []>} : vector<8x4xbf16>, vector<8x4xbf16>, vector<8x8xf32> -> vector<8x8xf32>
    %cst_230 = arith.constant 5.000000e-01 : f32
    %352 = vector.broadcast %cst_230 : f32 to vector<8x8xf32>
    %353 = arith.mulf %351, %352 : vector<8x8xf32>
    %354 = vector.broadcast %3 : vector<1x8xf32> to vector<8x8xf32>
    %355 = arith.addf %353, %354 : vector<8x8xf32>
    %cst_231 = arith.constant dense<0xFF800000> : vector<8xf32>
    %356 = vector.multi_reduction <maximumf>, %355, %cst_231 [1] : vector<8x8xf32> to vector<8xf32>
    %357 = vector.shape_cast %356 : vector<8xf32> to vector<8x1xf32>
    %358 = vector.broadcast %357 : vector<8x1xf32> to vector<8x8xf32>
    %359 = arith.subf %355, %358 : vector<8x8xf32>
    %360 = math.exp %359 : vector<8x8xf32>
    %cst_232 = arith.constant dense<0.000000e+00> : vector<8xf32>
    %361 = vector.multi_reduction <add>, %360, %cst_232 [1] : vector<8x8xf32> to vector<8xf32>
    %362 = vector.shape_cast %361 : vector<8xf32> to vector<8x1xf32>
    %363 = tpu.reciprocal %362 {approx = true} : vector<8x1xf32> -> vector<8x1xf32>
    %364 = vector.broadcast %363 : vector<8x1xf32> to vector<8x8xf32>
    %365 = arith.mulf %360, %364 : vector<8x8xf32>
    %366 = arith.truncf %365 : vector<8x8xf32> to vector<8x8xbf16>
    %367 = arith.truncf %348 : vector<8x4xf32> to vector<8x4xbf16>
    %cst_233 = arith.constant dense<0.000000e+00> : vector<8x4xf32>
    %368 = tpu.matmul %366, %367, %cst_233 {dimension_numbers = #tpu.dot_dimension_numbers<[1], [0], [0], [1], [0, 0, 1, 1], [], []>} : vector<8x8xbf16>, vector<8x4xbf16>, vector<8x4xf32> -> vector<8x4xf32>
    %369 = arith.truncf %368 : vector<8x4xf32> to vector<8x4xbf16>
    %c7_234 = arith.constant 7 : index
    %c0_235 = arith.constant 0 : index
    %c0_236 = arith.constant 0 : index
    %370 = vector.load %arg9[%c7_234, %c0_235, %c0_236] : memref<8x4x32xbf16, #tpu.memory_space<vmem>>, vector<1x4x32xbf16>
    %371 = vector.shape_cast %370 : vector<1x4x32xbf16> to vector<4x32xbf16>
    %cst_237 = arith.constant dense<0.000000e+00> : vector<8x32xf32>
    %372 = tpu.matmul %369, %371, %cst_237 {dimension_numbers = #tpu.dot_dimension_numbers<[1], [0], [0], [1], [0, 0, 1, 1], [], []>} : vector<8x4xbf16>, vector<4x32xbf16>, vector<8x32xf32> -> vector<8x32xf32>
    %373 = arith.addf %327, %372 : vector<8x32xf32>
    %c0_238 = arith.constant 0 : index
    %c0_239 = arith.constant 0 : index
    %374 = vector.load %arg10[%c0_238, %c0_239] : memref<1x32xf32, #tpu.memory_space<vmem>>, vector<1x32xf32>
    %375 = vector.broadcast %374 : vector<1x32xf32> to vector<8x32xf32>
    %376 = arith.addf %373, %375 : vector<8x32xf32>
    %377 = arith.addf %376, %1 : vector<8x32xf32>
    %c0_240 = arith.constant 0 : index
    %c0_241 = arith.constant 0 : index
    %378 = vector.load %arg11[%c0_240, %c0_241] : memref<1x32xf32, #tpu.memory_space<vmem>>, vector<1x32xf32>
    %c0_242 = arith.constant 0 : index
    %c0_243 = arith.constant 0 : index
    %379 = vector.load %arg12[%c0_242, %c0_243] : memref<1x32xf32, #tpu.memory_space<vmem>>, vector<1x32xf32>
    %cst_244 = arith.constant dense<0.000000e+00> : vector<8xf32>
    %380 = vector.multi_reduction <add>, %377, %cst_244 [1] : vector<8x32xf32> to vector<8xf32>
    %381 = vector.shape_cast %380 : vector<8xf32> to vector<8x1xf32>
    %cst_245 = arith.constant 3.200000e+01 : f32
    %382 = vector.broadcast %cst_245 : f32 to vector<8x1xf32>
    %383 = arith.divf %381, %382 : vector<8x1xf32>
    %384 = vector.broadcast %383 : vector<8x1xf32> to vector<8x32xf32>
    %385 = arith.subf %377, %384 : vector<8x32xf32>
    %386 = arith.mulf %385, %385 : vector<8x32xf32>
    %cst_246 = arith.constant dense<0.000000e+00> : vector<8xf32>
    %387 = vector.multi_reduction <add>, %386, %cst_246 [1] : vector<8x32xf32> to vector<8xf32>
    %388 = vector.shape_cast %387 : vector<8xf32> to vector<8x1xf32>
    %cst_247 = arith.constant 3.200000e+01 : f32
    %389 = vector.broadcast %cst_247 : f32 to vector<8x1xf32>
    %390 = arith.divf %388, %389 : vector<8x1xf32>
    %391 = vector.broadcast %383 : vector<8x1xf32> to vector<8x32xf32>
    %392 = arith.subf %377, %391 : vector<8x32xf32>
    %cst_248 = arith.constant 9.99999974E-6 : f32
    %393 = vector.broadcast %cst_248 : f32 to vector<8x1xf32>
    %394 = arith.addf %390, %393 : vector<8x1xf32>
    %395 = math.rsqrt %394 : vector<8x1xf32>
    %396 = vector.broadcast %395 : vector<8x1xf32> to vector<8x32xf32>
    %397 = arith.mulf %392, %396 : vector<8x32xf32>
    %398 = vector.broadcast %378 : vector<1x32xf32> to vector<8x32xf32>
    %399 = arith.mulf %397, %398 : vector<8x32xf32>
    %400 = vector.broadcast %379 : vector<1x32xf32> to vector<8x32xf32>
    %401 = arith.addf %399, %400 : vector<8x32xf32>
    %402 = arith.truncf %401 : vector<8x32xf32> to vector<8x32xbf16>
    %c0_249 = arith.constant 0 : index
    %c0_250 = arith.constant 0 : index
    %403 = vector.load %arg13[%c0_249, %c0_250] : memref<32x64xbf16, #tpu.memory_space<vmem>>, vector<32x64xbf16>
    %cst_251 = arith.constant dense<0.000000e+00> : vector<8x64xf32>
    %404 = tpu.matmul %402, %403, %cst_251 {dimension_numbers = #tpu.dot_dimension_numbers<[1], [0], [0], [1], [0, 0, 1, 1], [], []>} : vector<8x32xbf16>, vector<32x64xbf16>, vector<8x64xf32> -> vector<8x64xf32>
    %c0_252 = arith.constant 0 : index
    %c0_253 = arith.constant 0 : index
    %405 = vector.load %arg14[%c0_252, %c0_253] : memref<1x64xf32, #tpu.memory_space<vmem>>, vector<1x64xf32>
    %406 = vector.broadcast %405 : vector<1x64xf32> to vector<8x64xf32>
    %407 = arith.addf %404, %406 : vector<8x64xf32>
    %cst_254 = arith.constant 0.000000e+00 : f32
    %408 = vector.broadcast %cst_254 : f32 to vector<8x64xf32>
    %409 = arith.maximumf %407, %408 : vector<8x64xf32>
    %410 = arith.truncf %409 : vector<8x64xf32> to vector<8x64xbf16>
    %c0_255 = arith.constant 0 : index
    %c0_256 = arith.constant 0 : index
    %411 = vector.load %arg15[%c0_255, %c0_256] : memref<64x32xbf16, #tpu.memory_space<vmem>>, vector<64x32xbf16>
    %cst_257 = arith.constant dense<0.000000e+00> : vector<8x32xf32>
    %412 = tpu.matmul %410, %411, %cst_257 {dimension_numbers = #tpu.dot_dimension_numbers<[1], [0], [0], [1], [0, 0, 1, 1], [], []>} : vector<8x64xbf16>, vector<64x32xbf16>, vector<8x32xf32> -> vector<8x32xf32>
    %c0_258 = arith.constant 0 : index
    %c0_259 = arith.constant 0 : index
    %413 = vector.load %arg16[%c0_258, %c0_259] : memref<1x32xf32, #tpu.memory_space<vmem>>, vector<1x32xf32>
    %414 = vector.broadcast %413 : vector<1x32xf32> to vector<8x32xf32>
    %415 = arith.addf %412, %414 : vector<8x32xf32>
    %416 = arith.addf %415, %401 : vector<8x32xf32>
    %c0_260 = arith.constant 0 : index
    %c0_261 = arith.constant 0 : index
    %417 = vector.load %arg17[%c0_260, %c0_261] : memref<1x32xf32, #tpu.memory_space<vmem>>, vector<1x32xf32>
    %c0_262 = arith.constant 0 : index
    %c0_263 = arith.constant 0 : index
    %418 = vector.load %arg18[%c0_262, %c0_263] : memref<1x32xf32, #tpu.memory_space<vmem>>, vector<1x32xf32>
    %cst_264 = arith.constant dense<0.000000e+00> : vector<8xf32>
    %419 = vector.multi_reduction <add>, %416, %cst_264 [1] : vector<8x32xf32> to vector<8xf32>
    %420 = vector.shape_cast %419 : vector<8xf32> to vector<8x1xf32>
    %cst_265 = arith.constant 3.200000e+01 : f32
    %421 = vector.broadcast %cst_265 : f32 to vector<8x1xf32>
    %422 = arith.divf %420, %421 : vector<8x1xf32>
    %423 = vector.broadcast %422 : vector<8x1xf32> to vector<8x32xf32>
    %424 = arith.subf %416, %423 : vector<8x32xf32>
    %425 = arith.mulf %424, %424 : vector<8x32xf32>
    %cst_266 = arith.constant dense<0.000000e+00> : vector<8xf32>
    %426 = vector.multi_reduction <add>, %425, %cst_266 [1] : vector<8x32xf32> to vector<8xf32>
    %427 = vector.shape_cast %426 : vector<8xf32> to vector<8x1xf32>
    %cst_267 = arith.constant 3.200000e+01 : f32
    %428 = vector.broadcast %cst_267 : f32 to vector<8x1xf32>
    %429 = arith.divf %427, %428 : vector<8x1xf32>
    %430 = vector.broadcast %422 : vector<8x1xf32> to vector<8x32xf32>
    %431 = arith.subf %416, %430 : vector<8x32xf32>
    %cst_268 = arith.constant 9.99999974E-6 : f32
    %432 = vector.broadcast %cst_268 : f32 to vector<8x1xf32>
    %433 = arith.addf %429, %432 : vector<8x1xf32>
    %434 = math.rsqrt %433 : vector<8x1xf32>
    %435 = vector.broadcast %434 : vector<8x1xf32> to vector<8x32xf32>
    %436 = arith.mulf %431, %435 : vector<8x32xf32>
    %437 = vector.broadcast %417 : vector<1x32xf32> to vector<8x32xf32>
    %438 = arith.mulf %436, %437 : vector<8x32xf32>
    %439 = vector.broadcast %418 : vector<1x32xf32> to vector<8x32xf32>
    %440 = arith.addf %438, %439 : vector<8x32xf32>
    %c0_269 = arith.constant 0 : index
    %c0_270 = arith.constant 0 : index
    %c0_271 = arith.constant 0 : index
    %441 = vector.load %arg19[%c0_269, %c0_270, %c0_271] : memref<1x8x32xf32, #tpu.memory_space<vmem>>, vector<1x8x32xf32>
    %442 = vector.shape_cast %441 : vector<1x8x32xf32> to vector<8x32xf32>
    %443 = vector.shape_cast %440 : vector<8x32xf32> to vector<1x8x32xf32>
    tpu.vector_store %arg19[%c0_269, %c0_270, %c0_271], %443 {strides = array<i32>} : memref<1x8x32xf32, #tpu.memory_space<vmem>>, vector<1x8x32xf32>,
    return
  }
  func.func @transform_0(%arg0: i32) -> (i32, i32, i32) {
    %c0_i32 = arith.constant 0 : i32
    %c0_i32_0 = arith.constant 0 : i32
    %c0_i32_1 = arith.constant 0 : i32
    return %arg0, %c0_i32, %c0_i32_0 : i32, i32, i32
  }
  func.func @transform_1(%arg0: i32) -> (i32, i32, i32) {
    %c0_i32 = arith.constant 0 : i32
    %c0_i32_0 = arith.constant 0 : i32
    %c0_i32_1 = arith.constant 0 : i32
    return %arg0, %c0_i32, %c0_i32_0 : i32, i32, i32
  }
  func.func @transform_2(%arg0: i32) -> (i32, i32, i32) {
    %c0_i32 = arith.constant 0 : i32
    %c0_i32_0 = arith.constant 0 : i32
    %c0_i32_1 = arith.constant 0 : i32
    %c0_i32_2 = arith.constant 0 : i32
    return %c0_i32, %c0_i32_0, %c0_i32_1 : i32, i32, i32
  }
  func.func @transform_3(%arg0: i32) -> (i32, i32, i32) {
    %c0_i32 = arith.constant 0 : i32
    %c0_i32_0 = arith.constant 0 : i32
    %c0_i32_1 = arith.constant 0 : i32
    %c0_i32_2 = arith.constant 0 : i32
    return %c0_i32, %c0_i32_0, %c0_i32_1 : i32, i32, i32
  }
  func.func @transform_4(%arg0: i32) -> (i32, i32, i32) {
    %c0_i32 = arith.constant 0 : i32
    %c0_i32_0 = arith.constant 0 : i32
    %c0_i32_1 = arith.constant 0 : i32
    %c0_i32_2 = arith.constant 0 : i32
    return %c0_i32, %c0_i32_0, %c0_i32_1 : i32, i32, i32
  }
  func.func @transform_5(%arg0: i32) -> (i32, i32, i32) {
    %c0_i32 = arith.constant 0 : i32
    %c0_i32_0 = arith.constant 0 : i32
    %c0_i32_1 = arith.constant 0 : i32
    %c0_i32_2 = arith.constant 0 : i32
    return %c0_i32, %c0_i32_0, %c0_i32_1 : i32, i32, i32
  }
  func.func @transform_6(%arg0: i32) -> (i32, i32, i32) {
    %c0_i32 = arith.constant 0 : i32
    %c0_i32_0 = arith.constant 0 : i32
    %c0_i32_1 = arith.constant 0 : i32
    %c0_i32_2 = arith.constant 0 : i32
    return %c0_i32, %c0_i32_0, %c0_i32_1 : i32, i32, i32
  }
  func.func @transform_7(%arg0: i32) -> (i32, i32, i32) {
    %c0_i32 = arith.constant 0 : i32
    %c0_i32_0 = arith.constant 0 : i32
    %c0_i32_1 = arith.constant 0 : i32
    %c0_i32_2 = arith.constant 0 : i32
    return %c0_i32, %c0_i32_0, %c0_i32_1 : i32, i32, i32
  }
  func.func @transform_8(%arg0: i32) -> (i32, i32, i32) {
    %c0_i32 = arith.constant 0 : i32
    %c0_i32_0 = arith.constant 0 : i32
    %c0_i32_1 = arith.constant 0 : i32
    %c0_i32_2 = arith.constant 0 : i32
    return %c0_i32, %c0_i32_0, %c0_i32_1 : i32, i32, i32
  }
  func.func @transform_9(%arg0: i32) -> (i32, i32) {
    %c0_i32 = arith.constant 0 : i32
    %c0_i32_0 = arith.constant 0 : i32
    %c0_i32_1 = arith.constant 0 : i32
    return %c0_i32, %c0_i32_0 : i32, i32
  }
  func.func @transform_10(%arg0: i32) -> (i32, i32) {
    %c0_i32 = arith.constant 0 : i32
    %c0_i32_0 = arith.constant 0 : i32
    %c0_i32_1 = arith.constant 0 : i32
    return %c0_i32, %c0_i32_0 : i32, i32
  }
  func.func @transform_11(%arg0: i32) -> (i32, i32) {
    %c0_i32 = arith.constant 0 : i32
    %c0_i32_0 = arith.constant 0 : i32
    %c0_i32_1 = arith.constant 0 : i32
    return %c0_i32, %c0_i32_0 : i32, i32
  }
  func.func @transform_12(%arg0: i32) -> (i32, i32) {
    %c0_i32 = arith.constant 0 : i32
    %c0_i32_0 = arith.constant 0 : i32
    %c0_i32_1 = arith.constant 0 : i32
    return %c0_i32, %c0_i32_0 : i32, i32
  }
  func.func @transform_13(%arg0: i32) -> (i32, i32) {
    %c0_i32 = arith.constant 0 : i32
    %c0_i32_0 = arith.constant 0 : i32
    %c0_i32_1 = arith.constant 0 : i32
    return %c0_i32, %c0_i32_0 : i32, i32
  }
  func.func @transform_14(%arg0: i32) -> (i32, i32) {
    %c0_i32 = arith.constant 0 : i32
    %c0_i32_0 = arith.constant 0 : i32
    %c0_i32_1 = arith.constant 0 : i32
    return %c0_i32, %c0_i32_0 : i32, i32
  }
  func.func @transform_15(%arg0: i32) -> (i32, i32) {
    %c0_i32 = arith.constant 0 : i32
    %c0_i32_0 = arith.constant 0 : i32
    %c0_i32_1 = arith.constant 0 : i32
    return %c0_i32, %c0_i32_0 : i32, i32
  }
  func.func @transform_16(%arg0: i32) -> (i32, i32) {
    %c0_i32 = arith.constant 0 : i32
    %c0_i32_0 = arith.constant 0 : i32
    %c0_i32_1 = arith.constant 0 : i32
    return %c0_i32, %c0_i32_0 : i32, i32
  }
  func.func @transform_17(%arg0: i32) -> (i32, i32) {
    %c0_i32 = arith.constant 0 : i32
    %c0_i32_0 = arith.constant 0 : i32
    %c0_i32_1 = arith.constant 0 : i32
    return %c0_i32, %c0_i32_0 : i32, i32
  }
  func.func @transform_18(%arg0: i32) -> (i32, i32, i32) {
    %c0_i32 = arith.constant 0 : i32
    %c0_i32_0 = arith.constant 0 : i32
    %c0_i32_1 = arith.constant 0 : i32
    return %arg0, %c0_i32, %c0_i32_0 : i32, i32, i32
  }
}

module attributes {stable_mosaic.version = 11 : i64} {
  func.func @_encoder_layer_kernel(%arg0: i32, %arg1: memref<1x8x32xf32, #tpu.memory_space<vmem>>, %arg2: memref<1x1x8xf32, #tpu.memory_space<vmem>>, %arg3: memref<8x32x4xbf16, #tpu.memory_space<vmem>>, %arg4: memref<8x1x4xf32, #tpu.memory_space<vmem>>, %arg5: memref<8x32x4xbf16, #tpu.memory_space<vmem>>, %arg6: memref<8x1x4xf32, #tpu.memory_space<vmem>>, %arg7: memref<8x32x4xbf16, #tpu.memory_space<vmem>>, %arg8: memref<8x1x4xf32, #tpu.memory_space<vmem>>, %arg9: memref<8x4x32xbf16, #tpu.memory_space<vmem>>, %arg10: memref<1x32xf32, #tpu.memory_space<vmem>>, %arg11: memref<1x32xf32, #tpu.memory_space<vmem>>, %arg12: memref<1x32xf32, #tpu.memory_space<vmem>>, %arg13: memref<32x64xbf16, #tpu.memory_space<vmem>>, %arg14: memref<1x64xf32, #tpu.memory_space<vmem>>, %arg15: memref<64x32xbf16, #tpu.memory_space<vmem>>, %arg16: memref<1x32xf32, #tpu.memory_space<vmem>>, %arg17: memref<1x32xf32, #tpu.memory_space<vmem>>, %arg18: memref<1x32xf32, #tpu.memory_space<vmem>>, %arg19: memref<1x8x32xf32, #tpu.memory_space<vmem>>) attributes {dimension_semantics = [#tpu.dimension_semantics<parallel>], iteration_bounds = array<i64: 2>, scalar_prefetch = 0 : i64, scratch_operands = 0 : i64, tpu.core_type = #tpu.core_type<tc>, window_params = [{transform_indices = @transform_0, window_bounds = array<i64: 1, 8, 32>}, {transform_indices = @transform_1, window_bounds = array<i64: 1, 1, 8>}, {pipeline_mode = #tpu.pipeline_mode<synchronous>, transform_indices = @transform_2, window_bounds = array<i64: 8, 32, 4>}, {pipeline_mode = #tpu.pipeline_mode<synchronous>, transform_indices = @transform_3, window_bounds = array<i64: 8, 1, 4>}, {pipeline_mode = #tpu.pipeline_mode<synchronous>, transform_indices = @transform_4, window_bounds = array<i64: 8, 32, 4>}, {pipeline_mode = #tpu.pipeline_mode<synchronous>, transform_indices = @transform_5, window_bounds = array<i64: 8, 1, 4>}, {pipeline_mode = #tpu.pipeline_mode<synchronous>, transform_indices = @transform_6, window_bounds = array<i64: 8, 32, 4>}, {pipeline_mode = #tpu.pipeline_mode<synchronous>, transform_indices = @transform_7, window_bounds = array<i64: 8, 1, 4>}, {pipeline_mode = #tpu.pipeline_mode<synchronous>, transform_indices = @transform_8, window_bounds = array<i64: 8, 4, 32>}, {pipeline_mode = #tpu.pipeline_mode<synchronous>, transform_indices = @transform_9, window_bounds = array<i64: 1, 32>}, {pipeline_mode = #tpu.pipeline_mode<synchronous>, transform_indices = @transform_10, window_bounds = array<i64: 1, 32>}, {pipeline_mode = #tpu.pipeline_mode<synchronous>, transform_indices = @transform_11, window_bounds = array<i64: 1, 32>}, {pipeline_mode = #tpu.pipeline_mode<synchronous>, transform_indices = @transform_12, window_bounds = array<i64: 32, 64>}, {pipeline_mode = #tpu.pipeline_mode<synchronous>, transform_indices = @transform_13, window_bounds = array<i64: 1, 64>}, {pipeline_mode = #tpu.pipeline_mode<synchronous>, transform_indices = @transform_14, window_bounds = array<i64: 64, 32>}, {pipeline_mode = #tpu.pipeline_mode<synchronous>, transform_indices = @transform_15, window_bounds = array<i64: 1, 32>}, {pipeline_mode = #tpu.pipeline_mode<synchronous>, transform_indices = @transform_16, window_bounds = array<i64: 1, 32>}, {pipeline_mode = #tpu.pipeline_mode<synchronous>, transform_indices = @transform_17, window_bounds = array<i64: 1, 32>}, {transform_indices = @transform_18, window_bounds = array<i64: 1, 8, 32>}]} {
    %c0 = arith.constant 0 : index
    %c0_0 = arith.constant 0 : index
    %c0_1 = arith.constant 0 : index
    %0 = vector.load %arg1[%c0, %c0_0, %c0_1] : memref<1x8x32xf32, #tpu.memory_space<vmem>>, vector<1x8x32xf32>
    %1 = vector.shape_cast %0 : vector<1x8x32xf32> to vector<8x32xf32>
    %c0_2 = arith.constant 0 : index
    %c0_3 = arith.constant 0 : index
    %c0_4 = arith.constant 0 : index
    %2 = vector.load %arg2[%c0_2, %c0_3, %c0_4] : memref<1x1x8xf32, #tpu.memory_space<vmem>>, vector<1x1x8xf32>
    %3 = vector.shape_cast %2 : vector<1x1x8xf32> to vector<1x8xf32>
    %4 = arith.truncf %1 : vector<8x32xf32> to vector<8x32xbf16>
    %cst = arith.constant 0.000000e+00 : f32
    %5 = vector.broadcast %cst : f32 to vector<8x32xf32>
    %c0_5 = arith.constant 0 : index
    %c0_6 = arith.constant 0 : index
    %c0_7 = arith.constant 0 : index
    %6 = vector.load %arg3[%c0_5, %c0_6, %c0_7] : memref<8x32x4xbf16, #tpu.memory_space<vmem>>, vector<1x32x4xbf16>
    %7 = vector.shape_cast %6 : vector<1x32x4xbf16> to vector<32x4xbf16>
    %cst_8 = arith.constant dense<0.000000e+00> : vector<8x4xf32>
    %8 = tpu.matmul %4, %7, %cst_8 {dimension_numbers = #tpu.dot_dimension_numbers<[1], [0], [0], [1], [0, 0, 1, 1], [], []>} : vector<8x32xbf16>, vector<32x4xbf16>, vector<8x4xf32> -> vector<8x4xf32>
    %c0_9 = arith.constant 0 : index
    %c0_10 = arith.constant 0 : index
    %c0_11 = arith.constant 0 : index
    %9 = vector.load %arg4[%c0_9, %c0_10, %c0_11] : memref<8x1x4xf32, #tpu.memory_space<vmem>>, vector<1x1x4xf32>
    %10 = vector.shape_cast %9 : vector<1x1x4xf32> to vector<1x4xf32>
    %11 = vector.broadcast %10 : vector<1x4xf32> to vector<8x4xf32>
    %12 = arith.addf %8, %11 : vector<8x4xf32>
    %c0_12 = arith.constant 0 : index
    %c0_13 = arith.constant 0 : index
    %c0_14 = arith.constant 0 : index
    %13 = vector.load %arg5[%c0_12, %c0_13, %c0_14] : memref<8x32x4xbf16, #tpu.memory_space<vmem>>, vector<1x32x4xbf16>
    %14 = vector.shape_cast %13 : vector<1x32x4xbf16> to vector<32x4xbf16>
    %cst_15 = arith.constant dense<0.000000e+00> : vector<8x4xf32>
    %15 = tpu.matmul %4, %14, %cst_15 {dimension_numbers = #tpu.dot_dimension_numbers<[1], [0], [0], [1], [0, 0, 1, 1], [], []>} : vector<8x32xbf16>, vector<32x4xbf16>, vector<8x4xf32> -> vector<8x4xf32>
    %c0_16 = arith.constant 0 : index
    %c0_17 = arith.constant 0 : index
    %c0_18 = arith.constant 0 : index
    %16 = vector.load %arg6[%c0_16, %c0_17, %c0_18] : memref<8x1x4xf32, #tpu.memory_space<vmem>>, vector<1x1x4xf32>
    %17 = vector.shape_cast %16 : vector<1x1x4xf32> to vector<1x4xf32>
    %18 = vector.broadcast %17 : vector<1x4xf32> to vector<8x4xf32>
    %19 = arith.addf %15, %18 : vector<8x4xf32>
    %c0_19 = arith.constant 0 : index
    %c0_20 = arith.constant 0 : index
    %c0_21 = arith.constant 0 : index
    %20 = vector.load %arg7[%c0_19, %c0_20, %c0_21] : memref<8x32x4xbf16, #tpu.memory_space<vmem>>, vector<1x32x4xbf16>
    %21 = vector.shape_cast %20 : vector<1x32x4xbf16> to vector<32x4xbf16>
    %cst_22 = arith.constant dense<0.000000e+00> : vector<8x4xf32>
    %22 = tpu.matmul %4, %21, %cst_22 {dimension_numbers = #tpu.dot_dimension_numbers<[1], [0], [0], [1], [0, 0, 1, 1], [], []>} : vector<8x32xbf16>, vector<32x4xbf16>, vector<8x4xf32> -> vector<8x4xf32>
    %c0_23 = arith.constant 0 : index
    %c0_24 = arith.constant 0 : index
    %c0_25 = arith.constant 0 : index
    %23 = vector.load %arg8[%c0_23, %c0_24, %c0_25] : memref<8x1x4xf32, #tpu.memory_space<vmem>>, vector<1x1x4xf32>
    %24 = vector.shape_cast %23 : vector<1x1x4xf32> to vector<1x4xf32>
    %25 = vector.broadcast %24 : vector<1x4xf32> to vector<8x4xf32>
    %26 = arith.addf %22, %25 : vector<8x4xf32>
    %27 = arith.truncf %12 : vector<8x4xf32> to vector<8x4xbf16>
    %28 = arith.truncf %19 : vector<8x4xf32> to vector<8x4xbf16>
    %cst_26 = arith.constant dense<0.000000e+00> : vector<8x8xf32>
    %29 = tpu.matmul %27, %28, %cst_26 {dimension_numbers = #tpu.dot_dimension_numbers<[1], [1], [0], [0], [0, 0, 1, 0], [], []>} : vector<8x4xbf16>, vector<8x4xbf16>, vector<8x8xf32> -> vector<8x8xf32>
    %cst_27 = arith.constant 5.000000e-01 : f32
    %30 = vector.broadcast %cst_27 : f32 to vector<8x8xf32>
    %31 = arith.mulf %29, %30 : vector<8x8xf32>
    %32 = vector.broadcast %3 : vector<1x8xf32> to vector<8x8xf32>
    %33 = arith.addf %31, %32 : vector<8x8xf32>
    %cst_28 = arith.constant dense<0xFF800000> : vector<8xf32>
    %34 = vector.multi_reduction <maximumf>, %33, %cst_28 [1] : vector<8x8xf32> to vector<8xf32>
    %35 = vector.shape_cast %34 : vector<8xf32> to vector<8x1xf32>
    %36 = vector.broadcast %35 : vector<8x1xf32> to vector<8x8xf32>
    %37 = arith.subf %33, %36 : vector<8x8xf32>
    %38 = math.exp %37 : vector<8x8xf32>
    %cst_29 = arith.constant dense<0.000000e+00> : vector<8xf32>
    %39 = vector.multi_reduction <add>, %38, %cst_29 [1] : vector<8x8xf32> to vector<8xf32>
    %40 = vector.shape_cast %39 : vector<8xf32> to vector<8x1xf32>
    %41 = tpu.reciprocal %40 {approx = true} : vector<8x1xf32> -> vector<8x1xf32>
    %42 = vector.broadcast %41 : vector<8x1xf32> to vector<8x8xf32>
    %43 = arith.mulf %38, %42 : vector<8x8xf32>
    %44 = arith.truncf %43 : vector<8x8xf32> to vector<8x8xbf16>
    %45 = arith.truncf %26 : vector<8x4xf32> to vector<8x4xbf16>
    %cst_30 = arith.constant dense<0.000000e+00> : vector<8x4xf32>
    %46 = tpu.matmul %44, %45, %cst_30 {dimension_numbers = #tpu.dot_dimension_numbers<[1], [0], [0], [1], [0, 0, 1, 1], [], []>} : vector<8x8xbf16>, vector<8x4xbf16>, vector<8x4xf32> -> vector<8x4xf32>
    %47 = arith.truncf %46 : vector<8x4xf32> to vector<8x4xbf16>
    %c0_31 = arith.constant 0 : index
    %c0_32 = arith.constant 0 : index
    %c0_33 = arith.constant 0 : index
    %48 = vector.load %arg9[%c0_31, %c0_32, %c0_33] : memref<8x4x32xbf16, #tpu.memory_space<vmem>>, vector<1x4x32xbf16>
    %49 = vector.shape_cast %48 : vector<1x4x32xbf16> to vector<4x32xbf16>
    %cst_34 = arith.constant dense<0.000000e+00> : vector<8x32xf32>
    %50 = tpu.matmul %47, %49, %cst_34 {dimension_numbers = #tpu.dot_dimension_numbers<[1], [0], [0], [1], [0, 0, 1, 1], [], []>} : vector<8x4xbf16>, vector<4x32xbf16>, vector<8x32xf32> -> vector<8x32xf32>
    %51 = arith.addf %5, %50 : vector<8x32xf32>
    %c1 = arith.constant 1 : index
    %c0_35 = arith.constant 0 : index
    %c0_36 = arith.constant 0 : index
    %52 = vector.load %arg3[%c1, %c0_35, %c0_36] : memref<8x32x4xbf16, #tpu.memory_space<vmem>>, vector<1x32x4xbf16>
    %53 = vector.shape_cast %52 : vector<1x32x4xbf16> to vector<32x4xbf16>
    %cst_37 = arith.constant dense<0.000000e+00> : vector<8x4xf32>
    %54 = tpu.matmul %4, %53, %cst_37 {dimension_numbers = #tpu.dot_dimension_numbers<[1], [0], [0], [1], [0, 0, 1, 1], [], []>} : vector<8x32xbf16>, vector<32x4xbf16>, vector<8x4xf32> -> vector<8x4xf32>
    %c1_38 = arith.constant 1 : index
    %c0_39 = arith.constant 0 : index
    %c0_40 = arith.constant 0 : index
    %55 = vector.load %arg4[%c1_38, %c0_39, %c0_40] : memref<8x1x4xf32, #tpu.memory_space<vmem>>, vector<1x1x4xf32>
    %56 = vector.shape_cast %55 : vector<1x1x4xf32> to vector<1x4xf32>
    %57 = vector.broadcast %56 : vector<1x4xf32> to vector<8x4xf32>
    %58 = arith.addf %54, %57 : vector<8x4xf32>
    %c1_41 = arith.constant 1 : index
    %c0_42 = arith.constant 0 : index
    %c0_43 = arith.constant 0 : index
    %59 = vector.load %arg5[%c1_41, %c0_42, %c0_43] : memref<8x32x4xbf16, #tpu.memory_space<vmem>>, vector<1x32x4xbf16>
    %60 = vector.shape_cast %59 : vector<1x32x4xbf16> to vector<32x4xbf16>
    %cst_44 = arith.constant dense<0.000000e+00> : vector<8x4xf32>
    %61 = tpu.matmul %4, %60, %cst_44 {dimension_numbers = #tpu.dot_dimension_numbers<[1], [0], [0], [1], [0, 0, 1, 1], [], []>} : vector<8x32xbf16>, vector<32x4xbf16>, vector<8x4xf32> -> vector<8x4xf32>
    %c1_45 = arith.constant 1 : index
    %c0_46 = arith.constant 0 : index
    %c0_47 = arith.constant 0 : index
    %62 = vector.load %arg6[%c1_45, %c0_46, %c0_47] : memref<8x1x4xf32, #tpu.memory_space<vmem>>, vector<1x1x4xf32>
    %63 = vector.shape_cast %62 : vector<1x1x4xf32> to vector<1x4xf32>
    %64 = vector.broadcast %63 : vector<1x4xf32> to vector<8x4xf32>
    %65 = arith.addf %61, %64 : vector<8x4xf32>
    %c1_48 = arith.constant 1 : index
    %c0_49 = arith.constant 0 : index
    %c0_50 = arith.constant 0 : index
    %66 = vector.load %arg7[%c1_48, %c0_49, %c0_50] : memref<8x32x4xbf16, #tpu.memory_space<vmem>>, vector<1x32x4xbf16>
    %67 = vector.shape_cast %66 : vector<1x32x4xbf16> to vector<32x4xbf16>
    %cst_51 = arith.constant dense<0.000000e+00> : vector<8x4xf32>
    %68 = tpu.matmul %4, %67, %cst_51 {dimension_numbers = #tpu.dot_dimension_numbers<[1], [0], [0], [1], [0, 0, 1, 1], [], []>} : vector<8x32xbf16>, vector<32x4xbf16>, vector<8x4xf32> -> vector<8x4xf32>
    %c1_52 = arith.constant 1 : index
    %c0_53 = arith.constant 0 : index
    %c0_54 = arith.constant 0 : index
    %69 = vector.load %arg8[%c1_52, %c0_53, %c0_54] : memref<8x1x4xf32, #tpu.memory_space<vmem>>, vector<1x1x4xf32>
    %70 = vector.shape_cast %69 : vector<1x1x4xf32> to vector<1x4xf32>
    %71 = vector.broadcast %70 : vector<1x4xf32> to vector<8x4xf32>
    %72 = arith.addf %68, %71 : vector<8x4xf32>
    %73 = arith.truncf %58 : vector<8x4xf32> to vector<8x4xbf16>
    %74 = arith.truncf %65 : vector<8x4xf32> to vector<8x4xbf16>
    %cst_55 = arith.constant dense<0.000000e+00> : vector<8x8xf32>
    %75 = tpu.matmul %73, %74, %cst_55 {dimension_numbers = #tpu.dot_dimension_numbers<[1], [1], [0], [0], [0, 0, 1, 0], [], []>} : vector<8x4xbf16>, vector<8x4xbf16>, vector<8x8xf32> -> vector<8x8xf32>
    %cst_56 = arith.constant 5.000000e-01 : f32
    %76 = vector.broadcast %cst_56 : f32 to vector<8x8xf32>
    %77 = arith.mulf %75, %76 : vector<8x8xf32>
    %78 = vector.broadcast %3 : vector<1x8xf32> to vector<8x8xf32>
    %79 = arith.addf %77, %78 : vector<8x8xf32>
    %cst_57 = arith.constant dense<0xFF800000> : vector<8xf32>
    %80 = vector.multi_reduction <maximumf>, %79, %cst_57 [1] : vector<8x8xf32> to vector<8xf32>
    %81 = vector.shape_cast %80 : vector<8xf32> to vector<8x1xf32>
    %82 = vector.broadcast %81 : vector<8x1xf32> to vector<8x8xf32>
    %83 = arith.subf %79, %82 : vector<8x8xf32>
    %84 = math.exp %83 : vector<8x8xf32>
    %cst_58 = arith.constant dense<0.000000e+00> : vector<8xf32>
    %85 = vector.multi_reduction <add>, %84, %cst_58 [1] : vector<8x8xf32> to vector<8xf32>
    %86 = vector.shape_cast %85 : vector<8xf32> to vector<8x1xf32>
    %87 = tpu.reciprocal %86 {approx = true} : vector<8x1xf32> -> vector<8x1xf32>
    %88 = vector.broadcast %87 : vector<8x1xf32> to vector<8x8xf32>
    %89 = arith.mulf %84, %88 : vector<8x8xf32>
    %90 = arith.truncf %89 : vector<8x8xf32> to vector<8x8xbf16>
    %91 = arith.truncf %72 : vector<8x4xf32> to vector<8x4xbf16>
    %cst_59 = arith.constant dense<0.000000e+00> : vector<8x4xf32>
    %92 = tpu.matmul %90, %91, %cst_59 {dimension_numbers = #tpu.dot_dimension_numbers<[1], [0], [0], [1], [0, 0, 1, 1], [], []>} : vector<8x8xbf16>, vector<8x4xbf16>, vector<8x4xf32> -> vector<8x4xf32>
    %93 = arith.truncf %92 : vector<8x4xf32> to vector<8x4xbf16>
    %c1_60 = arith.constant 1 : index
    %c0_61 = arith.constant 0 : index
    %c0_62 = arith.constant 0 : index
    %94 = vector.load %arg9[%c1_60, %c0_61, %c0_62] : memref<8x4x32xbf16, #tpu.memory_space<vmem>>, vector<1x4x32xbf16>
    %95 = vector.shape_cast %94 : vector<1x4x32xbf16> to vector<4x32xbf16>
    %cst_63 = arith.constant dense<0.000000e+00> : vector<8x32xf32>
    %96 = tpu.matmul %93, %95, %cst_63 {dimension_numbers = #tpu.dot_dimension_numbers<[1], [0], [0], [1], [0, 0, 1, 1], [], []>} : vector<8x4xbf16>, vector<4x32xbf16>, vector<8x32xf32> -> vector<8x32xf32>
    %97 = arith.addf %51, %96 : vector<8x32xf32>
    %c2 = arith.constant 2 : index
    %c0_64 = arith.constant 0 : index
    %c0_65 = arith.constant 0 : index
    %98 = vector.load %arg3[%c2, %c0_64, %c0_65] : memref<8x32x4xbf16, #tpu.memory_space<vmem>>, vector<1x32x4xbf16>
    %99 = vector.shape_cast %98 : vector<1x32x4xbf16> to vector<32x4xbf16>
    %cst_66 = arith.constant dense<0.000000e+00> : vector<8x4xf32>
    %100 = tpu.matmul %4, %99, %cst_66 {dimension_numbers = #tpu.dot_dimension_numbers<[1], [0], [0], [1], [0, 0, 1, 1], [], []>} : vector<8x32xbf16>, vector<32x4xbf16>, vector<8x4xf32> -> vector<8x4xf32>
    %c2_67 = arith.constant 2 : index
    %c0_68 = arith.constant 0 : index
    %c0_69 = arith.constant 0 : index
    %101 = vector.load %arg4[%c2_67, %c0_68, %c0_69] : memref<8x1x4xf32, #tpu.memory_space<vmem>>, vector<1x1x4xf32>
    %102 = vector.shape_cast %101 : vector<1x1x4xf32> to vector<1x4xf32>
    %103 = vector.broadcast %102 : vector<1x4xf32> to vector<8x4xf32>
    %104 = arith.addf %100, %103 : vector<8x4xf32>
    %c2_70 = arith.constant 2 : index
    %c0_71 = arith.constant 0 : index
    %c0_72 = arith.constant 0 : index
    %105 = vector.load %arg5[%c2_70, %c0_71, %c0_72] : memref<8x32x4xbf16, #tpu.memory_space<vmem>>, vector<1x32x4xbf16>
    %106 = vector.shape_cast %105 : vector<1x32x4xbf16> to vector<32x4xbf16>
    %cst_73 = arith.constant dense<0.000000e+00> : vector<8x4xf32>
    %107 = tpu.matmul %4, %106, %cst_73 {dimension_numbers = #tpu.dot_dimension_numbers<[1], [0], [0], [1], [0, 0, 1, 1], [], []>} : vector<8x32xbf16>, vector<32x4xbf16>, vector<8x4xf32> -> vector<8x4xf32>
    %c2_74 = arith.constant 2 : index
    %c0_75 = arith.constant 0 : index
    %c0_76 = arith.constant 0 : index
    %108 = vector.load %arg6[%c2_74, %c0_75, %c0_76] : memref<8x1x4xf32, #tpu.memory_space<vmem>>, vector<1x1x4xf32>
    %109 = vector.shape_cast %108 : vector<1x1x4xf32> to vector<1x4xf32>
    %110 = vector.broadcast %109 : vector<1x4xf32> to vector<8x4xf32>
    %111 = arith.addf %107, %110 : vector<8x4xf32>
    %c2_77 = arith.constant 2 : index
    %c0_78 = arith.constant 0 : index
    %c0_79 = arith.constant 0 : index
    %112 = vector.load %arg7[%c2_77, %c0_78, %c0_79] : memref<8x32x4xbf16, #tpu.memory_space<vmem>>, vector<1x32x4xbf16>
    %113 = vector.shape_cast %112 : vector<1x32x4xbf16> to vector<32x4xbf16>
    %cst_80 = arith.constant dense<0.000000e+00> : vector<8x4xf32>
    %114 = tpu.matmul %4, %113, %cst_80 {dimension_numbers = #tpu.dot_dimension_numbers<[1], [0], [0], [1], [0, 0, 1, 1], [], []>} : vector<8x32xbf16>, vector<32x4xbf16>, vector<8x4xf32> -> vector<8x4xf32>
    %c2_81 = arith.constant 2 : index
    %c0_82 = arith.constant 0 : index
    %c0_83 = arith.constant 0 : index
    %115 = vector.load %arg8[%c2_81, %c0_82, %c0_83] : memref<8x1x4xf32, #tpu.memory_space<vmem>>, vector<1x1x4xf32>
    %116 = vector.shape_cast %115 : vector<1x1x4xf32> to vector<1x4xf32>
    %117 = vector.broadcast %116 : vector<1x4xf32> to vector<8x4xf32>
    %118 = arith.addf %114, %117 : vector<8x4xf32>
    %119 = arith.truncf %104 : vector<8x4xf32> to vector<8x4xbf16>
    %120 = arith.truncf %111 : vector<8x4xf32> to vector<8x4xbf16>
    %cst_84 = arith.constant dense<0.000000e+00> : vector<8x8xf32>
    %121 = tpu.matmul %119, %120, %cst_84 {dimension_numbers = #tpu.dot_dimension_numbers<[1], [1], [0], [0], [0, 0, 1, 0], [], []>} : vector<8x4xbf16>, vector<8x4xbf16>, vector<8x8xf32> -> vector<8x8xf32>
    %cst_85 = arith.constant 5.000000e-01 : f32
    %122 = vector.broadcast %cst_85 : f32 to vector<8x8xf32>
    %123 = arith.mulf %121, %122 : vector<8x8xf32>
    %124 = vector.broadcast %3 : vector<1x8xf32> to vector<8x8xf32>
    %125 = arith.addf %123, %124 : vector<8x8xf32>
    %cst_86 = arith.constant dense<0xFF800000> : vector<8xf32>
    %126 = vector.multi_reduction <maximumf>, %125, %cst_86 [1] : vector<8x8xf32> to vector<8xf32>
    %127 = vector.shape_cast %126 : vector<8xf32> to vector<8x1xf32>
    %128 = vector.broadcast %127 : vector<8x1xf32> to vector<8x8xf32>
    %129 = arith.subf %125, %128 : vector<8x8xf32>
    %130 = math.exp %129 : vector<8x8xf32>
    %cst_87 = arith.constant dense<0.000000e+00> : vector<8xf32>
    %131 = vector.multi_reduction <add>, %130, %cst_87 [1] : vector<8x8xf32> to vector<8xf32>
    %132 = vector.shape_cast %131 : vector<8xf32> to vector<8x1xf32>
    %133 = tpu.reciprocal %132 {approx = true} : vector<8x1xf32> -> vector<8x1xf32>
    %134 = vector.broadcast %133 : vector<8x1xf32> to vector<8x8xf32>
    %135 = arith.mulf %130, %134 : vector<8x8xf32>
    %136 = arith.truncf %135 : vector<8x8xf32> to vector<8x8xbf16>
    %137 = arith.truncf %118 : vector<8x4xf32> to vector<8x4xbf16>
    %cst_88 = arith.constant dense<0.000000e+00> : vector<8x4xf32>
    %138 = tpu.matmul %136, %137, %cst_88 {dimension_numbers = #tpu.dot_dimension_numbers<[1], [0], [0], [1], [0, 0, 1, 1], [], []>} : vector<8x8xbf16>, vector<8x4xbf16>, vector<8x4xf32> -> vector<8x4xf32>
    %139 = arith.truncf %138 : vector<8x4xf32> to vector<8x4xbf16>
    %c2_89 = arith.constant 2 : index
    %c0_90 = arith.constant 0 : index
    %c0_91 = arith.constant 0 : index
    %140 = vector.load %arg9[%c2_89, %c0_90, %c0_91] : memref<8x4x32xbf16, #tpu.memory_space<vmem>>, vector<1x4x32xbf16>
    %141 = vector.shape_cast %140 : vector<1x4x32xbf16> to vector<4x32xbf16>
    %cst_92 = arith.constant dense<0.000000e+00> : vector<8x32xf32>
    %142 = tpu.matmul %139, %141, %cst_92 {dimension_numbers = #tpu.dot_dimension_numbers<[1], [0], [0], [1], [0, 0, 1, 1], [], []>} : vector<8x4xbf16>, vector<4x32xbf16>, vector<8x32xf32> -> vector<8x32xf32>
    %143 = arith.addf %97, %142 : vector<8x32xf32>
    %c3 = arith.constant 3 : index
    %c0_93 = arith.constant 0 : index
    %c0_94 = arith.constant 0 : index
    %144 = vector.load %arg3[%c3, %c0_93, %c0_94] : memref<8x32x4xbf16, #tpu.memory_space<vmem>>, vector<1x32x4xbf16>
    %145 = vector.shape_cast %144 : vector<1x32x4xbf16> to vector<32x4xbf16>
    %cst_95 = arith.constant dense<0.000000e+00> : vector<8x4xf32>
    %146 = tpu.matmul %4, %145, %cst_95 {dimension_numbers = #tpu.dot_dimension_numbers<[1], [0], [0], [1], [0, 0, 1, 1], [], []>} : vector<8x32xbf16>, vector<32x4xbf16>, vector<8x4xf32> -> vector<8x4xf32>
    %c3_96 = arith.constant 3 : index
    %c0_97 = arith.constant 0 : index
    %c0_98 = arith.constant 0 : index
    %147 = vector.load %arg4[%c3_96, %c0_97, %c0_98] : memref<8x1x4xf32, #tpu.memory_space<vmem>>, vector<1x1x4xf32>
    %148 = vector.shape_cast %147 : vector<1x1x4xf32> to vector<1x4xf32>
    %149 = vector.broadcast %148 : vector<1x4xf32> to vector<8x4xf32>
    %150 = arith.addf %146, %149 : vector<8x4xf32>
    %c3_99 = arith.constant 3 : index
    %c0_100 = arith.constant 0 : index
    %c0_101 = arith.constant 0 : index
    %151 = vector.load %arg5[%c3_99, %c0_100, %c0_101] : memref<8x32x4xbf16, #tpu.memory_space<vmem>>, vector<1x32x4xbf16>
    %152 = vector.shape_cast %151 : vector<1x32x4xbf16> to vector<32x4xbf16>
    %cst_102 = arith.constant dense<0.000000e+00> : vector<8x4xf32>
    %153 = tpu.matmul %4, %152, %cst_102 {dimension_numbers = #tpu.dot_dimension_numbers<[1], [0], [0], [1], [0, 0, 1, 1], [], []>} : vector<8x32xbf16>, vector<32x4xbf16>, vector<8x4xf32> -> vector<8x4xf32>
    %c3_103 = arith.constant 3 : index
    %c0_104 = arith.constant 0 : index
    %c0_105 = arith.constant 0 : index
    %154 = vector.load %arg6[%c3_103, %c0_104, %c0_105] : memref<8x1x4xf32, #tpu.memory_space<vmem>>, vector<1x1x4xf32>
    %155 = vector.shape_cast %154 : vector<1x1x4xf32> to vector<1x4xf32>
    %156 = vector.broadcast %155 : vector<1x4xf32> to vector<8x4xf32>
    %157 = arith.addf %153, %156 : vector<8x4xf32>
    %c3_106 = arith.constant 3 : index
    %c0_107 = arith.constant 0 : index
    %c0_108 = arith.constant 0 : index
    %158 = vector.load %arg7[%c3_106, %c0_107, %c0_108] : memref<8x32x4xbf16, #tpu.memory_space<vmem>>, vector<1x32x4xbf16>
    %159 = vector.shape_cast %158 : vector<1x32x4xbf16> to vector<32x4xbf16>
    %cst_109 = arith.constant dense<0.000000e+00> : vector<8x4xf32>
    %160 = tpu.matmul %4, %159, %cst_109 {dimension_numbers = #tpu.dot_dimension_numbers<[1], [0], [0], [1], [0, 0, 1, 1], [], []>} : vector<8x32xbf16>, vector<32x4xbf16>, vector<8x4xf32> -> vector<8x4xf32>
    %c3_110 = arith.constant 3 : index
    %c0_111 = arith.constant 0 : index
    %c0_112 = arith.constant 0 : index
    %161 = vector.load %arg8[%c3_110, %c0_111, %c0_112] : memref<8x1x4xf32, #tpu.memory_space<vmem>>, vector<1x1x4xf32>
    %162 = vector.shape_cast %161 : vector<1x1x4xf32> to vector<1x4xf32>
    %163 = vector.broadcast %162 : vector<1x4xf32> to vector<8x4xf32>
    %164 = arith.addf %160, %163 : vector<8x4xf32>
    %165 = arith.truncf %150 : vector<8x4xf32> to vector<8x4xbf16>
    %166 = arith.truncf %157 : vector<8x4xf32> to vector<8x4xbf16>
    %cst_113 = arith.constant dense<0.000000e+00> : vector<8x8xf32>
    %167 = tpu.matmul %165, %166, %cst_113 {dimension_numbers = #tpu.dot_dimension_numbers<[1], [1], [0], [0], [0, 0, 1, 0], [], []>} : vector<8x4xbf16>, vector<8x4xbf16>, vector<8x8xf32> -> vector<8x8xf32>
    %cst_114 = arith.constant 5.000000e-01 : f32
    %168 = vector.broadcast %cst_114 : f32 to vector<8x8xf32>
    %169 = arith.mulf %167, %168 : vector<8x8xf32>
    %170 = vector.broadcast %3 : vector<1x8xf32> to vector<8x8xf32>
    %171 = arith.addf %169, %170 : vector<8x8xf32>
    %cst_115 = arith.constant dense<0xFF800000> : vector<8xf32>
    %172 = vector.multi_reduction <maximumf>, %171, %cst_115 [1] : vector<8x8xf32> to vector<8xf32>
    %173 = vector.shape_cast %172 : vector<8xf32> to vector<8x1xf32>
    %174 = vector.broadcast %173 : vector<8x1xf32> to vector<8x8xf32>
    %175 = arith.subf %171, %174 : vector<8x8xf32>
    %176 = math.exp %175 : vector<8x8xf32>
    %cst_116 = arith.constant dense<0.000000e+00> : vector<8xf32>
    %177 = vector.multi_reduction <add>, %176, %cst_116 [1] : vector<8x8xf32> to vector<8xf32>
    %178 = vector.shape_cast %177 : vector<8xf32> to vector<8x1xf32>
    %179 = tpu.reciprocal %178 {approx = true} : vector<8x1xf32> -> vector<8x1xf32>
    %180 = vector.broadcast %179 : vector<8x1xf32> to vector<8x8xf32>
    %181 = arith.mulf %176, %180 : vector<8x8xf32>
    %182 = arith.truncf %181 : vector<8x8xf32> to vector<8x8xbf16>
    %183 = arith.truncf %164 : vector<8x4xf32> to vector<8x4xbf16>
    %cst_117 = arith.constant dense<0.000000e+00> : vector<8x4xf32>
    %184 = tpu.matmul %182, %183, %cst_117 {dimension_numbers = #tpu.dot_dimension_numbers<[1], [0], [0], [1], [0, 0, 1, 1], [], []>} : vector<8x8xbf16>, vector<8x4xbf16>, vector<8x4xf32> -> vector<8x4xf32>
    %185 = arith.truncf %184 : vector<8x4xf32> to vector<8x4xbf16>
    %c3_118 = arith.constant 3 : index
    %c0_119 = arith.constant 0 : index
    %c0_120 = arith.constant 0 : index
    %186 = vector.load %arg9[%c3_118, %c0_119, %c0_120] : memref<8x4x32xbf16, #tpu.memory_space<vmem>>, vector<1x4x32xbf16>
    %187 = vector.shape_cast %186 : vector<1x4x32xbf16> to vector<4x32xbf16>
    %cst_121 = arith.constant dense<0.000000e+00> : vector<8x32xf32>
    %188 = tpu.matmul %185, %187, %cst_121 {dimension_numbers = #tpu.dot_dimension_numbers<[1], [0], [0], [1], [0, 0, 1, 1], [], []>} : vector<8x4xbf16>, vector<4x32xbf16>, vector<8x32xf32> -> vector<8x32xf32>
    %189 = arith.addf %143, %188 : vector<8x32xf32>
    %c4 = arith.constant 4 : index
    %c0_122 = arith.constant 0 : index
    %c0_123 = arith.constant 0 : index
    %190 = vector.load %arg3[%c4, %c0_122, %c0_123] : memref<8x32x4xbf16, #tpu.memory_space<vmem>>, vector<1x32x4xbf16>
    %191 = vector.shape_cast %190 : vector<1x32x4xbf16> to vector<32x4xbf16>
    %cst_124 = arith.constant dense<0.000000e+00> : vector<8x4xf32>
    %192 = tpu.matmul %4, %191, %cst_124 {dimension_numbers = #tpu.dot_dimension_numbers<[1], [0], [0], [1], [0, 0, 1, 1], [], []>} : vector<8x32xbf16>, vector<32x4xbf16>, vector<8x4xf32> -> vector<8x4xf32>
    %c4_125 = arith.constant 4 : index
    %c0_126 = arith.constant 0 : index
    %c0_127 = arith.constant 0 : index
    %193 = vector.load %arg4[%c4_125, %c0_126, %c0_127] : memref<8x1x4xf32, #tpu.memory_space<vmem>>, vector<1x1x4xf32>
    %194 = vector.shape_cast %193 : vector<1x1x4xf32> to vector<1x4xf32>
    %195 = vector.broadcast %194 : vector<1x4xf32> to vector<8x4xf32>
    %196 = arith.addf %192, %195 : vector<8x4xf32>
    %c4_128 = arith.constant 4 : index
    %c0_129 = arith.constant 0 : index
    %c0_130 = arith.constant 0 : index
    %197 = vector.load %arg5[%c4_128, %c0_129, %c0_130] : memref<8x32x4xbf16, #tpu.memory_space<vmem>>, vector<1x32x4xbf16>
    %198 = vector.shape_cast %197 : vector<1x32x4xbf16> to vector<32x4xbf16>
    %cst_131 = arith.constant dense<0.000000e+00> : vector<8x4xf32>
    %199 = tpu.matmul %4, %198, %cst_131 {dimension_numbers = #tpu.dot_dimension_numbers<[1], [0], [0], [1], [0, 0, 1, 1], [], []>} : vector<8x32xbf16>, vector<32x4xbf16>, vector<8x4xf32> -> vector<8x4xf32>
    %c4_132 = arith.constant 4 : index
    %c0_133 = arith.constant 0 : index
    %c0_134 = arith.constant 0 : index
    %200 = vector.load %arg6[%c4_132, %c0_133, %c0_134] : memref<8x1x4xf32, #tpu.memory_space<vmem>>, vector<1x1x4xf32>
    %201 = vector.shape_cast %200 : vector<1x1x4xf32> to vector<1x4xf32>
    %202 = vector.broadcast %201 : vector<1x4xf32> to vector<8x4xf32>
    %203 = arith.addf %199, %202 : vector<8x4xf32>
    %c4_135 = arith.constant 4 : index
    %c0_136 = arith.constant 0 : index
    %c0_137 = arith.constant 0 : index
    %204 = vector.load %arg7[%c4_135, %c0_136, %c0_137] : memref<8x32x4xbf16, #tpu.memory_space<vmem>>, vector<1x32x4xbf16>
    %205 = vector.shape_cast %204 : vector<1x32x4xbf16> to vector<32x4xbf16>
    %cst_138 = arith.constant dense<0.000000e+00> : vector<8x4xf32>
    %206 = tpu.matmul %4, %205, %cst_138 {dimension_numbers = #tpu.dot_dimension_numbers<[1], [0], [0], [1], [0, 0, 1, 1], [], []>} : vector<8x32xbf16>, vector<32x4xbf16>, vector<8x4xf32> -> vector<8x4xf32>
    %c4_139 = arith.constant 4 : index
    %c0_140 = arith.constant 0 : index
    %c0_141 = arith.constant 0 : index
    %207 = vector.load %arg8[%c4_139, %c0_140, %c0_141] : memref<8x1x4xf32, #tpu.memory_space<vmem>>, vector<1x1x4xf32>
    %208 = vector.shape_cast %207 : vector<1x1x4xf32> to vector<1x4xf32>
    %209 = vector.broadcast %208 : vector<1x4xf32> to vector<8x4xf32>
    %210 = arith.addf %206, %209 : vector<8x4xf32>
    %211 = arith.truncf %196 : vector<8x4xf32> to vector<8x4xbf16>
    %212 = arith.truncf %203 : vector<8x4xf32> to vector<8x4xbf16>
    %cst_142 = arith.constant dense<0.000000e+00> : vector<8x8xf32>
    %213 = tpu.matmul %211, %212, %cst_142 {dimension_numbers = #tpu.dot_dimension_numbers<[1], [1], [0], [0], [0, 0, 1, 0], [], []>} : vector<8x4xbf16>, vector<8x4xbf16>, vector<8x8xf32> -> vector<8x8xf32>
    %cst_143 = arith.constant 5.000000e-01 : f32
    %214 = vector.broadcast %cst_143 : f32 to vector<8x8xf32>
    %215 = arith.mulf %213, %214 : vector<8x8xf32>
    %216 = vector.broadcast %3 : vector<1x8xf32> to vector<8x8xf32>
    %217 = arith.addf %215, %216 : vector<8x8xf32>
    %cst_144 = arith.constant dense<0xFF800000> : vector<8xf32>
    %218 = vector.multi_reduction <maximumf>, %217, %cst_144 [1] : vector<8x8xf32> to vector<8xf32>
    %219 = vector.shape_cast %218 : vector<8xf32> to vector<8x1xf32>
    %220 = vector.broadcast %219 : vector<8x1xf32> to vector<8x8xf32>
    %221 = arith.subf %217, %220 : vector<8x8xf32>
    %222 = math.exp %221 : vector<8x8xf32>
    %cst_145 = arith.constant dense<0.000000e+00> : vector<8xf32>
    %223 = vector.multi_reduction <add>, %222, %cst_145 [1] : vector<8x8xf32> to vector<8xf32>
    %224 = vector.shape_cast %223 : vector<8xf32> to vector<8x1xf32>
    %225 = tpu.reciprocal %224 {approx = true} : vector<8x1xf32> -> vector<8x1xf32>
    %226 = vector.broadcast %225 : vector<8x1xf32> to vector<8x8xf32>
    %227 = arith.mulf %222, %226 : vector<8x8xf32>
    %228 = arith.truncf %227 : vector<8x8xf32> to vector<8x8xbf16>
    %229 = arith.truncf %210 : vector<8x4xf32> to vector<8x4xbf16>
    %cst_146 = arith.constant dense<0.000000e+00> : vector<8x4xf32>
    %230 = tpu.matmul %228, %229, %cst_146 {dimension_numbers = #tpu.dot_dimension_numbers<[1], [0], [0], [1], [0, 0, 1, 1], [], []>} : vector<8x8xbf16>, vector<8x4xbf16>, vector<8x4xf32> -> vector<8x4xf32>
    %231 = arith.truncf %230 : vector<8x4xf32> to vector<8x4xbf16>
    %c4_147 = arith.constant 4 : index
    %c0_148 = arith.constant 0 : index
    %c0_149 = arith.constant 0 : index
    %232 = vector.load %arg9[%c4_147, %c0_148, %c0_149] : memref<8x4x32xbf16, #tpu.memory_space<vmem>>, vector<1x4x32xbf16>
    %233 = vector.shape_cast %232 : vector<1x4x32xbf16> to vector<4x32xbf16>
    %cst_150 = arith.constant dense<0.000000e+00> : vector<8x32xf32>
    %234 = tpu.matmul %231, %233, %cst_150 {dimension_numbers = #tpu.dot_dimension_numbers<[1], [0], [0], [1], [0, 0, 1, 1], [], []>} : vector<8x4xbf16>, vector<4x32xbf16>, vector<8x32xf32> -> vector<8x32xf32>
    %235 = arith.addf %189, %234 : vector<8x32xf32>
    %c5 = arith.constant 5 : index
    %c0_151 = arith.constant 0 : index
    %c0_152 = arith.constant 0 : index
    %236 = vector.load %arg3[%c5, %c0_151, %c0_152] : memref<8x32x4xbf16, #tpu.memory_space<vmem>>, vector<1x32x4xbf16>
    %237 = vector.shape_cast %236 : vector<1x32x4xbf16> to vector<32x4xbf16>
    %cst_153 = arith.constant dense<0.000000e+00> : vector<8x4xf32>
    %238 = tpu.matmul %4, %237, %cst_153 {dimension_numbers = #tpu.dot_dimension_numbers<[1], [0], [0], [1], [0, 0, 1, 1], [], []>} : vector<8x32xbf16>, vector<32x4xbf16>, vector<8x4xf32> -> vector<8x4xf32>
    %c5_154 = arith.constant 5 : index
    %c0_155 = arith.constant 0 : index
    %c0_156 = arith.constant 0 : index
    %239 = vector.load %arg4[%c5_154, %c0_155, %c0_156] : memref<8x1x4xf32, #tpu.memory_space<vmem>>, vector<1x1x4xf32>
    %240 = vector.shape_cast %239 : vector<1x1x4xf32> to vector<1x4xf32>
    %241 = vector.broadcast %240 : vector<1x4xf32> to vector<8x4xf32>
    %242 = arith.addf %238, %241 : vector<8x4xf32>
    %c5_157 = arith.constant 5 : index
    %c0_158 = arith.constant 0 : index
    %c0_159 = arith.constant 0 : index
    %243 = vector.load %arg5[%c5_157, %c0_158, %c0_159] : memref<8x32x4xbf16, #tpu.memory_space<vmem>>, vector<1x32x4xbf16>
    %244 = vector.shape_cast %243 : vector<1x32x4xbf16> to vector<32x4xbf16>
    %cst_160 = arith.constant dense<0.000000e+00> : vector<8x4xf32>
    %245 = tpu.matmul %4, %244, %cst_160 {dimension_numbers = #tpu.dot_dimension_numbers<[1], [0], [0], [1], [0, 0, 1, 1], [], []>} : vector<8x32xbf16>, vector<32x4xbf16>, vector<8x4xf32> -> vector<8x4xf32>
    %c5_161 = arith.constant 5 : index
    %c0_162 = arith.constant 0 : index
    %c0_163 = arith.constant 0 : index
    %246 = vector.load %arg6[%c5_161, %c0_162, %c0_163] : memref<8x1x4xf32, #tpu.memory_space<vmem>>, vector<1x1x4xf32>
    %247 = vector.shape_cast %246 : vector<1x1x4xf32> to vector<1x4xf32>
    %248 = vector.broadcast %247 : vector<1x4xf32> to vector<8x4xf32>
    %249 = arith.addf %245, %248 : vector<8x4xf32>
    %c5_164 = arith.constant 5 : index
    %c0_165 = arith.constant 0 : index
    %c0_166 = arith.constant 0 : index
    %250 = vector.load %arg7[%c5_164, %c0_165, %c0_166] : memref<8x32x4xbf16, #tpu.memory_space<vmem>>, vector<1x32x4xbf16>
    %251 = vector.shape_cast %250 : vector<1x32x4xbf16> to vector<32x4xbf16>
    %cst_167 = arith.constant dense<0.000000e+00> : vector<8x4xf32>
    %252 = tpu.matmul %4, %251, %cst_167 {dimension_numbers = #tpu.dot_dimension_numbers<[1], [0], [0], [1], [0, 0, 1, 1], [], []>} : vector<8x32xbf16>, vector<32x4xbf16>, vector<8x4xf32> -> vector<8x4xf32>
    %c5_168 = arith.constant 5 : index
    %c0_169 = arith.constant 0 : index
    %c0_170 = arith.constant 0 : index
    %253 = vector.load %arg8[%c5_168, %c0_169, %c0_170] : memref<8x1x4xf32, #tpu.memory_space<vmem>>, vector<1x1x4xf32>
    %254 = vector.shape_cast %253 : vector<1x1x4xf32> to vector<1x4xf32>
    %255 = vector.broadcast %254 : vector<1x4xf32> to vector<8x4xf32>
    %256 = arith.addf %252, %255 : vector<8x4xf32>
    %257 = arith.truncf %242 : vector<8x4xf32> to vector<8x4xbf16>
    %258 = arith.truncf %249 : vector<8x4xf32> to vector<8x4xbf16>
    %cst_171 = arith.constant dense<0.000000e+00> : vector<8x8xf32>
    %259 = tpu.matmul %257, %258, %cst_171 {dimension_numbers = #tpu.dot_dimension_numbers<[1], [1], [0], [0], [0, 0, 1, 0], [], []>} : vector<8x4xbf16>, vector<8x4xbf16>, vector<8x8xf32> -> vector<8x8xf32>
    %cst_172 = arith.constant 5.000000e-01 : f32
    %260 = vector.broadcast %cst_172 : f32 to vector<8x8xf32>
    %261 = arith.mulf %259, %260 : vector<8x8xf32>
    %262 = vector.broadcast %3 : vector<1x8xf32> to vector<8x8xf32>
    %263 = arith.addf %261, %262 : vector<8x8xf32>
    %cst_173 = arith.constant dense<0xFF800000> : vector<8xf32>
    %264 = vector.multi_reduction <maximumf>, %263, %cst_173 [1] : vector<8x8xf32> to vector<8xf32>
    %265 = vector.shape_cast %264 : vector<8xf32> to vector<8x1xf32>
    %266 = vector.broadcast %265 : vector<8x1xf32> to vector<8x8xf32>
    %267 = arith.subf %263, %266 : vector<8x8xf32>
    %268 = math.exp %267 : vector<8x8xf32>
    %cst_174 = arith.constant dense<0.000000e+00> : vector<8xf32>
    %269 = vector.multi_reduction <add>, %268, %cst_174 [1] : vector<8x8xf32> to vector<8xf32>
    %270 = vector.shape_cast %269 : vector<8xf32> to vector<8x1xf32>
    %271 = tpu.reciprocal %270 {approx = true} : vector<8x1xf32> -> vector<8x1xf32>
    %272 = vector.broadcast %271 : vector<8x1xf32> to vector<8x8xf32>
    %273 = arith.mulf %268, %272 : vector<8x8xf32>
    %274 = arith.truncf %273 : vector<8x8xf32> to vector<8x8xbf16>
    %275 = arith.truncf %256 : vector<8x4xf32> to vector<8x4xbf16>
    %cst_175 = arith.constant dense<0.000000e+00> : vector<8x4xf32>
    %276 = tpu.matmul %274, %275, %cst_175 {dimension_numbers = #tpu.dot_dimension_numbers<[1], [0], [0], [1], [0, 0, 1, 1], [], []>} : vector<8x8xbf16>, vector<8x4xbf16>, vector<8x4xf32> -> vector<8x4xf32>
    %277 = arith.truncf %276 : vector<8x4xf32> to vector<8x4xbf16>
    %c5_176 = arith.constant 5 : index
    %c0_177 = arith.constant 0 : index
    %c0_178 = arith.constant 0 : index
    %278 = vector.load %arg9[%c5_176, %c0_177, %c0_178] : memref<8x4x32xbf16, #tpu.memory_space<vmem>>, vector<1x4x32xbf16>
    %279 = vector.shape_cast %278 : vector<1x4x32xbf16> to vector<4x32xbf16>
    %cst_179 = arith.constant dense<0.000000e+00> : vector<8x32xf32>
    %280 = tpu.matmul %277, %279, %cst_179 {dimension_numbers = #tpu.dot_dimension_numbers<[1], [0], [0], [1], [0, 0, 1, 1], [], []>} : vector<8x4xbf16>, vector<4x32xbf16>, vector<8x32xf32> -> vector<8x32xf32>
    %281 = arith.addf %235, %280 : vector<8x32xf32>
    %c6 = arith.constant 6 : index
    %c0_180 = arith.constant 0 : index
    %c0_181 = arith.constant 0 : index
    %282 = vector.load %arg3[%c6, %c0_180, %c0_181] : memref<8x32x4xbf16, #tpu.memory_space<vmem>>, vector<1x32x4xbf16>
    %283 = vector.shape_cast %282 : vector<1x32x4xbf16> to vector<32x4xbf16>
    %cst_182 = arith.constant dense<0.000000e+00> : vector<8x4xf32>
    %284 = tpu.matmul %4, %283, %cst_182 {dimension_numbers = #tpu.dot_dimension_numbers<[1], [0], [0], [1], [0, 0, 1, 1], [], []>} : vector<8x32xbf16>, vector<32x4xbf16>, vector<8x4xf32> -> vector<8x4xf32>
    %c6_183 = arith.constant 6 : index
    %c0_184 = arith.constant 0 : index
    %c0_185 = arith.constant 0 : index
    %285 = vector.load %arg4[%c6_183, %c0_184, %c0_185] : memref<8x1x4xf32, #tpu.memory_space<vmem>>, vector<1x1x4xf32>
    %286 = vector.shape_cast %285 : vector<1x1x4xf32> to vector<1x4xf32>
    %287 = vector.broadcast %286 : vector<1x4xf32> to vector<8x4xf32>
    %288 = arith.addf %284, %287 : vector<8x4xf32>
    %c6_186 = arith.constant 6 : index
    %c0_187 = arith.constant 0 : index
    %c0_188 = arith.constant 0 : index
    %289 = vector.load %arg5[%c6_186, %c0_187, %c0_188] : memref<8x32x4xbf16, #tpu.memory_space<vmem>>, vector<1x32x4xbf16>
    %290 = vector.shape_cast %289 : vector<1x32x4xbf16> to vector<32x4xbf16>
    %cst_189 = arith.constant dense<0.000000e+00> : vector<8x4xf32>
    %291 = tpu.matmul %4, %290, %cst_189 {dimension_numbers = #tpu.dot_dimension_numbers<[1], [0], [0], [1], [0, 0, 1, 1], [], []>} : vector<8x32xbf16>, vector<32x4xbf16>, vector<8x4xf32> -> vector<8x4xf32>
    %c6_190 = arith.constant 6 : index
    %c0_191 = arith.constant 0 : index
    %c0_192 = arith.constant 0 : index
    %292 = vector.load %arg6[%c6_190, %c0_191, %c0_192] : memref<8x1x4xf32, #tpu.memory_space<vmem>>, vector<1x1x4xf32>
    %293 = vector.shape_cast %292 : vector<1x1x4xf32> to vector<1x4xf32>
    %294 = vector.broadcast %293 : vector<1x4xf32> to vector<8x4xf32>
    %295 = arith.addf %291, %294 : vector<8x4xf32>
    %c6_193 = arith.constant 6 : index
    %c0_194 = arith.constant 0 : index
    %c0_195 = arith.constant 0 : index
    %296 = vector.load %arg7[%c6_193, %c0_194, %c0_195] : memref<8x32x4xbf16, #tpu.memory_space<vmem>>, vector<1x32x4xbf16>
    %297 = vector.shape_cast %296 : vector<1x32x4xbf16> to vector<32x4xbf16>
    %cst_196 = arith.constant dense<0.000000e+00> : vector<8x4xf32>
    %298 = tpu.matmul %4, %297, %cst_196 {dimension_numbers = #tpu.dot_dimension_numbers<[1], [0], [0], [1], [0, 0, 1, 1], [], []>} : vector<8x32xbf16>, vector<32x4xbf16>, vector<8x4xf32> -> vector<8x4xf32>
    %c6_197 = arith.constant 6 : index
    %c0_198 = arith.constant 0 : index
    %c0_199 = arith.constant 0 : index
    %299 = vector.load %arg8[%c6_197, %c0_198, %c0_199] : memref<8x1x4xf32, #tpu.memory_space<vmem>>, vector<1x1x4xf32>
    %300 = vector.shape_cast %299 : vector<1x1x4xf32> to vector<1x4xf32>
    %301 = vector.broadcast %300 : vector<1x4xf32> to vector<8x4xf32>
    %302 = arith.addf %298, %301 : vector<8x4xf32>
    %303 = arith.truncf %288 : vector<8x4xf32> to vector<8x4xbf16>
    %304 = arith.truncf %295 : vector<8x4xf32> to vector<8x4xbf16>
    %cst_200 = arith.constant dense<0.000000e+00> : vector<8x8xf32>
    %305 = tpu.matmul %303, %304, %cst_200 {dimension_numbers = #tpu.dot_dimension_numbers<[1], [1], [0], [0], [0, 0, 1, 0], [], []>} : vector<8x4xbf16>, vector<8x4xbf16>, vector<8x8xf32> -> vector<8x8xf32>
    %cst_201 = arith.constant 5.000000e-01 : f32
    %306 = vector.broadcast %cst_201 : f32 to vector<8x8xf32>
    %307 = arith.mulf %305, %306 : vector<8x8xf32>
    %308 = vector.broadcast %3 : vector<1x8xf32> to vector<8x8xf32>
    %309 = arith.addf %307, %308 : vector<8x8xf32>
    %cst_202 = arith.constant dense<0xFF800000> : vector<8xf32>
    %310 = vector.multi_reduction <maximumf>, %309, %cst_202 [1] : vector<8x8xf32> to vector<8xf32>
    %311 = vector.shape_cast %310 : vector<8xf32> to vector<8x1xf32>
    %312 = vector.broadcast %311 : vector<8x1xf32> to vector<8x8xf32>
    %313 = arith.subf %309, %312 : vector<8x8xf32>
    %314 = math.exp %313 : vector<8x8xf32>
    %cst_203 = arith.constant dense<0.000000e+00> : vector<8xf32>
    %315 = vector.multi_reduction <add>, %314, %cst_203 [1] : vector<8x8xf32> to vector<8xf32>
    %316 = vector.shape_cast %315 : vector<8xf32> to vector<8x1xf32>
    %317 = tpu.reciprocal %316 {approx = true} : vector<8x1xf32> -> vector<8x1xf32>
    %318 = vector.broadcast %317 : vector<8x1xf32> to vector<8x8xf32>
    %319 = arith.mulf %314, %318 : vector<8x8xf32>
    %320 = arith.truncf %319 : vector<8x8xf32> to vector<8x8xbf16>
    %321 = arith.truncf %302 : vector<8x4xf32> to vector<8x4xbf16>
    %cst_204 = arith.constant dense<0.000000e+00> : vector<8x4xf32>
    %322 = tpu.matmul %320, %321, %cst_204 {dimension_numbers = #tpu.dot_dimension_numbers<[1], [0], [0], [1], [0, 0, 1, 1], [], []>} : vector<8x8xbf16>, vector<8x4xbf16>, vector<8x4xf32> -> vector<8x4xf32>
    %323 = arith.truncf %322 : vector<8x4xf32> to vector<8x4xbf16>
    %c6_205 = arith.constant 6 : index
    %c0_206 = arith.constant 0 : index
    %c0_207 = arith.constant 0 : index
    %324 = vector.load %arg9[%c6_205, %c0_206, %c0_207] : memref<8x4x32xbf16, #tpu.memory_space<vmem>>, vector<1x4x32xbf16>
    %325 = vector.shape_cast %324 : vector<1x4x32xbf16> to vector<4x32xbf16>
    %cst_208 = arith.constant dense<0.000000e+00> : vector<8x32xf32>
    %326 = tpu.matmul %323, %325, %cst_208 {dimension_numbers = #tpu.dot_dimension_numbers<[1], [0], [0], [1], [0, 0, 1, 1], [], []>} : vector<8x4xbf16>, vector<4x32xbf16>, vector<8x32xf32> -> vector<8x32xf32>
    %327 = arith.addf %281, %326 : vector<8x32xf32>
    %c7 = arith.constant 7 : index
    %c0_209 = arith.constant 0 : index
    %c0_210 = arith.constant 0 : index
    %328 = vector.load %arg3[%c7, %c0_209, %c0_210] : memref<8x32x4xbf16, #tpu.memory_space<vmem>>, vector<1x32x4xbf16>
    %329 = vector.shape_cast %328 : vector<1x32x4xbf16> to vector<32x4xbf16>
    %cst_211 = arith.constant dense<0.000000e+00> : vector<8x4xf32>
    %330 = tpu.matmul %4, %329, %cst_211 {dimension_numbers = #tpu.dot_dimension_numbers<[1], [0], [0], [1], [0, 0, 1, 1], [], []>} : vector<8x32xbf16>, vector<32x4xbf16>, vector<8x4xf32> -> vector<8x4xf32>
    %c7_212 = arith.constant 7 : index
    %c0_213 = arith.constant 0 : index
    %c0_214 = arith.constant 0 : index
    %331 = vector.load %arg4[%c7_212, %c0_213, %c0_214] : memref<8x1x4xf32, #tpu.memory_space<vmem>>, vector<1x1x4xf32>
    %332 = vector.shape_cast %331 : vector<1x1x4xf32> to vector<1x4xf32>
    %333 = vector.broadcast %332 : vector<1x4xf32> to vector<8x4xf32>
    %334 = arith.addf %330, %333 : vector<8x4xf32>
    %c7_215 = arith.constant 7 : index
    %c0_216 = arith.constant 0 : index
    %c0_217 = arith.constant 0 : index
    %335 = vector.load %arg5[%c7_215, %c0_216, %c0_217] : memref<8x32x4xbf16, #tpu.memory_space<vmem>>, vector<1x32x4xbf16>
    %336 = vector.shape_cast %335 : vector<1x32x4xbf16> to vector<32x4xbf16>
    %cst_218 = arith.constant dense<0.000000e+00> : vector<8x4xf32>
    %337 = tpu.matmul %4, %336, %cst_218 {dimension_numbers = #tpu.dot_dimension_numbers<[1], [0], [0], [1], [0, 0, 1, 1], [], []>} : vector<8x32xbf16>, vector<32x4xbf16>, vector<8x4xf32> -> vector<8x4xf32>
    %c7_219 = arith.constant 7 : index
    %c0_220 = arith.constant 0 : index
    %c0_221 = arith.constant 0 : index
    %338 = vector.load %arg6[%c7_219, %c0_220, %c0_221] : memref<8x1x4xf32, #tpu.memory_space<vmem>>, vector<1x1x4xf32>
    %339 = vector.shape_cast %338 : vector<1x1x4xf32> to vector<1x4xf32>
    %340 = vector.broadcast %339 : vector<1x4xf32> to vector<8x4xf32>
    %341 = arith.addf %337, %340 : vector<8x4xf32>
    %c7_222 = arith.constant 7 : index
    %c0_223 = arith.constant 0 : index
    %c0_224 = arith.constant 0 : index
    %342 = vector.load %arg7[%c7_222, %c0_223, %c0_224] : memref<8x32x4xbf16, #tpu.memory_space<vmem>>, vector<1x32x4xbf16>
    %343 = vector.shape_cast %342 : vector<1x32x4xbf16> to vector<32x4xbf16>
    %cst_225 = arith.constant dense<0.000000e+00> : vector<8x4xf32>
    %344 = tpu.matmul %4, %343, %cst_225 {dimension_numbers = #tpu.dot_dimension_numbers<[1], [0], [0], [1], [0, 0, 1, 1], [], []>} : vector<8x32xbf16>, vector<32x4xbf16>, vector<8x4xf32> -> vector<8x4xf32>
    %c7_226 = arith.constant 7 : index
    %c0_227 = arith.constant 0 : index
    %c0_228 = arith.constant 0 : index
    %345 = vector.load %arg8[%c7_226, %c0_227, %c0_228] : memref<8x1x4xf32, #tpu.memory_space<vmem>>, vector<1x1x4xf32>
    %346 = vector.shape_cast %345 : vector<1x1x4xf32> to vector<1x4xf32>
    %347 = vector.broadcast %346 : vector<1x4xf32> to vector<8x4xf32>
    %348 = arith.addf %344, %347 : vector<8x4xf32>
    %349 = arith.truncf %334 : vector<8x4xf32> to vector<8x4xbf16>
    %350 = arith.truncf %341 : vector<8x4xf32> to vector<8x4xbf16>
    %cst_229 = arith.constant dense<0.000000e+00> : vector<8x8xf32>
    %351 = tpu.matmul %349, %350, %cst_229 {dimension_numbers = #tpu.dot_dimension_numbers<[1], [1], [0], [0], [0, 0, 1, 0], [], []>} : vector<8x4xbf16>, vector<8x4xbf16>, vector<8x8xf32> -> vector<8x8xf32>
    %cst_230 = arith.constant 5.000000e-01 : f32
    %352 = vector.broadcast %cst_230 : f32 to vector<8x8xf32>
    %353 = arith.mulf %351, %352 : vector<8x8xf32>
    %354 = vector.broadcast %3 : vector<1x8xf32> to vector<8x8xf32>
    %355 = arith.addf %353, %354 : vector<8x8xf32>
    %cst_231 = arith.constant dense<0xFF800000> : vector<8xf32>
    %356 = vector.multi_reduction <maximumf>, %355, %cst_231 [1] : vector<8x8xf32> to vector<8xf32>
    %357 = vector.shape_cast %356 : vector<8xf32> to vector<8x1xf32>
    %358 = vector.broadcast %357 : vector<8x1xf32> to vector<8x8xf32>
    %359 = arith.subf %355, %358 : vector<8x8xf32>
    %360 = math.exp %359 : vector<8x8xf32>
    %cst_232 = arith.constant dense<0.000000e+00> : vector<8xf32>
    %361 = vector.multi_reduction <add>, %360, %cst_232 [1] : vector<8x8xf32> to vector<8xf32>
    %362 = vector.shape_cast %361 : vector<8xf32> to vector<8x1xf32>
    %363 = tpu.reciprocal %362 {approx = true} : vector<8x1xf32> -> vector<8x1xf32>
    %364 = vector.broadcast %363 : vector<8x1xf32> to vector<8x8xf32>
    %365 = arith.mulf %360, %364 : vector<8x8xf32>
    %366 = arith.truncf %365 : vector<8x8xf32> to vector<8x8xbf16>
    %367 = arith.truncf %348 : vector<8x4xf32> to vector<8x4xbf16>
    %cst_233 = arith.constant dense<0.000000e+00> : vector<8x4xf32>
    %368 = tpu.matmul %366, %367, %cst_233 {dimension_numbers = #tpu.dot_dimension_numbers<[1], [0], [0], [1], [0, 0, 1, 1], [], []>} : vector<8x8xbf16>, vector<8x4xbf16>, vector<8x4xf32> -> vector<8x4xf32>
    %369 = arith.truncf %368 : vector<8x4xf32> to vector<8x4xbf16>
    %c7_234 = arith.constant 7 : index
    %c0_235 = arith.constant 0 : index
    %c0_236 = arith.constant 0 : index
    %370 = vector.load %arg9[%c7_234, %c0_235, %c0_236] : memref<8x4x32xbf16, #tpu.memory_space<vmem>>, vector<1x4x32xbf16>
    %371 = vector.shape_cast %370 : vector<1x4x32xbf16> to vector<4x32xbf16>
    %cst_237 = arith.constant dense<0.000000e+00> : vector<8x32xf32>
    %372 = tpu.matmul %369, %371, %cst_237 {dimension_numbers = #tpu.dot_dimension_numbers<[1], [0], [0], [1], [0, 0, 1, 1], [], []>} : vector<8x4xbf16>, vector<4x32xbf16>, vector<8x32xf32> -> vector<8x32xf32>
    %373 = arith.addf %327, %372 : vector<8x32xf32>
    %c0_238 = arith.constant 0 : index
    %c0_239 = arith.constant 0 : index
    %374 = vector.load %arg10[%c0_238, %c0_239] : memref<1x32xf32, #tpu.memory_space<vmem>>, vector<1x32xf32>
    %375 = vector.broadcast %374 : vector<1x32xf32> to vector<8x32xf32>
    %376 = arith.addf %373, %375 : vector<8x32xf32>
    %377 = arith.addf %376, %1 : vector<8x32xf32>
    %c0_240 = arith.constant 0 : index
    %c0_241 = arith.constant 0 : index
    %378 = vector.load %arg11[%c0_240, %c0_241] : memref<1x32xf32, #tpu.memory_space<vmem>>, vector<1x32xf32>
    %c0_242 = arith.constant 0 : index
    %c0_243 = arith.constant 0 : index
    %379 = vector.load %arg12[%c0_242, %c0_243] : memref<1x32xf32, #tpu.memory_space<vmem>>, vector<1x32xf32>
    %cst_244 = arith.constant dense<0.000000e+00> : vector<8xf32>
    %380 = vector.multi_reduction <add>, %377, %cst_244 [1] : vector<8x32xf32> to vector<8xf32>
    %381 = vector.shape_cast %380 : vector<8xf32> to vector<8x1xf32>
    %cst_245 = arith.constant 3.200000e+01 : f32
    %382 = vector.broadcast %cst_245 : f32 to vector<8x1xf32>
    %383 = arith.divf %381, %382 : vector<8x1xf32>
    %384 = vector.broadcast %383 : vector<8x1xf32> to vector<8x32xf32>
    %385 = arith.subf %377, %384 : vector<8x32xf32>
    %386 = arith.mulf %385, %385 : vector<8x32xf32>
    %cst_246 = arith.constant dense<0.000000e+00> : vector<8xf32>
    %387 = vector.multi_reduction <add>, %386, %cst_246 [1] : vector<8x32xf32> to vector<8xf32>
    %388 = vector.shape_cast %387 : vector<8xf32> to vector<8x1xf32>
    %cst_247 = arith.constant 3.200000e+01 : f32
    %389 = vector.broadcast %cst_247 : f32 to vector<8x1xf32>
    %390 = arith.divf %388, %389 : vector<8x1xf32>
    %391 = vector.broadcast %383 : vector<8x1xf32> to vector<8x32xf32>
    %392 = arith.subf %377, %391 : vector<8x32xf32>
    %cst_248 = arith.constant 9.99999974E-6 : f32
    %393 = vector.broadcast %cst_248 : f32 to vector<8x1xf32>
    %394 = arith.addf %390, %393 : vector<8x1xf32>
    %395 = math.rsqrt %394 : vector<8x1xf32>
    %396 = vector.broadcast %395 : vector<8x1xf32> to vector<8x32xf32>
    %397 = arith.mulf %392, %396 : vector<8x32xf32>
    %398 = vector.broadcast %378 : vector<1x32xf32> to vector<8x32xf32>
    %399 = arith.mulf %397, %398 : vector<8x32xf32>
    %400 = vector.broadcast %379 : vector<1x32xf32> to vector<8x32xf32>
    %401 = arith.addf %399, %400 : vector<8x32xf32>
    %402 = arith.truncf %401 : vector<8x32xf32> to vector<8x32xbf16>
    %c0_249 = arith.constant 0 : index
    %c0_250 = arith.constant 0 : index
    %403 = vector.load %arg13[%c0_249, %c0_250] : memref<32x64xbf16, #tpu.memory_space<vmem>>, vector<32x64xbf16>
    %cst_251 = arith.constant dense<0.000000e+00> : vector<8x64xf32>
    %404 = tpu.matmul %402, %403, %cst_251 {dimension_numbers = #tpu.dot_dimension_numbers<[1], [0], [0], [1], [0, 0, 1, 1], [], []>} : vector<8x32xbf16>, vector<32x64xbf16>, vector<8x64xf32> -> vector<8x64xf32>
    %c0_252 = arith.constant 0 : index
    %c0_253 = arith.constant 0 : index
    %405 = vector.load %arg14[%c0_252, %c0_253] : memref<1x64xf32, #tpu.memory_space<vmem>>, vector<1x64xf32>
    %406 = vector.broadcast %405 : vector<1x64xf32> to vector<8x64xf32>
    %407 = arith.addf %404, %406 : vector<8x64xf32>
    %cst_254 = arith.constant 0.000000e+00 : f32
    %408 = vector.broadcast %cst_254 : f32 to vector<8x64xf32>
    %409 = arith.maximumf %407, %408 : vector<8x64xf32>
    %410 = arith.truncf %409 : vector<8x64xf32> to vector<8x64xbf16>
    %c0_255 = arith.constant 0 : index
    %c0_256 = arith.constant 0 : index
    %411 = vector.load %arg15[%c0_255, %c0_256] : memref<64x32xbf16, #tpu.memory_space<vmem>>, vector<64x32xbf16>
    %cst_257 = arith.constant dense<0.000000e+00> : vector<8x32xf32>
    %412 = tpu.matmul %410, %411, %cst_257 {dimension_numbers = #tpu.dot_dimension_numbers<[1], [0], [0], [1], [0, 0, 1, 1], [], []>} : vector<8x64xbf16>, vector<64x32xbf16>, vector<8x32xf32> -> vector<8x32xf32>
    %c0_258 = arith.constant 0 : index
    %c0_259 = arith.constant 0 : index
    %413 = vector.load %arg16[%c0_258, %c0_259] : memref<1x32xf32, #tpu.memory_space<vmem>>, vector<1x32xf32>
    %414 = vector.broadcast %413 : vector<1x32xf32> to vector<8x32xf32>
    %415 = arith.addf %412, %414 : vector<8x32xf32>
    %416 = arith.addf %415, %401 : vector<8x32xf32>
    %c0_260 = arith.constant 0 : index
    %c0_261 = arith.constant 0 : index
    %417 = vector.load %arg17[%c0_260, %c0_261] : memref<1x32xf32, #tpu.memory_space<vmem>>, vector<1x32xf32>
    %c0_262 = arith.constant 0 : index
    %c0_263 = arith.constant 0 : index
    %418 = vector.load %arg18[%c0_262, %c0_263] : memref<1x32xf32, #tpu.memory_space<vmem>>, vector<1x32xf32>
    %cst_264 = arith.constant dense<0.000000e+00> : vector<8xf32>
    %419 = vector.multi_reduction <add>, %416, %cst_264 [1] : vector<8x32xf32> to vector<8xf32>
    %420 = vector.shape_cast %419 : vector<8xf32> to vector<8x1xf32>
    %cst_265 = arith.constant 3.200000e+01 : f32
    %421 = vector.broadcast %cst_265 : f32 to vector<8x1xf32>
    %422 = arith.divf %420, %421 : vector<8x1xf32>
    %423 = vector.broadcast %422 : vector<8x1xf32> to vector<8x32xf32>
    %424 = arith.subf %416, %423 : vector<8x32xf32>
    %425 = arith.mulf %424, %424 : vector<8x32xf32>
    %cst_266 = arith.constant dense<0.000000e+00> : vector<8xf32>
    %426 = vector.multi_reduction <add>, %425, %cst_266 [1] : vector<8x32xf32> to vector<8xf32>
    %427 = vector.shape_cast %426 : vector<8xf32> to vector<8x1xf32>
    %cst_267 = arith.constant 3.200000e+01 : f32
    %428 = vector.broadcast %cst_267 : f32 to vector<8x1xf32>
    %429 = arith.divf %427, %428 : vector<8x1xf32>
    %430 = vector.broadcast %422 : vector<8x1xf32> to vector<8x32xf32>
    %431 = arith.subf %416, %430 : vector<8x32xf32>
    %cst_268 = arith.constant 9.99999974E-6 : f32
    %432 = vector.broadcast %cst_268 : f32 to vector<8x1xf32>
    %433 = arith.addf %429, %432 : vector<8x1xf32>
    %434 = math.rsqrt %433 : vector<8x1xf32>
    %435 = vector.broadcast %434 : vector<8x1xf32> to vector<8x32xf32>
    %436 = arith.mulf %431, %435 : vector<8x32xf32>
    %437 = vector.broadcast %417 : vector<1x32xf32> to vector<8x32xf32>
    %438 = arith.mulf %436, %437 : vector<8x32xf32>
    %439 = vector.broadcast %418 : vector<1x32xf32> to vector<8x32xf32>
    %440 = arith.addf %438, %439 : vector<8x32xf32>
    %c0_269 = arith.constant 0 : index
    %c0_270 = arith.constant 0 : index
    %c0_271 = arith.constant 0 : index
    %441 = vector.load %arg19[%c0_269, %c0_270, %c0_271] : memref<1x8x32xf32, #tpu.memory_space<vmem>>, vector<1x8x32xf32>
    %442 = vector.shape_cast %441 : vector<1x8x32xf32> to vector<8x32xf32>
    %443 = vector.shape_cast %440 : vector<8x32xf32> to vector<1x8x32xf32>
    tpu.vector_store %arg19[%c0_269, %c0_270, %c0_271], %443 {strides = array<i32>} : memref<1x8x32xf32, #tpu.memory_space<vmem>>, vector<1x8x32xf32>,
    return
  }
  func.func @transform_0(%arg0: i32) -> (i32, i32, i32) {
    %c0_i32 = arith.constant 0 : i32
    %c0_i32_0 = arith.constant 0 : i32
    %c0_i32_1 = arith.constant 0 : i32
    return %arg0, %c0_i32, %c0_i32_0 : i32, i32, i32
  }
  func.func @transform_1(%arg0: i32) -> (i32, i32, i32) {
    %c0_i32 = arith.constant 0 : i32
    %c0_i32_0 = arith.constant 0 : i32
    %c0_i32_1 = arith.constant 0 : i32
    return %arg0, %c0_i32, %c0_i32_0 : i32, i32, i32
  }
  func.func @transform_2(%arg0: i32) -> (i32, i32, i32) {
    %c0_i32 = arith.constant 0 : i32
    %c0_i32_0 = arith.constant 0 : i32
    %c0_i32_1 = arith.constant 0 : i32
    %c0_i32_2 = arith.constant 0 : i32
    return %c0_i32, %c0_i32_0, %c0_i32_1 : i32, i32, i32
  }
  func.func @transform_3(%arg0: i32) -> (i32, i32, i32) {
    %c0_i32 = arith.constant 0 : i32
    %c0_i32_0 = arith.constant 0 : i32
    %c0_i32_1 = arith.constant 0 : i32
    %c0_i32_2 = arith.constant 0 : i32
    return %c0_i32, %c0_i32_0, %c0_i32_1 : i32, i32, i32
  }
  func.func @transform_4(%arg0: i32) -> (i32, i32, i32) {
    %c0_i32 = arith.constant 0 : i32
    %c0_i32_0 = arith.constant 0 : i32
    %c0_i32_1 = arith.constant 0 : i32
    %c0_i32_2 = arith.constant 0 : i32
    return %c0_i32, %c0_i32_0, %c0_i32_1 : i32, i32, i32
  }
  func.func @transform_5(%arg0: i32) -> (i32, i32, i32) {
    %c0_i32 = arith.constant 0 : i32
    %c0_i32_0 = arith.constant 0 : i32
    %c0_i32_1 = arith.constant 0 : i32
    %c0_i32_2 = arith.constant 0 : i32
    return %c0_i32, %c0_i32_0, %c0_i32_1 : i32, i32, i32
  }
  func.func @transform_6(%arg0: i32) -> (i32, i32, i32) {
    %c0_i32 = arith.constant 0 : i32
    %c0_i32_0 = arith.constant 0 : i32
    %c0_i32_1 = arith.constant 0 : i32
    %c0_i32_2 = arith.constant 0 : i32
    return %c0_i32, %c0_i32_0, %c0_i32_1 : i32, i32, i32
  }
  func.func @transform_7(%arg0: i32) -> (i32, i32, i32) {
    %c0_i32 = arith.constant 0 : i32
    %c0_i32_0 = arith.constant 0 : i32
    %c0_i32_1 = arith.constant 0 : i32
    %c0_i32_2 = arith.constant 0 : i32
    return %c0_i32, %c0_i32_0, %c0_i32_1 : i32, i32, i32
  }
  func.func @transform_8(%arg0: i32) -> (i32, i32, i32) {
    %c0_i32 = arith.constant 0 : i32
    %c0_i32_0 = arith.constant 0 : i32
    %c0_i32_1 = arith.constant 0 : i32
    %c0_i32_2 = arith.constant 0 : i32
    return %c0_i32, %c0_i32_0, %c0_i32_1 : i32, i32, i32
  }
  func.func @transform_9(%arg0: i32) -> (i32, i32) {
    %c0_i32 = arith.constant 0 : i32
    %c0_i32_0 = arith.constant 0 : i32
    %c0_i32_1 = arith.constant 0 : i32
    return %c0_i32, %c0_i32_0 : i32, i32
  }
  func.func @transform_10(%arg0: i32) -> (i32, i32) {
    %c0_i32 = arith.constant 0 : i32
    %c0_i32_0 = arith.constant 0 : i32
    %c0_i32_1 = arith.constant 0 : i32
    return %c0_i32, %c0_i32_0 : i32, i32
  }
  func.func @transform_11(%arg0: i32) -> (i32, i32) {
    %c0_i32 = arith.constant 0 : i32
    %c0_i32_0 = arith.constant 0 : i32
    %c0_i32_1 = arith.constant 0 : i32
    return %c0_i32, %c0_i32_0 : i32, i32
  }
  func.func @transform_12(%arg0: i32) -> (i32, i32) {
    %c0_i32 = arith.constant 0 : i32
    %c0_i32_0 = arith.constant 0 : i32
    %c0_i32_1 = arith.constant 0 : i32
    return %c0_i32, %c0_i32_0 : i32, i32
  }
  func.func @transform_13(%arg0: i32) -> (i32, i32) {
    %c0_i32 = arith.constant 0 : i32
    %c0_i32_0 = arith.constant 0 : i32
    %c0_i32_1 = arith.constant 0 : i32
    return %c0_i32, %c0_i32_0 : i32, i32
  }
  func.func @transform_14(%arg0: i32) -> (i32, i32) {
    %c0_i32 = arith.constant 0 : i32
    %c0_i32_0 = arith.constant 0 : i32
    %c0_i32_1 = arith.constant 0 : i32
    return %c0_i32, %c0_i32_0 : i32, i32
  }
  func.func @transform_15(%arg0: i32) -> (i32, i32) {
    %c0_i32 = arith.constant 0 : i32
    %c0_i32_0 = arith.constant 0 : i32
    %c0_i32_1 = arith.constant 0 : i32
    return %c0_i32, %c0_i32_0 : i32, i32
  }
  func.func @transform_16(%arg0: i32) -> (i32, i32) {
    %c0_i32 = arith.constant 0 : i32
    %c0_i32_0 = arith.constant 0 : i32
    %c0_i32_1 = arith.constant 0 : i32
    return %c0_i32, %c0_i32_0 : i32, i32
  }
  func.func @transform_17(%arg0: i32) -> (i32, i32) {
    %c0_i32 = arith.constant 0 : i32
    %c0_i32_0 = arith.constant 0 : i32
    %c0_i32_1 = arith.constant 0 : i32
    return %c0_i32, %c0_i32_0 : i32, i32
  }
  func.func @transform_18(%arg0: i32) -> (i32, i32, i32) {
    %c0_i32 = arith.constant 0 : i32
    %c0_i32_0 = arith.constant 0 : i32
    %c0_i32_1 = arith.constant 0 : i32
    return %arg0, %c0_i32, %c0_i32_0 : i32, i32, i32
  }
}

module attributes {stable_mosaic.version = 11 : i64} {
  func.func @_head_kernel(%arg0: i32, %arg1: memref<1x8x32xf32, #tpu.memory_space<vmem>>, %arg2: memref<1x32xf32, #tpu.memory_space<vmem>>, %arg3: memref<1x32xf32, #tpu.memory_space<vmem>>, %arg4: memref<32x24xbf16, #tpu.memory_space<vmem>>, %arg5: memref<1x24xf32, #tpu.memory_space<vmem>>, %arg6: memref<1x24xf32, #tpu.memory_space<vmem>>, %arg7: memref<1x24xf32, #tpu.memory_space<vmem>>, %arg8: memref<24x10xbf16, #tpu.memory_space<vmem>>, %arg9: memref<1x10xf32, #tpu.memory_space<vmem>>, %arg10: memref<1x8x10xf32, #tpu.memory_space<vmem>>) attributes {dimension_semantics = [#tpu.dimension_semantics<parallel>], iteration_bounds = array<i64: 2>, scalar_prefetch = 0 : i64, scratch_operands = 0 : i64, tpu.core_type = #tpu.core_type<tc>, window_params = [{transform_indices = @transform_0, window_bounds = array<i64: 1, 8, 32>}, {pipeline_mode = #tpu.pipeline_mode<synchronous>, transform_indices = @transform_1, window_bounds = array<i64: 1, 32>}, {pipeline_mode = #tpu.pipeline_mode<synchronous>, transform_indices = @transform_2, window_bounds = array<i64: 1, 32>}, {pipeline_mode = #tpu.pipeline_mode<synchronous>, transform_indices = @transform_3, window_bounds = array<i64: 32, 24>}, {pipeline_mode = #tpu.pipeline_mode<synchronous>, transform_indices = @transform_4, window_bounds = array<i64: 1, 24>}, {pipeline_mode = #tpu.pipeline_mode<synchronous>, transform_indices = @transform_5, window_bounds = array<i64: 1, 24>}, {pipeline_mode = #tpu.pipeline_mode<synchronous>, transform_indices = @transform_6, window_bounds = array<i64: 1, 24>}, {pipeline_mode = #tpu.pipeline_mode<synchronous>, transform_indices = @transform_7, window_bounds = array<i64: 24, 10>}, {pipeline_mode = #tpu.pipeline_mode<synchronous>, transform_indices = @transform_8, window_bounds = array<i64: 1, 10>}, {transform_indices = @transform_9, window_bounds = array<i64: 1, 8, 10>}]} {
    %c0 = arith.constant 0 : index
    %c0_0 = arith.constant 0 : index
    %c0_1 = arith.constant 0 : index
    %0 = vector.load %arg1[%c0, %c0_0, %c0_1] : memref<1x8x32xf32, #tpu.memory_space<vmem>>, vector<1x8x32xf32>
    %1 = vector.shape_cast %0 : vector<1x8x32xf32> to vector<8x32xf32>
    %c0_2 = arith.constant 0 : index
    %c0_3 = arith.constant 0 : index
    %2 = vector.load %arg2[%c0_2, %c0_3] : memref<1x32xf32, #tpu.memory_space<vmem>>, vector<1x32xf32>
    %c0_4 = arith.constant 0 : index
    %c0_5 = arith.constant 0 : index
    %3 = vector.load %arg3[%c0_4, %c0_5] : memref<1x32xf32, #tpu.memory_space<vmem>>, vector<1x32xf32>
    %cst = arith.constant dense<0.000000e+00> : vector<8xf32>
    %4 = vector.multi_reduction <add>, %1, %cst [1] : vector<8x32xf32> to vector<8xf32>
    %5 = vector.shape_cast %4 : vector<8xf32> to vector<8x1xf32>
    %cst_6 = arith.constant 3.200000e+01 : f32
    %6 = vector.broadcast %cst_6 : f32 to vector<8x1xf32>
    %7 = arith.divf %5, %6 : vector<8x1xf32>
    %8 = vector.broadcast %7 : vector<8x1xf32> to vector<8x32xf32>
    %9 = arith.subf %1, %8 : vector<8x32xf32>
    %10 = arith.mulf %9, %9 : vector<8x32xf32>
    %cst_7 = arith.constant dense<0.000000e+00> : vector<8xf32>
    %11 = vector.multi_reduction <add>, %10, %cst_7 [1] : vector<8x32xf32> to vector<8xf32>
    %12 = vector.shape_cast %11 : vector<8xf32> to vector<8x1xf32>
    %cst_8 = arith.constant 3.200000e+01 : f32
    %13 = vector.broadcast %cst_8 : f32 to vector<8x1xf32>
    %14 = arith.divf %12, %13 : vector<8x1xf32>
    %15 = vector.broadcast %7 : vector<8x1xf32> to vector<8x32xf32>
    %16 = arith.subf %1, %15 : vector<8x32xf32>
    %cst_9 = arith.constant 9.99999974E-6 : f32
    %17 = vector.broadcast %cst_9 : f32 to vector<8x1xf32>
    %18 = arith.addf %14, %17 : vector<8x1xf32>
    %19 = math.rsqrt %18 : vector<8x1xf32>
    %20 = vector.broadcast %19 : vector<8x1xf32> to vector<8x32xf32>
    %21 = arith.mulf %16, %20 : vector<8x32xf32>
    %22 = vector.broadcast %2 : vector<1x32xf32> to vector<8x32xf32>
    %23 = arith.mulf %21, %22 : vector<8x32xf32>
    %24 = vector.broadcast %3 : vector<1x32xf32> to vector<8x32xf32>
    %25 = arith.addf %23, %24 : vector<8x32xf32>
    %26 = arith.truncf %25 : vector<8x32xf32> to vector<8x32xbf16>
    %c0_10 = arith.constant 0 : index
    %c0_11 = arith.constant 0 : index
    %27 = vector.load %arg4[%c0_10, %c0_11] : memref<32x24xbf16, #tpu.memory_space<vmem>>, vector<32x24xbf16>
    %cst_12 = arith.constant dense<0.000000e+00> : vector<8x24xf32>
    %28 = tpu.matmul %26, %27, %cst_12 {dimension_numbers = #tpu.dot_dimension_numbers<[1], [0], [0], [1], [0, 0, 1, 1], [], []>} : vector<8x32xbf16>, vector<32x24xbf16>, vector<8x24xf32> -> vector<8x24xf32>
    %c0_13 = arith.constant 0 : index
    %c0_14 = arith.constant 0 : index
    %29 = vector.load %arg5[%c0_13, %c0_14] : memref<1x24xf32, #tpu.memory_space<vmem>>, vector<1x24xf32>
    %30 = vector.broadcast %29 : vector<1x24xf32> to vector<8x24xf32>
    %31 = arith.addf %28, %30 : vector<8x24xf32>
    %c0_15 = arith.constant 0 : index
    %c0_16 = arith.constant 0 : index
    %32 = vector.load %arg6[%c0_15, %c0_16] : memref<1x24xf32, #tpu.memory_space<vmem>>, vector<1x24xf32>
    %c0_17 = arith.constant 0 : index
    %c0_18 = arith.constant 0 : index
    %33 = vector.load %arg7[%c0_17, %c0_18] : memref<1x24xf32, #tpu.memory_space<vmem>>, vector<1x24xf32>
    %cst_19 = arith.constant dense<0.000000e+00> : vector<8xf32>
    %34 = vector.multi_reduction <add>, %31, %cst_19 [1] : vector<8x24xf32> to vector<8xf32>
    %35 = vector.shape_cast %34 : vector<8xf32> to vector<8x1xf32>
    %cst_20 = arith.constant 2.400000e+01 : f32
    %36 = vector.broadcast %cst_20 : f32 to vector<8x1xf32>
    %37 = arith.divf %35, %36 : vector<8x1xf32>
    %38 = vector.broadcast %37 : vector<8x1xf32> to vector<8x24xf32>
    %39 = arith.subf %31, %38 : vector<8x24xf32>
    %40 = arith.mulf %39, %39 : vector<8x24xf32>
    %cst_21 = arith.constant dense<0.000000e+00> : vector<8xf32>
    %41 = vector.multi_reduction <add>, %40, %cst_21 [1] : vector<8x24xf32> to vector<8xf32>
    %42 = vector.shape_cast %41 : vector<8xf32> to vector<8x1xf32>
    %cst_22 = arith.constant 2.400000e+01 : f32
    %43 = vector.broadcast %cst_22 : f32 to vector<8x1xf32>
    %44 = arith.divf %42, %43 : vector<8x1xf32>
    %45 = vector.broadcast %37 : vector<8x1xf32> to vector<8x24xf32>
    %46 = arith.subf %31, %45 : vector<8x24xf32>
    %cst_23 = arith.constant 9.99999974E-6 : f32
    %47 = vector.broadcast %cst_23 : f32 to vector<8x1xf32>
    %48 = arith.addf %44, %47 : vector<8x1xf32>
    %49 = math.rsqrt %48 : vector<8x1xf32>
    %50 = vector.broadcast %49 : vector<8x1xf32> to vector<8x24xf32>
    %51 = arith.mulf %46, %50 : vector<8x24xf32>
    %52 = vector.broadcast %32 : vector<1x24xf32> to vector<8x24xf32>
    %53 = arith.mulf %51, %52 : vector<8x24xf32>
    %54 = vector.broadcast %33 : vector<1x24xf32> to vector<8x24xf32>
    %55 = arith.addf %53, %54 : vector<8x24xf32>
    %cst_24 = arith.constant 0.000000e+00 : f32
    %56 = vector.broadcast %cst_24 : f32 to vector<8x24xf32>
    %57 = arith.maximumf %55, %56 : vector<8x24xf32>
    %58 = arith.truncf %57 : vector<8x24xf32> to vector<8x24xbf16>
    %c0_25 = arith.constant 0 : index
    %c0_26 = arith.constant 0 : index
    %59 = vector.load %arg8[%c0_25, %c0_26] : memref<24x10xbf16, #tpu.memory_space<vmem>>, vector<24x10xbf16>
    %cst_27 = arith.constant dense<0.000000e+00> : vector<8x10xf32>
    %60 = tpu.matmul %58, %59, %cst_27 {dimension_numbers = #tpu.dot_dimension_numbers<[1], [0], [0], [1], [0, 0, 1, 1], [], []>} : vector<8x24xbf16>, vector<24x10xbf16>, vector<8x10xf32> -> vector<8x10xf32>
    %c0_28 = arith.constant 0 : index
    %c0_29 = arith.constant 0 : index
    %61 = vector.load %arg9[%c0_28, %c0_29] : memref<1x10xf32, #tpu.memory_space<vmem>>, vector<1x10xf32>
    %62 = vector.broadcast %61 : vector<1x10xf32> to vector<8x10xf32>
    %63 = arith.addf %60, %62 : vector<8x10xf32>
    %c0_30 = arith.constant 0 : index
    %c0_31 = arith.constant 0 : index
    %c0_32 = arith.constant 0 : index
    %64 = vector.load %arg10[%c0_30, %c0_31, %c0_32] : memref<1x8x10xf32, #tpu.memory_space<vmem>>, vector<1x8x10xf32>
    %65 = vector.shape_cast %64 : vector<1x8x10xf32> to vector<8x10xf32>
    %66 = vector.shape_cast %63 : vector<8x10xf32> to vector<1x8x10xf32>
    tpu.vector_store %arg10[%c0_30, %c0_31, %c0_32], %66 {strides = array<i32>} : memref<1x8x10xf32, #tpu.memory_space<vmem>>, vector<1x8x10xf32>,
    return
  }
  func.func @transform_0(%arg0: i32) -> (i32, i32, i32) {
    %c0_i32 = arith.constant 0 : i32
    %c0_i32_0 = arith.constant 0 : i32
    %c0_i32_1 = arith.constant 0 : i32
    return %arg0, %c0_i32, %c0_i32_0 : i32, i32, i32
  }
  func.func @transform_1(%arg0: i32) -> (i32, i32) {
    %c0_i32 = arith.constant 0 : i32
    %c0_i32_0 = arith.constant 0 : i32
    %c0_i32_1 = arith.constant 0 : i32
    return %c0_i32, %c0_i32_0 : i32, i32
  }
  func.func @transform_2(%arg0: i32) -> (i32, i32) {
    %c0_i32 = arith.constant 0 : i32
    %c0_i32_0 = arith.constant 0 : i32
    %c0_i32_1 = arith.constant 0 : i32
    return %c0_i32, %c0_i32_0 : i32, i32
  }
  func.func @transform_3(%arg0: i32) -> (i32, i32) {
    %c0_i32 = arith.constant 0 : i32
    %c0_i32_0 = arith.constant 0 : i32
    %c0_i32_1 = arith.constant 0 : i32
    return %c0_i32, %c0_i32_0 : i32, i32
  }
  func.func @transform_4(%arg0: i32) -> (i32, i32) {
    %c0_i32 = arith.constant 0 : i32
    %c0_i32_0 = arith.constant 0 : i32
    %c0_i32_1 = arith.constant 0 : i32
    return %c0_i32, %c0_i32_0 : i32, i32
  }
  func.func @transform_5(%arg0: i32) -> (i32, i32) {
    %c0_i32 = arith.constant 0 : i32
    %c0_i32_0 = arith.constant 0 : i32
    %c0_i32_1 = arith.constant 0 : i32
    return %c0_i32, %c0_i32_0 : i32, i32
  }
  func.func @transform_6(%arg0: i32) -> (i32, i32) {
    %c0_i32 = arith.constant 0 : i32
    %c0_i32_0 = arith.constant 0 : i32
    %c0_i32_1 = arith.constant 0 : i32
    return %c0_i32, %c0_i32_0 : i32, i32
  }
  func.func @transform_7(%arg0: i32) -> (i32, i32) {
    %c0_i32 = arith.constant 0 : i32
    %c0_i32_0 = arith.constant 0 : i32
    %c0_i32_1 = arith.constant 0 : i32
    return %c0_i32, %c0_i32_0 : i32, i32
  }
  func.func @transform_8(%arg0: i32) -> (i32, i32) {
    %c0_i32 = arith.constant 0 : i32
    %c0_i32_0 = arith.constant 0 : i32
    %c0_i32_1 = arith.constant 0 : i32
    return %c0_i32, %c0_i32_0 : i32, i32
  }
  func.func @transform_9(%arg0: i32) -> (i32, i32, i32) {
    %c0_i32 = arith.constant 0 : i32
    %c0_i32_0 = arith.constant 0 : i32
    %c0_i32_1 = arith.constant 0 : i32
    return %arg0, %c0_i32, %c0_i32_0 : i32, i32, i32
  }
}

</mosaic_0001>

<bundles_post_ra>
// kernel: _lambda_.11
= control target key start
LH: loop header
LB: loop body
LE: loop exit
PB: predicated region body
PF: predicated region fallthrough
CT: control target
= control target key end

     0   :  { %14 = vsyncpa [#allocation3], 0  ;;  %s948_s0 = inlined_call_operand.vmem [shape: f32[2,8,32], index: 0, kind: input, shape index: {}]   ;;  %s949_s1 = inlined_call_operand.vmem [shape: f32[1,32], index: 1, kind: input, shape index: {}]   ;;  %s950_s2 = inlined_call_operand.vmem [shape: f32[1,32], index: 2, kind: input, shape index: {}]   ;;  %s951_s3 = inlined_call_operand.vmem [shape: bf16[32,24], index: 3, kind: input, shape index: {}]   ;;  %s952_s4 = inlined_call_operand.vmem [shape: f32[1,24], index: 4, kind: input, shape index: {}, may-alias: {4,6}]   ;;  %s953_s5 = inlined_call_operand.vmem [shape: f32[1,24], index: 5, kind: input, shape index: {}]   ;;  %s954_s6 = inlined_call_operand.vmem [shape: f32[1,24], index: 6, kind: input, shape index: {}, may-alias: {4,6}]   ;;  %s955_s7 = inlined_call_operand.vmem [shape: bf16[24,10], index: 7, kind: input, shape index: {}]   ;;  %s956_s8 = inlined_call_operand.vmem [shape: f32[1,10], index: 8, kind: input, shape index: {}]   ;;  %s957_s9 = inlined_call_operand.hbm [shape: f32[2,8,10], index: 9, kind: output, shape index: {}]  }
   0x1   :  { %16 = vsyncpa [#allocation3 + $0x1], 0  ;;  %s812_s30 = smov 0   ;;  %s814_s10 = smov 0  }
   0x2   :  { %s816_s11 = smov 0   ;;  %s818_s12 = smov 0  }
   0x3 LB: > { %s833_s13 = sadd.s32 4294967295, %s757_s12   ;;  %s602_s14 = sadd.s32 4294967294, %s757_s12   ;;  %s757_s12 = sphi %s818_s12, %s963_s12   ;;  %s753_s11 = sphi %s816_s11, %s962_s11   ;;  %s749_s10 = sphi %s814_s10, %s961_s10   ;;  %s745_s30 = sphi %s812_s30, %s960_s30  }
   0x4   : > { %s837_s15 = sadd.s32 1, %s757_s12   ;;  %s223_s16 = sadd.s32 1, %s753_s11 }
   0x5   : > { %s220_s17 = ssub.s32 %s757_s12, %s837_s15  ;;  %p233_p0 = scmp.ne.s32.totalorder %s753_s11, %s749_s10 }
   0x6   : > { %p221_p1 = scmp.eq.s32.totalorder %s220_s17, 0  ;;  %p234_p2 = scmp.eq.s32.totalorder %s833_s13, 1 }
   0x7   : > { %p239_p3 = scmp.ne.s32.totalorder %s749_s10, %s745_s30  ;;  %p240_p4 = scmp.eq.s32.totalorder %s602_s14, 1 }
   0x8   : > { %s848_s18 = scalar_select %p221_p1, %s753_s11, %s223_s16  }
   0x9   : > { %p850_p5 = por %p234_p2, %p233_p0  ;;  %p854_p6 = por %p240_p4, %p239_p3 }
   0xa   : > { %p605_p7 = scmp.ge.s32.totalorder %s757_s12, 1  ;;  %p289_p8 = scmp.lt.s32.totalorder %s757_s12, 3 }
   0xc   : > { %p290_p9 = pnand %p605_p7, %p289_p8 }
   0xd   : > { %p324_p10 = scmp.lt.s32.totalorder (!%p290_p9), %s833_s13, 1  ;;  %vm332_vm0 = vcmask (!%p290_p9), 261120   ;;  %v687_v7 = vld [vmem:[%s951_s3] sm:$0xff] (!%p290_p9)   ;;  %v759_v8 = vmov (!%p290_p9), 0.0   ;;  %v688_v9 = vld [vmem:[%s951_s3 + $0x8] sm:$0xff] (!%p290_p9)   ;;  %vm760_vm1 = vmmov (!%p290_p9), 0  }
   0xe   : > { %293 = sbr.rel (%p290_p9) target bundleno = 1100 (0x44c), region = 56  ;;  %630 = vmatprep.subr.bf16.mxu0 (!%p290_p9), %v759_v8  ;;  %638 = vmatprep.subr.bf16.mxu1 (!%p290_p9), %v759_v8  ;;  %v608_v14 = vld [vmem:[%s949_s1] ss:$0 sm:$0xff] (!%p290_p9)  ;;  %vm430_vm2 = vcmask (!%p290_p9), 195584   ;;  %v690_v33 = vld [vmem:[%s955_s7 + $0x8] ss:$0 sps:$4 sm:$0xff] (!%p290_p9)  }
   0xf   : > { %631 = vmatpush3.bf16.msra.mxu0 (!%p290_p9), %v687_v7  ;;  %634 = vmatprep.mubr.msk.bf16.mxu0 (!%p290_p9), %vm760_vm1, %v759_v8  ;;  %v609_v16 = vld [vmem:[%s950_s2] ss:$0 sm:$0xff] (!%p290_p9)  ;;  %vm483_vm3 = vcmask (!%p290_p9), 1043456   ;;  %s321_s17 = sand.u32 (!%p290_p9), 1, %s749_s10   ;;  %s621_s24 = sshll.u32 (!%p290_p9), %s833_s13, 7  ;;  %vm527_vm4 = vcmask (!%p290_p9), 80896  }
  0x10   : > { %632 = vmatprep.subr.bf16.mxu0 (!%p290_p9), %v759_v8  ;;  %642 = vmatprep.mubr.msk.bf16.mxu1 (!%p290_p9), %vm760_vm1, %v759_v8  ;;  %v610_v20 = vld [vmem:[%s952_s4] ss:$0 sm:$0xff] (!%p290_p9)  ;;  %v485_v34 = vsel (!%p290_p9), %vm483_vm3, %v690_v33, 0  ;;  %s906_s29 = scalar_lea.hbm (!%p290_p9), %s957_s9, %s621_s24  ;;  %s761_s16 = smov (!%p290_p9), [#allocation2]  }
  0x11   : > { %v689_v32 = vld [vmem:[%s955_s7] sm:$0xff] (!%p290_p9)  }
  0x12   : > { %639 = vmatpush3.bf16.msra.mxu1 (!%p290_p9), %v689_v32  ;;  %v614_v39 = vld [vmem:[%s953_s5] ss:$0 sm:$0xff] (!%p290_p9) }
  0x13   : > { %633 = vmatpush3.bf16.msra.mxu0 (!%p290_p9), %v688_v9  ;;  %640 = vmatprep.subr.bf16.mxu1 (!%p290_p9), %v759_v8  ;;  %v615_v41 = vld [vmem:[%s954_s6] ss:$0 sm:$0xff] (!%p290_p9) }
  0x14   : > { %v616_v46 = vld [vmem:[%s956_s8] ss:$0 sm:$0xff] (!%p290_p9) }
  0x15   : > { %s325_s21 = scalar_select %p324_p10, %s833_s13, 1 }
  0x16   : > { %641 = vmatpush3.bf16.msra.mxu1 %v485_v34  ;;  %s530_s13 = scalar_lea.sflag [#allocation3], %s321_s17 }
  0x17   : > { %s607_s22 = sshll.u32 %s325_s21, 3  ;;  %s606_s21 = sshll.u32 %s321_s17, 3 }
  0x18   : > { %s327_s25 = scalar_lea.vmem %s948_s0, %s607_s22 }
  0x19   : > { %v329_v0 = vld [vmem:[%s327_s25] sm:$0xff]  ;;  %s323_s25 = scalar_lea.vmem [#allocation2], %s606_s21  ;;  %s699_s21 = sshll.u32 %s761_s16, 4  ;;  %s700_s21 = int_to_ptr.vmem [resolvable:$false] %s699_s21 }
  0x1a   : > { %v333_v1 = vsel %vm332_vm0, %v329_v0, 0.0  ;;  %s543_s26 = sshll.u32 %s323_s25, 4  ;;  %s701_s22 = scalar_lea.vmem %s700_s21, 256  ;;  %s908_s26 = int_to_ptr.vmem [resolvable:$true] %s543_s26 }
  0x1b   : > { %334 = vadd.xlane.f32.xlu0 %v333_v1  ;;  %s695_s14 = scalar_lea.vmem %s908_s26, 128  ;;  %p702_p0 = scmp.lt.s32.totalorder %s908_s26, %s700_s21 }
  0x1c   : > { %p696_p11 = scmp.ne.s32.totalorder %s908_s26, %s695_s14  ;;  %p703_p1 = scmp.lt.s32.totalorder %s701_s22, %s695_s14 }
  0x1e   : > { %p697_p12 = pnand %p696_p11, %p850_p5  ;;  %p704_p2 = por %p703_p1, %p702_p0 }
  0x20   : > { %p698_p13 = pneg %p697_p12 }
  0x22   : > { %p705_p3 = pnand %p704_p2, %p698_p13 }
  0xa8   : > { %v335_v2 = vpop.xlane.xlu0 %334 }
  0xa9   : > { %v337_v3 = vmul.f32 0.03125, %v335_v2 }
  0xab   : > { %v338_v4 = vsub.f32 %v329_v0, %v337_v3 }
  0xad   : > { %v339_v5 = vmul.f32 %v338_v4, %v338_v4 }
  0xaf   : > { %v340_v6 = vsel %vm332_vm0, %v339_v5, 0.0 }
  0xb0   : > { %341 = vadd.xlane.f32.xlu0 %v340_v6 }
 0x13d   : > { %v342_v10 = vpop.xlane.xlu0 %341 }
 0x13e   : > { %v343_v11 = vmul.f32 0.03125, %v342_v10 }
 0x140   : > { %v344_v12 = vadd.f32 1e-05, %v343_v11 }
 0x142   : > { %691 = vrsqrt.f32 %v344_v12 }
 0x14c   : > { %v692_v13 = vpop.eup %691 }
 0x14d   : > { %v346_v15 = vmul.f32 %v692_v13, %v338_v4 }
 0x14f   : > { %v353_v17 = vmul.f32 %v608_v14, %v346_v15 }
 0x151   : > { %v360_v18 = vadd.f32 %v609_v16, %v353_v17 }
 0x153   : > { %v361_v19 = vpack.c.bf16 %v360_v18, %v360_v18 }
 0x155   : > { %635 = vmatmul.mubr.msk.bf16.vlgmr.msra.gmra.mrb[0].mxu0 %vm332_vm0, %v361_v19 }
 0x228   : > { %v422_v21 = vpop.f32.mrb[0].mxu0 }
 0x229   : > { %v423_v22 = vadd.f32 %v610_v20, %v422_v21  ;;  %v636_v23 = vpop.f32.mrb[1].mxu0 }
 0x22a   : > { %v425_v24 = vpop.f32.mrb[2].mxu0 }
 0x22b   : > { %v637_v25 = vpop.f32.mrb[3].mxu0  ;;  %v431_v26 = vsel %vm430_vm2, %v423_v22, 0.0 }
 0x22c   : > { %432 = vadd.xlane.f32.xlu1 %v431_v26 }
 0x2b9   : > { %v433_v27 = vpop.xlane.xlu1 %432 }
 0x2ba   : > { %v435_v28 = vmul.f32 0.041666668, %v433_v27 }
 0x2bc   : > { %v436_v29 = vsub.f32 %v423_v22, %v435_v28 }
 0x2be   : > { %v437_v30 = vmul.f32 %v436_v29, %v436_v29 }
 0x2c0   : > { %v438_v31 = vsel %vm430_vm2, %v437_v30, 0.0 }
 0x2c1   : > { %439 = vadd.xlane.f32.xlu1 %v438_v31 }
 0x34e   : > { %v440_v35 = vpop.xlane.xlu1 %439 }
 0x34f   : > { %v441_v36 = vmul.f32 0.041666668, %v440_v35 }
 0x351   : > { %v442_v37 = vadd.f32 1e-05, %v441_v36 }
 0x353   : > { %693 = vrsqrt.f32 %v442_v37 }
 0x35d   : > { %v694_v38 = vpop.eup %693 }
 0x35e   : > { %v444_v40 = vmul.f32 %v694_v38, %v436_v29 }
 0x360   : > { %v451_v42 = vmul.f32 %v614_v39, %v444_v40 }
 0x362   : > { %v458_v43 = vadd.f32 %v615_v41, %v451_v42 }
 0x364   : > { %v459_v44 = vmax.f32 %v458_v43, 0.0 }
 0x366   : > { %v460_v45 = vpack.c.bf16 %v459_v44, %v459_v44 }
 0x368   : > { %643 = vmatmul.mubr.msk.bf16.vlgmr.msra.gmra.mrb[0].mxu1 %vm430_vm2, %v460_v45 }
 0x43b   : > { %v521_v47 = vpop.f32.mrb[0].mxu1 }
 0x43c   : > { %v522_v48 = vadd.f32 %v616_v46, %v521_v47  ;;  %v644_v49 = vpop.f32.mrb[1].mxu1 }
 0x43d   : > { %v524_v50 = vpop.f32.mrb[2].mxu1 }
 0x43e   : > { %v645_v51 = vpop.f32.mrb[3].mxu1  ;;  %528 = vst.msk [vmem:[%s323_s25] sm:$0xff] %vm527_vm4, %v522_v48 }
 0x43f   : > { %708 = shalt.err (!%p705_p3)
}
 0x440   : > { %s709_s17 = scalar_lea.hbm %s906_s29, 128  ;;  %s713_s25 = scalar_lea.hbm %s957_s9, 256 }
 0x441   : > { %p710_p4 = scmp.ne.s32.totalorder %s906_s29, %s709_s17  ;;  %p714_p9 = scmp.lt.u32.totalorder %s906_s29, %s957_s9 }
 0x442   : > { %p715_p10 = scmp.lt.u32.totalorder %s713_s25, %s709_s17  ;;  %p717_p12 = scmp.lt.u32.totalorder %s709_s17, %s906_s29 }
 0x443   : > { %p711_p7 = pnand %p710_p4, %p850_p5 }
 0x444   : > { %p716_p11 = por %p715_p10, %p714_p9 }
 0x445   : > { %p712_p8 = pneg %p711_p7 }
 0x446   : > { %p718_p13 = por %p717_p12, %p716_p11 }
 0x448   : > { %p719_p0 = pnand %p718_p13, %p712_p8 }
 0x44a   : > { %722 = shalt.err (!%p719_p0)
}
 0x44b   : > { %646 = dma.vmem_to_hbm [thread:$0]  (%p850_p5), %s908_s26, 128, %s906_s29, %s530_s13  }
 0x44c PF: > { %p652_p1 = scmp.ge.s32.totalorder %s757_s12, 2  ;;  %s555_s14 = sand.u32 1, %s745_s30  }
 0x44d   : > { %s556_s16 = scalar_lea.sflag [#allocation3], %s555_s14 }
 0x44e   : > { %p649_p2 = pnand %p652_p1, %p854_p6 }
 0x450   : > { %740 = dma.done.wait (!%p649_p2), %s556_s16, 128  }
 0x451   : > { %742 = vsyncadd (!%p649_p2), %s556_s16, 4294967168  ;;  %p19_p3 = scmp.ge.s32.totalorder %s837_s15, 4   ;;  %s960_s30 = smov %s749_s10 }
 0x452   : > { %s961_s10 = smov %s753_s11  ;;  %s962_s11 = smov %s848_s18 }
 0x453   : > { %s963_s12 = smov %s837_s15  ;;  %21 = sbr.rel (!%p19_p3) target bundleno = 3 (0x3), region = 91 }
 0x45a   :  { %561 = vsyncpa [#allocation3], 1 }
 0x45b   :  { %563 = vsyncpa [#allocation3 + $0x1], 1 }

// kernel: _lambda_.6
= control target key start
LH: loop header
LB: loop body
LE: loop exit
PB: predicated region body
PF: predicated region fallthrough
CT: control target
= control target key end

     0   :  { %11 = vsyncpa [#allocation3], 0  ;;  %s725_s0 = inlined_call_operand.hbm [shape: f32[2,8,16], index: 0, kind: input, shape index: {}]   ;;  %s726_s1 = inlined_call_operand.vmem [shape: f32[1,16], index: 1, kind: input, shape index: {}]   ;;  %s727_s2 = inlined_call_operand.vmem [shape: f32[1,16], index: 2, kind: input, shape index: {}]   ;;  %s728_s3 = inlined_call_operand.vmem [shape: bf16[16,32], index: 3, kind: input, shape index: {}]   ;;  %s729_s4 = inlined_call_operand.vmem [shape: f32[1,32], index: 4, kind: input, shape index: {}]   ;;  %s730_s5 = inlined_call_operand.vmem [shape: f32[8,32], index: 5, kind: input, shape index: {}]   ;;  %s731_s6 = inlined_call_operand.vmem [shape: f32[2,8,32], index: 6, kind: output, shape index: {}]  }
   0x1   :  { %13 = vsyncpa [#allocation3 + $0x1], 0  ;;  %s600_s21 = smov 0   ;;  %s602_s22 = smov 0  }
   0x2   :  { %s604_s23 = smov 0   ;;  %s606_s24 = smov 0  }
   0x3 LB: > { %s619_s25 = sadd.s32 4294967295, %s560_s24   ;;  %s622_s26 = sadd.s32 1, %s560_s24   ;;  %s560_s24 = sphi %s606_s24, %s739_s24   ;;  %s556_s23 = sphi %s604_s23, %s738_s23   ;;  %s552_s22 = sphi %s602_s22, %s737_s22   ;;  %s548_s21 = sphi %s600_s21, %s736_s21  }
   0x4   : > { %s23_s27 = ssub.s32 %s560_s24, %s622_s26  ;;  %s26_s28 = sadd.s32 1, %s556_s23 }
   0x5   : > { %p24_p0 = scmp.eq.s32.totalorder %s23_s27, 0  ;;  %p33_p1 = scmp.ne.s32.totalorder %s556_s23, %s552_s22 }
   0x6   : > { %p34_p2 = scmp.eq.s32.totalorder %s560_s24, 0  ;;  %p39_p3 = scmp.ne.s32.totalorder %s552_s22, %s548_s21 }
   0x7   : > { %s632_s29 = scalar_select %p24_p0, %s556_s23, %s26_s28  }
   0x8   : > { %p35_p4 = por %p34_p2, %p33_p1  ;;  %p40_p5 = scmp.eq.s32.totalorder %s619_s25, 0 }
   0x9   : > { %p458_p6 = scmp.lt.s32.totalorder %s560_s24, 2  ;;  %s209_s7 = sand.u32 1, %s556_s23  }
   0xa   : > { %p636_p7 = por %p40_p5, %p39_p3  ;;  %s432_s8 = sshll.u32 %s209_s7, 3 }
   0xb   : > { %s433_s9 = sshll.u32 %s560_s24, 7  ;;  %s213_s13 = scalar_lea.vmem [#allocation2], %s432_s8 }
   0xc   : > { %s645_s12 = scalar_lea.hbm %s725_s0, %s433_s9  ;;  %s220_s14 = sshll.u32 %s213_s13, 4  ;;  %s647_s14 = int_to_ptr.vmem [resolvable:$true] %s220_s14 }
   0xd   : > { %p649_p8 = pnand %p458_p6, %p35_p4  ;;  %s210_s16 = scalar_lea.sflag [#allocation3], %s209_s7 }
   0xe   : > { %s496_s17 = scalar_lea.hbm %s645_s12, 128  ;;  %s501_s20 = scalar_lea.hbm %s725_s0, 256 }
   0xf   : > { %p497_p11 = scmp.ne.s32.totalorder %s645_s12, %s496_s17  ;;  %p498_p12 = pneg %p649_p8 }
  0x10   : > { %p502_p1 = scmp.lt.u32.totalorder %s645_s12, %s725_s0  ;;  %p503_p2 = scmp.lt.u32.totalorder %s501_s20, %s496_s17 }
  0x11   : > { %p499_p13 = pnand %p498_p12, %p497_p11  ;;  %p505_p4 = scmp.lt.u32.totalorder %s496_s17, %s645_s12 }
  0x12   : > { %p504_p3 = por %p503_p2, %p502_p1 }
  0x13   : > { %p500_p0 = pneg %p499_p13 }
  0x14   : > { %p506_p5 = por %p505_p4, %p504_p3 }
  0x16   : > { %p507_p6 = pnand %p506_p5, %p500_p0 }
  0x18   : > { %510 = shalt.err (!%p507_p6)
}
  0x19   : > { %s511_s28 = scalar_lea.vmem %s647_s14, 128  ;;  %s562_s7 = smov [#allocation2]  }
  0x1a   : > { %p512_p11 = scmp.ne.s32.totalorder %s647_s14, %s511_s28  ;;  %s516_s8 = sshll.u32 %s562_s7, 4  ;;  %s517_s8 = int_to_ptr.vmem [resolvable:$false] %s516_s8 }
  0x1b   : > { %s518_s9 = scalar_lea.vmem %s517_s8, 256  ;;  %p519_p10 = scmp.lt.s32.totalorder %s647_s14, %s517_s8 }
  0x1c   : > { %p514_p13 = pnand %p512_p11, %p498_p12  ;;  %p520_p1 = scmp.lt.s32.totalorder %s518_s9, %s511_s28 }
  0x1e   : > { %p515_p9 = pneg %p514_p13  ;;  %p521_p2 = por %p520_p1, %p519_p10 }
  0x20   : > { %p522_p3 = pnand %p521_p2, %p515_p9 }
  0x22   : > { %525 = shalt.err (!%p522_p3)
}
  0x23   : > { %457 = dma.hbm_to_vmem [thread:$0]  (!%p649_p8), %s645_s12, 128, %s647_s14, %s210_s16  }
  0x24   : > { %p734_p0 = scmp.lt.s32.totalorder %s560_s24, 3  ;;  %p735_p4 = scmp.ge.s32.totalorder %s560_s24, 1 }
  0x26   : > { %p226_p12 = pnand %p735_p4, %p734_p0 }
  0x27   : > { %s231_s10 = sand.u32 (!%p226_p12), 1, %s552_s22  }
  0x28   : > { %229 = sbr.rel (%p226_p12) target bundleno = 583 (0x247), region = 44  ;;  %s435_s11 = sshll.u32 (!%p226_p12), %s231_s10, 3 }
  0x29   : > { %s232_s13 = scalar_lea.sflag (!%p226_p12), [#allocation3], %s231_s10  ;;  %s235_s17 = scalar_lea.vmem (!%p226_p12), [#allocation2], %s435_s11 }
  0x2f   : > { %543 = dma.done.wait (%p636_p7), %s232_s13, 128  }
  0x30   : > { %545 = vsyncadd (%p636_p7), %s232_s13, 4294967168  ;;  %vm271_vm0 = vcmask 130048   ;;  %v268_v0 = vld [vmem:[%s235_s17] sm:$0xff]  ;;  %v563_v8 = vmov 0.0   ;;  %vm564_vm1 = vmmov 0   ;;  %p263_p7 = scmp.lt.s32.totalorder %s619_s25, 1 }
  0x31   : > { %v272_v1 = vsel %vm271_vm0, %v268_v0, 0.0  ;;  %v493_v7 = vld [vmem:[%s728_s3] sm:$0xff]   ;;  %446 = vmatprep.subr.bf16.mxu0 %v563_v8  ;;  %448 = vmatprep.mubr.msk.bf16.mxu0 %vm564_vm1, %v563_v8  ;;  %vm362_vm2 = vcmask 261120  }
  0x32   : > { %273 = vadd.xlane.f32.xlu0 %v272_v1  ;;  %447 = vmatpush3.bf16.msra.mxu0 %v493_v7  ;;  %v437_v13 = vld [vmem:[%s726_s1] ss:$0 sm:$0xff]  ;;  %s741_s25 = smov (!%p263_p7, %s619_s25), 1 }
  0x33   : > { %v438_v15 = vld [vmem:[%s727_s2] ss:$0 sm:$0xff]  ;;  %s436_s20 = sshll.u32 %s741_s25, 3 }
  0x34   : > { %v439_v19 = vld [vmem:[%s729_s4] ss:$0 sm:$0xff]  ;;  %s266_s8 = scalar_lea.vmem %s731_s6, %s436_s20 }
  0x35   : > { %v360_v23 = vld [vmem:[%s730_s5] sm:$0xff] }
  0xbf   : > { %v274_v2 = vpop.xlane.xlu0 %273 }
  0xc0   : > { %v276_v3 = vmul.f32 0.0625, %v274_v2 }
  0xc2   : > { %v277_v4 = vsub.f32 %v268_v0, %v276_v3 }
  0xc4   : > { %v278_v5 = vmul.f32 %v277_v4, %v277_v4 }
  0xc6   : > { %v279_v6 = vsel %vm271_vm0, %v278_v5, 0.0 }
  0xc7   : > { %280 = vadd.xlane.f32.xlu0 %v279_v6 }
 0x154   : > { %v281_v9 = vpop.xlane.xlu0 %280 }
 0x155   : > { %v282_v10 = vmul.f32 0.0625, %v281_v9 }
 0x157   : > { %v283_v11 = vadd.f32 1e-05, %v282_v10 }
 0x159   : > { %494 = vrsqrt.f32 %v283_v11 }
 0x163   : > { %v495_v12 = vpop.eup %494 }
 0x164   : > { %v285_v14 = vmul.f32 %v495_v12, %v277_v4 }
 0x166   : > { %v292_v16 = vmul.f32 %v437_v13, %v285_v14 }
 0x168   : > { %v299_v17 = vadd.f32 %v438_v15, %v292_v16 }
 0x16a   : > { %v300_v18 = vpack.c.bf16 %v299_v17, %v299_v17 }
 0x16c   : > { %449 = vmatmul.mubr.msk.bf16.vlgmr.msra.gmra.mrb[0].mxu0 %vm271_vm0, %v300_v18 }
 0x23f   : > { %v353_v20 = vpop.f32.mrb[0].mxu0 }
 0x240   : > { %v354_v21 = vadd.f32 %v439_v19, %v353_v20  ;;  %v450_v22 = vpop.f32.mrb[1].mxu0 }
 0x241   : > { %v356_v24 = vpop.f32.mrb[2].mxu0 }
 0x242   : > { %v359_v25 = vmax.f32 %v354_v21, 0.0  ;;  %v451_v26 = vpop.f32.mrb[3].mxu0 }
 0x244   : > { %v361_v27 = vadd.f32 %v360_v23, %v359_v25 }
 0x246   : > { %363 = vst.msk [vmem:[%s266_s8] sm:$0xff] %vm362_vm2, %v361_v27 }
 0x247 PF: > { %p16_p8 = scmp.ge.s32.totalorder %s622_s26, 4   ;;  %s736_s21 = smov %s552_s22 }
 0x248   : > { %s737_s22 = smov %s556_s23  ;;  %s738_s23 = smov %s632_s29 }
 0x249   : > { %s739_s24 = smov %s622_s26  ;;  %18 = sbr.rel (!%p16_p8) target bundleno = 3 (0x3), region = 84 }
 0x250   :  { %383 = vsyncpa [#allocation3], 1 }
 0x251   :  { %385 = vsyncpa [#allocation3 + $0x1], 1 }

// kernel: _lambda_.8
= control target key start
LH: loop header
LB: loop body
LE: loop exit
PB: predicated region body
PF: predicated region fallthrough
CT: control target
= control target key end

     0   :  { %s4658_s27 = smov 0   ;;  %s5305_s0 = inlined_call_operand.vmem [shape: f32[2,8,32], index: 0, kind: input, shape index: {}]   ;;  %s5306_s1 = inlined_call_operand.vmem [shape: f32[2,1,8], index: 1, kind: input, shape index: {}]   ;;  %s5307_s2 = inlined_call_operand.vmem [shape: bf16[8,32,4], index: 2, kind: input, shape index: {}]   ;;  %s5308_s3 = inlined_call_operand.vmem [shape: f32[8,1,4], index: 3, kind: input, shape index: {}, may-alias: {3,5,7}]   ;;  %s5309_s4 = inlined_call_operand.vmem [shape: bf16[8,32,4], index: 4, kind: input, shape index: {}]   ;;  %s5310_s5 = inlined_call_operand.vmem [shape: f32[8,1,4], index: 5, kind: input, shape index: {}, may-alias: {3,5,7}]   ;;  %s5311_s6 = inlined_call_operand.vmem [shape: bf16[8,32,4], index: 6, kind: input, shape index: {}]   ;;  %s5312_s7 = inlined_call_operand.vmem [shape: f32[8,1,4], index: 7, kind: input, shape index: {}, may-alias: {3,5,7}]   ;;  %s5313_s8 = inlined_call_operand.vmem [shape: bf16[8,4,32], index: 8, kind: input, shape index: {}]   ;;  %s5314_s9 = inlined_call_operand.vmem [shape: f32[1,32], index: 9, kind: input, shape index: {}, may-alias: {9,11,15,17}]   ;;  %s5315_s10 = inlined_call_operand.vmem [shape: f32[1,32], index: 10, kind: input, shape index: {}, may-alias: {10,16}]   ;;  %s5316_s11 = inlined_call_operand.vmem [shape: f32[1,32], index: 11, kind: input, shape index: {}, may-alias: {9,11,15,17}]   ;;  %s5317_s12 = inlined_call_operand.vmem [shape: bf16[32,64], index: 12, kind: input, shape index: {}]   ;;  %s5318_s13 = inlined_call_operand.vmem [shape: f32[1,64], index: 13, kind: input, shape index: {}]   ;;  %s5319_s14 = inlined_call_operand.vmem [shape: bf16[64,32], index: 14, kind: input, shape index: {}]   ;;  %s5320_s15 = inlined_call_operand.vmem [shape: f32[1,32], index: 15, kind: input, shape index: {}, may-alias: {9,11,15,17}]   ;;  %s5321_s16 = inlined_call_operand.vmem [shape: f32[1,32], index: 16, kind: input, shape index: {}, may-alias: {10,16}]   ;;  %s5322_s17 = inlined_call_operand.vmem [shape: f32[1,32], index: 17, kind: input, shape index: {}, may-alias: {9,11,15,17}]   ;;  %s5323_s18 = inlined_call_operand.vmem [shape: f32[2,8,32], index: 18, kind: output, shape index: {}]  }
   0x1   :  { %5325 = sst [smem:[#allocation2_spill]] %s5305_s0 }
   0x2   :  { %5326 = sst [smem:[#allocation3_spill]] %s5306_s1 }
   0x3   :  { %5327 = sst [smem:[#allocation4_spill]] %s5307_s2 }
   0x4 LB: > { %s3710_s28 = sadd.s32 4294967295, %s4559_s27   ;;  %p3714_p0 = scmp.ge.s32.totalorder %s4559_s27, 1  ;;  %s4559_s27 = sphi %s4658_s27, %s28_s27  }
   0x5   : > { %p519_p1 = scmp.lt.s32.totalorder %s4559_s27, 3 }
   0x7   : > { %p520_p2 = pnand %p3714_p0, %p519_p1 }
   0x8   : > { %v4461_v0 = vld [vmem:[%s5309_s4] sm:$0xff] (!%p520_p2)   ;;  %v4561_v1 = vmov (!%p520_p2), 0.0   ;;  %v4462_v2 = vld [vmem:[%s5309_s4 + $0x8] sm:$0xff] (!%p520_p2)   ;;  %s5328_s21 = sld [smem:[#allocation4_spill]] (!%p520_p2)  ;;  %vm4562_vm0 = vmmov (!%p520_p2), 0   ;;  %p574_p3 = scmp.lt.s32.totalorder (!%p520_p2), %s3710_s28, 1 }
   0x9   : > { %523 = sbr.rel (%p520_p2) target bundleno = 8897 (0x22c1), region = 92  ;;  %4103 = vmatprep.subr.bf16.mxu1 (!%p520_p2), %v4561_v1  ;;  %4095 = vmatprep.subr.bf16.mxu0 (!%p520_p2), %v4561_v1  ;;  %s5329_s26 = sld [smem:[#allocation2_spill]] (!%p520_p2)  ;;  %vm612_vm1 = vcmask (!%p520_p2), 261120   ;;  %v3721_v7 = vld [vmem:[%s5310_s5] ss:$0 sm:$0xff] (!%p520_p2)  ;;  %vm784_vm2 = vcmask (!%p520_p2), 31744  }
   0xa   : > { %4104 = vmatpush3.bf16.msra.mxu1 (!%p520_p2), %v4461_v0  ;;  %4107 = vmatprep.mubr.msk.bf16.mxu1 (!%p520_p2), %vm4562_vm0, %v4561_v1  ;;  %v3717_v14 = vld [vmem:[%s5308_s3] ss:$0 sm:$0xff] (!%p520_p2)  ;;  %v4466_v23 = vld [vmem:[%s5311_s6 + $0x8] sm:$0xff] (!%p520_p2)   ;;  %s5330_s30 = sld [smem:[#allocation3_spill]] (!%p520_p2)  ;;  %vm839_vm3 = vcmask (!%p520_p2), 64512   ;;  %vm856_vm4 = vcmask (!%p520_p2), 1043456  }
   0xb   : > { %4105 = vmatprep.subr.bf16.mxu1 (!%p520_p2), %v4561_v1  ;;  %4099 = vmatprep.mubr.msk.bf16.mxu0 (!%p520_p2), %vm4562_vm0, %v4561_v1  ;;  %v4465_v22 = vld [vmem:[%s5311_s6] sm:$0xff] (!%p520_p2)   ;;  %v4467_v50 = vld [vmem:[%s5309_s4 + $0x10] sm:$0xff] (!%p520_p2)   ;;  %v4468_v52 = vld [vmem:[%s5309_s4 + $0x18] sm:$0xff] (!%p520_p2)   ;;  %vm1212_vm5 = vcmask (!%p520_p2), 1041408   ;;  %vm3573_vm6 = vcmask (!%p520_p2), 523264  }
   0xc   : > { %v3725_v40 = vld [vmem:[%s5312_s7] ss:$0 sm:$0xff] (!%p520_p2)  ;;  %v3746_v61 = vld [vmem:[%s5310_s5 + $0x1] ss:$0 sm:$0xff] (!%p520_p2) }
   0xe   : > { %v4463_v3 = vld [vmem:[%s5328_s21] sm:$0xff] (!%p520_p2)   ;;  %v4464_v4 = vld [vmem:[%s5328_s21 + $0x8] sm:$0xff] (!%p520_p2)   ;;  %4106 = vmatpush3.bf16.msra.mxu1 (!%p520_p2), %v4462_v2  ;;  %v4469_v45 = vld [vmem:[%s5328_s21 + $0x10] sm:$0xff] (!%p520_p2)  }
   0xf   : > { %4096 = vmatpush3.bf16.msra.mxu0 (!%p520_p2), %v4463_v3  ;;  %4119 = vmatprep.subr.bf16.mxu1 (!%p520_p2), %v4561_v1  ;;  %v4470_v46 = vld [vmem:[%s5328_s21 + $0x18] sm:$0xff] (!%p520_p2)   ;;  %v3737_v3 = vld [vmem:[%s5308_s3 + $0x1] ss:$0 sm:$0xff] (!%p520_p2) }
  0x10   : > { %s5332_s28 = smov (!%p574_p3, %s3710_s28), 1  ;;  %4097 = vmatprep.subr.bf16.mxu0 %v4561_v1 }
  0x11   : > { %s3715_s23 = sshll.u32 %s5332_s28, 3  ;;  %s4736_s0 = scalar_lea.vmem %s5330_s30, %s5332_s28 }
  0x12   : > { %s4694_s29 = scalar_lea.vmem %s5329_s26, %s3715_s23  ;;  %v4739_v25 = vld [vmem:[%s4736_s0] ss:$0 sm:$0xff]  ;;  %s584_s20 = scalar_lea.vmem %s5323_s18, %s3715_s23 }
  0x13   : > { %v586_v5 = vld [vmem:[%s4694_s29] sm:$0xff]  ;;  %4098 = vmatpush3.bf16.msra.mxu0 %v4464_v4 }
  0x14   : > { %v4698_v6 = vpack.c.bf16 %v586_v5, %v586_v5  ;;  %4111 = vmatprep.subr.bf16.mxu0 %v4561_v1 }
  0x16   : > { %4108 = vmatmul.mubr.msk.bf16.vlgmr.msra.gmra.mrb[0].mxu1 %vm612_vm1, %v4698_v6  ;;  %4100 = vmatmul.mubr.msk.bf16.vlgmr.msra.gmra.mrb[0].mxu0 %vm612_vm1, %v4698_v6 }
  0x17   : > { %4121 = vmatprep.mubr.msk.bf16.mxu1 %vm4562_vm0, %v4561_v1  ;;  %4115 = vmatprep.mubr.msk.bf16.mxu0 %vm4562_vm0, %v4561_v1 }
  0x18   : > { %4112 = vmatpush3.bf16.msra.mxu0 %v4465_v22 }
  0x19   : > { %4113 = vmatprep.subr.bf16.mxu0 %v4561_v1 }
  0x1c   : > { %4114 = vmatpush3.bf16.msra.mxu0 %v4466_v23 }
  0x1d   : > { %4125 = vmatprep.subr.bf16.mxu0 %v4561_v1 }
  0x1f   : > { %4116 = vmatmul.mubr.msk.bf16.vlgmr.msra.gmra.mrb[4].mxu0 %vm612_vm1, %v4698_v6 }
  0x20   : > { %4127 = vmatprep.mubr.msk.bf16.mxu0 %vm4562_vm0, %v4561_v1 }
  0xe9   : > { %v713_v8 = vpop.f32.mrb[0].mxu1  ;;  %v650_v9 = vpop.f32.mrb[0].mxu0 }
  0xea   : > { %v714_v10 = vadd.f32 %v3721_v7, %v713_v8  ;;  %v4109_v11 = vpop.f32.mrb[1].mxu1  ;;  %v4101_v12 = vpop.f32.mrb[1].mxu0  ;;  %v651_v20 = vadd.f32 %v3717_v14, %v650_v9 }
  0xeb   : > { %v716_v13 = vpop.f32.mrb[2].mxu1  ;;  %v653_v15 = vpop.f32.mrb[2].mxu0  ;;  %v4472_v11 = vld [vmem:[%s5311_s6 + $0x18] sm:$0xff]  }
  0xec   : > { %v783_v16 = vpack.c.bf16 %v714_v10, %v714_v10  ;;  %v4110_v17 = vpop.f32.mrb[3].mxu1  ;;  %v4102_v18 = vpop.f32.mrb[3].mxu0  ;;  %v782_v21 = vpack.c.bf16 %v651_v20, %v651_v20  ;;  %v4471_v10 = vld [vmem:[%s5311_s6 + $0x10] sm:$0xff]  }
  0xee   : > { %v789_v19 = vsel %vm784_vm2, %v783_v16, 0 }
  0xef   : > { %4120 = vmatpush3.bf16.xpose.msra.mxu1 %v789_v19  ;;  %v3755_v19 = vld [vmem:[%s5312_s7 + $0x1] ss:$0 sm:$0xff] }
  0xf0   : > { %4131 = vmatprep.subr.bf16.mxu1 %v4561_v1 }
  0xf2   : > { %v776_v37 = vpop.f32.mrb[4].mxu0 }
  0xf3   : > { %v4117_v38 = vpop.f32.mrb[5].mxu0  ;;  %v777_v42 = vadd.f32 %v3725_v40, %v776_v37  ;;  %v901_v37 = vld [vmem:[%s5313_s8] sm:$0x3] }
  0xf4   : > { %v779_v39 = vpop.f32.mrb[6].mxu0  ;;  %v1260_v40 = vsel %vm1212_vm5, %v901_v37, 0 }
  0xf5   : > { %v4118_v41 = vpop.f32.mrb[7].mxu0  ;;  %v852_v43 = vpack.c.bf16 %v777_v42, %v777_v42 }
  0xf6   : > { %4122 = vmatmul.mubr.msk.bf16.vlgmr.msra.gmra.mrb[4].mxu1 %vm784_vm2, %v782_v21  ;;  %v4473_v41 = vld [vmem:[%s5309_s4 + $0x20] sm:$0xff]  }
  0xf7   : > { %4135 = vmatprep.mubr.msk.bf16.mxu1 %vm4562_vm0, %v4561_v1  ;;  %v858_v44 = vsel %vm856_vm4, %v852_v43, 0  ;;  %4132 = vmatpush3.bf16.msra.mxu1 %v4469_v45  ;;  %v4474_v43 = vld [vmem:[%s5309_s4 + $0x28] sm:$0xff]   ;;  %v4475_v45 = vld [vmem:[%s5328_s21 + $0x20] sm:$0xff]  }
  0xf8   : > { %4126 = vmatpush3.bf16.msra.mxu0 %v858_v44  ;;  %4133 = vmatprep.subr.bf16.mxu1 %v4561_v1 }
  0xf9   : > { %4139 = vmatprep.subr.bf16.mxu0 %v4561_v1 }
  0xfb   : > { %4134 = vmatpush3.bf16.msra.mxu1 %v4470_v46 }
  0xfc   : > { %4147 = vmatprep.subr.bf16.mxu1 %v4561_v1 }
  0xfe   : > { %4136 = vmatmul.mubr.msk.bf16.vlgmr.msra.gmra.mrb[8].mxu1 %vm612_vm1, %v4698_v6 }
  0xff   : > { %4151 = vmatprep.mubr.msk.bf16.mxu1 %vm4562_vm0, %v4561_v1  ;;  %4148 = vmatpush3.bf16.msra.mxu1 %v4471_v10 }
 0x100   : > { %4149 = vmatprep.subr.bf16.mxu1 %v4561_v1 }
 0x103   : > { %4150 = vmatpush3.bf16.msra.mxu1 %v4472_v11 }
 0x104   : > { %4161 = vmatprep.subr.bf16.mxu1 %v4561_v1 }
 0x106   : > { %4152 = vmatmul.mubr.msk.bf16.vlgmr.msra.gmra.mrb[12].mxu1 %vm612_vm1, %v4698_v6 }
 0x107   : > { %4163 = vmatprep.mubr.msk.bf16.mxu1 %vm4562_vm0, %v4561_v1 }
 0x1c9   : > { %v825_v24 = vpop.f32.mrb[4].mxu1 }
 0x1ca   : > { %v831_v26 = vmul.f32 0.5, %v825_v24  ;;  %v4123_v27 = vpop.f32.mrb[5].mxu1 }
 0x1cb   : > { %v828_v28 = vpop.f32.mrb[6].mxu1 }
 0x1cc   : > { %v4124_v29 = vpop.f32.mrb[7].mxu1  ;;  %v838_v30 = vadd.f32 %v4739_v25, %v831_v26 }
 0x1ce   : > { %v840_v31 = vsel %vm839_vm3, %v838_v30, -inf }
 0x1cf   : > { %841 = vmax.xlane.f32.xlu0 %v840_v31 }
 0x1d1   : > { %v961_v53 = vpop.f32.mrb[8].mxu1 }
 0x1d2   : > { %v4137_v54 = vpop.f32.mrb[9].mxu1  ;;  %v962_v8 = vadd.f32 %v3737_v3, %v961_v53 }
 0x1d3   : > { %v964_v55 = vpop.f32.mrb[10].mxu1 }
 0x1d4   : > { %v4138_v56 = vpop.f32.mrb[11].mxu1  ;;  %v1097_v9 = vpack.c.bf16 %v962_v8, %v962_v8  ;;  %v3778_v55 = vld [vmem:[%s5310_s5 + $0x2] ss:$0 sm:$0xff] }
 0x1d9   : > { %v1091_v20 = vpop.f32.mrb[12].mxu1 }
 0x1da   : > { %v1092_v21 = vadd.f32 %v3755_v19, %v1091_v20  ;;  %v4153_v22 = vpop.f32.mrb[13].mxu1 }
 0x1db   : > { %v1094_v23 = vpop.f32.mrb[14].mxu1 }
 0x1dc   : > { %v1159_v24 = vpack.c.bf16 %v1092_v21, %v1092_v21  ;;  %v4154_v26 = vpop.f32.mrb[15].mxu1 }
 0x1de   : > { %v1164_v27 = vsel %vm856_vm4, %v1159_v24, 0 }
 0x1df   : > { %4162 = vmatpush3.bf16.msra.mxu1 %v1164_v27 }
 0x1e0   : > { %4173 = vmatprep.subr.bf16.mxu1 %v4561_v1 }
 0x25c   : > { %v842_v32 = vpop.xlane.xlu0 %841 }
 0x25d   : > { %v843_v33 = vsub.f32 %v838_v30, %v842_v32 }
 0x25f   : > { %v844_v34 = vmul.f32 1.442695, %v843_v33  ;;  %v3761_v33 = vld [vmem:[%s5313_s8 + $0x2] sm:$0x3] }
 0x261   : > { %4515 = vpow2.f32 %v844_v34  ;;  %v1214_v34 = vsel %vm1212_vm5, %v3761_v33, 0 }
 0x26b   : > { %v4516_v35 = vpop.eup %4515 }
 0x26c   : > { %v846_v36 = vsel %vm839_vm3, %v4516_v35, 0.0 }
 0x26d   : > { %847 = vadd.xlane.f32.xlu0 %v846_v36 }
 0x2fa   : > { %v848_v47 = vpop.xlane.xlu0 %847 }
 0x2fb   : > { %4517 = vrcp.f32 %v848_v47 }
 0x305   : > { %v4518_v48 = vpop.eup %4517 }
 0x306   : > { %v850_v49 = vmul.f32 %v4518_v48, %v4516_v35 }
 0x308   : > { %v851_v51 = vpack.c.bf16 %v850_v49, %v850_v49 }
 0x30a   : > { %4128 = vmatmul.mubr.msk.bf16.vlgmr.msra.gmra.mrb[8].mxu0 %vm839_vm3, %v851_v51 }
 0x30b   : > { %4140 = vmatpush3.bf16.msra.mxu0 %v4467_v50  ;;  %4143 = vmatprep.mubr.msk.bf16.mxu0 %vm4562_vm0, %v4561_v1  ;;  %v4476_v50 = vld [vmem:[%s5328_s21 + $0x28] sm:$0xff]  }
 0x30c   : > { %4141 = vmatprep.subr.bf16.mxu0 %v4561_v1 }
 0x30f   : > { %4142 = vmatpush3.bf16.msra.mxu0 %v4468_v52 }
 0x310   : > { %4155 = vmatprep.subr.bf16.mxu0 %v4561_v1 }
 0x312   : > { %4144 = vmatmul.mubr.msk.bf16.vlgmr.msra.gmra.mrb[12].mxu0 %vm612_vm1, %v4698_v6 }
 0x313   : > { %4157 = vmatprep.mubr.msk.bf16.mxu0 %vm4562_vm0, %v4561_v1 }
 0x3dd   : > { %v4776_v57 = vpop.f32.mrb[8].mxu0 }
 0x3de   : > { %v4129_v58 = vpop.f32.mrb[9].mxu0  ;;  %v900_v42 = vpack.c.bf16 %v4776_v57, %v4776_v57 }
 0x3df   : > { %v897_v59 = vpop.f32.mrb[10].mxu0 }
 0x3e0   : > { %v4130_v60 = vpop.f32.mrb[11].mxu0 }
 0x3e5   : > { %v1026_v62 = vpop.f32.mrb[12].mxu0 }
 0x3e6   : > { %v1027_v63 = vadd.f32 %v3746_v61, %v1026_v62  ;;  %v4145_v0 = vpop.f32.mrb[13].mxu0 }
 0x3e7   : > { %v1029_v2 = vpop.f32.mrb[14].mxu0 }
 0x3e8   : > { %v1098_v4 = vpack.c.bf16 %v1027_v63, %v1027_v63  ;;  %v4146_v5 = vpop.f32.mrb[15].mxu0 }
 0x3e9   : > { %v3769_v5 = vld [vmem:[%s5308_s3 + $0x2] ss:$0 sm:$0xff] }
 0x3ea   : > { %v1103_v7 = vsel %vm784_vm2, %v1098_v4, 0 }
 0x3eb   : > { %4156 = vmatpush3.bf16.xpose.msra.mxu0 %v1103_v7 }
 0x3ec   : > { %4167 = vmatprep.subr.bf16.mxu0 %v4561_v1 }
 0x3f2   : > { %4158 = vmatmul.mubr.msk.bf16.vlgmr.msra.gmra.mrb[16].mxu0 %vm784_vm2, %v1097_v9 }
 0x3f3   : > { %4169 = vmatprep.mubr.msk.bf16.mxu0 %vm4562_vm0, %v4561_v1  ;;  %4168 = vmatpush3.bf16.msra.mxu0 %v1214_v34 }
 0x3f4   : > { %4179 = vmatprep.subr.bf16.mxu0 %v4561_v1 }
 0x4c5   : > { %v1139_v12 = vpop.f32.mrb[16].mxu0 }
 0x4c6   : > { %v1145_v13 = vmul.f32 0.5, %v1139_v12  ;;  %v4159_v14 = vpop.f32.mrb[17].mxu0 }
 0x4c7   : > { %v1142_v15 = vpop.f32.mrb[18].mxu0  ;;  %v4478_v14 = vld [vmem:[%s5311_s6 + $0x28] sm:$0xff]  }
 0x4c8   : > { %v4160_v16 = vpop.f32.mrb[19].mxu0  ;;  %v1146_v17 = vadd.f32 %v4739_v25, %v1145_v13  ;;  %v4477_v13 = vld [vmem:[%s5311_s6 + $0x20] sm:$0xff]  }
 0x4ca   : > { %v1147_v18 = vsel %vm839_vm3, %v1146_v17, -inf }
 0x4cb   : > { %1148 = vmax.xlane.f32.xlu1 %v1147_v18 }
 0x558   : > { %v1149_v28 = vpop.xlane.xlu1 %1148 }
 0x559   : > { %v1150_v29 = vsub.f32 %v1146_v17, %v1149_v28 }
 0x55b   : > { %v1151_v30 = vmul.f32 1.442695, %v1150_v29 }
 0x55d   : > { %4519 = vpow2.f32 %v1151_v30 }
 0x567   : > { %v4520_v31 = vpop.eup %4519 }
 0x568   : > { %v1153_v32 = vsel %vm839_vm3, %v4520_v31, 0.0 }
 0x569   : > { %1154 = vadd.xlane.f32.xlu1 %v1153_v32 }
 0x5f6   : > { %v1155_v35 = vpop.xlane.xlu1 %1154 }
 0x5f7   : > { %4521 = vrcp.f32 %v1155_v35 }
 0x601   : > { %v4522_v36 = vpop.eup %4521 }
 0x602   : > { %v1157_v38 = vmul.f32 %v4522_v36, %v4520_v31  ;;  %v3787_v31 = vld [vmem:[%s5312_s7 + $0x2] ss:$0 sm:$0xff]  ;;  %v3793_v36 = vld [vmem:[%s5313_s8 + $0x4] sm:$0x3] }
 0x603   : > { %v1613_v37 = vsel %vm1212_vm5, %v3793_v36, 0 }
 0x604   : > { %v1158_v39 = vpack.c.bf16 %v1157_v38, %v1157_v38 }
 0x606   : > { %4164 = vmatmul.mubr.msk.bf16.vlgmr.msra.gmra.mrb[16].mxu1 %vm839_vm3, %v1158_v39 }
 0x607   : > { %4174 = vmatpush3.bf16.msra.mxu1 %v1260_v40  ;;  %4175 = vmatprep.mubr.msk.bf16.mxu1 %vm4562_vm0, %v4561_v1 }
 0x608   : > { %4187 = vmatprep.subr.bf16.mxu1 %v4561_v1 }
 0x60e   : > { %4176 = vmatmul.mubr.msk.bf16.vlgmr.msra.gmra.mrb[20].mxu1 %vm784_vm2, %v900_v42  ;;  %v4481_v42 = vld [vmem:[%s5328_s21 + $0x30] sm:$0xff]  }
 0x60f   : > { %4188 = vmatpush3.bf16.msra.mxu1 %v4473_v41  ;;  %4191 = vmatprep.mubr.msk.bf16.mxu1 %vm4562_vm0, %v4561_v1 }
 0x610   : > { %4189 = vmatprep.subr.bf16.mxu1 %v4561_v1 }
 0x613   : > { %4190 = vmatpush3.bf16.msra.mxu1 %v4474_v43  ;;  %v4482_v43 = vld [vmem:[%s5328_s21 + $0x38] sm:$0xff]  }
 0x614   : > { %4203 = vmatprep.subr.bf16.mxu1 %v4561_v1 }
 0x616   : > { %4192 = vmatmul.mubr.msk.bf16.vlgmr.msra.gmra.mrb[24].mxu1 %vm612_vm1, %v4698_v6 }
 0x617   : > { %4205 = vmatprep.mubr.msk.bf16.mxu1 %vm4562_vm0, %v4561_v1 }
 0x6d9   : > { %v1200_v44 = vpop.f32.mrb[16].mxu1 }
 0x6da   : > { %v1206_v46 = vpack.c.bf16 %v1200_v44, %v1200_v44  ;;  %v4165_v47 = vpop.f32.mrb[17].mxu1 }
 0x6db   : > { %v1203_v48 = vpop.f32.mrb[18].mxu1 }
 0x6dc   : > { %v4166_v49 = vpop.f32.mrb[19].mxu1  ;;  %4170 = vmatmul.mubr.msk.bf16.vlgmr.msra.gmra.mrb[20].mxu0 %vm784_vm2, %v1206_v46 }
 0x6dd   : > { %4180 = vmatpush3.bf16.msra.mxu0 %v4475_v45  ;;  %4183 = vmatprep.mubr.msk.bf16.mxu0 %vm4562_vm0, %v4561_v1  ;;  %v4479_v45 = vld [vmem:[%s5309_s4 + $0x30] sm:$0xff]  }
 0x6de   : > { %4181 = vmatprep.subr.bf16.mxu0 %v4561_v1 }
 0x6e1   : > { %v1296_v51 = vpop.f32.mrb[20].mxu1  ;;  %4182 = vmatpush3.bf16.msra.mxu0 %v4476_v50  ;;  %v4480_v50 = vld [vmem:[%s5309_s4 + $0x38] sm:$0xff]  }
 0x6e2   : > { %v4177_v52 = vpop.f32.mrb[21].mxu1  ;;  %4195 = vmatprep.subr.bf16.mxu0 %v4561_v1 }
 0x6e3   : > { %v1299_v53 = vpop.f32.mrb[22].mxu1 }
 0x6e4   : > { %v4178_v54 = vpop.f32.mrb[23].mxu1  ;;  %4184 = vmatmul.mubr.msk.bf16.vlgmr.msra.gmra.mrb[24].mxu0 %vm612_vm1, %v4698_v6 }
 0x6e5   : > { %4199 = vmatprep.mubr.msk.bf16.mxu0 %vm4562_vm0, %v4561_v1  ;;  %4196 = vmatpush3.bf16.msra.mxu0 %v4477_v13 }
 0x6e6   : > { %4197 = vmatprep.subr.bf16.mxu0 %v4561_v1 }
 0x6e9   : > { %v1426_v56 = vpop.f32.mrb[24].mxu1  ;;  %4198 = vmatpush3.bf16.msra.mxu0 %v4478_v14 }
 0x6ea   : > { %v1427_v57 = vadd.f32 %v3778_v55, %v1426_v56  ;;  %v4193_v58 = vpop.f32.mrb[25].mxu1  ;;  %4209 = vmatprep.subr.bf16.mxu0 %v4561_v1 }
 0x6eb   : > { %v1429_v59 = vpop.f32.mrb[26].mxu1 }
 0x6ec   : > { %v1498_v60 = vpack.c.bf16 %v1427_v57, %v1427_v57  ;;  %v4194_v61 = vpop.f32.mrb[27].mxu1  ;;  %4200 = vmatmul.mubr.msk.bf16.vlgmr.msra.gmra.mrb[28].mxu0 %vm612_vm1, %v4698_v6 }
 0x6ed   : > { %4211 = vmatprep.mubr.msk.bf16.mxu0 %vm4562_vm0, %v4561_v1 }
 0x6ee   : > { %v1503_v62 = vsel %vm784_vm2, %v1498_v60, 0  ;;  %v3809_v60 = vld [vmem:[%s5310_s5 + $0x3] ss:$0 sm:$0xff] }
 0x6ef   : > { %4204 = vmatpush3.bf16.xpose.msra.mxu1 %v1503_v62 }
 0x6f0   : > { %4215 = vmatprep.subr.bf16.mxu1 %v4561_v1 }
 0x7af   : > { %v1250_v63 = vpop.f32.mrb[20].mxu0 }
 0x7b0   : > { %v4859_v0 = vadd.f32 %v1296_v51, %v1250_v63  ;;  %v4171_v2 = vpop.f32.mrb[21].mxu0 }
 0x7b1   : > { %v1253_v3 = vpop.f32.mrb[22].mxu0 }
 0x7b2   : > { %v4172_v4 = vpop.f32.mrb[23].mxu0  ;;  %v3800_v3 = vld [vmem:[%s5308_s3 + $0x3] ss:$0 sm:$0xff] }
 0x7b7   : > { %v1361_v7 = vpop.f32.mrb[24].mxu0 }
 0x7b8   : > { %v1362_v8 = vadd.f32 %v3769_v5, %v1361_v7  ;;  %v4185_v9 = vpop.f32.mrb[25].mxu0 }
 0x7b9   : > { %v1364_v10 = vpop.f32.mrb[26].mxu0  ;;  %v4483_v9 = vld [vmem:[%s5311_s6 + $0x30] sm:$0xff]  }
 0x7ba   : > { %v1497_v11 = vpack.c.bf16 %v1362_v8, %v1362_v8  ;;  %v4186_v12 = vpop.f32.mrb[27].mxu0  ;;  %v4484_v10 = vld [vmem:[%s5311_s6 + $0x38] sm:$0xff]  }
 0x7bc   : > { %4206 = vmatmul.mubr.msk.bf16.vlgmr.msra.gmra.mrb[28].mxu1 %vm784_vm2, %v1497_v11 }
 0x7bd   : > { %4217 = vmatprep.mubr.msk.bf16.mxu1 %vm4562_vm0, %v4561_v1  ;;  %4216 = vmatpush3.bf16.msra.mxu1 %v1613_v37 }
 0x7be   : > { %4229 = vmatprep.subr.bf16.mxu1 %v4561_v1 }
 0x7bf   : > { %v1491_v28 = vpop.f32.mrb[28].mxu0 }
 0x7c0   : > { %v4201_v29 = vpop.f32.mrb[29].mxu0  ;;  %v1492_v33 = vadd.f32 %v3787_v31, %v1491_v28 }
 0x7c1   : > { %v1494_v30 = vpop.f32.mrb[30].mxu0 }
 0x7c2   : > { %v4202_v32 = vpop.f32.mrb[31].mxu0  ;;  %v1559_v34 = vpack.c.bf16 %v1492_v33, %v1492_v33 }
 0x7c3   : > { %v3824_v32 = vld [vmem:[%s5313_s8 + $0x6] sm:$0x3] }
 0x7c4   : > { %v1564_v35 = vsel %vm856_vm4, %v1559_v34, 0  ;;  %v1967_v33 = vsel %vm1212_vm5, %v3824_v32, 0 }
 0x7c5   : > { %4210 = vmatpush3.bf16.msra.mxu0 %v1564_v35 }
 0x7c6   : > { %4221 = vmatprep.subr.bf16.mxu0 %v4561_v1 }
 0x88f   : > { %v1539_v15 = vpop.f32.mrb[28].mxu1 }
 0x890   : > { %v1545_v16 = vmul.f32 0.5, %v1539_v15  ;;  %v4207_v17 = vpop.f32.mrb[29].mxu1 }
 0x891   : > { %v1542_v18 = vpop.f32.mrb[30].mxu1 }
 0x892   : > { %v4208_v19 = vpop.f32.mrb[31].mxu1  ;;  %v1546_v20 = vadd.f32 %v4739_v25, %v1545_v16 }
 0x894   : > { %v1547_v21 = vsel %vm839_vm3, %v1546_v20, -inf }
 0x895   : > { %1548 = vmax.xlane.f32.xlu0 %v1547_v21 }
 0x922   : > { %v1549_v22 = vpop.xlane.xlu0 %1548 }
 0x923   : > { %v1550_v23 = vsub.f32 %v1546_v20, %v1549_v22 }
 0x925   : > { %v1551_v24 = vmul.f32 1.442695, %v1550_v23 }
 0x927   : > { %4523 = vpow2.f32 %v1551_v24 }
 0x931   : > { %v4524_v26 = vpop.eup %4523 }
 0x932   : > { %v1553_v27 = vsel %vm839_vm3, %v4524_v26, 0.0 }
 0x933   : > { %1554 = vadd.xlane.f32.xlu1 %v1553_v27  ;;  %v3818_v27 = vld [vmem:[%s5312_s7 + $0x3] ss:$0 sm:$0xff] }
 0x9c0   : > { %v1555_v38 = vpop.xlane.xlu1 %1554 }
 0x9c1   : > { %4525 = vrcp.f32 %v1555_v38  ;;  %v4487_v38 = vld [vmem:[%s5328_s21 + $0x40] sm:$0xff]  }
 0x9cb   : > { %v4526_v39 = vpop.eup %4525 }
 0x9cc   : > { %v1557_v40 = vmul.f32 %v4526_v39, %v4524_v26  ;;  %v4488_v39 = vld [vmem:[%s5328_s21 + $0x48] sm:$0xff]  }
 0x9ce   : > { %v1558_v41 = vpack.c.bf16 %v1557_v40, %v1557_v40 }
 0x9d0   : > { %4212 = vmatmul.mubr.msk.bf16.vlgmr.msra.gmra.mrb[32].mxu0 %vm839_vm3, %v1558_v41  ;;  %v4485_v41 = vld [vmem:[%s5309_s4 + $0x40] sm:$0xff]  }
 0x9d1   : > { %4225 = vmatprep.mubr.msk.bf16.mxu0 %vm4562_vm0, %v4561_v1  ;;  %4222 = vmatpush3.bf16.msra.mxu0 %v4481_v42 }
 0x9d2   : > { %4223 = vmatprep.subr.bf16.mxu0 %v4561_v1 }
 0x9d5   : > { %4224 = vmatpush3.bf16.msra.mxu0 %v4482_v43 }
 0x9d6   : > { %4237 = vmatprep.subr.bf16.mxu0 %v4561_v1 }
 0x9d8   : > { %4226 = vmatmul.mubr.msk.bf16.vlgmr.msra.gmra.mrb[36].mxu0 %vm612_vm1, %v4698_v6 }
 0x9d9   : > { %4241 = vmatprep.mubr.msk.bf16.mxu0 %vm4562_vm0, %v4561_v1  ;;  %4238 = vmatpush3.bf16.msra.mxu0 %v4483_v9 }
 0x9da   : > { %4239 = vmatprep.subr.bf16.mxu0 %v4561_v1 }
 0x9dd   : > { %4240 = vmatpush3.bf16.msra.mxu0 %v4484_v10 }
 0x9de   : > { %4251 = vmatprep.subr.bf16.mxu0 %v4561_v1 }
 0x9e0   : > { %4242 = vmatmul.mubr.msk.bf16.vlgmr.msra.gmra.mrb[40].mxu0 %vm612_vm1, %v4698_v6 }
 0x9e1   : > { %4253 = vmatprep.mubr.msk.bf16.mxu0 %vm4562_vm0, %v4561_v1 }
 0xaa3   : > { %v1600_v44 = vpop.f32.mrb[32].mxu0 }
 0xaa4   : > { %v1606_v46 = vpack.c.bf16 %v1600_v44, %v1600_v44  ;;  %v4213_v47 = vpop.f32.mrb[33].mxu0 }
 0xaa5   : > { %v1603_v48 = vpop.f32.mrb[34].mxu0 }
 0xaa6   : > { %v4214_v49 = vpop.f32.mrb[35].mxu0  ;;  %4218 = vmatmul.mubr.msk.bf16.vlgmr.msra.gmra.mrb[32].mxu1 %vm784_vm2, %v1606_v46  ;;  %v4486_v46 = vld [vmem:[%s5309_s4 + $0x48] sm:$0xff]  }
 0xaa7   : > { %4230 = vmatpush3.bf16.msra.mxu1 %v4479_v45  ;;  %4233 = vmatprep.mubr.msk.bf16.mxu1 %vm4562_vm0, %v4561_v1 }
 0xaa8   : > { %4231 = vmatprep.subr.bf16.mxu1 %v4561_v1 }
 0xaab   : > { %4232 = vmatpush3.bf16.msra.mxu1 %v4480_v50  ;;  %v1715_v51 = vpop.f32.mrb[36].mxu0 }
 0xaac   : > { %4245 = vmatprep.subr.bf16.mxu1 %v4561_v1  ;;  %v4227_v52 = vpop.f32.mrb[37].mxu0  ;;  %v1716_v7 = vadd.f32 %v3800_v3, %v1715_v51 }
 0xaad   : > { %v1718_v53 = vpop.f32.mrb[38].mxu0 }
 0xaae   : > { %4234 = vmatmul.mubr.msk.bf16.vlgmr.msra.gmra.mrb[36].mxu1 %vm612_vm1, %v4698_v6  ;;  %v4228_v54 = vpop.f32.mrb[39].mxu0  ;;  %v1851_v8 = vpack.c.bf16 %v1716_v7, %v1716_v7 }
 0xaaf   : > { %4247 = vmatprep.mubr.msk.bf16.mxu1 %vm4562_vm0, %v4561_v1 }
 0xab3   : > { %v1845_v23 = vpop.f32.mrb[40].mxu0 }
 0xab4   : > { %v4243_v24 = vpop.f32.mrb[41].mxu0  ;;  %v1846_v29 = vadd.f32 %v3818_v27, %v1845_v23 }
 0xab5   : > { %v1848_v26 = vpop.f32.mrb[42].mxu0 }
 0xab6   : > { %v4244_v28 = vpop.f32.mrb[43].mxu0  ;;  %v1913_v30 = vpack.c.bf16 %v1846_v29, %v1846_v29 }
 0xab7   : > { %v3855_v28 = vld [vmem:[%s5313_s8 + $0x8] sm:$0x3] }
 0xab8   : > { %v1918_v31 = vsel %vm856_vm4, %v1913_v30, 0  ;;  %v2321_v29 = vsel %vm1212_vm5, %v3855_v28, 0 }
 0xab9   : > { %4252 = vmatpush3.bf16.msra.mxu0 %v1918_v31 }
 0xaba   : > { %4263 = vmatprep.subr.bf16.mxu0 %v4561_v1 }
 0xb79   : > { %v1649_v55 = vpop.f32.mrb[32].mxu1 }
 0xb7a   : > { %v4923_v56 = vadd.f32 %v1649_v55, %v4859_v0  ;;  %v4219_v57 = vpop.f32.mrb[33].mxu1 }
 0xb7b   : > { %v1652_v58 = vpop.f32.mrb[34].mxu1  ;;  %v3840_v57 = vld [vmem:[%s5310_s5 + $0x4] ss:$0 sm:$0xff] }
 0xb7c   : > { %v4220_v59 = vpop.f32.mrb[35].mxu1 }
 0xb81   : > { %v1780_v61 = vpop.f32.mrb[36].mxu1 }
 0xb82   : > { %v1781_v62 = vadd.f32 %v3809_v60, %v1780_v61  ;;  %v4235_v63 = vpop.f32.mrb[37].mxu1 }
 0xb83   : > { %v1783_v2 = vpop.f32.mrb[38].mxu1 }
 0xb84   : > { %v1852_v4 = vpack.c.bf16 %v1781_v62, %v1781_v62  ;;  %v4236_v5 = vpop.f32.mrb[39].mxu1  ;;  %v3831_v62 = vld [vmem:[%s5308_s3 + $0x4] ss:$0 sm:$0xff] }
 0xb85   : > { %v4489_v5 = vld [vmem:[%s5311_s6 + $0x40] sm:$0xff]  }
 0xb86   : > { %v1857_v0 = vsel %vm784_vm2, %v1852_v4, 0 }
 0xb87   : > { %4246 = vmatpush3.bf16.xpose.msra.mxu1 %v1857_v0  ;;  %v4490_v0 = vld [vmem:[%s5311_s6 + $0x48] sm:$0xff]  }
 0xb88   : > { %4257 = vmatprep.subr.bf16.mxu1 %v4561_v1 }
 0xb8e   : > { %4248 = vmatmul.mubr.msk.bf16.vlgmr.msra.gmra.mrb[40].mxu1 %vm784_vm2, %v1851_v8 }
 0xb8f   : > { %4259 = vmatprep.mubr.msk.bf16.mxu1 %vm4562_vm0, %v4561_v1  ;;  %4258 = vmatpush3.bf16.msra.mxu1 %v1967_v33 }
 0xb90   : > { %4271 = vmatprep.subr.bf16.mxu1 %v4561_v1 }
 0xc61   : > { %v1893_v11 = vpop.f32.mrb[40].mxu1 }
 0xc62   : > { %v1899_v12 = vmul.f32 0.5, %v1893_v11  ;;  %v4249_v13 = vpop.f32.mrb[41].mxu1 }
 0xc63   : > { %v1896_v14 = vpop.f32.mrb[42].mxu1 }
 0xc64   : > { %v4250_v15 = vpop.f32.mrb[43].mxu1  ;;  %v1900_v16 = vadd.f32 %v4739_v25, %v1899_v12 }
 0xc66   : > { %v1901_v17 = vsel %vm839_vm3, %v1900_v16, -inf }
 0xc67   : > { %1902 = vmax.xlane.f32.xlu0 %v1901_v17 }
 0xcf4   : > { %v1903_v18 = vpop.xlane.xlu0 %1902 }
 0xcf5   : > { %v1904_v19 = vsub.f32 %v1900_v16, %v1903_v18 }
 0xcf7   : > { %v1905_v20 = vmul.f32 1.442695, %v1904_v19 }
 0xcf9   : > { %4527 = vpow2.f32 %v1905_v20 }
 0xd03   : > { %v4528_v21 = vpop.eup %4527 }
 0xd04   : > { %v1907_v22 = vsel %vm839_vm3, %v4528_v21, 0.0 }
 0xd05   : > { %1908 = vadd.xlane.f32.xlu1 %v1907_v22  ;;  %v3849_v22 = vld [vmem:[%s5312_s7 + $0x4] ss:$0 sm:$0xff] }
 0xd92   : > { %v1909_v34 = vpop.xlane.xlu1 %1908 }
 0xd93   : > { %4529 = vrcp.f32 %v1909_v34  ;;  %v4493_v34 = vld [vmem:[%s5328_s21 + $0x50] sm:$0xff]  }
 0xd9d   : > { %v4530_v35 = vpop.eup %4529 }
 0xd9e   : > { %v1911_v36 = vmul.f32 %v4530_v35, %v4528_v21  ;;  %v4494_v35 = vld [vmem:[%s5328_s21 + $0x58] sm:$0xff]  }
 0xda0   : > { %v1912_v37 = vpack.c.bf16 %v1911_v36, %v1911_v36 }
 0xda2   : > { %4254 = vmatmul.mubr.msk.bf16.vlgmr.msra.gmra.mrb[44].mxu0 %vm839_vm3, %v1912_v37  ;;  %v4491_v37 = vld [vmem:[%s5309_s4 + $0x50] sm:$0xff]  }
 0xda3   : > { %4267 = vmatprep.mubr.msk.bf16.mxu0 %vm4562_vm0, %v4561_v1  ;;  %4264 = vmatpush3.bf16.msra.mxu0 %v4487_v38 }
 0xda4   : > { %4265 = vmatprep.subr.bf16.mxu0 %v4561_v1 }
 0xda7   : > { %4266 = vmatpush3.bf16.msra.mxu0 %v4488_v39 }
 0xda8   : > { %4279 = vmatprep.subr.bf16.mxu0 %v4561_v1 }
 0xdaa   : > { %4268 = vmatmul.mubr.msk.bf16.vlgmr.msra.gmra.mrb[48].mxu0 %vm612_vm1, %v4698_v6 }
 0xdab   : > { %4283 = vmatprep.mubr.msk.bf16.mxu0 %vm4562_vm0, %v4561_v1  ;;  %4280 = vmatpush3.bf16.msra.mxu0 %v4489_v5 }
 0xdac   : > { %4281 = vmatprep.subr.bf16.mxu0 %v4561_v1 }
 0xdaf   : > { %4282 = vmatpush3.bf16.msra.mxu0 %v4490_v0 }
 0xdb0   : > { %4293 = vmatprep.subr.bf16.mxu0 %v4561_v1 }
 0xdb2   : > { %4284 = vmatmul.mubr.msk.bf16.vlgmr.msra.gmra.mrb[52].mxu0 %vm612_vm1, %v4698_v6 }
 0xdb3   : > { %4295 = vmatprep.mubr.msk.bf16.mxu0 %vm4562_vm0, %v4561_v1 }
 0xe75   : > { %v1954_v40 = vpop.f32.mrb[44].mxu0 }
 0xe76   : > { %v1960_v42 = vpack.c.bf16 %v1954_v40, %v1954_v40  ;;  %v4255_v43 = vpop.f32.mrb[45].mxu0 }
 0xe77   : > { %v1957_v44 = vpop.f32.mrb[46].mxu0 }
 0xe78   : > { %v4256_v45 = vpop.f32.mrb[47].mxu0  ;;  %4260 = vmatmul.mubr.msk.bf16.vlgmr.msra.gmra.mrb[44].mxu1 %vm784_vm2, %v1960_v42  ;;  %v4492_v42 = vld [vmem:[%s5309_s4 + $0x58] sm:$0xff]  }
 0xe79   : > { %4272 = vmatpush3.bf16.msra.mxu1 %v4485_v41  ;;  %4275 = vmatprep.mubr.msk.bf16.mxu1 %vm4562_vm0, %v4561_v1 }
 0xe7a   : > { %4273 = vmatprep.subr.bf16.mxu1 %v4561_v1 }
 0xe7d   : > { %4274 = vmatpush3.bf16.msra.mxu1 %v4486_v46  ;;  %v2069_v47 = vpop.f32.mrb[48].mxu0 }
 0xe7e   : > { %4287 = vmatprep.subr.bf16.mxu1 %v4561_v1  ;;  %v4269_v48 = vpop.f32.mrb[49].mxu0  ;;  %v2070_v3 = vadd.f32 %v3831_v62, %v2069_v47 }
 0xe7f   : > { %v2072_v49 = vpop.f32.mrb[50].mxu0 }
 0xe80   : > { %4276 = vmatmul.mubr.msk.bf16.vlgmr.msra.gmra.mrb[48].mxu1 %vm612_vm1, %v4698_v6  ;;  %v4270_v50 = vpop.f32.mrb[51].mxu0  ;;  %v2205_v4 = vpack.c.bf16 %v2070_v3, %v2070_v3 }
 0xe81   : > { %4289 = vmatprep.mubr.msk.bf16.mxu1 %vm4562_vm0, %v4561_v1 }
 0xe85   : > { %v2199_v19 = vpop.f32.mrb[52].mxu0 }
 0xe86   : > { %v4285_v20 = vpop.f32.mrb[53].mxu0  ;;  %v2200_v24 = vadd.f32 %v3849_v22, %v2199_v19  ;;  %v3886_v22 = vld [vmem:[%s5313_s8 + $0xa] sm:$0x3] }
 0xe87   : > { %v2202_v21 = vpop.f32.mrb[54].mxu0 }
 0xe88   : > { %v4286_v23 = vpop.f32.mrb[55].mxu0  ;;  %v2267_v26 = vpack.c.bf16 %v2200_v24, %v2200_v24 }
 0xe89   : > { %v2675_v23 = vsel %vm1212_vm5, %v3886_v22, 0 }
 0xe8a   : > { %v2272_v27 = vsel %vm856_vm4, %v2267_v26, 0 }
 0xe8b   : > { %4294 = vmatpush3.bf16.msra.mxu0 %v2272_v27 }
 0xe8c   : > { %4305 = vmatprep.subr.bf16.mxu0 %v4561_v1 }
 0xf4b   : > { %v2003_v51 = vpop.f32.mrb[44].mxu1 }
 0xf4c   : > { %v4992_v52 = vadd.f32 %v2003_v51, %v4923_v56  ;;  %v4261_v53 = vpop.f32.mrb[45].mxu1 }
 0xf4d   : > { %v2006_v54 = vpop.f32.mrb[46].mxu1  ;;  %v3871_v53 = vld [vmem:[%s5310_s5 + $0x5] ss:$0 sm:$0xff] }
 0xf4e   : > { %v4262_v55 = vpop.f32.mrb[47].mxu1 }
 0xf53   : > { %v2134_v58 = vpop.f32.mrb[48].mxu1 }
 0xf54   : > { %v2135_v59 = vadd.f32 %v3840_v57, %v2134_v58  ;;  %v4277_v60 = vpop.f32.mrb[49].mxu1 }
 0xf55   : > { %v2137_v61 = vpop.f32.mrb[50].mxu1 }
 0xf56   : > { %v2206_v63 = vpack.c.bf16 %v2135_v59, %v2135_v59  ;;  %v4278_v2 = vpop.f32.mrb[51].mxu1  ;;  %v3862_v59 = vld [vmem:[%s5308_s3 + $0x5] ss:$0 sm:$0xff] }
 0xf57   : > { %v4495_v2 = vld [vmem:[%s5311_s6 + $0x50] sm:$0xff]  }
 0xf58   : > { %v2211_v56 = vsel %vm784_vm2, %v2206_v63, 0 }
 0xf59   : > { %4288 = vmatpush3.bf16.xpose.msra.mxu1 %v2211_v56  ;;  %v4496_v56 = vld [vmem:[%s5311_s6 + $0x58] sm:$0xff]  }
 0xf5a   : > { %4299 = vmatprep.subr.bf16.mxu1 %v4561_v1 }
 0xf60   : > { %4290 = vmatmul.mubr.msk.bf16.vlgmr.msra.gmra.mrb[52].mxu1 %vm784_vm2, %v2205_v4 }
 0xf61   : > { %4301 = vmatprep.mubr.msk.bf16.mxu1 %vm4562_vm0, %v4561_v1  ;;  %4300 = vmatpush3.bf16.msra.mxu1 %v2321_v29  ;;  %v4499_v29 = vld [vmem:[%s5328_s21 + $0x60] sm:$0xff]  }
 0xf62   : > { %4313 = vmatprep.subr.bf16.mxu1 %v4561_v1 }
0x1033   : > { %v2247_v7 = vpop.f32.mrb[52].mxu1 }
0x1034   : > { %v2253_v8 = vmul.f32 0.5, %v2247_v7  ;;  %v4291_v9 = vpop.f32.mrb[53].mxu1 }
0x1035   : > { %v2250_v10 = vpop.f32.mrb[54].mxu1 }
0x1036   : > { %v4292_v11 = vpop.f32.mrb[55].mxu1  ;;  %v2254_v12 = vadd.f32 %v4739_v25, %v2253_v8 }
0x1038   : > { %v2255_v13 = vsel %vm839_vm3, %v2254_v12, -inf }
0x1039   : > { %2256 = vmax.xlane.f32.xlu0 %v2255_v13 }
0x10c6   : > { %v2257_v14 = vpop.xlane.xlu0 %2256 }
0x10c7   : > { %v2258_v15 = vsub.f32 %v2254_v12, %v2257_v14 }
0x10c9   : > { %v2259_v16 = vmul.f32 1.442695, %v2258_v15 }
0x10cb   : > { %4531 = vpow2.f32 %v2259_v16 }
0x10d5   : > { %v4532_v17 = vpop.eup %4531 }
0x10d6   : > { %v2261_v18 = vsel %vm839_vm3, %v4532_v17, 0.0 }
0x10d7   : > { %2262 = vadd.xlane.f32.xlu1 %v2261_v18  ;;  %v3880_v18 = vld [vmem:[%s5312_s7 + $0x5] ss:$0 sm:$0xff] }
0x1164   : > { %v2263_v30 = vpop.xlane.xlu1 %2262 }
0x1165   : > { %4533 = vrcp.f32 %v2263_v30  ;;  %v4500_v30 = vld [vmem:[%s5328_s21 + $0x68] sm:$0xff]  }
0x116f   : > { %v4534_v31 = vpop.eup %4533 }
0x1170   : > { %v2265_v32 = vmul.f32 %v4534_v31, %v4532_v17 }
0x1172   : > { %v2266_v33 = vpack.c.bf16 %v2265_v32, %v2265_v32  ;;  %v4497_v32 = vld [vmem:[%s5309_s4 + $0x60] sm:$0xff]  }
0x1174   : > { %4296 = vmatmul.mubr.msk.bf16.vlgmr.msra.gmra.mrb[56].mxu0 %vm839_vm3, %v2266_v33 }
0x1175   : > { %4309 = vmatprep.mubr.msk.bf16.mxu0 %vm4562_vm0, %v4561_v1  ;;  %4306 = vmatpush3.bf16.msra.mxu0 %v4493_v34 }
0x1176   : > { %4307 = vmatprep.subr.bf16.mxu0 %v4561_v1 }
0x1179   : > { %4308 = vmatpush3.bf16.msra.mxu0 %v4494_v35 }
0x117a   : > { %4321 = vmatprep.subr.bf16.mxu0 %v4561_v1 }
0x117c   : > { %4310 = vmatmul.mubr.msk.bf16.vlgmr.msra.gmra.mrb[60].mxu0 %vm612_vm1, %v4698_v6 }
0x117d   : > { %4325 = vmatprep.mubr.msk.bf16.mxu0 %vm4562_vm0, %v4561_v1  ;;  %4322 = vmatpush3.bf16.msra.mxu0 %v4495_v2 }
0x117e   : > { %4323 = vmatprep.subr.bf16.mxu0 %v4561_v1 }
0x1181   : > { %4324 = vmatpush3.bf16.msra.mxu0 %v4496_v56 }
0x1182   : > { %4335 = vmatprep.subr.bf16.mxu0 %v4561_v1 }
0x1184   : > { %4326 = vmatmul.mubr.msk.bf16.vlgmr.msra.gmra.mrb[64].mxu0 %vm612_vm1, %v4698_v6 }
0x1185   : > { %4337 = vmatprep.mubr.msk.bf16.mxu0 %vm4562_vm0, %v4561_v1 }
0x1247   : > { %v2308_v36 = vpop.f32.mrb[56].mxu0 }
0x1248   : > { %v2314_v38 = vpack.c.bf16 %v2308_v36, %v2308_v36  ;;  %v4297_v39 = vpop.f32.mrb[57].mxu0 }
0x1249   : > { %v2311_v40 = vpop.f32.mrb[58].mxu0 }
0x124a   : > { %v4298_v41 = vpop.f32.mrb[59].mxu0  ;;  %4302 = vmatmul.mubr.msk.bf16.vlgmr.msra.gmra.mrb[56].mxu1 %vm784_vm2, %v2314_v38 }
0x124b   : > { %4314 = vmatpush3.bf16.msra.mxu1 %v4491_v37  ;;  %4317 = vmatprep.mubr.msk.bf16.mxu1 %vm4562_vm0, %v4561_v1  ;;  %v4498_v37 = vld [vmem:[%s5309_s4 + $0x68] sm:$0xff]  }
0x124c   : > { %4315 = vmatprep.subr.bf16.mxu1 %v4561_v1 }
0x124f   : > { %4316 = vmatpush3.bf16.msra.mxu1 %v4492_v42  ;;  %v2423_v43 = vpop.f32.mrb[60].mxu0 }
0x1250   : > { %4329 = vmatprep.subr.bf16.mxu1 %v4561_v1  ;;  %v4311_v44 = vpop.f32.mrb[61].mxu0  ;;  %v2424_v62 = vadd.f32 %v3862_v59, %v2423_v43 }
0x1251   : > { %v2426_v45 = vpop.f32.mrb[62].mxu0 }
0x1252   : > { %4318 = vmatmul.mubr.msk.bf16.vlgmr.msra.gmra.mrb[60].mxu1 %vm612_vm1, %v4698_v6  ;;  %v4312_v46 = vpop.f32.mrb[63].mxu0  ;;  %v2559_v63 = vpack.c.bf16 %v2424_v62, %v2424_v62 }
0x1253   : > { %4331 = vmatprep.mubr.msk.bf16.mxu1 %vm4562_vm0, %v4561_v1 }
0x1257   : > { %v2553_v15 = vpop.f32.mrb[64].mxu0 }
0x1258   : > { %v4327_v16 = vpop.f32.mrb[65].mxu0 }
0x1259   : > { %v2556_v17 = vpop.f32.mrb[66].mxu0 }
0x125a   : > { %v4328_v19 = vpop.f32.mrb[67].mxu0 }
0x125b   : > { %v3917_v19 = vld [vmem:[%s5313_s8 + $0xc] sm:$0x3] }
0x131d   : > { %v2357_v47 = vpop.f32.mrb[56].mxu1 }
0x131e   : > { %v5061_v48 = vadd.f32 %v2357_v47, %v4992_v52  ;;  %v4303_v49 = vpop.f32.mrb[57].mxu1  ;;  %v3902_v47 = vld [vmem:[%s5310_s5 + $0x6] ss:$0 sm:$0xff] }
0x131f   : > { %v2360_v50 = vpop.f32.mrb[58].mxu1 }
0x1320   : > { %v4304_v51 = vpop.f32.mrb[59].mxu1 }
0x1325   : > { %v2488_v54 = vpop.f32.mrb[60].mxu1 }
0x1326   : > { %v2489_v55 = vadd.f32 %v3871_v53, %v2488_v54  ;;  %v4319_v57 = vpop.f32.mrb[61].mxu1  ;;  %v3893_v54 = vld [vmem:[%s5308_s3 + $0x6] ss:$0 sm:$0xff] }
0x1327   : > { %v2491_v58 = vpop.f32.mrb[62].mxu1 }
0x1328   : > { %v2560_v60 = vpack.c.bf16 %v2489_v55, %v2489_v55  ;;  %v4320_v61 = vpop.f32.mrb[63].mxu1 }
0x1329   : > { %v4502_v61 = vld [vmem:[%s5311_s6 + $0x68] sm:$0xff]  }
0x132a   : > { %v2565_v52 = vsel %vm784_vm2, %v2560_v60, 0  ;;  %v4501_v60 = vld [vmem:[%s5311_s6 + $0x60] sm:$0xff]  }
0x132b   : > { %4330 = vmatpush3.bf16.xpose.msra.mxu1 %v2565_v52 }
0x132c   : > { %4341 = vmatprep.subr.bf16.mxu1 %v4561_v1 }
0x1332   : > { %4332 = vmatmul.mubr.msk.bf16.vlgmr.msra.gmra.mrb[64].mxu1 %vm784_vm2, %v2559_v63 }
0x1333   : > { %4343 = vmatprep.mubr.msk.bf16.mxu1 %vm4562_vm0, %v4561_v1  ;;  %4342 = vmatpush3.bf16.msra.mxu1 %v2675_v23 }
0x1334   : > { %4355 = vmatprep.subr.bf16.mxu1 %v4561_v1 }
0x1405   : > { %v2601_v3 = vpop.f32.mrb[64].mxu1 }
0x1406   : > { %v2607_v4 = vmul.f32 0.5, %v2601_v3  ;;  %v4333_v5 = vpop.f32.mrb[65].mxu1  ;;  %v5156_v3 = vld [vmem:[%s4736_s0] ss:$0 sm:$0xff] }
0x1407   : > { %v2604_v0 = vpop.f32.mrb[66].mxu1 }
0x1408   : > { %v4334_v7 = vpop.f32.mrb[67].mxu1  ;;  %v2608_v8 = vadd.f32 %v4739_v25, %v2607_v4  ;;  %v2554_v25 = vadd.f32 %v3880_v18, %v2553_v15 }
0x140a   : > { %v2609_v9 = vsel %vm839_vm3, %v2608_v8, -inf  ;;  %v2621_v20 = vpack.c.bf16 %v2554_v25, %v2554_v25  ;;  %v3029_v25 = vsel %vm1212_vm5, %v3917_v19, 0 }
0x140b   : > { %2610 = vmax.xlane.f32.xlu0 %v2609_v9 }
0x140c   : > { %v2626_v21 = vsel %vm856_vm4, %v2621_v20, 0 }
0x140d   : > { %4336 = vmatpush3.bf16.msra.mxu0 %v2626_v21 }
0x140e   : > { %4347 = vmatprep.subr.bf16.mxu0 %v4561_v1 }
0x1498   : > { %v2611_v10 = vpop.xlane.xlu0 %2610 }
0x1499   : > { %v2612_v11 = vsub.f32 %v2608_v8, %v2611_v10 }
0x149b   : > { %v2613_v12 = vmul.f32 1.442695, %v2612_v11 }
0x149d   : > { %4535 = vpow2.f32 %v2613_v12 }
0x14a7   : > { %v4536_v13 = vpop.eup %4535 }
0x14a8   : > { %v2615_v14 = vsel %vm839_vm3, %v4536_v13, 0.0 }
0x14a9   : > { %2616 = vadd.xlane.f32.xlu1 %v2615_v14  ;;  %v3911_v14 = vld [vmem:[%s5312_s7 + $0x6] ss:$0 sm:$0xff] }
0x1536   : > { %v2617_v24 = vpop.xlane.xlu1 %2616 }
0x1537   : > { %4537 = vrcp.f32 %v2617_v24  ;;  %v4505_v24 = vld [vmem:[%s5328_s21 + $0x70] sm:$0xff]  }
0x1541   : > { %v4538_v26 = vpop.eup %4537 }
0x1542   : > { %v2619_v27 = vmul.f32 %v4538_v26, %v4536_v13  ;;  %v4506_v26 = vld [vmem:[%s5328_s21 + $0x78] sm:$0xff]  }
0x1544   : > { %v2620_v28 = vpack.c.bf16 %v2619_v27, %v2619_v27 }
0x1546   : > { %4338 = vmatmul.mubr.msk.bf16.vlgmr.msra.gmra.mrb[68].mxu0 %vm839_vm3, %v2620_v28  ;;  %v4503_v28 = vld [vmem:[%s5309_s4 + $0x70] sm:$0xff]  }
0x1547   : > { %4351 = vmatprep.mubr.msk.bf16.mxu0 %vm4562_vm0, %v4561_v1  ;;  %4348 = vmatpush3.bf16.msra.mxu0 %v4499_v29 }
0x1548   : > { %4349 = vmatprep.subr.bf16.mxu0 %v4561_v1 }
0x154b   : > { %4350 = vmatpush3.bf16.msra.mxu0 %v4500_v30 }
0x154c   : > { %4363 = vmatprep.subr.bf16.mxu0 %v4561_v1 }
0x154e   : > { %4352 = vmatmul.mubr.msk.bf16.vlgmr.msra.gmra.mrb[72].mxu0 %vm612_vm1, %v4698_v6 }
0x154f   : > { %4367 = vmatprep.mubr.msk.bf16.mxu0 %vm4562_vm0, %v4561_v1  ;;  %4364 = vmatpush3.bf16.msra.mxu0 %v4501_v60 }
0x1550   : > { %4365 = vmatprep.subr.bf16.mxu0 %v4561_v1 }
0x1553   : > { %4366 = vmatpush3.bf16.msra.mxu0 %v4502_v61 }
0x1554   : > { %4377 = vmatprep.subr.bf16.mxu0 %v4561_v1 }
0x1556   : > { %4368 = vmatmul.mubr.msk.bf16.vlgmr.msra.gmra.mrb[76].mxu0 %vm612_vm1, %v4698_v6 }
0x1557   : > { %4379 = vmatprep.mubr.msk.bf16.mxu0 %vm4562_vm0, %v4561_v1 }
0x1619   : > { %v2662_v31 = vpop.f32.mrb[68].mxu0 }
0x161a   : > { %v2668_v33 = vpack.c.bf16 %v2662_v31, %v2662_v31  ;;  %v4339_v34 = vpop.f32.mrb[69].mxu0 }
0x161b   : > { %v2665_v35 = vpop.f32.mrb[70].mxu0 }
0x161c   : > { %v4340_v36 = vpop.f32.mrb[71].mxu0  ;;  %4344 = vmatmul.mubr.msk.bf16.vlgmr.msra.gmra.mrb[68].mxu1 %vm784_vm2, %v2668_v33  ;;  %v4504_v33 = vld [vmem:[%s5309_s4 + $0x78] sm:$0xff]  }
0x161d   : > { %4356 = vmatpush3.bf16.msra.mxu1 %v4497_v32  ;;  %4359 = vmatprep.mubr.msk.bf16.mxu1 %vm4562_vm0, %v4561_v1 }
0x161e   : > { %4357 = vmatprep.subr.bf16.mxu1 %v4561_v1 }
0x1621   : > { %4358 = vmatpush3.bf16.msra.mxu1 %v4498_v37  ;;  %v2777_v38 = vpop.f32.mrb[72].mxu0 }
0x1622   : > { %4371 = vmatprep.subr.bf16.mxu1 %v4561_v1  ;;  %v4353_v39 = vpop.f32.mrb[73].mxu0  ;;  %v2778_v58 = vadd.f32 %v3893_v54, %v2777_v38 }
0x1623   : > { %v2780_v40 = vpop.f32.mrb[74].mxu0 }
0x1624   : > { %4360 = vmatmul.mubr.msk.bf16.vlgmr.msra.gmra.mrb[72].mxu1 %vm612_vm1, %v4698_v6  ;;  %v4354_v41 = vpop.f32.mrb[75].mxu0  ;;  %v2913_v59 = vpack.c.bf16 %v2778_v58, %v2778_v58 }
0x1625   : > { %4373 = vmatprep.mubr.msk.bf16.mxu1 %vm4562_vm0, %v4561_v1 }
0x1629   : > { %v2907_v11 = vpop.f32.mrb[76].mxu0 }
0x162a   : > { %v4369_v12 = vpop.f32.mrb[77].mxu0  ;;  %v2908_v16 = vadd.f32 %v3911_v14, %v2907_v11 }
0x162b   : > { %v2910_v13 = vpop.f32.mrb[78].mxu0 }
0x162c   : > { %v4370_v15 = vpop.f32.mrb[79].mxu0  ;;  %v2975_v17 = vpack.c.bf16 %v2908_v16, %v2908_v16  ;;  %v3948_v13 = vld [vmem:[%s5313_s8 + $0xe] sm:$0x3] }
0x162d   : > { %v3383_v14 = vsel %vm1212_vm5, %v3948_v13, 0 }
0x162e   : > { %v2980_v18 = vsel %vm856_vm4, %v2975_v17, 0 }
0x162f   : > { %4378 = vmatpush3.bf16.msra.mxu0 %v2980_v18 }
0x1630   : > { %4389 = vmatprep.subr.bf16.mxu0 %v4561_v1 }
0x16ef   : > { %v2711_v42 = vpop.f32.mrb[68].mxu1 }
0x16f0   : > { %v5130_v43 = vadd.f32 %v2711_v42, %v5061_v48  ;;  %v4345_v44 = vpop.f32.mrb[69].mxu1 }
0x16f1   : > { %v2714_v45 = vpop.f32.mrb[70].mxu1  ;;  %v3933_v44 = vld [vmem:[%s5310_s5 + $0x7] ss:$0 sm:$0xff] }
0x16f2   : > { %v4346_v46 = vpop.f32.mrb[71].mxu1 }
0x16f7   : > { %v2842_v49 = vpop.f32.mrb[72].mxu1 }
0x16f8   : > { %v2843_v50 = vadd.f32 %v3902_v47, %v2842_v49  ;;  %v4361_v51 = vpop.f32.mrb[73].mxu1 }
0x16f9   : > { %v2845_v53 = vpop.f32.mrb[74].mxu1 }
0x16fa   : > { %v2914_v55 = vpack.c.bf16 %v2843_v50, %v2843_v50  ;;  %v4362_v57 = vpop.f32.mrb[75].mxu1  ;;  %v3924_v50 = vld [vmem:[%s5308_s3 + $0x7] ss:$0 sm:$0xff] }
0x16fb   : > { %v4507_v57 = vld [vmem:[%s5311_s6 + $0x70] sm:$0xff]  }
0x16fc   : > { %v2919_v48 = vsel %vm784_vm2, %v2914_v55, 0 }
0x16fd   : > { %4372 = vmatpush3.bf16.xpose.msra.mxu1 %v2919_v48  ;;  %v4508_v48 = vld [vmem:[%s5311_s6 + $0x78] sm:$0xff]  }
0x16fe   : > { %4383 = vmatprep.subr.bf16.mxu1 %v4561_v1 }
0x1704   : > { %4374 = vmatmul.mubr.msk.bf16.vlgmr.msra.gmra.mrb[76].mxu1 %vm784_vm2, %v2913_v59 }
0x1705   : > { %4385 = vmatprep.mubr.msk.bf16.mxu1 %vm4562_vm0, %v4561_v1  ;;  %4384 = vmatpush3.bf16.msra.mxu1 %v3029_v25 }
0x1706   : > { %4397 = vmatprep.subr.bf16.mxu1 %v4561_v1 }
0x17d7   : > { %v2955_v52 = vpop.f32.mrb[76].mxu1 }
0x17d8   : > { %v2961_v62 = vmul.f32 0.5, %v2955_v52  ;;  %v4375_v63 = vpop.f32.mrb[77].mxu1 }
0x17d9   : > { %v2958_v2 = vpop.f32.mrb[78].mxu1 }
0x17da   : > { %v4376_v56 = vpop.f32.mrb[79].mxu1  ;;  %v2962_v4 = vadd.f32 %v5156_v3, %v2961_v62 }
0x17dc   : > { %v2963_v5 = vsel %vm839_vm3, %v2962_v4, -inf }
0x17dd   : > { %2964 = vmax.xlane.f32.xlu0 %v2963_v5 }
0x186a   : > { %v2965_v0 = vpop.xlane.xlu0 %2964 }
0x186b   : > { %v2966_v7 = vsub.f32 %v2962_v4, %v2965_v0 }
0x186d   : > { %v2967_v8 = vmul.f32 1.442695, %v2966_v7 }
0x186f   : > { %4539 = vpow2.f32 %v2967_v8 }
0x1879   : > { %v4540_v9 = vpop.eup %4539 }
0x187a   : > { %v2969_v10 = vsel %vm839_vm3, %v4540_v9, 0.0 }
0x187b   : > { %2970 = vadd.xlane.f32.xlu1 %v2969_v10 }
0x1908   : > { %v2971_v20 = vpop.xlane.xlu1 %2970 }
0x1909   : > { %4541 = vrcp.f32 %v2971_v20 }
0x1913   : > { %v4542_v21 = vpop.eup %4541 }
0x1914   : > { %v2973_v22 = vmul.f32 %v4542_v21, %v4540_v9  ;;  %v3942_v9 = vld [vmem:[%s5312_s7 + $0x7] ss:$0 sm:$0xff] }
0x1916   : > { %v2974_v23 = vpack.c.bf16 %v2973_v22, %v2973_v22 }
0x1918   : > { %4380 = vmatmul.mubr.msk.bf16.vlgmr.msra.gmra.mrb[80].mxu0 %vm839_vm3, %v2974_v23 }
0x1919   : > { %4393 = vmatprep.mubr.msk.bf16.mxu0 %vm4562_vm0, %v4561_v1  ;;  %4390 = vmatpush3.bf16.msra.mxu0 %v4505_v24  ;;  %v3950_v24 = vld [vmem:[%s5314_s9] ss:$0 sm:$0xff] }
0x191a   : > { %4391 = vmatprep.subr.bf16.mxu0 %v4561_v1 }
0x191d   : > { %4392 = vmatpush3.bf16.msra.mxu0 %v4506_v26 }
0x191e   : > { %4405 = vmatprep.subr.bf16.mxu0 %v4561_v1 }
0x1920   : > { %4394 = vmatmul.mubr.msk.bf16.vlgmr.msra.gmra.mrb[84].mxu0 %vm612_vm1, %v4698_v6 }
0x1921   : > { %4409 = vmatprep.mubr.msk.bf16.mxu0 %vm4562_vm0, %v4561_v1  ;;  %4406 = vmatpush3.bf16.msra.mxu0 %v4507_v57  ;;  %v4514_v57 = vld [vmem:[%s5319_s14 + $0x18] sm:$0xff]  }
0x1922   : > { %4407 = vmatprep.subr.bf16.mxu0 %v4561_v1 }
0x1925   : > { %4408 = vmatpush3.bf16.msra.mxu0 %v4508_v48  ;;  %v3953_v48 = vld [vmem:[%s5318_s13] ss:$0 sm:$0xff] }
0x1926   : > { %4419 = vmatprep.subr.bf16.mxu0 %v4561_v1 }
0x1928   : > { %4410 = vmatmul.mubr.msk.bf16.vlgmr.msra.gmra.mrb[88].mxu0 %vm612_vm1, %v4698_v6 }
0x1929   : > { %4421 = vmatprep.mubr.msk.bf16.mxu0 %vm4562_vm0, %v4561_v1 }
0x19eb   : > { %v3016_v27 = vpop.f32.mrb[80].mxu0 }
0x19ec   : > { %v3022_v29 = vpack.c.bf16 %v3016_v27, %v3016_v27  ;;  %v4381_v30 = vpop.f32.mrb[81].mxu0 }
0x19ed   : > { %v3019_v31 = vpop.f32.mrb[82].mxu0 }
0x19ee   : > { %v4382_v32 = vpop.f32.mrb[83].mxu0  ;;  %4386 = vmatmul.mubr.msk.bf16.vlgmr.msra.gmra.mrb[80].mxu1 %vm784_vm2, %v3022_v29  ;;  %v4552_v31 = vld [vmem:[%s4694_s29] sm:$0xff] }
0x19ef   : > { %4398 = vmatpush3.bf16.msra.mxu1 %v4503_v28  ;;  %4401 = vmatprep.mubr.msk.bf16.mxu1 %vm4562_vm0, %v4561_v1 }
0x19f0   : > { %4399 = vmatprep.subr.bf16.mxu1 %v4561_v1 }
0x19f3   : > { %4400 = vmatpush3.bf16.msra.mxu1 %v4504_v33  ;;  %v3131_v34 = vpop.f32.mrb[84].mxu0 }
0x19f4   : > { %4413 = vmatprep.subr.bf16.mxu1 %v4561_v1  ;;  %v4395_v35 = vpop.f32.mrb[85].mxu0  ;;  %v3132_v54 = vadd.f32 %v3924_v50, %v3131_v34 }
0x19f5   : > { %v3134_v36 = vpop.f32.mrb[86].mxu0 }
0x19f6   : > { %4402 = vmatmul.mubr.msk.bf16.vlgmr.msra.gmra.mrb[84].mxu1 %vm612_vm1, %v4698_v6  ;;  %v4396_v37 = vpop.f32.mrb[87].mxu0  ;;  %v3267_v55 = vpack.c.bf16 %v3132_v54, %v3132_v54 }
0x19f7   : > { %4415 = vmatprep.mubr.msk.bf16.mxu1 %vm4562_vm0, %v4561_v1 }
0x19fb   : > { %v3261_v0 = vpop.f32.mrb[88].mxu0 }
0x19fc   : > { %v4411_v7 = vpop.f32.mrb[89].mxu0 }
0x19fd   : > { %v3264_v8 = vpop.f32.mrb[90].mxu0 }
0x19fe   : > { %v4412_v10 = vpop.f32.mrb[91].mxu0 }
0x1ac1   : > { %v3065_v38 = vpop.f32.mrb[80].mxu1 }
0x1ac2   : > { %v5202_v39 = vadd.f32 %v3065_v38, %v5130_v43  ;;  %v4387_v40 = vpop.f32.mrb[81].mxu1 }
0x1ac3   : > { %v3068_v41 = vpop.f32.mrb[82].mxu1  ;;  %v4510_v40 = vld [vmem:[%s5317_s12 + $0x8] sm:$0xff]  }
0x1ac4   : > { %v4388_v42 = vpop.f32.mrb[83].mxu1  ;;  %v4511_v41 = vld [vmem:[%s5319_s14] sm:$0xff]  }
0x1ac5   : > { %v4512_v42 = vld [vmem:[%s5319_s14 + $0x8] sm:$0xff]  }
0x1ac9   : > { %v3196_v45 = vpop.f32.mrb[84].mxu1 }
0x1aca   : > { %v3197_v46 = vadd.f32 %v3933_v44, %v3196_v45  ;;  %v4403_v47 = vpop.f32.mrb[85].mxu1 }
0x1acb   : > { %v3199_v49 = vpop.f32.mrb[86].mxu1 }
0x1acc   : > { %v3268_v51 = vpack.c.bf16 %v3197_v46, %v3197_v46  ;;  %v4404_v53 = vpop.f32.mrb[87].mxu1  ;;  %v3951_v49 = vld [vmem:[%s5315_s10] ss:$0 sm:$0xff] }
0x1ace   : > { %v3273_v43 = vsel %vm784_vm2, %v3268_v51, 0  ;;  %v3952_v51 = vld [vmem:[%s5316_s11] ss:$0 sm:$0xff] }
0x1acf   : > { %4414 = vmatpush3.bf16.xpose.msra.mxu1 %v3273_v43 }
0x1ad0   : > { %4425 = vmatprep.subr.bf16.mxu1 %v4561_v1 }
0x1ad6   : > { %4416 = vmatmul.mubr.msk.bf16.vlgmr.msra.gmra.mrb[88].mxu1 %vm784_vm2, %v3267_v55  ;;  %v4513_v55 = vld [vmem:[%s5319_s14 + $0x10] sm:$0xff]  }
0x1ad7   : > { %4427 = vmatprep.mubr.msk.bf16.mxu1 %vm4562_vm0, %v4561_v1  ;;  %4426 = vmatpush3.bf16.msra.mxu1 %v3383_v14 }
0x1ad8   : > { %4439 = vmatprep.subr.bf16.mxu1 %v4561_v1 }
0x1ba9   : > { %v3309_v58 = vpop.f32.mrb[88].mxu1 }
0x1baa   : > { %v3315_v59 = vmul.f32 0.5, %v3309_v58  ;;  %v4417_v60 = vpop.f32.mrb[89].mxu1 }
0x1bab   : > { %v3312_v61 = vpop.f32.mrb[90].mxu1 }
0x1bac   : > { %v4418_v52 = vpop.f32.mrb[91].mxu1  ;;  %v3316_v62 = vadd.f32 %v5156_v3, %v3315_v59  ;;  %v3262_v3 = vadd.f32 %v3942_v9, %v3261_v0 }
0x1bae   : > { %v3317_v63 = vsel %vm839_vm3, %v3316_v62, -inf  ;;  %v3329_v11 = vpack.c.bf16 %v3262_v3, %v3262_v3 }
0x1baf   : > { %3318 = vmax.xlane.f32.xlu0 %v3317_v63 }
0x1bb0   : > { %v3334_v12 = vsel %vm856_vm4, %v3329_v11, 0 }
0x1bb1   : > { %4420 = vmatpush3.bf16.msra.mxu0 %v3334_v12 }
0x1bb2   : > { %4431 = vmatprep.subr.bf16.mxu0 %v4561_v1 }
0x1c3c   : > { %v3319_v2 = vpop.xlane.xlu0 %3318 }
0x1c3d   : > { %v3320_v56 = vsub.f32 %v3316_v62, %v3319_v2 }
0x1c3f   : > { %v3321_v4 = vmul.f32 1.442695, %v3320_v56 }
0x1c41   : > { %4543 = vpow2.f32 %v3321_v4 }
0x1c4b   : > { %v4544_v5 = vpop.eup %4543 }
0x1c4c   : > { %v3323_v6 = vsel %vm839_vm3, %v4544_v5, 0.0 }
0x1c4d   : > { %3324 = vadd.xlane.f32.xlu1 %v3323_v6 }
0x1cda   : > { %v3325_v15 = vpop.xlane.xlu1 %3324 }
0x1cdb   : > { %4545 = vrcp.f32 %v3325_v15 }
0x1ce5   : > { %v4546_v16 = vpop.eup %4545 }
0x1ce6   : > { %v3327_v17 = vmul.f32 %v4546_v16, %v4544_v5  ;;  %v3963_v16 = vld [vmem:[%s5321_s16] ss:$0 sm:$0xff] }
0x1ce8   : > { %v3328_v18 = vpack.c.bf16 %v3327_v17, %v3327_v17 }
0x1cea   : > { %4422 = vmatmul.mubr.msk.bf16.vlgmr.msra.gmra.mrb[92].mxu0 %vm839_vm3, %v3328_v18  ;;  %v3964_v18 = vld [vmem:[%s5322_s17] ss:$0 sm:$0xff] }
0x1ceb   : > { %4435 = vmatprep.mubr.msk.bf16.mxu0 %vm4562_vm0, %v4561_v1 }
0x1dbd   : > { %v3370_v19 = vpop.f32.mrb[92].mxu0 }
0x1dbe   : > { %v3376_v25 = vpack.c.bf16 %v3370_v19, %v3370_v19  ;;  %v4423_v20 = vpop.f32.mrb[93].mxu0 }
0x1dbf   : > { %v3373_v21 = vpop.f32.mrb[94].mxu0 }
0x1dc0   : > { %v4424_v22 = vpop.f32.mrb[95].mxu0  ;;  %4428 = vmatmul.mubr.msk.bf16.vlgmr.msra.gmra.mrb[92].mxu1 %vm784_vm2, %v3376_v25 }
0x1dc1   : > { %4447 = vmatprep.mubr.msk.bf16.mxu1 %vm4562_vm0, %v4561_v1  ;;  %4440 = vmatpush3.bf16.msra.mxu1 %v4511_v41 }
0x1dc2   : > { %4441 = vmatprep.subr.bf16.mxu1 %v4561_v1 }
0x1dc5   : > { %4442 = vmatpush3.bf16.msra.mxu1 %v4512_v42 }
0x1dc6   : > { %4443 = vmatprep.subr.bf16.mxu1 %v4561_v1 }
0x1dc9   : > { %4444 = vmatpush3.bf16.msra.mxu1 %v4513_v55 }
0x1dca   : > { %4445 = vmatprep.subr.bf16.mxu1 %v4561_v1 }
0x1dcd   : > { %4446 = vmatpush3.bf16.msra.mxu1 %v4514_v57 }
0x1e93   : > { %v3419_v23 = vpop.f32.mrb[92].mxu1 }
0x1e94   : > { %v3425_v26 = vadd.f32 %v3419_v23, %v5202_v39  ;;  %v4429_v27 = vpop.f32.mrb[93].mxu1  ;;  %v4509_v39 = vld [vmem:[%s5317_s12] sm:$0xff]  }
0x1e95   : > { %v3422_v28 = vpop.f32.mrb[94].mxu1  ;;  %4432 = vmatpush3.bf16.msra.mxu0 %v4509_v39 }
0x1e96   : > { %v3433_v29 = vadd.f32 %v3950_v24, %v3425_v26  ;;  %v4430_v30 = vpop.f32.mrb[95].mxu1  ;;  %4433 = vmatprep.subr.bf16.mxu0 %v4561_v1  ;;  %v3957_v1 = vld [vmem:[%s5320_s15] ss:$0 sm:$0xff] }
0x1e98   : > { %v3434_v32 = vadd.f32 %v4552_v31, %v3433_v29 }
0x1e99   : > { %4434 = vmatpush3.bf16.msra.mxu0 %v4510_v40 }
0x1e9a   : > { %v3437_v33 = vsel %vm612_vm1, %v3434_v32, 0.0 }
0x1e9b   : > { %3438 = vadd.xlane.f32.xlu0 %v3437_v33 }
0x1f28   : > { %v3439_v34 = vpop.xlane.xlu0 %3438 }
0x1f29   : > { %v3441_v35 = vmul.f32 0.03125, %v3439_v34 }
0x1f2b   : > { %v3442_v36 = vsub.f32 %v3434_v32, %v3441_v35 }
0x1f2d   : > { %v3443_v37 = vmul.f32 %v3442_v36, %v3442_v36 }
0x1f2f   : > { %v3444_v38 = vsel %vm612_vm1, %v3443_v37, 0.0 }
0x1f30   : > { %3445 = vadd.xlane.f32.xlu1 %v3444_v38 }
0x1fbd   : > { %v3446_v44 = vpop.xlane.xlu1 %3445 }
0x1fbe   : > { %v3447_v45 = vmul.f32 0.03125, %v3446_v44 }
0x1fc0   : > { %v3448_v46 = vadd.f32 1e-05, %v3447_v45 }
0x1fc2   : > { %4547 = vrsqrt.f32 %v3448_v46 }
0x1fcc   : > { %v4548_v47 = vpop.eup %4547 }
0x1fcd   : > { %v3450_v50 = vmul.f32 %v4548_v47, %v3442_v36 }
0x1fcf   : > { %v3457_v53 = vmul.f32 %v3951_v49, %v3450_v50 }
0x1fd1   : > { %v3464_v43 = vadd.f32 %v3952_v51, %v3457_v53 }
0x1fd3   : > { %v3465_v54 = vpack.c.bf16 %v3464_v43, %v3464_v43 }
0x1fd5   : > { %4436 = vmatmul.mubr.msk.bf16.vlgmr.msra.gmra.mrb[96].mxu0 %vm612_vm1, %v3465_v54 }
0x20a8   : > { %v3526_v58 = vpop.f32.mrb[96].mxu0 }
0x20a9   : > { %v3527_v59 = vadd.f32 %v3953_v48, %v3526_v58  ;;  %v4437_v60 = vpop.f32.mrb[97].mxu0 }
0x20aa   : > { %v3529_v61 = vpop.f32.mrb[98].mxu0 }
0x20ab   : > { %v3532_v52 = vmax.f32 %v3527_v59, 0.0  ;;  %v4438_v62 = vpop.f32.mrb[99].mxu0 }
0x20ad   : > { %v3533_v63 = vpack.c.bf16 %v3532_v52, %v3532_v52 }
0x20af   : > { %4448 = vmatmul.mubr.msk.bf16.vlgmr.msra.gmra.mrb[96].mxu1 %vm3573_vm6, %v3533_v63 }
0x2182   : > { %v3611_v2 = vpop.f32.mrb[96].mxu1 }
0x2183   : > { %v3612_v56 = vadd.f32 %v3957_v1, %v3611_v2  ;;  %v4449_v4 = vpop.f32.mrb[97].mxu1 }
0x2184   : > { %v3614_v5 = vpop.f32.mrb[98].mxu1 }
0x2185   : > { %v4450_v6 = vpop.f32.mrb[99].mxu1  ;;  %v3617_v0 = vadd.f32 %v3612_v56, %v3464_v43 }
0x2187   : > { %v3620_v7 = vsel %vm612_vm1, %v3617_v0, 0.0 }
0x2188   : > { %3621 = vadd.xlane.f32.xlu0 %v3620_v7 }
0x2215   : > { %v3622_v8 = vpop.xlane.xlu0 %3621 }
0x2216   : > { %v3623_v9 = vmul.f32 0.03125, %v3622_v8 }
0x2218   : > { %v3624_v10 = vsub.f32 %v3617_v0, %v3623_v9 }
0x221a   : > { %v3625_v3 = vmul.f32 %v3624_v10, %v3624_v10 }
0x221c   : > { %v3626_v11 = vsel %vm612_vm1, %v3625_v3, 0.0 }
0x221d   : > { %3627 = vadd.xlane.f32.xlu1 %v3626_v11 }
0x22aa   : > { %v3628_v12 = vpop.xlane.xlu1 %3627 }
0x22ab   : > { %v3629_v13 = vmul.f32 0.03125, %v3628_v12 }
0x22ad   : > { %v3630_v14 = vadd.f32 1e-05, %v3629_v13 }
0x22af   : > { %4549 = vrsqrt.f32 %v3630_v14 }
0x22b9   : > { %v4550_v15 = vpop.eup %4549 }
0x22ba   : > { %v3632_v17 = vmul.f32 %v4550_v15, %v3624_v10 }
0x22bc   : > { %v3639_v19 = vmul.f32 %v3963_v16, %v3632_v17 }
0x22be   : > { %v3646_v25 = vadd.f32 %v3964_v18, %v3639_v19 }
0x22c0   : > { %3647 = vst.msk [vmem:[%s584_s20] sm:$0xff] %vm612_vm1, %v3646_v25 }
0x22c1 PF: > { %s28_s27 = sadd.s32 1, %s4559_s27  }
0x22c2   : > { %p25_p4 = scmp.ge.s32.totalorder %s28_s27, 4  }
0x22c4   :  { %27 = sbr.rel (!%p25_p4) target bundleno = 4 (0x4), region = 174 }

// kernel: _lambda_.7
= control target key start
LH: loop header
LB: loop body
LE: loop exit
PB: predicated region body
PF: predicated region fallthrough
CT: control target
= control target key end

     0   :  { %s5345_s0 = inlined_call_operand.vmem [shape: f32[2,8,32], index: 0, kind: input, shape index: {}]   ;;  %s5346_s1 = inlined_call_operand.vmem [shape: f32[2,1,8], index: 1, kind: input, shape index: {}]   ;;  %s5347_s2 = inlined_call_operand.vmem [shape: bf16[8,32,4], index: 2, kind: input, shape index: {}]   ;;  %s5348_s3 = inlined_call_operand.vmem [shape: f32[8,1,4], index: 3, kind: input, shape index: {}, may-alias: {3,5,7}]   ;;  %s5349_s4 = inlined_call_operand.vmem [shape: bf16[8,32,4], index: 4, kind: input, shape index: {}]   ;;  %s5350_s5 = inlined_call_operand.vmem [shape: f32[8,1,4], index: 5, kind: input, shape index: {}, may-alias: {3,5,7}]   ;;  %s5351_s6 = inlined_call_operand.hbm [shape: bf16[8,32,4], index: 6, kind: input, shape index: {}]   ;;  %s5352_s7 = inlined_call_operand.vmem [shape: f32[8,1,4], index: 7, kind: input, shape index: {}, may-alias: {3,5,7}]   ;;  %s5353_s8 = inlined_call_operand.vmem [shape: bf16[8,4,32], index: 8, kind: input, shape index: {}]   ;;  %s5354_s9 = inlined_call_operand.vmem [shape: f32[1,32], index: 9, kind: input, shape index: {}, may-alias: {9,11,15,17}]   ;;  %s5355_s10 = inlined_call_operand.vmem [shape: f32[1,32], index: 10, kind: input, shape index: {}, may-alias: {10,16}]   ;;  %s5356_s11 = inlined_call_operand.vmem [shape: f32[1,32], index: 11, kind: input, shape index: {}, may-alias: {9,11,15,17}]   ;;  %s5357_s12 = inlined_call_operand.vmem [shape: bf16[32,64], index: 12, kind: input, shape index: {}]   ;;  %s5358_s13 = inlined_call_operand.vmem [shape: f32[1,64], index: 13, kind: input, shape index: {}]   ;;  %s5359_s14 = inlined_call_operand.vmem [shape: bf16[64,32], index: 14, kind: input, shape index: {}]   ;;  %s5360_s15 = inlined_call_operand.vmem [shape: f32[1,32], index: 15, kind: input, shape index: {}, may-alias: {9,11,15,17}]   ;;  %s5361_s16 = inlined_call_operand.vmem [shape: f32[1,32], index: 16, kind: input, shape index: {}, may-alias: {10,16}]   ;;  %s5362_s17 = inlined_call_operand.vmem [shape: f32[1,32], index: 17, kind: input, shape index: {}, may-alias: {9,11,15,17}]   ;;  %s5363_s18 = inlined_call_operand.vmem [shape: f32[2,8,32], index: 18, kind: output, shape index: {}]  }
   0x1   :  { %5367 = sst [smem:[#allocation5_spill]] %s5345_s0 }
   0x2   :  { %5368 = sst [smem:[#allocation6_spill]] %s5346_s1 }
   0x3   :  { %5369 = sst [smem:[#allocation7_spill]] %s5347_s2 }
   0x4   :  { %23 = vsyncpa [#allocation3], 0  ;;  %s4707_s27 = smov 0  }
   0x5 LB: > { %s4713_s28 = sadd.s32 4294967295, %s4605_s27   ;;  %p3739_p0 = scmp.ge.s32.totalorder %s4605_s27, 1  ;;  %s4605_s27 = sphi %s4707_s27, %s29_s27  }
   0x6   : > { %p448_p1 = scmp.lt.s32.totalorder %s4605_s27, 3  ;;  %s4607_s29 = smov [#allocation2]  }
   0x7   : > { %s472_s30 = sshll.u32 %s4607_s29, 4  ;;  %p5365_p3 = scmp.eq.s32.totalorder %s4713_s28, 0  ;;  %s473_s30 = int_to_ptr.vmem [resolvable:$true] %s472_s30 }
   0x8   : > { %p4717_p2 = pnand %p3739_p0, %p448_p1  ;;  %s4567_s21 = scalar_lea.hbm %s5351_s6, 2048 }
   0x9   : > { %p4568_p6 = scmp.ne.s32.totalorder %s5351_s6, %s4567_s21  ;;  %p4574_p10 = scmp.lt.u32.totalorder %s4567_s21, %s5351_s6 }
   0xa   : > { %s5370_s0 = scalar_select %p4717_p2, 1, 0 }
   0xb   : > { %p4456_p4 = pneg %p4717_p2 }
   0xd   : > { %p4726_p5 = pnand %p5365_p3, %p4456_p4 }
   0xf   : > { %p4569_p7 = pneg %p4726_p5 }
  0x11   : > { %p4570_p8 = pnand %p4569_p7, %p4568_p6 }
  0x13   : > { %p4571_p9 = pneg %p4570_p8 }
  0x15   : > { %p4576_p11 = pnand %p4574_p10, %p4571_p9 }
  0x17   : > { %4579 = shalt.err (!%p4576_p11)
}
  0x18   : > { %s4580_s25 = scalar_lea.vmem %s473_s30, 2048  ;;  %p4588_p1 = scmp.lt.s32.totalorder %s473_s30, %s473_s30 }
  0x19   : > { %p4581_p12 = scmp.ne.s32.totalorder %s473_s30, %s4580_s25  ;;  %p4589_p4 = scmp.lt.s32.totalorder %s4580_s25, %s4580_s25 }
  0x1b   : > { %p4583_p13 = pnand %p4581_p12, %p4569_p7  ;;  %p4590_p3 = por %p4589_p4, %p4588_p1 }
  0x1d   : > { %p4584_p0 = pneg %p4583_p13 }
  0x1f   : > { %p4591_p2 = pnand %p4590_p3, %p4584_p0 }
  0x21   : > { %4594 = shalt.err (!%p4591_p2)
}
  0x22   : > { %s4608_s26 = smov 64   ;;  %s4609_s29 = smov 4  }
  0x23   : > { %4459 = dma.hbm_to_vmem [thread:$0]  (!%p4726_p5), %s5351_s6, 2048, %s473_s30, [#allocation3], %s4608_s26, %s4608_s26, %s4609_s29  }
  0x24   : > { %p5372_p6 = scmp.ne.s32.totalorder %s5370_s0, 0 }
  0x25   : > { %p5373_p8 = scmp.eq.s32.totalorder (!%p5372_p6), %s4713_s28, 0 }
  0x26   : > { %534 = sbr.rel (%p5372_p6) target bundleno = 8932 (0x22e4), region = 92 }
  0x2d   : > { %4600 = dma.done.wait (%p5373_p8), [#allocation3], 2048   ;;  %p5374_p7 = pmov %p5373_p8 }
  0x2e   : > { %p589_p2 = scmp.lt.s32.totalorder %s4713_s28, 1  ;;  %v4610_v0 = vmov 0.0   ;;  %vm4611_vm0 = vmmov 0   ;;  %v4475_v1 = vld [vmem:[%s5349_s4] sm:$0xff]   ;;  %s5375_s2 = sld [smem:[#allocation5_spill]]  ;;  %v4476_v2 = vld [vmem:[%s5349_s4 + $0x8] sm:$0xff]  }
  0x2f   : > { %4602 = vsyncadd (%p5374_p7), [#allocation3], 4294965248  ;;  %4104 = vmatprep.subr.bf16.mxu1 %v4610_v0  ;;  %4096 = vmatprep.subr.bf16.mxu0 %v4610_v0  ;;  %s5376_s1 = sld [smem:[#allocation7_spill]]  ;;  %vm627_vm1 = vcmask 261120   ;;  %v3750_v7 = vld [vmem:[%s5350_s5] ss:$0 sm:$0xff] }
  0x30   : > { %4108 = vmatprep.mubr.msk.bf16.mxu1 %vm4611_vm0, %v4610_v0  ;;  %s5379_s28 = smov (!%p589_p2, %s4713_s28), 1  ;;  %4100 = vmatprep.mubr.msk.bf16.mxu0 %vm4611_vm0, %v4610_v0  ;;  %vm799_vm2 = vcmask 31744   ;;  %v3746_v12 = vld [vmem:[%s5348_s3] ss:$0 sm:$0xff]  ;;  %v4480_v23 = vld [vmem:[#allocation2 + $0x8] sm:$0xff]   ;;  %s5377_s26 = sld [smem:[#allocation6_spill]] }
  0x31   : > { %s3744_s30 = sshll.u32 %s5379_s28, 3  ;;  %4105 = vmatpush3.bf16.msra.mxu1 %v4475_v1  ;;  %v4479_v22 = vld [vmem:[#allocation2] sm:$0xff]   ;;  %vm854_vm3 = vcmask 64512   ;;  %vm871_vm4 = vcmask 1043456   ;;  %v4481_v50 = vld [vmem:[%s5349_s4 + $0x10] sm:$0xff]   ;;  %v4482_v52 = vld [vmem:[%s5349_s4 + $0x18] sm:$0xff]  }
  0x32   : > { %4106 = vmatprep.subr.bf16.mxu1 %v4610_v0  ;;  %v3754_v40 = vld [vmem:[%s5352_s7] ss:$0 sm:$0xff]  ;;  %v3775_v61 = vld [vmem:[%s5350_s5 + $0x1] ss:$0 sm:$0xff]  ;;  %vm1227_vm5 = vcmask 1041408   ;;  %vm3588_vm6 = vcmask 523264   ;;  %s599_s0 = scalar_lea.vmem %s5363_s18, %s3744_s30 }
  0x34   : > { %s4771_s23 = scalar_lea.vmem %s5375_s2, %s3744_s30 }
  0x35   : > { %v4477_v3 = vld [vmem:[%s5376_s1] sm:$0xff]   ;;  %v4478_v5 = vld [vmem:[%s5376_s1 + $0x8] sm:$0xff]   ;;  %4107 = vmatpush3.bf16.msra.mxu1 %v4476_v2  ;;  %v4483_v45 = vld [vmem:[%s5376_s1 + $0x10] sm:$0xff]  }
  0x36   : > { %v601_v4 = vld [vmem:[%s4771_s23] sm:$0xff]  ;;  %4097 = vmatpush3.bf16.msra.mxu0 %v4477_v3  ;;  %4120 = vmatprep.subr.bf16.mxu1 %v4610_v0  ;;  %s4818_s29 = scalar_lea.vmem %s5377_s26, %s5379_s28  ;;  %v4484_v46 = vld [vmem:[%s5376_s1 + $0x18] sm:$0xff]  }
  0x37   : > { %v4784_v6 = vpack.c.bf16 %v601_v4, %v601_v4  ;;  %4098 = vmatprep.subr.bf16.mxu0 %v4610_v0  ;;  %v4821_v25 = vld [vmem:[%s4818_s29] ss:$0 sm:$0xff]  ;;  %v3766_v3 = vld [vmem:[%s5348_s3 + $0x1] ss:$0 sm:$0xff] }
  0x39   : > { %4109 = vmatmul.mubr.msk.bf16.vlgmr.msra.gmra.mrb[0].mxu1 %vm627_vm1, %v4784_v6 }
  0x3a   : > { %4099 = vmatpush3.bf16.msra.mxu0 %v4478_v5  ;;  %4122 = vmatprep.mubr.msk.bf16.mxu1 %vm4611_vm0, %v4610_v0 }
  0x3b   : > { %4112 = vmatprep.subr.bf16.mxu0 %v4610_v0 }
  0x3d   : > { %4101 = vmatmul.mubr.msk.bf16.vlgmr.msra.gmra.mrb[0].mxu0 %vm627_vm1, %v4784_v6 }
  0x3e   : > { %4116 = vmatprep.mubr.msk.bf16.mxu0 %vm4611_vm0, %v4610_v0  ;;  %4113 = vmatpush3.bf16.msra.mxu0 %v4479_v22 }
  0x3f   : > { %4114 = vmatprep.subr.bf16.mxu0 %v4610_v0 }
  0x42   : > { %4115 = vmatpush3.bf16.msra.mxu0 %v4480_v23 }
  0x43   : > { %4126 = vmatprep.subr.bf16.mxu0 %v4610_v0 }
  0x45   : > { %4117 = vmatmul.mubr.msk.bf16.vlgmr.msra.gmra.mrb[4].mxu0 %vm627_vm1, %v4784_v6 }
  0x46   : > { %4128 = vmatprep.mubr.msk.bf16.mxu0 %vm4611_vm0, %v4610_v0 }
 0x10c   : > { %v728_v8 = vpop.f32.mrb[0].mxu1 }
 0x10d   : > { %v729_v9 = vadd.f32 %v3750_v7, %v728_v8  ;;  %v4110_v10 = vpop.f32.mrb[1].mxu1 }
 0x10e   : > { %v731_v11 = vpop.f32.mrb[2].mxu1  ;;  %v4485_v10 = vld [vmem:[#allocation2 + $0x10] sm:$0xff]  }
 0x10f   : > { %v798_v14 = vpack.c.bf16 %v729_v9, %v729_v9  ;;  %v4111_v15 = vpop.f32.mrb[3].mxu1  ;;  %v4486_v11 = vld [vmem:[#allocation2 + $0x18] sm:$0xff]  }
 0x110   : > { %v665_v13 = vpop.f32.mrb[0].mxu0 }
 0x111   : > { %v4102_v16 = vpop.f32.mrb[1].mxu0  ;;  %v804_v18 = vsel %vm799_vm2, %v798_v14, 0  ;;  %v666_v19 = vadd.f32 %v3746_v12, %v665_v13 }
 0x112   : > { %v668_v17 = vpop.f32.mrb[2].mxu0  ;;  %4121 = vmatpush3.bf16.xpose.msra.mxu1 %v804_v18 }
 0x113   : > { %v4103_v20 = vpop.f32.mrb[3].mxu0  ;;  %4132 = vmatprep.subr.bf16.mxu1 %v4610_v0  ;;  %v797_v21 = vpack.c.bf16 %v666_v19, %v666_v19  ;;  %v3780_v19 = vld [vmem:[%s5352_s7 + $0x1] ss:$0 sm:$0xff] }
 0x118   : > { %v791_v37 = vpop.f32.mrb[4].mxu0 }
 0x119   : > { %4123 = vmatmul.mubr.msk.bf16.vlgmr.msra.gmra.mrb[4].mxu1 %vm799_vm2, %v797_v21  ;;  %v4118_v38 = vpop.f32.mrb[5].mxu0  ;;  %v792_v42 = vadd.f32 %v3754_v40, %v791_v37  ;;  %v916_v37 = vld [vmem:[%s5353_s8] sm:$0x3] }
 0x11a   : > { %4136 = vmatprep.mubr.msk.bf16.mxu1 %vm4611_vm0, %v4610_v0  ;;  %v794_v39 = vpop.f32.mrb[6].mxu0  ;;  %4133 = vmatpush3.bf16.msra.mxu1 %v4483_v45  ;;  %v1275_v40 = vsel %vm1227_vm5, %v916_v37, 0  ;;  %v4489_v45 = vld [vmem:[%s5376_s1 + $0x20] sm:$0xff]  }
 0x11b   : > { %v4119_v41 = vpop.f32.mrb[7].mxu0  ;;  %v867_v43 = vpack.c.bf16 %v792_v42, %v792_v42  ;;  %4134 = vmatprep.subr.bf16.mxu1 %v4610_v0 }
 0x11c   : > { %v4487_v41 = vld [vmem:[%s5349_s4 + $0x20] sm:$0xff]  }
 0x11d   : > { %v873_v44 = vsel %vm871_vm4, %v867_v43, 0  ;;  %v4488_v43 = vld [vmem:[%s5349_s4 + $0x28] sm:$0xff]  }
 0x11e   : > { %4127 = vmatpush3.bf16.msra.mxu0 %v873_v44  ;;  %4135 = vmatpush3.bf16.msra.mxu1 %v4484_v46 }
 0x11f   : > { %4140 = vmatprep.subr.bf16.mxu0 %v4610_v0  ;;  %4148 = vmatprep.subr.bf16.mxu1 %v4610_v0 }
 0x121   : > { %4137 = vmatmul.mubr.msk.bf16.vlgmr.msra.gmra.mrb[8].mxu1 %vm627_vm1, %v4784_v6 }
 0x122   : > { %4152 = vmatprep.mubr.msk.bf16.mxu1 %vm4611_vm0, %v4610_v0  ;;  %4149 = vmatpush3.bf16.msra.mxu1 %v4485_v10 }
 0x123   : > { %4150 = vmatprep.subr.bf16.mxu1 %v4610_v0 }
 0x126   : > { %4151 = vmatpush3.bf16.msra.mxu1 %v4486_v11 }
 0x127   : > { %4162 = vmatprep.subr.bf16.mxu1 %v4610_v0 }
 0x129   : > { %4153 = vmatmul.mubr.msk.bf16.vlgmr.msra.gmra.mrb[12].mxu1 %vm627_vm1, %v4784_v6 }
 0x12a   : > { %4164 = vmatprep.mubr.msk.bf16.mxu1 %vm4611_vm0, %v4610_v0 }
 0x1ec   : > { %v840_v24 = vpop.f32.mrb[4].mxu1 }
 0x1ed   : > { %v846_v26 = vmul.f32 0.5, %v840_v24  ;;  %v4124_v27 = vpop.f32.mrb[5].mxu1 }
 0x1ee   : > { %v843_v28 = vpop.f32.mrb[6].mxu1 }
 0x1ef   : > { %v4125_v29 = vpop.f32.mrb[7].mxu1  ;;  %v853_v30 = vadd.f32 %v4821_v25, %v846_v26 }
 0x1f1   : > { %v855_v31 = vsel %vm854_vm3, %v853_v30, -inf }
 0x1f2   : > { %856 = vmax.xlane.f32.xlu0 %v855_v31 }
 0x1f4   : > { %v976_v53 = vpop.f32.mrb[8].mxu1 }
 0x1f5   : > { %v4138_v54 = vpop.f32.mrb[9].mxu1  ;;  %v977_v8 = vadd.f32 %v3766_v3, %v976_v53 }
 0x1f6   : > { %v979_v55 = vpop.f32.mrb[10].mxu1 }
 0x1f7   : > { %v4139_v56 = vpop.f32.mrb[11].mxu1  ;;  %v1112_v9 = vpack.c.bf16 %v977_v8, %v977_v8  ;;  %v3803_v55 = vld [vmem:[%s5350_s5 + $0x2] ss:$0 sm:$0xff] }
 0x1fc   : > { %v1106_v20 = vpop.f32.mrb[12].mxu1 }
 0x1fd   : > { %v1107_v21 = vadd.f32 %v3780_v19, %v1106_v20  ;;  %v4154_v22 = vpop.f32.mrb[13].mxu1 }
 0x1fe   : > { %v1109_v23 = vpop.f32.mrb[14].mxu1 }
 0x1ff   : > { %v1174_v24 = vpack.c.bf16 %v1107_v21, %v1107_v21  ;;  %v4155_v26 = vpop.f32.mrb[15].mxu1 }
 0x201   : > { %v1179_v27 = vsel %vm871_vm4, %v1174_v24, 0 }
 0x202   : > { %4163 = vmatpush3.bf16.msra.mxu1 %v1179_v27 }
 0x203   : > { %4174 = vmatprep.subr.bf16.mxu1 %v4610_v0 }
 0x27f   : > { %v857_v32 = vpop.xlane.xlu0 %856 }
 0x280   : > { %v858_v33 = vsub.f32 %v853_v30, %v857_v32 }
 0x282   : > { %v859_v34 = vmul.f32 1.442695, %v858_v33  ;;  %v3786_v33 = vld [vmem:[%s5353_s8 + $0x2] sm:$0x3] }
 0x284   : > { %4529 = vpow2.f32 %v859_v34  ;;  %v1229_v34 = vsel %vm1227_vm5, %v3786_v33, 0 }
 0x28e   : > { %v4530_v35 = vpop.eup %4529 }
 0x28f   : > { %v861_v36 = vsel %vm854_vm3, %v4530_v35, 0.0 }
 0x290   : > { %862 = vadd.xlane.f32.xlu0 %v861_v36 }
 0x31d   : > { %v863_v47 = vpop.xlane.xlu0 %862 }
 0x31e   : > { %4531 = vrcp.f32 %v863_v47 }
 0x328   : > { %v4532_v48 = vpop.eup %4531 }
 0x329   : > { %v865_v49 = vmul.f32 %v4532_v48, %v4530_v35 }
 0x32b   : > { %v866_v51 = vpack.c.bf16 %v865_v49, %v865_v49 }
 0x32d   : > { %4129 = vmatmul.mubr.msk.bf16.vlgmr.msra.gmra.mrb[8].mxu0 %vm854_vm3, %v866_v51 }
 0x32e   : > { %4141 = vmatpush3.bf16.msra.mxu0 %v4481_v50  ;;  %4144 = vmatprep.mubr.msk.bf16.mxu0 %vm4611_vm0, %v4610_v0  ;;  %v4490_v50 = vld [vmem:[%s5376_s1 + $0x28] sm:$0xff]  }
 0x32f   : > { %4142 = vmatprep.subr.bf16.mxu0 %v4610_v0 }
 0x332   : > { %4143 = vmatpush3.bf16.msra.mxu0 %v4482_v52 }
 0x333   : > { %4156 = vmatprep.subr.bf16.mxu0 %v4610_v0 }
 0x335   : > { %4145 = vmatmul.mubr.msk.bf16.vlgmr.msra.gmra.mrb[12].mxu0 %vm627_vm1, %v4784_v6 }
 0x336   : > { %4158 = vmatprep.mubr.msk.bf16.mxu0 %vm4611_vm0, %v4610_v0 }
 0x400   : > { %v4858_v57 = vpop.f32.mrb[8].mxu0 }
 0x401   : > { %v4130_v58 = vpop.f32.mrb[9].mxu0  ;;  %v915_v42 = vpack.c.bf16 %v4858_v57, %v4858_v57 }
 0x402   : > { %v912_v59 = vpop.f32.mrb[10].mxu0 }
 0x403   : > { %v4131_v60 = vpop.f32.mrb[11].mxu0 }
 0x408   : > { %v1041_v62 = vpop.f32.mrb[12].mxu0 }
 0x409   : > { %v1042_v63 = vadd.f32 %v3775_v61, %v1041_v62  ;;  %v4146_v1 = vpop.f32.mrb[13].mxu0 }
 0x40a   : > { %v1044_v2 = vpop.f32.mrb[14].mxu0 }
 0x40b   : > { %v1113_v4 = vpack.c.bf16 %v1042_v63, %v1042_v63  ;;  %v4147_v5 = vpop.f32.mrb[15].mxu0 }
 0x40c   : > { %v3794_v5 = vld [vmem:[%s5348_s3 + $0x2] ss:$0 sm:$0xff] }
 0x40d   : > { %v1118_v7 = vsel %vm799_vm2, %v1113_v4, 0 }
 0x40e   : > { %4157 = vmatpush3.bf16.xpose.msra.mxu0 %v1118_v7 }
 0x40f   : > { %4168 = vmatprep.subr.bf16.mxu0 %v4610_v0 }
 0x415   : > { %4159 = vmatmul.mubr.msk.bf16.vlgmr.msra.gmra.mrb[16].mxu0 %vm799_vm2, %v1112_v9 }
 0x416   : > { %4170 = vmatprep.mubr.msk.bf16.mxu0 %vm4611_vm0, %v4610_v0  ;;  %4169 = vmatpush3.bf16.msra.mxu0 %v1229_v34 }
 0x417   : > { %4180 = vmatprep.subr.bf16.mxu0 %v4610_v0 }
 0x4e8   : > { %v1154_v12 = vpop.f32.mrb[16].mxu0 }
 0x4e9   : > { %v1160_v13 = vmul.f32 0.5, %v1154_v12  ;;  %v4160_v14 = vpop.f32.mrb[17].mxu0 }
 0x4ea   : > { %v1157_v15 = vpop.f32.mrb[18].mxu0  ;;  %v4492_v14 = vld [vmem:[#allocation2 + $0x28] sm:$0xff]  }
 0x4eb   : > { %v4161_v16 = vpop.f32.mrb[19].mxu0  ;;  %v1161_v17 = vadd.f32 %v4821_v25, %v1160_v13  ;;  %v4491_v13 = vld [vmem:[#allocation2 + $0x20] sm:$0xff]  }
 0x4ed   : > { %v1162_v18 = vsel %vm854_vm3, %v1161_v17, -inf }
 0x4ee   : > { %1163 = vmax.xlane.f32.xlu1 %v1162_v18 }
 0x57b   : > { %v1164_v28 = vpop.xlane.xlu1 %1163 }
 0x57c   : > { %v1165_v29 = vsub.f32 %v1161_v17, %v1164_v28 }
 0x57e   : > { %v1166_v30 = vmul.f32 1.442695, %v1165_v29 }
 0x580   : > { %4533 = vpow2.f32 %v1166_v30 }
 0x58a   : > { %v4534_v31 = vpop.eup %4533 }
 0x58b   : > { %v1168_v32 = vsel %vm854_vm3, %v4534_v31, 0.0 }
 0x58c   : > { %1169 = vadd.xlane.f32.xlu1 %v1168_v32 }
 0x619   : > { %v1170_v35 = vpop.xlane.xlu1 %1169 }
 0x61a   : > { %4535 = vrcp.f32 %v1170_v35 }
 0x624   : > { %v4536_v36 = vpop.eup %4535 }
 0x625   : > { %v1172_v38 = vmul.f32 %v4536_v36, %v4534_v31  ;;  %v3808_v31 = vld [vmem:[%s5352_s7 + $0x2] ss:$0 sm:$0xff]  ;;  %v3814_v36 = vld [vmem:[%s5353_s8 + $0x4] sm:$0x3] }
 0x626   : > { %v1628_v37 = vsel %vm1227_vm5, %v3814_v36, 0 }
 0x627   : > { %v1173_v39 = vpack.c.bf16 %v1172_v38, %v1172_v38 }
 0x629   : > { %4165 = vmatmul.mubr.msk.bf16.vlgmr.msra.gmra.mrb[16].mxu1 %vm854_vm3, %v1173_v39 }
 0x62a   : > { %4175 = vmatpush3.bf16.msra.mxu1 %v1275_v40  ;;  %4176 = vmatprep.mubr.msk.bf16.mxu1 %vm4611_vm0, %v4610_v0 }
 0x62b   : > { %4188 = vmatprep.subr.bf16.mxu1 %v4610_v0 }
 0x631   : > { %4177 = vmatmul.mubr.msk.bf16.vlgmr.msra.gmra.mrb[20].mxu1 %vm799_vm2, %v915_v42  ;;  %v4495_v42 = vld [vmem:[%s5376_s1 + $0x30] sm:$0xff]  }
 0x632   : > { %4189 = vmatpush3.bf16.msra.mxu1 %v4487_v41  ;;  %4192 = vmatprep.mubr.msk.bf16.mxu1 %vm4611_vm0, %v4610_v0 }
 0x633   : > { %4190 = vmatprep.subr.bf16.mxu1 %v4610_v0 }
 0x636   : > { %4191 = vmatpush3.bf16.msra.mxu1 %v4488_v43  ;;  %v4496_v43 = vld [vmem:[%s5376_s1 + $0x38] sm:$0xff]  }
 0x637   : > { %4204 = vmatprep.subr.bf16.mxu1 %v4610_v0 }
 0x639   : > { %4193 = vmatmul.mubr.msk.bf16.vlgmr.msra.gmra.mrb[24].mxu1 %vm627_vm1, %v4784_v6 }
 0x63a   : > { %4206 = vmatprep.mubr.msk.bf16.mxu1 %vm4611_vm0, %v4610_v0 }
 0x6fc   : > { %v1215_v44 = vpop.f32.mrb[16].mxu1 }
 0x6fd   : > { %v1221_v46 = vpack.c.bf16 %v1215_v44, %v1215_v44  ;;  %v4166_v47 = vpop.f32.mrb[17].mxu1 }
 0x6fe   : > { %v1218_v48 = vpop.f32.mrb[18].mxu1 }
 0x6ff   : > { %v4167_v49 = vpop.f32.mrb[19].mxu1  ;;  %4171 = vmatmul.mubr.msk.bf16.vlgmr.msra.gmra.mrb[20].mxu0 %vm799_vm2, %v1221_v46 }
 0x700   : > { %4181 = vmatpush3.bf16.msra.mxu0 %v4489_v45  ;;  %4184 = vmatprep.mubr.msk.bf16.mxu0 %vm4611_vm0, %v4610_v0  ;;  %v4493_v45 = vld [vmem:[%s5349_s4 + $0x30] sm:$0xff]  }
 0x701   : > { %4182 = vmatprep.subr.bf16.mxu0 %v4610_v0 }
 0x704   : > { %v1311_v51 = vpop.f32.mrb[20].mxu1  ;;  %4183 = vmatpush3.bf16.msra.mxu0 %v4490_v50  ;;  %v4494_v50 = vld [vmem:[%s5349_s4 + $0x38] sm:$0xff]  }
 0x705   : > { %v4178_v52 = vpop.f32.mrb[21].mxu1  ;;  %4196 = vmatprep.subr.bf16.mxu0 %v4610_v0 }
 0x706   : > { %v1314_v53 = vpop.f32.mrb[22].mxu1 }
 0x707   : > { %v4179_v54 = vpop.f32.mrb[23].mxu1  ;;  %4185 = vmatmul.mubr.msk.bf16.vlgmr.msra.gmra.mrb[24].mxu0 %vm627_vm1, %v4784_v6 }
 0x708   : > { %4200 = vmatprep.mubr.msk.bf16.mxu0 %vm4611_vm0, %v4610_v0  ;;  %4197 = vmatpush3.bf16.msra.mxu0 %v4491_v13 }
 0x709   : > { %4198 = vmatprep.subr.bf16.mxu0 %v4610_v0 }
 0x70c   : > { %v1441_v56 = vpop.f32.mrb[24].mxu1  ;;  %4199 = vmatpush3.bf16.msra.mxu0 %v4492_v14 }
 0x70d   : > { %v1442_v57 = vadd.f32 %v3803_v55, %v1441_v56  ;;  %v4194_v58 = vpop.f32.mrb[25].mxu1  ;;  %4210 = vmatprep.subr.bf16.mxu0 %v4610_v0 }
 0x70e   : > { %v1444_v59 = vpop.f32.mrb[26].mxu1 }
 0x70f   : > { %v1513_v60 = vpack.c.bf16 %v1442_v57, %v1442_v57  ;;  %v4195_v61 = vpop.f32.mrb[27].mxu1  ;;  %4201 = vmatmul.mubr.msk.bf16.vlgmr.msra.gmra.mrb[28].mxu0 %vm627_vm1, %v4784_v6 }
 0x710   : > { %4212 = vmatprep.mubr.msk.bf16.mxu0 %vm4611_vm0, %v4610_v0 }
 0x711   : > { %v1518_v62 = vsel %vm799_vm2, %v1513_v60, 0  ;;  %v3830_v60 = vld [vmem:[%s5350_s5 + $0x3] ss:$0 sm:$0xff] }
 0x712   : > { %4205 = vmatpush3.bf16.xpose.msra.mxu1 %v1518_v62 }
 0x713   : > { %4216 = vmatprep.subr.bf16.mxu1 %v4610_v0 }
 0x7d2   : > { %v1265_v63 = vpop.f32.mrb[20].mxu0 }
 0x7d3   : > { %v4935_v1 = vadd.f32 %v1311_v51, %v1265_v63  ;;  %v4172_v2 = vpop.f32.mrb[21].mxu0 }
 0x7d4   : > { %v1268_v3 = vpop.f32.mrb[22].mxu0 }
 0x7d5   : > { %v4173_v4 = vpop.f32.mrb[23].mxu0  ;;  %v3821_v3 = vld [vmem:[%s5348_s3 + $0x3] ss:$0 sm:$0xff] }
 0x7da   : > { %v1376_v7 = vpop.f32.mrb[24].mxu0 }
 0x7db   : > { %v1377_v8 = vadd.f32 %v3794_v5, %v1376_v7  ;;  %v4186_v9 = vpop.f32.mrb[25].mxu0 }
 0x7dc   : > { %v1379_v10 = vpop.f32.mrb[26].mxu0  ;;  %v4497_v9 = vld [vmem:[#allocation2 + $0x30] sm:$0xff]  }
 0x7dd   : > { %v1512_v11 = vpack.c.bf16 %v1377_v8, %v1377_v8  ;;  %v4187_v12 = vpop.f32.mrb[27].mxu0  ;;  %v4498_v10 = vld [vmem:[#allocation2 + $0x38] sm:$0xff]  }
 0x7df   : > { %4207 = vmatmul.mubr.msk.bf16.vlgmr.msra.gmra.mrb[28].mxu1 %vm799_vm2, %v1512_v11 }
 0x7e0   : > { %4218 = vmatprep.mubr.msk.bf16.mxu1 %vm4611_vm0, %v4610_v0  ;;  %4217 = vmatpush3.bf16.msra.mxu1 %v1628_v37 }
 0x7e1   : > { %4230 = vmatprep.subr.bf16.mxu1 %v4610_v0 }
 0x7e2   : > { %v1506_v28 = vpop.f32.mrb[28].mxu0 }
 0x7e3   : > { %v4202_v29 = vpop.f32.mrb[29].mxu0  ;;  %v1507_v33 = vadd.f32 %v3808_v31, %v1506_v28 }
 0x7e4   : > { %v1509_v30 = vpop.f32.mrb[30].mxu0 }
 0x7e5   : > { %v4203_v32 = vpop.f32.mrb[31].mxu0  ;;  %v1574_v34 = vpack.c.bf16 %v1507_v33, %v1507_v33 }
 0x7e6   : > { %v3841_v32 = vld [vmem:[%s5353_s8 + $0x6] sm:$0x3] }
 0x7e7   : > { %v1579_v35 = vsel %vm871_vm4, %v1574_v34, 0  ;;  %v1982_v33 = vsel %vm1227_vm5, %v3841_v32, 0 }
 0x7e8   : > { %4211 = vmatpush3.bf16.msra.mxu0 %v1579_v35 }
 0x7e9   : > { %4222 = vmatprep.subr.bf16.mxu0 %v4610_v0 }
 0x8b2   : > { %v1554_v15 = vpop.f32.mrb[28].mxu1 }
 0x8b3   : > { %v1560_v16 = vmul.f32 0.5, %v1554_v15  ;;  %v4208_v17 = vpop.f32.mrb[29].mxu1 }
 0x8b4   : > { %v1557_v18 = vpop.f32.mrb[30].mxu1 }
 0x8b5   : > { %v4209_v19 = vpop.f32.mrb[31].mxu1  ;;  %v1561_v20 = vadd.f32 %v4821_v25, %v1560_v16 }
 0x8b7   : > { %v1562_v21 = vsel %vm854_vm3, %v1561_v20, -inf }
 0x8b8   : > { %1563 = vmax.xlane.f32.xlu0 %v1562_v21 }
 0x945   : > { %v1564_v22 = vpop.xlane.xlu0 %1563 }
 0x946   : > { %v1565_v23 = vsub.f32 %v1561_v20, %v1564_v22 }
 0x948   : > { %v1566_v24 = vmul.f32 1.442695, %v1565_v23 }
 0x94a   : > { %4537 = vpow2.f32 %v1566_v24 }
 0x954   : > { %v4538_v26 = vpop.eup %4537 }
 0x955   : > { %v1568_v27 = vsel %vm854_vm3, %v4538_v26, 0.0 }
 0x956   : > { %1569 = vadd.xlane.f32.xlu1 %v1568_v27  ;;  %v3835_v27 = vld [vmem:[%s5352_s7 + $0x3] ss:$0 sm:$0xff] }
 0x9e3   : > { %v1570_v38 = vpop.xlane.xlu1 %1569 }
 0x9e4   : > { %4539 = vrcp.f32 %v1570_v38  ;;  %v4501_v38 = vld [vmem:[%s5376_s1 + $0x40] sm:$0xff]  }
 0x9ee   : > { %v4540_v39 = vpop.eup %4539 }
 0x9ef   : > { %v1572_v40 = vmul.f32 %v4540_v39, %v4538_v26  ;;  %v4502_v39 = vld [vmem:[%s5376_s1 + $0x48] sm:$0xff]  }
 0x9f1   : > { %v1573_v41 = vpack.c.bf16 %v1572_v40, %v1572_v40 }
 0x9f3   : > { %4213 = vmatmul.mubr.msk.bf16.vlgmr.msra.gmra.mrb[32].mxu0 %vm854_vm3, %v1573_v41  ;;  %v4499_v41 = vld [vmem:[%s5349_s4 + $0x40] sm:$0xff]  }
 0x9f4   : > { %4226 = vmatprep.mubr.msk.bf16.mxu0 %vm4611_vm0, %v4610_v0  ;;  %4223 = vmatpush3.bf16.msra.mxu0 %v4495_v42 }
 0x9f5   : > { %4224 = vmatprep.subr.bf16.mxu0 %v4610_v0 }
 0x9f8   : > { %4225 = vmatpush3.bf16.msra.mxu0 %v4496_v43 }
 0x9f9   : > { %4238 = vmatprep.subr.bf16.mxu0 %v4610_v0 }
 0x9fb   : > { %4227 = vmatmul.mubr.msk.bf16.vlgmr.msra.gmra.mrb[36].mxu0 %vm627_vm1, %v4784_v6 }
 0x9fc   : > { %4242 = vmatprep.mubr.msk.bf16.mxu0 %vm4611_vm0, %v4610_v0  ;;  %4239 = vmatpush3.bf16.msra.mxu0 %v4497_v9 }
 0x9fd   : > { %4240 = vmatprep.subr.bf16.mxu0 %v4610_v0 }
 0xa00   : > { %4241 = vmatpush3.bf16.msra.mxu0 %v4498_v10 }
 0xa01   : > { %4252 = vmatprep.subr.bf16.mxu0 %v4610_v0 }
 0xa03   : > { %4243 = vmatmul.mubr.msk.bf16.vlgmr.msra.gmra.mrb[40].mxu0 %vm627_vm1, %v4784_v6 }
 0xa04   : > { %4254 = vmatprep.mubr.msk.bf16.mxu0 %vm4611_vm0, %v4610_v0 }
 0xac6   : > { %v1615_v44 = vpop.f32.mrb[32].mxu0 }
 0xac7   : > { %v1621_v46 = vpack.c.bf16 %v1615_v44, %v1615_v44  ;;  %v4214_v47 = vpop.f32.mrb[33].mxu0 }
 0xac8   : > { %v1618_v48 = vpop.f32.mrb[34].mxu0 }
 0xac9   : > { %v4215_v49 = vpop.f32.mrb[35].mxu0  ;;  %4219 = vmatmul.mubr.msk.bf16.vlgmr.msra.gmra.mrb[32].mxu1 %vm799_vm2, %v1621_v46  ;;  %v4500_v46 = vld [vmem:[%s5349_s4 + $0x48] sm:$0xff]  }
 0xaca   : > { %4231 = vmatpush3.bf16.msra.mxu1 %v4493_v45  ;;  %4234 = vmatprep.mubr.msk.bf16.mxu1 %vm4611_vm0, %v4610_v0 }
 0xacb   : > { %4232 = vmatprep.subr.bf16.mxu1 %v4610_v0 }
 0xace   : > { %4233 = vmatpush3.bf16.msra.mxu1 %v4494_v50  ;;  %v1730_v51 = vpop.f32.mrb[36].mxu0 }
 0xacf   : > { %4246 = vmatprep.subr.bf16.mxu1 %v4610_v0  ;;  %v4228_v52 = vpop.f32.mrb[37].mxu0  ;;  %v1731_v7 = vadd.f32 %v3821_v3, %v1730_v51 }
 0xad0   : > { %v1733_v53 = vpop.f32.mrb[38].mxu0 }
 0xad1   : > { %4235 = vmatmul.mubr.msk.bf16.vlgmr.msra.gmra.mrb[36].mxu1 %vm627_vm1, %v4784_v6  ;;  %v4229_v54 = vpop.f32.mrb[39].mxu0  ;;  %v1866_v8 = vpack.c.bf16 %v1731_v7, %v1731_v7 }
 0xad2   : > { %4248 = vmatprep.mubr.msk.bf16.mxu1 %vm4611_vm0, %v4610_v0 }
 0xad6   : > { %v1860_v23 = vpop.f32.mrb[40].mxu0 }
 0xad7   : > { %v4244_v24 = vpop.f32.mrb[41].mxu0  ;;  %v1861_v29 = vadd.f32 %v3835_v27, %v1860_v23 }
 0xad8   : > { %v1863_v26 = vpop.f32.mrb[42].mxu0 }
 0xad9   : > { %v4245_v28 = vpop.f32.mrb[43].mxu0  ;;  %v1928_v30 = vpack.c.bf16 %v1861_v29, %v1861_v29 }
 0xada   : > { %v3868_v28 = vld [vmem:[%s5353_s8 + $0x8] sm:$0x3] }
 0xadb   : > { %v1933_v31 = vsel %vm871_vm4, %v1928_v30, 0  ;;  %v2336_v29 = vsel %vm1227_vm5, %v3868_v28, 0 }
 0xadc   : > { %4253 = vmatpush3.bf16.msra.mxu0 %v1933_v31 }
 0xadd   : > { %4264 = vmatprep.subr.bf16.mxu0 %v4610_v0 }
 0xb9c   : > { %v1664_v55 = vpop.f32.mrb[32].mxu1 }
 0xb9d   : > { %v4993_v56 = vadd.f32 %v1664_v55, %v4935_v1  ;;  %v4220_v57 = vpop.f32.mrb[33].mxu1 }
 0xb9e   : > { %v1667_v58 = vpop.f32.mrb[34].mxu1  ;;  %v3857_v57 = vld [vmem:[%s5350_s5 + $0x4] ss:$0 sm:$0xff] }
 0xb9f   : > { %v4221_v59 = vpop.f32.mrb[35].mxu1 }
 0xba4   : > { %v1795_v61 = vpop.f32.mrb[36].mxu1 }
 0xba5   : > { %v1796_v62 = vadd.f32 %v3830_v60, %v1795_v61  ;;  %v4236_v63 = vpop.f32.mrb[37].mxu1 }
 0xba6   : > { %v1798_v2 = vpop.f32.mrb[38].mxu1 }
 0xba7   : > { %v1867_v4 = vpack.c.bf16 %v1796_v62, %v1796_v62  ;;  %v4237_v5 = vpop.f32.mrb[39].mxu1  ;;  %v3848_v62 = vld [vmem:[%s5348_s3 + $0x4] ss:$0 sm:$0xff] }
 0xba8   : > { %v4503_v5 = vld [vmem:[#allocation2 + $0x40] sm:$0xff]  }
 0xba9   : > { %v1872_v1 = vsel %vm799_vm2, %v1867_v4, 0 }
 0xbaa   : > { %4247 = vmatpush3.bf16.xpose.msra.mxu1 %v1872_v1  ;;  %v4504_v1 = vld [vmem:[#allocation2 + $0x48] sm:$0xff]  }
 0xbab   : > { %4258 = vmatprep.subr.bf16.mxu1 %v4610_v0 }
 0xbb1   : > { %4249 = vmatmul.mubr.msk.bf16.vlgmr.msra.gmra.mrb[40].mxu1 %vm799_vm2, %v1866_v8 }
 0xbb2   : > { %4260 = vmatprep.mubr.msk.bf16.mxu1 %vm4611_vm0, %v4610_v0  ;;  %4259 = vmatpush3.bf16.msra.mxu1 %v1982_v33 }
 0xbb3   : > { %4272 = vmatprep.subr.bf16.mxu1 %v4610_v0 }
 0xc84   : > { %v1908_v11 = vpop.f32.mrb[40].mxu1 }
 0xc85   : > { %v1914_v12 = vmul.f32 0.5, %v1908_v11  ;;  %v4250_v13 = vpop.f32.mrb[41].mxu1 }
 0xc86   : > { %v1911_v14 = vpop.f32.mrb[42].mxu1 }
 0xc87   : > { %v4251_v15 = vpop.f32.mrb[43].mxu1  ;;  %v1915_v16 = vadd.f32 %v4821_v25, %v1914_v12 }
 0xc89   : > { %v1916_v17 = vsel %vm854_vm3, %v1915_v16, -inf }
 0xc8a   : > { %1917 = vmax.xlane.f32.xlu0 %v1916_v17 }
 0xd17   : > { %v1918_v18 = vpop.xlane.xlu0 %1917 }
 0xd18   : > { %v1919_v19 = vsub.f32 %v1915_v16, %v1918_v18 }
 0xd1a   : > { %v1920_v20 = vmul.f32 1.442695, %v1919_v19 }
 0xd1c   : > { %4541 = vpow2.f32 %v1920_v20 }
 0xd26   : > { %v4542_v21 = vpop.eup %4541 }
 0xd27   : > { %v1922_v22 = vsel %vm854_vm3, %v4542_v21, 0.0 }
 0xd28   : > { %1923 = vadd.xlane.f32.xlu1 %v1922_v22  ;;  %v3862_v22 = vld [vmem:[%s5352_s7 + $0x4] ss:$0 sm:$0xff] }
 0xdb5   : > { %v1924_v34 = vpop.xlane.xlu1 %1923 }
 0xdb6   : > { %4543 = vrcp.f32 %v1924_v34  ;;  %v4507_v34 = vld [vmem:[%s5376_s1 + $0x50] sm:$0xff]  }
 0xdc0   : > { %v4544_v35 = vpop.eup %4543 }
 0xdc1   : > { %v1926_v36 = vmul.f32 %v4544_v35, %v4542_v21  ;;  %v4508_v35 = vld [vmem:[%s5376_s1 + $0x58] sm:$0xff]  }
 0xdc3   : > { %v1927_v37 = vpack.c.bf16 %v1926_v36, %v1926_v36 }
 0xdc5   : > { %4255 = vmatmul.mubr.msk.bf16.vlgmr.msra.gmra.mrb[44].mxu0 %vm854_vm3, %v1927_v37  ;;  %v4505_v37 = vld [vmem:[%s5349_s4 + $0x50] sm:$0xff]  }
 0xdc6   : > { %4268 = vmatprep.mubr.msk.bf16.mxu0 %vm4611_vm0, %v4610_v0  ;;  %4265 = vmatpush3.bf16.msra.mxu0 %v4501_v38 }
 0xdc7   : > { %4266 = vmatprep.subr.bf16.mxu0 %v4610_v0 }
 0xdca   : > { %4267 = vmatpush3.bf16.msra.mxu0 %v4502_v39 }
 0xdcb   : > { %4280 = vmatprep.subr.bf16.mxu0 %v4610_v0 }
 0xdcd   : > { %4269 = vmatmul.mubr.msk.bf16.vlgmr.msra.gmra.mrb[48].mxu0 %vm627_vm1, %v4784_v6 }
 0xdce   : > { %4284 = vmatprep.mubr.msk.bf16.mxu0 %vm4611_vm0, %v4610_v0  ;;  %4281 = vmatpush3.bf16.msra.mxu0 %v4503_v5 }
 0xdcf   : > { %4282 = vmatprep.subr.bf16.mxu0 %v4610_v0 }
 0xdd2   : > { %4283 = vmatpush3.bf16.msra.mxu0 %v4504_v1 }
 0xdd3   : > { %4294 = vmatprep.subr.bf16.mxu0 %v4610_v0 }
 0xdd5   : > { %4285 = vmatmul.mubr.msk.bf16.vlgmr.msra.gmra.mrb[52].mxu0 %vm627_vm1, %v4784_v6 }
 0xdd6   : > { %4296 = vmatprep.mubr.msk.bf16.mxu0 %vm4611_vm0, %v4610_v0 }
 0xe98   : > { %v1969_v40 = vpop.f32.mrb[44].mxu0 }
 0xe99   : > { %v1975_v42 = vpack.c.bf16 %v1969_v40, %v1969_v40  ;;  %v4256_v43 = vpop.f32.mrb[45].mxu0 }
 0xe9a   : > { %v1972_v44 = vpop.f32.mrb[46].mxu0 }
 0xe9b   : > { %v4257_v45 = vpop.f32.mrb[47].mxu0  ;;  %4261 = vmatmul.mubr.msk.bf16.vlgmr.msra.gmra.mrb[44].mxu1 %vm799_vm2, %v1975_v42  ;;  %v4506_v42 = vld [vmem:[%s5349_s4 + $0x58] sm:$0xff]  }
 0xe9c   : > { %4273 = vmatpush3.bf16.msra.mxu1 %v4499_v41  ;;  %4276 = vmatprep.mubr.msk.bf16.mxu1 %vm4611_vm0, %v4610_v0 }
 0xe9d   : > { %4274 = vmatprep.subr.bf16.mxu1 %v4610_v0 }
 0xea0   : > { %4275 = vmatpush3.bf16.msra.mxu1 %v4500_v46  ;;  %v2084_v47 = vpop.f32.mrb[48].mxu0 }
 0xea1   : > { %4288 = vmatprep.subr.bf16.mxu1 %v4610_v0  ;;  %v4270_v48 = vpop.f32.mrb[49].mxu0  ;;  %v2085_v3 = vadd.f32 %v3848_v62, %v2084_v47 }
 0xea2   : > { %v2087_v49 = vpop.f32.mrb[50].mxu0 }
 0xea3   : > { %4277 = vmatmul.mubr.msk.bf16.vlgmr.msra.gmra.mrb[48].mxu1 %vm627_vm1, %v4784_v6  ;;  %v4271_v50 = vpop.f32.mrb[51].mxu0  ;;  %v2220_v4 = vpack.c.bf16 %v2085_v3, %v2085_v3 }
 0xea4   : > { %4290 = vmatprep.mubr.msk.bf16.mxu1 %vm4611_vm0, %v4610_v0 }
 0xea8   : > { %v2214_v19 = vpop.f32.mrb[52].mxu0 }
 0xea9   : > { %v4286_v20 = vpop.f32.mrb[53].mxu0  ;;  %v2215_v24 = vadd.f32 %v3862_v22, %v2214_v19  ;;  %v3895_v22 = vld [vmem:[%s5353_s8 + $0xa] sm:$0x3] }
 0xeaa   : > { %v2217_v21 = vpop.f32.mrb[54].mxu0 }
 0xeab   : > { %v4287_v23 = vpop.f32.mrb[55].mxu0  ;;  %v2282_v26 = vpack.c.bf16 %v2215_v24, %v2215_v24 }
 0xeac   : > { %v2690_v23 = vsel %vm1227_vm5, %v3895_v22, 0 }
 0xead   : > { %v2287_v27 = vsel %vm871_vm4, %v2282_v26, 0 }
 0xeae   : > { %4295 = vmatpush3.bf16.msra.mxu0 %v2287_v27 }
 0xeaf   : > { %4306 = vmatprep.subr.bf16.mxu0 %v4610_v0 }
 0xf6e   : > { %v2018_v51 = vpop.f32.mrb[44].mxu1 }
 0xf6f   : > { %v5056_v52 = vadd.f32 %v2018_v51, %v4993_v56  ;;  %v4262_v53 = vpop.f32.mrb[45].mxu1 }
 0xf70   : > { %v2021_v54 = vpop.f32.mrb[46].mxu1  ;;  %v3884_v53 = vld [vmem:[%s5350_s5 + $0x5] ss:$0 sm:$0xff] }
 0xf71   : > { %v4263_v55 = vpop.f32.mrb[47].mxu1 }
 0xf76   : > { %v2149_v58 = vpop.f32.mrb[48].mxu1 }
 0xf77   : > { %v2150_v59 = vadd.f32 %v3857_v57, %v2149_v58  ;;  %v4278_v60 = vpop.f32.mrb[49].mxu1 }
 0xf78   : > { %v2152_v61 = vpop.f32.mrb[50].mxu1 }
 0xf79   : > { %v2221_v63 = vpack.c.bf16 %v2150_v59, %v2150_v59  ;;  %v4279_v2 = vpop.f32.mrb[51].mxu1  ;;  %v3875_v59 = vld [vmem:[%s5348_s3 + $0x5] ss:$0 sm:$0xff] }
 0xf7a   : > { %v4509_v2 = vld [vmem:[#allocation2 + $0x50] sm:$0xff]  }
 0xf7b   : > { %v2226_v56 = vsel %vm799_vm2, %v2221_v63, 0 }
 0xf7c   : > { %4289 = vmatpush3.bf16.xpose.msra.mxu1 %v2226_v56  ;;  %v4510_v56 = vld [vmem:[#allocation2 + $0x58] sm:$0xff]  }
 0xf7d   : > { %4300 = vmatprep.subr.bf16.mxu1 %v4610_v0 }
 0xf83   : > { %4291 = vmatmul.mubr.msk.bf16.vlgmr.msra.gmra.mrb[52].mxu1 %vm799_vm2, %v2220_v4 }
 0xf84   : > { %4302 = vmatprep.mubr.msk.bf16.mxu1 %vm4611_vm0, %v4610_v0  ;;  %4301 = vmatpush3.bf16.msra.mxu1 %v2336_v29  ;;  %v4513_v29 = vld [vmem:[%s5376_s1 + $0x60] sm:$0xff]  }
 0xf85   : > { %4314 = vmatprep.subr.bf16.mxu1 %v4610_v0 }
0x1056   : > { %v2262_v7 = vpop.f32.mrb[52].mxu1 }
0x1057   : > { %v2268_v8 = vmul.f32 0.5, %v2262_v7  ;;  %v4292_v9 = vpop.f32.mrb[53].mxu1 }
0x1058   : > { %v2265_v10 = vpop.f32.mrb[54].mxu1 }
0x1059   : > { %v4293_v11 = vpop.f32.mrb[55].mxu1  ;;  %v2269_v12 = vadd.f32 %v4821_v25, %v2268_v8 }
0x105b   : > { %v2270_v13 = vsel %vm854_vm3, %v2269_v12, -inf }
0x105c   : > { %2271 = vmax.xlane.f32.xlu0 %v2270_v13 }
0x10e9   : > { %v2272_v14 = vpop.xlane.xlu0 %2271 }
0x10ea   : > { %v2273_v15 = vsub.f32 %v2269_v12, %v2272_v14 }
0x10ec   : > { %v2274_v16 = vmul.f32 1.442695, %v2273_v15 }
0x10ee   : > { %4545 = vpow2.f32 %v2274_v16 }
0x10f8   : > { %v4546_v17 = vpop.eup %4545 }
0x10f9   : > { %v2276_v18 = vsel %vm854_vm3, %v4546_v17, 0.0 }
0x10fa   : > { %2277 = vadd.xlane.f32.xlu1 %v2276_v18  ;;  %v3889_v18 = vld [vmem:[%s5352_s7 + $0x5] ss:$0 sm:$0xff] }
0x1187   : > { %v2278_v30 = vpop.xlane.xlu1 %2277 }
0x1188   : > { %4547 = vrcp.f32 %v2278_v30  ;;  %v4514_v30 = vld [vmem:[%s5376_s1 + $0x68] sm:$0xff]  }
0x1192   : > { %v4548_v31 = vpop.eup %4547 }
0x1193   : > { %v2280_v32 = vmul.f32 %v4548_v31, %v4546_v17 }
0x1195   : > { %v2281_v33 = vpack.c.bf16 %v2280_v32, %v2280_v32  ;;  %v4511_v32 = vld [vmem:[%s5349_s4 + $0x60] sm:$0xff]  }
0x1197   : > { %4297 = vmatmul.mubr.msk.bf16.vlgmr.msra.gmra.mrb[56].mxu0 %vm854_vm3, %v2281_v33 }
0x1198   : > { %4310 = vmatprep.mubr.msk.bf16.mxu0 %vm4611_vm0, %v4610_v0  ;;  %4307 = vmatpush3.bf16.msra.mxu0 %v4507_v34 }
0x1199   : > { %4308 = vmatprep.subr.bf16.mxu0 %v4610_v0 }
0x119c   : > { %4309 = vmatpush3.bf16.msra.mxu0 %v4508_v35 }
0x119d   : > { %4322 = vmatprep.subr.bf16.mxu0 %v4610_v0 }
0x119f   : > { %4311 = vmatmul.mubr.msk.bf16.vlgmr.msra.gmra.mrb[60].mxu0 %vm627_vm1, %v4784_v6 }
0x11a0   : > { %4326 = vmatprep.mubr.msk.bf16.mxu0 %vm4611_vm0, %v4610_v0  ;;  %4323 = vmatpush3.bf16.msra.mxu0 %v4509_v2 }
0x11a1   : > { %4324 = vmatprep.subr.bf16.mxu0 %v4610_v0 }
0x11a4   : > { %4325 = vmatpush3.bf16.msra.mxu0 %v4510_v56 }
0x11a5   : > { %4336 = vmatprep.subr.bf16.mxu0 %v4610_v0 }
0x11a7   : > { %4327 = vmatmul.mubr.msk.bf16.vlgmr.msra.gmra.mrb[64].mxu0 %vm627_vm1, %v4784_v6 }
0x11a8   : > { %4338 = vmatprep.mubr.msk.bf16.mxu0 %vm4611_vm0, %v4610_v0 }
0x126a   : > { %v2323_v36 = vpop.f32.mrb[56].mxu0 }
0x126b   : > { %v2329_v38 = vpack.c.bf16 %v2323_v36, %v2323_v36  ;;  %v4298_v39 = vpop.f32.mrb[57].mxu0 }
0x126c   : > { %v2326_v40 = vpop.f32.mrb[58].mxu0 }
0x126d   : > { %v4299_v41 = vpop.f32.mrb[59].mxu0  ;;  %4303 = vmatmul.mubr.msk.bf16.vlgmr.msra.gmra.mrb[56].mxu1 %vm799_vm2, %v2329_v38 }
0x126e   : > { %4315 = vmatpush3.bf16.msra.mxu1 %v4505_v37  ;;  %4318 = vmatprep.mubr.msk.bf16.mxu1 %vm4611_vm0, %v4610_v0  ;;  %v4512_v37 = vld [vmem:[%s5349_s4 + $0x68] sm:$0xff]  }
0x126f   : > { %4316 = vmatprep.subr.bf16.mxu1 %v4610_v0 }
0x1272   : > { %4317 = vmatpush3.bf16.msra.mxu1 %v4506_v42  ;;  %v2438_v43 = vpop.f32.mrb[60].mxu0 }
0x1273   : > { %4330 = vmatprep.subr.bf16.mxu1 %v4610_v0  ;;  %v4312_v44 = vpop.f32.mrb[61].mxu0  ;;  %v2439_v62 = vadd.f32 %v3875_v59, %v2438_v43 }
0x1274   : > { %v2441_v45 = vpop.f32.mrb[62].mxu0 }
0x1275   : > { %4319 = vmatmul.mubr.msk.bf16.vlgmr.msra.gmra.mrb[60].mxu1 %vm627_vm1, %v4784_v6  ;;  %v4313_v46 = vpop.f32.mrb[63].mxu0  ;;  %v2574_v63 = vpack.c.bf16 %v2439_v62, %v2439_v62 }
0x1276   : > { %4332 = vmatprep.mubr.msk.bf16.mxu1 %vm4611_vm0, %v4610_v0 }
0x127a   : > { %v2568_v15 = vpop.f32.mrb[64].mxu0 }
0x127b   : > { %v4328_v16 = vpop.f32.mrb[65].mxu0 }
0x127c   : > { %v2571_v17 = vpop.f32.mrb[66].mxu0 }
0x127d   : > { %v4329_v19 = vpop.f32.mrb[67].mxu0 }
0x127e   : > { %v3922_v19 = vld [vmem:[%s5353_s8 + $0xc] sm:$0x3] }
0x1340   : > { %v2372_v47 = vpop.f32.mrb[56].mxu1 }
0x1341   : > { %v5119_v48 = vadd.f32 %v2372_v47, %v5056_v52  ;;  %v4304_v49 = vpop.f32.mrb[57].mxu1  ;;  %v3911_v47 = vld [vmem:[%s5350_s5 + $0x6] ss:$0 sm:$0xff] }
0x1342   : > { %v2375_v50 = vpop.f32.mrb[58].mxu1 }
0x1343   : > { %v4305_v51 = vpop.f32.mrb[59].mxu1 }
0x1348   : > { %v2503_v54 = vpop.f32.mrb[60].mxu1 }
0x1349   : > { %v2504_v55 = vadd.f32 %v3884_v53, %v2503_v54  ;;  %v4320_v57 = vpop.f32.mrb[61].mxu1  ;;  %v3902_v54 = vld [vmem:[%s5348_s3 + $0x6] ss:$0 sm:$0xff] }
0x134a   : > { %v2506_v58 = vpop.f32.mrb[62].mxu1 }
0x134b   : > { %v2575_v60 = vpack.c.bf16 %v2504_v55, %v2504_v55  ;;  %v4321_v61 = vpop.f32.mrb[63].mxu1 }
0x134c   : > { %v4516_v61 = vld [vmem:[#allocation2 + $0x68] sm:$0xff]  }
0x134d   : > { %v2580_v52 = vsel %vm799_vm2, %v2575_v60, 0  ;;  %v4515_v60 = vld [vmem:[#allocation2 + $0x60] sm:$0xff]  }
0x134e   : > { %4331 = vmatpush3.bf16.xpose.msra.mxu1 %v2580_v52 }
0x134f   : > { %4342 = vmatprep.subr.bf16.mxu1 %v4610_v0 }
0x1355   : > { %4333 = vmatmul.mubr.msk.bf16.vlgmr.msra.gmra.mrb[64].mxu1 %vm799_vm2, %v2574_v63 }
0x1356   : > { %4344 = vmatprep.mubr.msk.bf16.mxu1 %vm4611_vm0, %v4610_v0  ;;  %4343 = vmatpush3.bf16.msra.mxu1 %v2690_v23 }
0x1357   : > { %4356 = vmatprep.subr.bf16.mxu1 %v4610_v0 }
0x1428   : > { %v2616_v3 = vpop.f32.mrb[64].mxu1 }
0x1429   : > { %v2622_v4 = vmul.f32 0.5, %v2616_v3  ;;  %v4334_v5 = vpop.f32.mrb[65].mxu1  ;;  %v5202_v3 = vld [vmem:[%s4818_s29] ss:$0 sm:$0xff] }
0x142a   : > { %v2619_v1 = vpop.f32.mrb[66].mxu1 }
0x142b   : > { %v4335_v7 = vpop.f32.mrb[67].mxu1  ;;  %v2623_v8 = vadd.f32 %v4821_v25, %v2622_v4  ;;  %v2569_v25 = vadd.f32 %v3889_v18, %v2568_v15 }
0x142d   : > { %v2624_v9 = vsel %vm854_vm3, %v2623_v8, -inf  ;;  %v2636_v20 = vpack.c.bf16 %v2569_v25, %v2569_v25  ;;  %v3044_v25 = vsel %vm1227_vm5, %v3922_v19, 0 }
0x142e   : > { %2625 = vmax.xlane.f32.xlu0 %v2624_v9 }
0x142f   : > { %v2641_v21 = vsel %vm871_vm4, %v2636_v20, 0 }
0x1430   : > { %4337 = vmatpush3.bf16.msra.mxu0 %v2641_v21 }
0x1431   : > { %4348 = vmatprep.subr.bf16.mxu0 %v4610_v0 }
0x14bb   : > { %v2626_v10 = vpop.xlane.xlu0 %2625 }
0x14bc   : > { %v2627_v11 = vsub.f32 %v2623_v8, %v2626_v10 }
0x14be   : > { %v2628_v12 = vmul.f32 1.442695, %v2627_v11 }
0x14c0   : > { %4549 = vpow2.f32 %v2628_v12 }
0x14ca   : > { %v4550_v13 = vpop.eup %4549 }
0x14cb   : > { %v2630_v14 = vsel %vm854_vm3, %v4550_v13, 0.0 }
0x14cc   : > { %2631 = vadd.xlane.f32.xlu1 %v2630_v14  ;;  %v3916_v14 = vld [vmem:[%s5352_s7 + $0x6] ss:$0 sm:$0xff] }
0x1559   : > { %v2632_v24 = vpop.xlane.xlu1 %2631 }
0x155a   : > { %4551 = vrcp.f32 %v2632_v24  ;;  %v4519_v24 = vld [vmem:[%s5376_s1 + $0x70] sm:$0xff]  }
0x1564   : > { %v4552_v26 = vpop.eup %4551 }
0x1565   : > { %v2634_v27 = vmul.f32 %v4552_v26, %v4550_v13  ;;  %v4520_v26 = vld [vmem:[%s5376_s1 + $0x78] sm:$0xff]  }
0x1567   : > { %v2635_v28 = vpack.c.bf16 %v2634_v27, %v2634_v27 }
0x1569   : > { %4339 = vmatmul.mubr.msk.bf16.vlgmr.msra.gmra.mrb[68].mxu0 %vm854_vm3, %v2635_v28  ;;  %v4517_v28 = vld [vmem:[%s5349_s4 + $0x70] sm:$0xff]  }
0x156a   : > { %4352 = vmatprep.mubr.msk.bf16.mxu0 %vm4611_vm0, %v4610_v0  ;;  %4349 = vmatpush3.bf16.msra.mxu0 %v4513_v29 }
0x156b   : > { %4350 = vmatprep.subr.bf16.mxu0 %v4610_v0 }
0x156e   : > { %4351 = vmatpush3.bf16.msra.mxu0 %v4514_v30 }
0x156f   : > { %4364 = vmatprep.subr.bf16.mxu0 %v4610_v0 }
0x1571   : > { %4353 = vmatmul.mubr.msk.bf16.vlgmr.msra.gmra.mrb[72].mxu0 %vm627_vm1, %v4784_v6 }
0x1572   : > { %4368 = vmatprep.mubr.msk.bf16.mxu0 %vm4611_vm0, %v4610_v0  ;;  %4365 = vmatpush3.bf16.msra.mxu0 %v4515_v60 }
0x1573   : > { %4366 = vmatprep.subr.bf16.mxu0 %v4610_v0 }
0x1576   : > { %4367 = vmatpush3.bf16.msra.mxu0 %v4516_v61 }
0x1577   : > { %4378 = vmatprep.subr.bf16.mxu0 %v4610_v0 }
0x1579   : > { %4369 = vmatmul.mubr.msk.bf16.vlgmr.msra.gmra.mrb[76].mxu0 %vm627_vm1, %v4784_v6 }
0x157a   : > { %4380 = vmatprep.mubr.msk.bf16.mxu0 %vm4611_vm0, %v4610_v0 }
0x163c   : > { %v2677_v31 = vpop.f32.mrb[68].mxu0 }
0x163d   : > { %v2683_v33 = vpack.c.bf16 %v2677_v31, %v2677_v31  ;;  %v4340_v34 = vpop.f32.mrb[69].mxu0 }
0x163e   : > { %v2680_v35 = vpop.f32.mrb[70].mxu0 }
0x163f   : > { %v4341_v36 = vpop.f32.mrb[71].mxu0  ;;  %4345 = vmatmul.mubr.msk.bf16.vlgmr.msra.gmra.mrb[68].mxu1 %vm799_vm2, %v2683_v33  ;;  %v4518_v33 = vld [vmem:[%s5349_s4 + $0x78] sm:$0xff]  }
0x1640   : > { %4357 = vmatpush3.bf16.msra.mxu1 %v4511_v32  ;;  %4360 = vmatprep.mubr.msk.bf16.mxu1 %vm4611_vm0, %v4610_v0 }
0x1641   : > { %4358 = vmatprep.subr.bf16.mxu1 %v4610_v0 }
0x1644   : > { %4359 = vmatpush3.bf16.msra.mxu1 %v4512_v37  ;;  %v2792_v38 = vpop.f32.mrb[72].mxu0 }
0x1645   : > { %4372 = vmatprep.subr.bf16.mxu1 %v4610_v0  ;;  %v4354_v39 = vpop.f32.mrb[73].mxu0  ;;  %v2793_v58 = vadd.f32 %v3902_v54, %v2792_v38 }
0x1646   : > { %v2795_v40 = vpop.f32.mrb[74].mxu0 }
0x1647   : > { %4361 = vmatmul.mubr.msk.bf16.vlgmr.msra.gmra.mrb[72].mxu1 %vm627_vm1, %v4784_v6  ;;  %v4355_v41 = vpop.f32.mrb[75].mxu0  ;;  %v2928_v59 = vpack.c.bf16 %v2793_v58, %v2793_v58 }
0x1648   : > { %4374 = vmatprep.mubr.msk.bf16.mxu1 %vm4611_vm0, %v4610_v0 }
0x164c   : > { %v2922_v11 = vpop.f32.mrb[76].mxu0 }
0x164d   : > { %v4370_v12 = vpop.f32.mrb[77].mxu0  ;;  %v2923_v16 = vadd.f32 %v3916_v14, %v2922_v11 }
0x164e   : > { %v2925_v13 = vpop.f32.mrb[78].mxu0 }
0x164f   : > { %v4371_v15 = vpop.f32.mrb[79].mxu0  ;;  %v2990_v17 = vpack.c.bf16 %v2923_v16, %v2923_v16  ;;  %v3949_v13 = vld [vmem:[%s5353_s8 + $0xe] sm:$0x3] }
0x1650   : > { %v3398_v14 = vsel %vm1227_vm5, %v3949_v13, 0 }
0x1651   : > { %v2995_v18 = vsel %vm871_vm4, %v2990_v17, 0 }
0x1652   : > { %4379 = vmatpush3.bf16.msra.mxu0 %v2995_v18 }
0x1653   : > { %4390 = vmatprep.subr.bf16.mxu0 %v4610_v0 }
0x1712   : > { %v2726_v42 = vpop.f32.mrb[68].mxu1 }
0x1713   : > { %v5182_v43 = vadd.f32 %v2726_v42, %v5119_v48  ;;  %v4346_v44 = vpop.f32.mrb[69].mxu1 }
0x1714   : > { %v2729_v45 = vpop.f32.mrb[70].mxu1  ;;  %v3938_v44 = vld [vmem:[%s5350_s5 + $0x7] ss:$0 sm:$0xff] }
0x1715   : > { %v4347_v46 = vpop.f32.mrb[71].mxu1 }
0x171a   : > { %v2857_v49 = vpop.f32.mrb[72].mxu1 }
0x171b   : > { %v2858_v50 = vadd.f32 %v3911_v47, %v2857_v49  ;;  %v4362_v51 = vpop.f32.mrb[73].mxu1 }
0x171c   : > { %v2860_v53 = vpop.f32.mrb[74].mxu1 }
0x171d   : > { %v2929_v55 = vpack.c.bf16 %v2858_v50, %v2858_v50  ;;  %v4363_v57 = vpop.f32.mrb[75].mxu1  ;;  %v3929_v50 = vld [vmem:[%s5348_s3 + $0x7] ss:$0 sm:$0xff] }
0x171e   : > { %v4521_v57 = vld [vmem:[#allocation2 + $0x70] sm:$0xff]  }
0x171f   : > { %v2934_v48 = vsel %vm799_vm2, %v2929_v55, 0 }
0x1720   : > { %4373 = vmatpush3.bf16.xpose.msra.mxu1 %v2934_v48  ;;  %v4522_v48 = vld [vmem:[#allocation2 + $0x78] sm:$0xff]  }
0x1721   : > { %4384 = vmatprep.subr.bf16.mxu1 %v4610_v0 }
0x1727   : > { %4375 = vmatmul.mubr.msk.bf16.vlgmr.msra.gmra.mrb[76].mxu1 %vm799_vm2, %v2928_v59 }
0x1728   : > { %4386 = vmatprep.mubr.msk.bf16.mxu1 %vm4611_vm0, %v4610_v0  ;;  %4385 = vmatpush3.bf16.msra.mxu1 %v3044_v25 }
0x1729   : > { %4398 = vmatprep.subr.bf16.mxu1 %v4610_v0 }
0x17fa   : > { %v2970_v52 = vpop.f32.mrb[76].mxu1 }
0x17fb   : > { %v2976_v62 = vmul.f32 0.5, %v2970_v52  ;;  %v4376_v63 = vpop.f32.mrb[77].mxu1 }
0x17fc   : > { %v2973_v2 = vpop.f32.mrb[78].mxu1 }
0x17fd   : > { %v4377_v56 = vpop.f32.mrb[79].mxu1  ;;  %v2977_v4 = vadd.f32 %v5202_v3, %v2976_v62 }
0x17ff   : > { %v2978_v5 = vsel %vm854_vm3, %v2977_v4, -inf }
0x1800   : > { %2979 = vmax.xlane.f32.xlu0 %v2978_v5 }
0x188d   : > { %v2980_v1 = vpop.xlane.xlu0 %2979 }
0x188e   : > { %v2981_v7 = vsub.f32 %v2977_v4, %v2980_v1 }
0x1890   : > { %v2982_v8 = vmul.f32 1.442695, %v2981_v7 }
0x1892   : > { %4553 = vpow2.f32 %v2982_v8 }
0x189c   : > { %v4554_v9 = vpop.eup %4553 }
0x189d   : > { %v2984_v10 = vsel %vm854_vm3, %v4554_v9, 0.0 }
0x189e   : > { %2985 = vadd.xlane.f32.xlu1 %v2984_v10 }
0x192b   : > { %v2986_v20 = vpop.xlane.xlu1 %2985 }
0x192c   : > { %4555 = vrcp.f32 %v2986_v20 }
0x1936   : > { %v4556_v21 = vpop.eup %4555 }
0x1937   : > { %v2988_v22 = vmul.f32 %v4556_v21, %v4554_v9  ;;  %v3943_v9 = vld [vmem:[%s5352_s7 + $0x7] ss:$0 sm:$0xff] }
0x1939   : > { %v2989_v23 = vpack.c.bf16 %v2988_v22, %v2988_v22 }
0x193b   : > { %4381 = vmatmul.mubr.msk.bf16.vlgmr.msra.gmra.mrb[80].mxu0 %vm854_vm3, %v2989_v23 }
0x193c   : > { %4394 = vmatprep.mubr.msk.bf16.mxu0 %vm4611_vm0, %v4610_v0  ;;  %4391 = vmatpush3.bf16.msra.mxu0 %v4519_v24  ;;  %v3951_v24 = vld [vmem:[%s5354_s9] ss:$0 sm:$0xff] }
0x193d   : > { %4392 = vmatprep.subr.bf16.mxu0 %v4610_v0 }
0x1940   : > { %4393 = vmatpush3.bf16.msra.mxu0 %v4520_v26 }
0x1941   : > { %4406 = vmatprep.subr.bf16.mxu0 %v4610_v0 }
0x1943   : > { %4395 = vmatmul.mubr.msk.bf16.vlgmr.msra.gmra.mrb[84].mxu0 %vm627_vm1, %v4784_v6 }
0x1944   : > { %4410 = vmatprep.mubr.msk.bf16.mxu0 %vm4611_vm0, %v4610_v0  ;;  %4407 = vmatpush3.bf16.msra.mxu0 %v4521_v57  ;;  %v4528_v57 = vld [vmem:[%s5359_s14 + $0x18] sm:$0xff]  }
0x1945   : > { %4408 = vmatprep.subr.bf16.mxu0 %v4610_v0 }
0x1948   : > { %4409 = vmatpush3.bf16.msra.mxu0 %v4522_v48  ;;  %v3954_v48 = vld [vmem:[%s5358_s13] ss:$0 sm:$0xff] }
0x1949   : > { %4420 = vmatprep.subr.bf16.mxu0 %v4610_v0 }
0x194b   : > { %4411 = vmatmul.mubr.msk.bf16.vlgmr.msra.gmra.mrb[88].mxu0 %vm627_vm1, %v4784_v6 }
0x194c   : > { %4422 = vmatprep.mubr.msk.bf16.mxu0 %vm4611_vm0, %v4610_v0 }
0x1a0e   : > { %v3031_v27 = vpop.f32.mrb[80].mxu0 }
0x1a0f   : > { %v3037_v29 = vpack.c.bf16 %v3031_v27, %v3031_v27  ;;  %v4382_v30 = vpop.f32.mrb[81].mxu0 }
0x1a10   : > { %v3034_v31 = vpop.f32.mrb[82].mxu0 }
0x1a11   : > { %v4383_v32 = vpop.f32.mrb[83].mxu0  ;;  %4387 = vmatmul.mubr.msk.bf16.vlgmr.msra.gmra.mrb[80].mxu1 %vm799_vm2, %v3037_v29  ;;  %v4566_v31 = vld [vmem:[%s4771_s23] sm:$0xff] }
0x1a12   : > { %4399 = vmatpush3.bf16.msra.mxu1 %v4517_v28  ;;  %4402 = vmatprep.mubr.msk.bf16.mxu1 %vm4611_vm0, %v4610_v0 }
0x1a13   : > { %4400 = vmatprep.subr.bf16.mxu1 %v4610_v0 }
0x1a16   : > { %4401 = vmatpush3.bf16.msra.mxu1 %v4518_v33  ;;  %v3146_v34 = vpop.f32.mrb[84].mxu0 }
0x1a17   : > { %4414 = vmatprep.subr.bf16.mxu1 %v4610_v0  ;;  %v4396_v35 = vpop.f32.mrb[85].mxu0  ;;  %v3147_v54 = vadd.f32 %v3929_v50, %v3146_v34 }
0x1a18   : > { %v3149_v36 = vpop.f32.mrb[86].mxu0 }
0x1a19   : > { %4403 = vmatmul.mubr.msk.bf16.vlgmr.msra.gmra.mrb[84].mxu1 %vm627_vm1, %v4784_v6  ;;  %v4397_v37 = vpop.f32.mrb[87].mxu0  ;;  %v3282_v55 = vpack.c.bf16 %v3147_v54, %v3147_v54 }
0x1a1a   : > { %4416 = vmatprep.mubr.msk.bf16.mxu1 %vm4611_vm0, %v4610_v0 }
0x1a1e   : > { %v3276_v1 = vpop.f32.mrb[88].mxu0 }
0x1a1f   : > { %v4412_v7 = vpop.f32.mrb[89].mxu0 }
0x1a20   : > { %v3279_v8 = vpop.f32.mrb[90].mxu0 }
0x1a21   : > { %v4413_v10 = vpop.f32.mrb[91].mxu0 }
0x1ae4   : > { %v3080_v38 = vpop.f32.mrb[80].mxu1 }
0x1ae5   : > { %v5248_v39 = vadd.f32 %v3080_v38, %v5182_v43  ;;  %v4388_v40 = vpop.f32.mrb[81].mxu1 }
0x1ae6   : > { %v3083_v41 = vpop.f32.mrb[82].mxu1  ;;  %v4524_v40 = vld [vmem:[%s5357_s12 + $0x8] sm:$0xff]  }
0x1ae7   : > { %v4389_v42 = vpop.f32.mrb[83].mxu1  ;;  %v4525_v41 = vld [vmem:[%s5359_s14] sm:$0xff]  }
0x1ae8   : > { %v4526_v42 = vld [vmem:[%s5359_s14 + $0x8] sm:$0xff]  }
0x1aec   : > { %v3211_v45 = vpop.f32.mrb[84].mxu1 }
0x1aed   : > { %v3212_v46 = vadd.f32 %v3938_v44, %v3211_v45  ;;  %v4404_v47 = vpop.f32.mrb[85].mxu1 }
0x1aee   : > { %v3214_v49 = vpop.f32.mrb[86].mxu1 }
0x1aef   : > { %v3283_v51 = vpack.c.bf16 %v3212_v46, %v3212_v46  ;;  %v4405_v53 = vpop.f32.mrb[87].mxu1  ;;  %v3952_v49 = vld [vmem:[%s5355_s10] ss:$0 sm:$0xff] }
0x1af1   : > { %v3288_v43 = vsel %vm799_vm2, %v3283_v51, 0  ;;  %v3953_v51 = vld [vmem:[%s5356_s11] ss:$0 sm:$0xff] }
0x1af2   : > { %4415 = vmatpush3.bf16.xpose.msra.mxu1 %v3288_v43 }
0x1af3   : > { %4426 = vmatprep.subr.bf16.mxu1 %v4610_v0 }
0x1af9   : > { %4417 = vmatmul.mubr.msk.bf16.vlgmr.msra.gmra.mrb[88].mxu1 %vm799_vm2, %v3282_v55  ;;  %v4527_v55 = vld [vmem:[%s5359_s14 + $0x10] sm:$0xff]  }
0x1afa   : > { %4428 = vmatprep.mubr.msk.bf16.mxu1 %vm4611_vm0, %v4610_v0  ;;  %4427 = vmatpush3.bf16.msra.mxu1 %v3398_v14 }
0x1afb   : > { %4440 = vmatprep.subr.bf16.mxu1 %v4610_v0 }
0x1bcc   : > { %v3324_v58 = vpop.f32.mrb[88].mxu1 }
0x1bcd   : > { %v3330_v59 = vmul.f32 0.5, %v3324_v58  ;;  %v4418_v60 = vpop.f32.mrb[89].mxu1 }
0x1bce   : > { %v3327_v61 = vpop.f32.mrb[90].mxu1 }
0x1bcf   : > { %v4419_v52 = vpop.f32.mrb[91].mxu1  ;;  %v3331_v62 = vadd.f32 %v5202_v3, %v3330_v59  ;;  %v3277_v3 = vadd.f32 %v3943_v9, %v3276_v1 }
0x1bd1   : > { %v3332_v63 = vsel %vm854_vm3, %v3331_v62, -inf  ;;  %v3344_v11 = vpack.c.bf16 %v3277_v3, %v3277_v3 }
0x1bd2   : > { %3333 = vmax.xlane.f32.xlu0 %v3332_v63 }
0x1bd3   : > { %v3349_v12 = vsel %vm871_vm4, %v3344_v11, 0 }
0x1bd4   : > { %4421 = vmatpush3.bf16.msra.mxu0 %v3349_v12 }
0x1bd5   : > { %4432 = vmatprep.subr.bf16.mxu0 %v4610_v0 }
0x1c5f   : > { %v3334_v2 = vpop.xlane.xlu0 %3333 }
0x1c60   : > { %v3335_v56 = vsub.f32 %v3331_v62, %v3334_v2 }
0x1c62   : > { %v3336_v4 = vmul.f32 1.442695, %v3335_v56 }
0x1c64   : > { %4557 = vpow2.f32 %v3336_v4 }
0x1c6e   : > { %v4558_v5 = vpop.eup %4557 }
0x1c6f   : > { %v3338_v6 = vsel %vm854_vm3, %v4558_v5, 0.0 }
0x1c70   : > { %3339 = vadd.xlane.f32.xlu1 %v3338_v6 }
0x1cfd   : > { %v3340_v15 = vpop.xlane.xlu1 %3339 }
0x1cfe   : > { %4559 = vrcp.f32 %v3340_v15 }
0x1d08   : > { %v4560_v16 = vpop.eup %4559 }
0x1d09   : > { %v3342_v17 = vmul.f32 %v4560_v16, %v4558_v5  ;;  %v3964_v16 = vld [vmem:[%s5361_s16] ss:$0 sm:$0xff] }
0x1d0b   : > { %v3343_v18 = vpack.c.bf16 %v3342_v17, %v3342_v17 }
0x1d0d   : > { %4423 = vmatmul.mubr.msk.bf16.vlgmr.msra.gmra.mrb[92].mxu0 %vm854_vm3, %v3343_v18  ;;  %v3965_v18 = vld [vmem:[%s5362_s17] ss:$0 sm:$0xff] }
0x1d0e   : > { %4436 = vmatprep.mubr.msk.bf16.mxu0 %vm4611_vm0, %v4610_v0 }
0x1de0   : > { %v3385_v19 = vpop.f32.mrb[92].mxu0 }
0x1de1   : > { %v3391_v25 = vpack.c.bf16 %v3385_v19, %v3385_v19  ;;  %v4424_v20 = vpop.f32.mrb[93].mxu0 }
0x1de2   : > { %v3388_v21 = vpop.f32.mrb[94].mxu0 }
0x1de3   : > { %v4425_v22 = vpop.f32.mrb[95].mxu0  ;;  %4429 = vmatmul.mubr.msk.bf16.vlgmr.msra.gmra.mrb[92].mxu1 %vm799_vm2, %v3391_v25 }
0x1de4   : > { %4448 = vmatprep.mubr.msk.bf16.mxu1 %vm4611_vm0, %v4610_v0  ;;  %4441 = vmatpush3.bf16.msra.mxu1 %v4525_v41 }
0x1de5   : > { %4442 = vmatprep.subr.bf16.mxu1 %v4610_v0 }
0x1de8   : > { %4443 = vmatpush3.bf16.msra.mxu1 %v4526_v42 }
0x1de9   : > { %4444 = vmatprep.subr.bf16.mxu1 %v4610_v0 }
0x1dec   : > { %4445 = vmatpush3.bf16.msra.mxu1 %v4527_v55 }
0x1ded   : > { %4446 = vmatprep.subr.bf16.mxu1 %v4610_v0 }
0x1df0   : > { %4447 = vmatpush3.bf16.msra.mxu1 %v4528_v57 }
0x1eb6   : > { %v3434_v23 = vpop.f32.mrb[92].mxu1 }
0x1eb7   : > { %v3440_v26 = vadd.f32 %v3434_v23, %v5248_v39  ;;  %v4430_v27 = vpop.f32.mrb[93].mxu1  ;;  %v4523_v39 = vld [vmem:[%s5357_s12] sm:$0xff]  }
0x1eb8   : > { %v3437_v28 = vpop.f32.mrb[94].mxu1  ;;  %4433 = vmatpush3.bf16.msra.mxu0 %v4523_v39 }
0x1eb9   : > { %v3448_v29 = vadd.f32 %v3951_v24, %v3440_v26  ;;  %v4431_v30 = vpop.f32.mrb[95].mxu1  ;;  %4434 = vmatprep.subr.bf16.mxu0 %v4610_v0  ;;  %v3958_v0 = vld [vmem:[%s5360_s15] ss:$0 sm:$0xff] }
0x1ebb   : > { %v3449_v32 = vadd.f32 %v4566_v31, %v3448_v29 }
0x1ebc   : > { %4435 = vmatpush3.bf16.msra.mxu0 %v4524_v40 }
0x1ebd   : > { %v3452_v33 = vsel %vm627_vm1, %v3449_v32, 0.0 }
0x1ebe   : > { %3453 = vadd.xlane.f32.xlu0 %v3452_v33 }
0x1f4b   : > { %v3454_v34 = vpop.xlane.xlu0 %3453 }
0x1f4c   : > { %v3456_v35 = vmul.f32 0.03125, %v3454_v34 }
0x1f4e   : > { %v3457_v36 = vsub.f32 %v3449_v32, %v3456_v35 }
0x1f50   : > { %v3458_v37 = vmul.f32 %v3457_v36, %v3457_v36 }
0x1f52   : > { %v3459_v38 = vsel %vm627_vm1, %v3458_v37, 0.0 }
0x1f53   : > { %3460 = vadd.xlane.f32.xlu1 %v3459_v38 }
0x1fe0   : > { %v3461_v44 = vpop.xlane.xlu1 %3460 }
0x1fe1   : > { %v3462_v45 = vmul.f32 0.03125, %v3461_v44 }
0x1fe3   : > { %v3463_v46 = vadd.f32 1e-05, %v3462_v45 }
0x1fe5   : > { %4561 = vrsqrt.f32 %v3463_v46 }
0x1fef   : > { %v4562_v47 = vpop.eup %4561 }
0x1ff0   : > { %v3465_v50 = vmul.f32 %v4562_v47, %v3457_v36 }
0x1ff2   : > { %v3472_v53 = vmul.f32 %v3952_v49, %v3465_v50 }
0x1ff4   : > { %v3479_v43 = vadd.f32 %v3953_v51, %v3472_v53 }
0x1ff6   : > { %v3480_v54 = vpack.c.bf16 %v3479_v43, %v3479_v43 }
0x1ff8   : > { %4437 = vmatmul.mubr.msk.bf16.vlgmr.msra.gmra.mrb[96].mxu0 %vm627_vm1, %v3480_v54 }
0x20cb   : > { %v3541_v58 = vpop.f32.mrb[96].mxu0 }
0x20cc   : > { %v3542_v59 = vadd.f32 %v3954_v48, %v3541_v58  ;;  %v4438_v60 = vpop.f32.mrb[97].mxu0 }
0x20cd   : > { %v3544_v61 = vpop.f32.mrb[98].mxu0 }
0x20ce   : > { %v3547_v52 = vmax.f32 %v3542_v59, 0.0  ;;  %v4439_v62 = vpop.f32.mrb[99].mxu0 }
0x20d0   : > { %v3548_v63 = vpack.c.bf16 %v3547_v52, %v3547_v52 }
0x20d2   : > { %4449 = vmatmul.mubr.msk.bf16.vlgmr.msra.gmra.mrb[96].mxu1 %vm3588_vm6, %v3548_v63 }
0x21a5   : > { %v3626_v2 = vpop.f32.mrb[96].mxu1 }
0x21a6   : > { %v3627_v56 = vadd.f32 %v3958_v0, %v3626_v2  ;;  %v4450_v4 = vpop.f32.mrb[97].mxu1 }
0x21a7   : > { %v3629_v5 = vpop.f32.mrb[98].mxu1 }
0x21a8   : > { %v4451_v6 = vpop.f32.mrb[99].mxu1  ;;  %v3632_v1 = vadd.f32 %v3627_v56, %v3479_v43 }
0x21aa   : > { %v3635_v7 = vsel %vm627_vm1, %v3632_v1, 0.0 }
0x21ab   : > { %3636 = vadd.xlane.f32.xlu0 %v3635_v7 }
0x2238   : > { %v3637_v8 = vpop.xlane.xlu0 %3636 }
0x2239   : > { %v3638_v9 = vmul.f32 0.03125, %v3637_v8 }
0x223b   : > { %v3639_v10 = vsub.f32 %v3632_v1, %v3638_v9 }
0x223d   : > { %v3640_v3 = vmul.f32 %v3639_v10, %v3639_v10 }
0x223f   : > { %v3641_v11 = vsel %vm627_vm1, %v3640_v3, 0.0 }
0x2240   : > { %3642 = vadd.xlane.f32.xlu1 %v3641_v11 }
0x22cd   : > { %v3643_v12 = vpop.xlane.xlu1 %3642 }
0x22ce   : > { %v3644_v13 = vmul.f32 0.03125, %v3643_v12 }
0x22d0   : > { %v3645_v14 = vadd.f32 1e-05, %v3644_v13 }
0x22d2   : > { %4563 = vrsqrt.f32 %v3645_v14 }
0x22dc   : > { %v4564_v15 = vpop.eup %4563 }
0x22dd   : > { %v3647_v17 = vmul.f32 %v4564_v15, %v3639_v10 }
0x22df   : > { %v3654_v19 = vmul.f32 %v3964_v16, %v3647_v17 }
0x22e1   : > { %v3661_v25 = vadd.f32 %v3965_v18, %v3654_v19 }
0x22e3   : > { %3662 = vst.msk [vmem:[%s599_s0] sm:$0xff] %vm627_vm1, %v3661_v25 }
0x22e4 PF: > { %s29_s27 = sadd.s32 1, %s4605_s27  }
0x22e5   : > { %p26_p3 = scmp.ge.s32.totalorder %s29_s27, 4  }
0x22e7   :  { %28 = sbr.rel (!%p26_p3) target bundleno = 5 (0x5), region = 179 }
0x22ee   :  { %3682 = vsyncpa [#allocation3], 1 }
0x22ef   :  { %3684 = vsyncpa [#allocation3 + $0x1], 1 }

</bundles_post_ra>
